<compile_context>
chip_gen: v7x
topology: tpu7x:2x2x1
jax: 0.10.0
libtpu: 0.0.40
codegen_flags: <defaults>
</compile_context>

<pallas_src>
import math

import jax
import jax.numpy as jnp
from jax import lax
from jax.experimental import pallas as pl
from jax.experimental.pallas import tpu as pltpu  # noqa: F401  (kept for TPU-specific tuning hooks)

# ----------------------------- configuration --------------------------------
LOCAL_FEATURE_SIZE = 8       # H of each local window slice (channels)
NUM_EXTRACTED_POINT = 16     # W (sequence length) of each local window slice
WINDOW_SIZE = 4
GLOBAL_FEATURE_SIZE = 8
FRT_FEATURE_SIZE = 6
OUTPUT_NODE = 3
DCCNN_K, DCCNN_S, DCCNN_P, DCCNN_D = 3, 1, 1, 1    # DilatedCNN conv hyperparams
PCNN_K, PCNN_S, PCNN_P, PCNN_D = 3, 1, 1, 1        # plain Conv1d hyperparams
LOCAL_N_LAYERS = 1
GLOBAL_N_LAYERS = 1
LN_EPS = 1e-5

N_BLOCK_PARAMS = 17          # number of parameter tensors per TransformerDecoderBlock

# Shape-preserving conditions implicitly required by the residual AddNorms in the
# original torch module (otherwise X + conv(X) would not broadcast).
assert DCCNN_S == 1 and 2 * DCCNN_P == DCCNN_D * (DCCNN_K - 1)
assert PCNN_S == 1 and 2 * PCNN_P == PCNN_D * (PCNN_K - 1)


# ---------------------- in-kernel helpers (shared by both kernels) -----------
def _batched_conv1d(x, w, b, left_pad, right_pad, dilation):
    """Channel-mixing Conv1d, batched over the leading axis.

    x: (N, C, L) f32, w: (K, N, C, C), b: (N, C, 1).
    One zero-pad concat per conv, then K shifted static slices + K batched matmuls.
    """
    n, c, length = x.shape
    k = w.shape[0]
    parts = []
    if left_pad:
        parts.append(jnp.zeros((n, c, left_pad), x.dtype))
    parts.append(x)
    if right_pad:
        parts.append(jnp.zeros((n, c, right_pad), x.dtype))
    xp = jnp.concatenate(parts, axis=-1) if len(parts) > 1 else x
    out = None
    for t in range(k):
        sl = xp[:, :, t * dilation: t * dilation + length]
        y = lax.dot_general(w[t], sl, (((2,), (1,)), ((0,), (0,))),
                            preferred_element_type=jnp.float32)
        out = y if out is None else out + y
    return out + b


def _layer_norm_hw(v, g, be):
    """nn.LayerNorm([H, W]): normalize over the trailing (C, L) dims per leading index."""
    mu = jnp.mean(jnp.mean(v, axis=2, keepdims=True), axis=1, keepdims=True)
    d = v - mu
    var = jnp.mean(jnp.mean(d * d, axis=2, keepdims=True), axis=1, keepdims=True)
    return d * lax.rsqrt(var + LN_EPS) * g + be


def _decoder_block_batched(x, p):
    """One TransformerDecoderBlock on a batch of independent (C, L) examples.

    x: (N, C, L).  All weights carry a leading N axis (stacked per-window, tiled per-batch).
    """
    (cw1, cb1, g1, be1, cw2, cb2, g2, be2,
     wq, wk, wv, g3, be3, pw1, pb1, pw2, pb2) = p

    # dccnn1 / dccnn2: Conv1d(.., padding=2*P) followed by chopping the last 2*P positions
    # == causal, length preserving.  Each followed by AddNorm (dropout == identity, eval).
    x = _layer_norm_hw(_batched_conv1d(x, cw1, cb1, 2 * DCCNN_P, 0, DCCNN_D) + x, g1, be1)
    x = _layer_norm_hw(_batched_conv1d(x, cw2, cb2, 2 * DCCNN_P, 0, DCCNN_D) + x, g2, be2)

    # torch.einsum('jj,ijk->ijk', Wq, X) == scale row j by diag(Wq)[j].
    # The 1/sqrt(d) attention scale is pre-folded into wq.
    q = wq * x
    k = wk * x
    v = wv * x

    s = lax.dot_general(q, k, (((2,), (2,)), ((0,), (0,))),
                        preferred_element_type=jnp.float32)        # (N, C, C)
    s = s - jnp.max(s, axis=-1, keepdims=True)
    e = jnp.exp(s)
    attn = e * pl.reciprocal(jnp.sum(e, axis=-1, keepdims=True), approx=True)
    y = lax.dot_general(attn, v, (((2,), (1,)), ((0,), (0,))),
                        preferred_element_type=jnp.float32)        # (N, C, L)

    x = _layer_norm_hw(y + x, g3, be3)

    # pcnn1 / pcnn2: plain symmetric-padding Conv1d (no residual / norm afterwards).
    x = _batched_conv1d(x, pw1, pb1, PCNN_P, PCNN_P, PCNN_D)
    x = _batched_conv1d(x, pw2, pb2, PCNN_P, PCNN_P, PCNN_D)
    return x, attn


# ---------------- kernel 1: stacked local decoders + per-window Post_Decoder -
def _make_local_kernel(n_layers):
    def kernel(*refs):
        nw = n_layers * N_BLOCK_PARAMS
        xl_ref, lpw_ref, lpc_ref = refs[:3]
        w_refs = refs[3:3 + nw]
        z_ref, attn_ref = refs[3 + nw], refs[3 + nw + 1]

        x = xl_ref[...].astype(jnp.float32)
        for layer in range(n_layers):
            p = [r[...] for r in w_refs[layer * N_BLOCK_PARAMS:(layer + 1) * N_BLOCK_PARAMS]]
            x, attn = _decoder_block_batched(x, p)
            attn_ref[layer] = attn.astype(attn_ref.dtype)

        # Post_Decoder(None, W, 1): Linear(W,1) then Linear(1,1), folded into one
        # weighted lane reduction (lpw) + per-(batch,window) bias (lpc).
        z = jnp.sum(x * lpw_ref[...], axis=-1) + lpc_ref[...]
        z_ref[...] = z.astype(z_ref.dtype)
    return kernel


def local_stack_call(xl, lpw, lpc, layer_weights):
    n_layers = len(layer_weights) // N_BLOCK_PARAMS
    n, h, _ = xl.shape
    out_shape = (jax.ShapeDtypeStruct((n, h), jnp.float32),
                 jax.ShapeDtypeStruct((n_layers, n, h, h), jnp.float32))
    return pl.pallas_call(_make_local_kernel(n_layers), out_shape=out_shape)(
        xl, lpw, lpc, *layer_weights)


# ----------- kernel 2: global decoder + final Post_Decoder + MLP head --------
def _make_global_kernel(n_layers):
    def kernel(*refs):
        nw = n_layers * N_BLOCK_PARAMS
        (yg_ref, xgf_ref, xfrt_ref, fpw_ref,
         w1a_ref, m_ref, w1c_ref, b1_ref, w2_ref, b2_ref) = refs[:10]
        w_refs = refs[10:10 + nw]
        out_ref, attn_ref = refs[10 + nw], refs[10 + nw + 1]

        x = yg_ref[...].astype(jnp.float32)
        for layer in range(n_layers):
            p = [r[...] for r in w_refs[layer * N_BLOCK_PARAMS:(layer + 1) * N_BLOCK_PARAMS]]
            x, attn = _decoder_block_batched(x, p)
            attn_ref[layer] = attn.astype(attn_ref.dtype)

        # Final Post_Decoder folded into a weighted lane-reduction (its bias is folded into
        # the dense1 bias host-side), global_linear folded into `m`, then dense1/tanh/dense2.
        tsum = jnp.sum(x * fpw_ref[...], axis=-1)                       # (B, HG)
        h1 = (jnp.dot(tsum, w1a_ref[...], preferred_element_type=jnp.float32)
              + jnp.dot(xgf_ref[...], m_ref[...], preferred_element_type=jnp.float32)
              + jnp.dot(xfrt_ref[...], w1c_ref[...], preferred_element_type=jnp.float32)
              + b1_ref[...])
        out = (jnp.dot(jnp.tanh(h1), w2_ref[...], preferred_element_type=jnp.float32)
               + b2_ref[...])
        out_ref[...] = out.astype(out_ref.dtype)
    return kernel


def global_head_call(yg, xg_flat, x_frt, fp):
    n_layers = len(fp['global_w']) // N_BLOCK_PARAMS
    b, hg, _ = yg.shape
    out_shape = (jax.ShapeDtypeStruct((b, 1), jnp.float32),
                 jax.ShapeDtypeStruct((n_layers, b, hg, hg), jnp.float32))
    return pl.pallas_call(_make_global_kernel(n_layers), out_shape=out_shape)(
        yg, xg_flat, x_frt, fp['fpw'], fp['w1a'], fp['m'], fp['w1c'],
        fp['b1'], fp['w2'], fp['b2'], *fp['global_w'])


# ---------------- parameter preparation (run once, outside the hot path) -----
def _prep_block_weights(block_params, n_rep, attn_d):
    """Stack the 17 block params over groups and tile over batch: leading dim = n_rep*G."""
    out = []
    for idx in range(N_BLOCK_PARAMS):
        s = jnp.stack([bp[idx] for bp in block_params], axis=0)         # (G,) + S
        t = jnp.tile(s, (n_rep,) + (1,) * (s.ndim - 1))                 # (n_rep*G,) + S
        if idx in (0, 4, 13, 15):           # conv weights: (N, K, H, H) -> (K, N, H, H)
            t = jnp.transpose(t, (1, 0, 2, 3))
        if idx == 8:                        # fold 1/sqrt(d) into diag(Wq)
            t = t / jnp.sqrt(jnp.float32(attn_d))
        out.append(t.astype(jnp.float32))
    return out


def prepare_fused(params, batch):
    g, h, w = WINDOW_SIZE, LOCAL_FEATURE_SIZE, NUM_EXTRACTED_POINT
    hg, wg = LOCAL_FEATURE_SIZE + GLOBAL_FEATURE_SIZE, WINDOW_SIZE
    fp = {}

    # stacked local decoder: window axis folded into the leading batch axis (n = b*G + g)
    local_w = []
    for layer in range(LOCAL_N_LAYERS):
        local_w += _prep_block_weights(
            [params['local_dec'][gi][layer] for gi in range(g)], batch, w)
    fp['local_w'] = local_w

    # per-window Post_Decoder: fold Linear(W,1) and Linear(1,1) into one weight + bias
    pw = jnp.stack([params['local_post'][gi]['proj_w'][:, 0] * params['local_post'][gi]['lin_w']
                    for gi in range(g)], axis=0)                        # (G, W)
    pc = jnp.stack([params['local_post'][gi]['proj_b'][0] * params['local_post'][gi]['lin_w']
                    + params['local_post'][gi]['lin_b'] for gi in range(g)], axis=0)  # (G,)
    fp['lpw'] = jnp.tile(pw, (batch, 1))[:, None, :].astype(jnp.float32)   # (N, 1, W)
    fp['lpc'] = jnp.tile(pc, (batch,))[:, None].astype(jnp.float32)        # (N, 1)

    # global decoder weights, tiled over batch
    global_w = []
    for layer in range(GLOBAL_N_LAYERS):
        global_w += _prep_block_weights([params['global_dec'][layer]], batch, wg)
    fp['global_w'] = global_w

    # final Post_Decoder + global_linear + dense head, algebraically folded
    fpw = params['post']['proj_w'][:, 0] * params['post']['lin_w']          # (WG,)
    fpc = params['post']['proj_b'][0] * params['post']['lin_w'] + params['post']['lin_b']
    w1 = params['dense1_w']                                                  # (34, DH)
    dh = w1.shape[1]
    w1a = w1[:hg, :]                                                         # (HG, DH)
    w1b = w1[hg:hg + wg * OUTPUT_NODE, :].reshape(wg, OUTPUT_NODE, dh)       # (WG, O, DH)
    w1c = w1[hg + wg * OUTPUT_NODE:, :]                                      # (frt, DH)
    m = jnp.einsum('fj,wjk->wfk', params['global_linear_w'], w1b)
    m = m.reshape(wg * GLOBAL_FEATURE_SIZE, dh)                              # (32, DH)
    c1 = jnp.einsum('j,wjk->k', params['global_linear_b'], w1b)              # (DH,)
    c2 = fpc * jnp.sum(w1a, axis=0)                                          # (DH,)

    fp['fpw'] = fpw[None, None, :].astype(jnp.float32)                       # (1, 1, WG)
    fp['w1a'] = w1a.astype(jnp.float32)
    fp['m'] = m.astype(jnp.float32)
    fp['w1c'] = w1c.astype(jnp.float32)
    fp['b1'] = (params['dense1_b'] + c1[None, :] + c2[None, :]).astype(jnp.float32)
    fp['w2'] = params['dense2_w'].astype(jnp.float32)
    fp['b2'] = params['dense2_b'].astype(jnp.float32)
    return fp


# ------------------ fused forward: 2 pallas_calls + minimal glue -------------
def forward_fused(fp, X_local, X_global, X_frt):
    b = X_local.shape[0]
    g, h, w = WINDOW_SIZE, LOCAL_FEATURE_SIZE, NUM_EXTRACTED_POINT

    # Mirrors torch.reshape(X_local, (B, win, size(3), size(2)))  -- a reshape, NOT a
    # transpose -- then folds (batch, window) into one leading axis for the stacked kernel.
    xl = jnp.reshape(X_local, (b * g, h, w)).astype(jnp.float32)
    z, attn_local = local_stack_call(xl, fp['lpw'], fp['lpc'], fp['local_w'])

    # reassemble per-window post-decoder outputs into (B, local_feature, window)
    y_local = jnp.transpose(jnp.reshape(z, (b, g, h)), (0, 2, 1))            # (B, H, G)
    xg_resh = jnp.reshape(X_global, (b, GLOBAL_FEATURE_SIZE, g))             # (B, gfs, window)
    yg_in = jnp.concatenate([y_local, xg_resh], axis=1)                      # (B, H+gfs, window)
    xg_flat = jnp.reshape(X_global, (b, g * GLOBAL_FEATURE_SIZE))            # (B, 32)

    out, attn_global = global_head_call(
        yg_in.astype(jnp.float32), xg_flat.astype(jnp.float32),
        X_frt.astype(jnp.float32), fp)

    n_l = attn_local.shape[0]
    attn = {'local': jnp.reshape(attn_local, (n_l, b, g, h, h)),   # packed per-window maps
            'global': attn_global}
    return out, attn


# --------------------- pure-JAX reference (validation only) ------------------
def decoder_block_ref(x, p):
    (cw1, cb1, g1, be1, cw2, cb2, g2, be2,
     wq, wk, wv, g3, be3, pw1, pb1, pw2, pb2) = p
    b, h, w = x.shape

    def causal_conv(xin, wt, bias):
        pad = 2 * DCCNN_P
        xp = jnp.concatenate([jnp.zeros((b, h, pad), xin.dtype), xin], axis=-1)
        out = jnp.zeros_like(xin)
        for t in range(DCCNN_K):
            out = out + jnp.einsum('oc,bcl->bol', wt[t],
                                   xp[..., t * DCCNN_D: t * DCCNN_D + w])
        return out + bias[None]

    def sym_conv(xin, wt, bias):
        z = jnp.zeros((b, h, PCNN_P), xin.dtype)
        xp = jnp.concatenate([z, xin, z], axis=-1)
        out = jnp.zeros_like(xin)
        for t in range(PCNN_K):
            out = out + jnp.einsum('oc,bcl->bol', wt[t],
                                   xp[..., t * PCNN_D: t * PCNN_D + w])
        return out + bias[None]

    def ln(v, gg, bb):
        mu = jnp.mean(v, axis=(1, 2), keepdims=True)
        var = jnp.mean((v - mu) ** 2, axis=(1, 2), keepdims=True)
        return (v - mu) / jnp.sqrt(var + LN_EPS) * gg[None] + bb[None]

    x = ln(causal_conv(x, cw1, cb1) + x, g1, be1)
    x = ln(causal_conv(x, cw2, cb2) + x, g2, be2)
    q, k, v = wq[None] * x, wk[None] * x, wv[None] * x
    s = jnp.einsum('bhw,bgw->bhg', q, k) / math.sqrt(w)
    a = jax.nn.softmax(s, axis=-1)
    y = jnp.einsum('bhg,bgw->bhw', a, v)
    x = ln(y + x, g3, be3)
    x = sym_conv(x, pw1, pb1)
    x = sym_conv(x, pw2, pb2)
    return x, a


def forward_ref(params, X_local, X_global, X_frt):
    b = X_local.shape[0]
    xl = jnp.reshape(X_local, (b, WINDOW_SIZE, LOCAL_FEATURE_SIZE, NUM_EXTRACTED_POINT))
    ys = []
    for i in range(WINDOW_SIZE):
        y = xl[:, i, :, :]
        for layer in range(LOCAL_N_LAYERS):
            y, _ = decoder_block_ref(y, params['local_dec'][i][layer])
        pp = params['local_post'][i]
        y = jnp.dot(y, pp['proj_w']) + pp['proj_b']
        y = y * pp['lin_w'] + pp['lin_b']
        ys.append(y)
    Y = jnp.concatenate(ys, axis=-1)                                        # (B, H, window)

    gl = jnp.dot(X_global, params['global_linear_w']) + params['global_linear_b']
    gl = gl.reshape(b, -1)

    xg = jnp.reshape(X_global, (-1, GLOBAL_FEATURE_SIZE, WINDOW_SIZE))
    Y = jnp.concatenate([Y, xg], axis=1)
    for layer in range(GLOBAL_N_LAYERS):
        Y, _ = decoder_block_ref(Y, params['global_dec'][layer])
    pp = params['post']
    Y = jnp.dot(Y, pp['proj_w']) + pp['proj_b']
    Y = Y * pp['lin_w'] + pp['lin_b']
    Y = Y.reshape(b, -1)

    feat = jnp.concatenate([Y, gl, X_frt], axis=-1)
    out = jnp.dot(jnp.tanh(jnp.dot(feat, params['dense1_w']) + params['dense1_b']),
                  params['dense2_w']) + params['dense2_b']
    return out, None


# ------------------------------ parameter init -------------------------------
def _rn(key, shape, scale=0.1):
    return (scale * jax.random.normal(key, shape)).astype(jnp.float32)


def init_block_params(key, h, w):
    ks = jax.random.split(key, 11)
    cw1, cb1 = _rn(ks[0], (DCCNN_K, h, h)), _rn(ks[1], (h, 1))
    cw2, cb2 = _rn(ks[2], (DCCNN_K, h, h)), _rn(ks[3], (h, 1))
    # torch.einsum('jj,ijk->ijk', Wq, X) only uses diag(Wq); store just the diagonals.
    wq = jnp.diagonal(jax.random.normal(ks[4], (h, h))).reshape(h, 1).astype(jnp.float32)
    wk = jnp.diagonal(jax.random.normal(ks[5], (h, h))).reshape(h, 1).astype(jnp.float32)
    wv = jnp.diagonal(jax.random.normal(ks[6], (h, h))).reshape(h, 1).astype(jnp.float32)
    pw1, pb1 = _rn(ks[7], (PCNN_K, h, h)), _rn(ks[8], (h, 1))
    pw2, pb2 = _rn(ks[9], (PCNN_K, h, h)), _rn(ks[10], (h, 1))
    ones = jnp.ones((h, w), jnp.float32)    # LayerNorm weight (default torch init)
    zeros = jnp.zeros((h, w), jnp.float32)  # LayerNorm bias
    return [cw1, cb1, ones, zeros,
            cw2, cb2, ones, zeros,
            wq, wk, wv,
            ones, zeros,
            pw1, pb1, pw2, pb2]


def init_params(key):
    k = jax.random.split(key, 7)
    params = {}
    kk = jax.random.split(k[0], WINDOW_SIZE * LOCAL_N_LAYERS)
    params['local_dec'] = [
        [init_block_params(kk[i * LOCAL_N_LAYERS + l], LOCAL_FEATURE_SIZE, NUM_EXTRACTED_POINT)
         for l in range(LOCAL_N_LAYERS)]
        for i in range(WINDOW_SIZE)
    ]
    kk = jax.random.split(k[1], WINDOW_SIZE)
    params['local_post'] = []
    for i in range(WINDOW_SIZE):
        a, bb, c, d = jax.random.split(kk[i], 4)
        params['local_post'].append({
            'proj_w': _rn(a, (NUM_EXTRACTED_POINT, 1)),
            'proj_b': _rn(bb, (1,)),
            'lin_w': _rn(c, ()) + 1.0,
            'lin_b': _rn(d, ()),
        })
    hg = LOCAL_FEATURE_SIZE + GLOBAL_FEATURE_SIZE
    kk = jax.random.split(k[2], GLOBAL_N_LAYERS)
    params['global_dec'] = [init_block_params(kk[l], hg, WINDOW_SIZE)
                            for l in range(GLOBAL_N_LAYERS)]
    a, bb, c, d = jax.random.split(k[3], 4)
    params['post'] = {
        'proj_w': _rn(a, (WINDOW_SIZE, 1)),
        'proj_b': _rn(bb, (1,)),
        'lin_w': _rn(c, ()) + 1.0,
        'lin_b': _rn(d, ()),
    }
    a, bb = jax.random.split(k[4], 2)
    params['global_linear_w'] = _rn(a, (GLOBAL_FEATURE_SIZE, OUTPUT_NODE))
    params['global_linear_b'] = _rn(bb, (OUTPUT_NODE,))
    fin = LOCAL_FEATURE_SIZE + GLOBAL_FEATURE_SIZE + WINDOW_SIZE * OUTPUT_NODE + FRT_FEATURE_SIZE
    a, bb = jax.random.split(k[5], 2)
    params['dense1_w'] = _rn(a, (fin, 10))
    params['dense1_b'] = _rn(bb, (1, 10))
    a, bb = jax.random.split(k[6], 2)
    params['dense2_w'] = _rn(a, (10, 1))
    params['dense2_b'] = _rn(bb, (1, 1))
    return params


# ---------------------------------- main --------------------------------------
if __name__ == "__main__":
    key = jax.random.PRNGKey(0)
    kp, k1, k2, k3 = jax.random.split(key, 4)
    params = init_params(kp)

    B = 2
    X_local = jax.random.normal(
        k1, (B, WINDOW_SIZE, NUM_EXTRACTED_POINT, LOCAL_FEATURE_SIZE), jnp.float32)
    X_global = jax.random.normal(k2, (B, WINDOW_SIZE, GLOBAL_FEATURE_SIZE), jnp.float32)
    X_frt = jax.random.normal(k3, (B, FRT_FEATURE_SIZE), jnp.float32)

    # one-time parameter prep: stack per-window weights, tile over batch, fold post
    # decoders / global_linear / attention scale into the kernel epilogue parameters.
    fused_params = prepare_fused(params, B)

    fwd = jax.jit(forward_fused)
    out, attn_w = fwd(fused_params, X_local, X_global, X_frt)
    out = jax.block_until_ready(out)

    # Validate the fused Pallas path against a pure-JAX re-implementation of the module.
    out_ref, _ = forward_ref(params, X_local, X_global, X_frt)
    out_ref = jax.block_until_ready(out_ref)

    HG = LOCAL_FEATURE_SIZE + GLOBAL_FEATURE_SIZE
    assert out.shape == (B, 1)
    assert attn_w['local'].shape == (LOCAL_N_LAYERS, B, WINDOW_SIZE,
                                     LOCAL_FEATURE_SIZE, LOCAL_FEATURE_SIZE)
    assert attn_w['global'].shape == (GLOBAL_N_LAYERS, B, HG, HG)
    assert bool(jnp.allclose(out, out_ref, atol=1e-2, rtol=1e-2))
    print("KERNEL_OK")
</pallas_src>

<mosaic_0001>
module attributes {stable_mosaic.version = 11 : i64} {
  func.func @kernel(%arg0: memref<8x8x16xf32, #tpu.memory_space<vmem>>, %arg1: memref<8x1x16xf32, #tpu.memory_space<vmem>>, %arg2: memref<8x1xf32, #tpu.memory_space<vmem>>, %arg3: memref<3x8x8x8xf32, #tpu.memory_space<vmem>>, %arg4: memref<8x8x1xf32, #tpu.memory_space<vmem>>, %arg5: memref<8x8x16xf32, #tpu.memory_space<vmem>>, %arg6: memref<8x8x16xf32, #tpu.memory_space<vmem>>, %arg7: memref<3x8x8x8xf32, #tpu.memory_space<vmem>>, %arg8: memref<8x8x1xf32, #tpu.memory_space<vmem>>, %arg9: memref<8x8x16xf32, #tpu.memory_space<vmem>>, %arg10: memref<8x8x16xf32, #tpu.memory_space<vmem>>, %arg11: memref<8x8x1xf32, #tpu.memory_space<vmem>>, %arg12: memref<8x8x1xf32, #tpu.memory_space<vmem>>, %arg13: memref<8x8x1xf32, #tpu.memory_space<vmem>>, %arg14: memref<8x8x16xf32, #tpu.memory_space<vmem>>, %arg15: memref<8x8x16xf32, #tpu.memory_space<vmem>>, %arg16: memref<3x8x8x8xf32, #tpu.memory_space<vmem>>, %arg17: memref<8x8x1xf32, #tpu.memory_space<vmem>>, %arg18: memref<3x8x8x8xf32, #tpu.memory_space<vmem>>, %arg19: memref<8x8x1xf32, #tpu.memory_space<vmem>>, %arg20: memref<8x8xf32, #tpu.memory_space<vmem>>, %arg21: memref<1x8x8x8xf32, #tpu.memory_space<vmem>>) attributes {dimension_semantics = [], scalar_prefetch = 0 : i64, scratch_operands = 0 : i64, tpu.core_type = #tpu.core_type<tc>} {
    %c0 = arith.constant 0 : index
    %c0_0 = arith.constant 0 : index
    %c0_1 = arith.constant 0 : index
    %0 = vector.load %arg0[%c0, %c0_0, %c0_1] : memref<8x8x16xf32, #tpu.memory_space<vmem>>, vector<8x8x16xf32>
    %c0_2 = arith.constant 0 : index
    %c0_3 = arith.constant 0 : index
    %c0_4 = arith.constant 0 : index
    %c0_5 = arith.constant 0 : index
    %1 = vector.load %arg3[%c0_2, %c0_3, %c0_4, %c0_5] : memref<3x8x8x8xf32, #tpu.memory_space<vmem>>, vector<3x8x8x8xf32>
    %c0_6 = arith.constant 0 : index
    %c0_7 = arith.constant 0 : index
    %c0_8 = arith.constant 0 : index
    %2 = vector.load %arg4[%c0_6, %c0_7, %c0_8] : memref<8x8x1xf32, #tpu.memory_space<vmem>>, vector<8x8x1xf32>
    %c0_9 = arith.constant 0 : index
    %c0_10 = arith.constant 0 : index
    %c0_11 = arith.constant 0 : index
    %3 = vector.load %arg5[%c0_9, %c0_10, %c0_11] : memref<8x8x16xf32, #tpu.memory_space<vmem>>, vector<8x8x16xf32>
    %c0_12 = arith.constant 0 : index
    %c0_13 = arith.constant 0 : index
    %c0_14 = arith.constant 0 : index
    %4 = vector.load %arg6[%c0_12, %c0_13, %c0_14] : memref<8x8x16xf32, #tpu.memory_space<vmem>>, vector<8x8x16xf32>
    %c0_15 = arith.constant 0 : index
    %c0_16 = arith.constant 0 : index
    %c0_17 = arith.constant 0 : index
    %c0_18 = arith.constant 0 : index
    %5 = vector.load %arg7[%c0_15, %c0_16, %c0_17, %c0_18] : memref<3x8x8x8xf32, #tpu.memory_space<vmem>>, vector<3x8x8x8xf32>
    %c0_19 = arith.constant 0 : index
    %c0_20 = arith.constant 0 : index
    %c0_21 = arith.constant 0 : index
    %6 = vector.load %arg8[%c0_19, %c0_20, %c0_21] : memref<8x8x1xf32, #tpu.memory_space<vmem>>, vector<8x8x1xf32>
    %c0_22 = arith.constant 0 : index
    %c0_23 = arith.constant 0 : index
    %c0_24 = arith.constant 0 : index
    %7 = vector.load %arg9[%c0_22, %c0_23, %c0_24] : memref<8x8x16xf32, #tpu.memory_space<vmem>>, vector<8x8x16xf32>
    %c0_25 = arith.constant 0 : index
    %c0_26 = arith.constant 0 : index
    %c0_27 = arith.constant 0 : index
    %8 = vector.load %arg10[%c0_25, %c0_26, %c0_27] : memref<8x8x16xf32, #tpu.memory_space<vmem>>, vector<8x8x16xf32>
    %c0_28 = arith.constant 0 : index
    %c0_29 = arith.constant 0 : index
    %c0_30 = arith.constant 0 : index
    %9 = vector.load %arg11[%c0_28, %c0_29, %c0_30] : memref<8x8x1xf32, #tpu.memory_space<vmem>>, vector<8x8x1xf32>
    %c0_31 = arith.constant 0 : index
    %c0_32 = arith.constant 0 : index
    %c0_33 = arith.constant 0 : index
    %10 = vector.load %arg12[%c0_31, %c0_32, %c0_33] : memref<8x8x1xf32, #tpu.memory_space<vmem>>, vector<8x8x1xf32>
    %c0_34 = arith.constant 0 : index
    %c0_35 = arith.constant 0 : index
    %c0_36 = arith.constant 0 : index
    %11 = vector.load %arg13[%c0_34, %c0_35, %c0_36] : memref<8x8x1xf32, #tpu.memory_space<vmem>>, vector<8x8x1xf32>
    %c0_37 = arith.constant 0 : index
    %c0_38 = arith.constant 0 : index
    %c0_39 = arith.constant 0 : index
    %12 = vector.load %arg14[%c0_37, %c0_38, %c0_39] : memref<8x8x16xf32, #tpu.memory_space<vmem>>, vector<8x8x16xf32>
    %c0_40 = arith.constant 0 : index
    %c0_41 = arith.constant 0 : index
    %c0_42 = arith.constant 0 : index
    %13 = vector.load %arg15[%c0_40, %c0_41, %c0_42] : memref<8x8x16xf32, #tpu.memory_space<vmem>>, vector<8x8x16xf32>
    %c0_43 = arith.constant 0 : index
    %c0_44 = arith.constant 0 : index
    %c0_45 = arith.constant 0 : index
    %c0_46 = arith.constant 0 : index
    %14 = vector.load %arg16[%c0_43, %c0_44, %c0_45, %c0_46] : memref<3x8x8x8xf32, #tpu.memory_space<vmem>>, vector<3x8x8x8xf32>
    %c0_47 = arith.constant 0 : index
    %c0_48 = arith.constant 0 : index
    %c0_49 = arith.constant 0 : index
    %15 = vector.load %arg17[%c0_47, %c0_48, %c0_49] : memref<8x8x1xf32, #tpu.memory_space<vmem>>, vector<8x8x1xf32>
    %c0_50 = arith.constant 0 : index
    %c0_51 = arith.constant 0 : index
    %c0_52 = arith.constant 0 : index
    %c0_53 = arith.constant 0 : index
    %16 = vector.load %arg18[%c0_50, %c0_51, %c0_52, %c0_53] : memref<3x8x8x8xf32, #tpu.memory_space<vmem>>, vector<3x8x8x8xf32>
    %c0_54 = arith.constant 0 : index
    %c0_55 = arith.constant 0 : index
    %c0_56 = arith.constant 0 : index
    %17 = vector.load %arg19[%c0_54, %c0_55, %c0_56] : memref<8x8x1xf32, #tpu.memory_space<vmem>>, vector<8x8x1xf32>
    %cst = arith.constant 0.000000e+00 : f32
    %18 = vector.broadcast %cst : f32 to vector<8x8x2xf32>
    %19 = tpu.concatenate %18, %0 in 2 : vector<8x8x2xf32>, vector<8x8x16xf32> -> vector<8x8x18xf32>
    %20 = vector.extract_strided_slice %19 {offsets = [0, 0, 0], sizes = [8, 8, 16], strides = [1, 1, 1]} : vector<8x8x18xf32> to vector<8x8x16xf32>
    %21 = vector.extract_strided_slice %1 {offsets = [0, 0, 0, 0], sizes = [1, 8, 8, 8], strides = [1, 1, 1, 1]} : vector<3x8x8x8xf32> to vector<1x8x8x8xf32>
    %22 = vector.shape_cast %21 : vector<1x8x8x8xf32> to vector<8x8x8xf32>
    %cst_57 = arith.constant dense<0.000000e+00> : vector<8x8x16xf32>
    %23 = tpu.matmul %22, %20, %cst_57 {dimension_numbers = #tpu.dot_dimension_numbers<[2], [1], [1], [2], [0, 0, 0, 1, 1, 2], [0], [0]>} : vector<8x8x8xf32>, vector<8x8x16xf32>, vector<8x8x16xf32> -> vector<8x8x16xf32>
    %24 = vector.extract_strided_slice %19 {offsets = [0, 0, 1], sizes = [8, 8, 16], strides = [1, 1, 1]} : vector<8x8x18xf32> to vector<8x8x16xf32>
    %25 = vector.extract_strided_slice %1 {offsets = [1, 0, 0, 0], sizes = [1, 8, 8, 8], strides = [1, 1, 1, 1]} : vector<3x8x8x8xf32> to vector<1x8x8x8xf32>
    %26 = vector.shape_cast %25 : vector<1x8x8x8xf32> to vector<8x8x8xf32>
    %cst_58 = arith.constant dense<0.000000e+00> : vector<8x8x16xf32>
    %27 = tpu.matmul %26, %24, %cst_58 {dimension_numbers = #tpu.dot_dimension_numbers<[2], [1], [1], [2], [0, 0, 0, 1, 1, 2], [0], [0]>} : vector<8x8x8xf32>, vector<8x8x16xf32>, vector<8x8x16xf32> -> vector<8x8x16xf32>
    %28 = arith.addf %23, %27 : vector<8x8x16xf32>
    %29 = vector.extract_strided_slice %19 {offsets = [0, 0, 2], sizes = [8, 8, 16], strides = [1, 1, 1]} : vector<8x8x18xf32> to vector<8x8x16xf32>
    %30 = vector.extract_strided_slice %1 {offsets = [2, 0, 0, 0], sizes = [1, 8, 8, 8], strides = [1, 1, 1, 1]} : vector<3x8x8x8xf32> to vector<1x8x8x8xf32>
    %31 = vector.shape_cast %30 : vector<1x8x8x8xf32> to vector<8x8x8xf32>
    %cst_59 = arith.constant dense<0.000000e+00> : vector<8x8x16xf32>
    %32 = tpu.matmul %31, %29, %cst_59 {dimension_numbers = #tpu.dot_dimension_numbers<[2], [1], [1], [2], [0, 0, 0, 1, 1, 2], [0], [0]>} : vector<8x8x8xf32>, vector<8x8x16xf32>, vector<8x8x16xf32> -> vector<8x8x16xf32>
    %33 = arith.addf %28, %32 : vector<8x8x16xf32>
    %34 = vector.broadcast %2 : vector<8x8x1xf32> to vector<8x8x16xf32>
    %35 = arith.addf %33, %34 : vector<8x8x16xf32>
    %36 = arith.addf %35, %0 : vector<8x8x16xf32>
    %cst_60 = arith.constant dense<0.000000e+00> : vector<8x8xf32>
    %37 = vector.multi_reduction <add>, %36, %cst_60 [2] : vector<8x8x16xf32> to vector<8x8xf32>
    %38 = vector.shape_cast %37 : vector<8x8xf32> to vector<8x8x1xf32>
    %cst_61 = arith.constant 1.600000e+01 : f32
    %39 = vector.broadcast %cst_61 : f32 to vector<8x8x1xf32>
    %40 = arith.divf %38, %39 : vector<8x8x1xf32>
    %cst_62 = arith.constant dense<0.000000e+00> : vector<8x1xf32>
    %41 = vector.multi_reduction <add>, %40, %cst_62 [1] : vector<8x8x1xf32> to vector<8x1xf32>
    %42 = vector.shape_cast %41 : vector<8x1xf32> to vector<8x1x1xf32>
    %cst_63 = arith.constant 8.000000e+00 : f32
    %43 = vector.broadcast %cst_63 : f32 to vector<8x1x1xf32>
    %44 = arith.divf %42, %43 : vector<8x1x1xf32>
    %45 = vector.broadcast %44 : vector<8x1x1xf32> to vector<8x8x16xf32>
    %46 = arith.subf %36, %45 : vector<8x8x16xf32>
    %47 = arith.mulf %46, %46 : vector<8x8x16xf32>
    %cst_64 = arith.constant dense<0.000000e+00> : vector<8x8xf32>
    %48 = vector.multi_reduction <add>, %47, %cst_64 [2] : vector<8x8x16xf32> to vector<8x8xf32>
    %49 = vector.shape_cast %48 : vector<8x8xf32> to vector<8x8x1xf32>
    %cst_65 = arith.constant 1.600000e+01 : f32
    %50 = vector.broadcast %cst_65 : f32 to vector<8x8x1xf32>
    %51 = arith.divf %49, %50 : vector<8x8x1xf32>
    %cst_66 = arith.constant dense<0.000000e+00> : vector<8x1xf32>
    %52 = vector.multi_reduction <add>, %51, %cst_66 [1] : vector<8x8x1xf32> to vector<8x1xf32>
    %53 = vector.shape_cast %52 : vector<8x1xf32> to vector<8x1x1xf32>
    %cst_67 = arith.constant 8.000000e+00 : f32
    %54 = vector.broadcast %cst_67 : f32 to vector<8x1x1xf32>
    %55 = arith.divf %53, %54 : vector<8x1x1xf32>
    %cst_68 = arith.constant 9.99999974E-6 : f32
    %56 = vector.broadcast %cst_68 : f32 to vector<8x1x1xf32>
    %57 = arith.addf %55, %56 : vector<8x1x1xf32>
    %58 = math.rsqrt %57 : vector<8x1x1xf32>
    %59 = vector.broadcast %58 : vector<8x1x1xf32> to vector<8x8x16xf32>
    %60 = arith.mulf %46, %59 : vector<8x8x16xf32>
    %61 = arith.mulf %60, %3 : vector<8x8x16xf32>
    %62 = arith.addf %61, %4 : vector<8x8x16xf32>
    %cst_69 = arith.constant 0.000000e+00 : f32
    %63 = vector.broadcast %cst_69 : f32 to vector<8x8x2xf32>
    %64 = tpu.concatenate %63, %62 in 2 : vector<8x8x2xf32>, vector<8x8x16xf32> -> vector<8x8x18xf32>
    %65 = vector.extract_strided_slice %64 {offsets = [0, 0, 0], sizes = [8, 8, 16], strides = [1, 1, 1]} : vector<8x8x18xf32> to vector<8x8x16xf32>
    %66 = vector.extract_strided_slice %5 {offsets = [0, 0, 0, 0], sizes = [1, 8, 8, 8], strides = [1, 1, 1, 1]} : vector<3x8x8x8xf32> to vector<1x8x8x8xf32>
    %67 = vector.shape_cast %66 : vector<1x8x8x8xf32> to vector<8x8x8xf32>
    %cst_70 = arith.constant dense<0.000000e+00> : vector<8x8x16xf32>
    %68 = tpu.matmul %67, %65, %cst_70 {dimension_numbers = #tpu.dot_dimension_numbers<[2], [1], [1], [2], [0, 0, 0, 1, 1, 2], [0], [0]>} : vector<8x8x8xf32>, vector<8x8x16xf32>, vector<8x8x16xf32> -> vector<8x8x16xf32>
    %69 = vector.extract_strided_slice %64 {offsets = [0, 0, 1], sizes = [8, 8, 16], strides = [1, 1, 1]} : vector<8x8x18xf32> to vector<8x8x16xf32>
    %70 = vector.extract_strided_slice %5 {offsets = [1, 0, 0, 0], sizes = [1, 8, 8, 8], strides = [1, 1, 1, 1]} : vector<3x8x8x8xf32> to vector<1x8x8x8xf32>
    %71 = vector.shape_cast %70 : vector<1x8x8x8xf32> to vector<8x8x8xf32>
    %cst_71 = arith.constant dense<0.000000e+00> : vector<8x8x16xf32>
    %72 = tpu.matmul %71, %69, %cst_71 {dimension_numbers = #tpu.dot_dimension_numbers<[2], [1], [1], [2], [0, 0, 0, 1, 1, 2], [0], [0]>} : vector<8x8x8xf32>, vector<8x8x16xf32>, vector<8x8x16xf32> -> vector<8x8x16xf32>
    %73 = arith.addf %68, %72 : vector<8x8x16xf32>
    %74 = vector.extract_strided_slice %64 {offsets = [0, 0, 2], sizes = [8, 8, 16], strides = [1, 1, 1]} : vector<8x8x18xf32> to vector<8x8x16xf32>
    %75 = vector.extract_strided_slice %5 {offsets = [2, 0, 0, 0], sizes = [1, 8, 8, 8], strides = [1, 1, 1, 1]} : vector<3x8x8x8xf32> to vector<1x8x8x8xf32>
    %76 = vector.shape_cast %75 : vector<1x8x8x8xf32> to vector<8x8x8xf32>
    %cst_72 = arith.constant dense<0.000000e+00> : vector<8x8x16xf32>
    %77 = tpu.matmul %76, %74, %cst_72 {dimension_numbers = #tpu.dot_dimension_numbers<[2], [1], [1], [2], [0, 0, 0, 1, 1, 2], [0], [0]>} : vector<8x8x8xf32>, vector<8x8x16xf32>, vector<8x8x16xf32> -> vector<8x8x16xf32>
    %78 = arith.addf %73, %77 : vector<8x8x16xf32>
    %79 = vector.broadcast %6 : vector<8x8x1xf32> to vector<8x8x16xf32>
    %80 = arith.addf %78, %79 : vector<8x8x16xf32>
    %81 = arith.addf %80, %62 : vector<8x8x16xf32>
    %cst_73 = arith.constant dense<0.000000e+00> : vector<8x8xf32>
    %82 = vector.multi_reduction <add>, %81, %cst_73 [2] : vector<8x8x16xf32> to vector<8x8xf32>
    %83 = vector.shape_cast %82 : vector<8x8xf32> to vector<8x8x1xf32>
    %cst_74 = arith.constant 1.600000e+01 : f32
    %84 = vector.broadcast %cst_74 : f32 to vector<8x8x1xf32>
    %85 = arith.divf %83, %84 : vector<8x8x1xf32>
    %cst_75 = arith.constant dense<0.000000e+00> : vector<8x1xf32>
    %86 = vector.multi_reduction <add>, %85, %cst_75 [1] : vector<8x8x1xf32> to vector<8x1xf32>
    %87 = vector.shape_cast %86 : vector<8x1xf32> to vector<8x1x1xf32>
    %cst_76 = arith.constant 8.000000e+00 : f32
    %88 = vector.broadcast %cst_76 : f32 to vector<8x1x1xf32>
    %89 = arith.divf %87, %88 : vector<8x1x1xf32>
    %90 = vector.broadcast %89 : vector<8x1x1xf32> to vector<8x8x16xf32>
    %91 = arith.subf %81, %90 : vector<8x8x16xf32>
    %92 = arith.mulf %91, %91 : vector<8x8x16xf32>
    %cst_77 = arith.constant dense<0.000000e+00> : vector<8x8xf32>
    %93 = vector.multi_reduction <add>, %92, %cst_77 [2] : vector<8x8x16xf32> to vector<8x8xf32>
    %94 = vector.shape_cast %93 : vector<8x8xf32> to vector<8x8x1xf32>
    %cst_78 = arith.constant 1.600000e+01 : f32
    %95 = vector.broadcast %cst_78 : f32 to vector<8x8x1xf32>
    %96 = arith.divf %94, %95 : vector<8x8x1xf32>
    %cst_79 = arith.constant dense<0.000000e+00> : vector<8x1xf32>
    %97 = vector.multi_reduction <add>, %96, %cst_79 [1] : vector<8x8x1xf32> to vector<8x1xf32>
    %98 = vector.shape_cast %97 : vector<8x1xf32> to vector<8x1x1xf32>
    %cst_80 = arith.constant 8.000000e+00 : f32
    %99 = vector.broadcast %cst_80 : f32 to vector<8x1x1xf32>
    %100 = arith.divf %98, %99 : vector<8x1x1xf32>
    %cst_81 = arith.constant 9.99999974E-6 : f32
    %101 = vector.broadcast %cst_81 : f32 to vector<8x1x1xf32>
    %102 = arith.addf %100, %101 : vector<8x1x1xf32>
    %103 = math.rsqrt %102 : vector<8x1x1xf32>
    %104 = vector.broadcast %103 : vector<8x1x1xf32> to vector<8x8x16xf32>
    %105 = arith.mulf %91, %104 : vector<8x8x16xf32>
    %106 = arith.mulf %105, %7 : vector<8x8x16xf32>
    %107 = arith.addf %106, %8 : vector<8x8x16xf32>
    %108 = vector.broadcast %9 : vector<8x8x1xf32> to vector<8x8x16xf32>
    %109 = arith.mulf %108, %107 : vector<8x8x16xf32>
    %110 = vector.broadcast %10 : vector<8x8x1xf32> to vector<8x8x16xf32>
    %111 = arith.mulf %110, %107 : vector<8x8x16xf32>
    %112 = vector.broadcast %11 : vector<8x8x1xf32> to vector<8x8x16xf32>
    %113 = arith.mulf %112, %107 : vector<8x8x16xf32>
    %cst_82 = arith.constant dense<0.000000e+00> : vector<8x8x8xf32>
    %114 = tpu.matmul %109, %111, %cst_82 {dimension_numbers = #tpu.dot_dimension_numbers<[2], [2], [1], [1], [0, 0, 0, 1, 1, 1], [0], [0]>} : vector<8x8x16xf32>, vector<8x8x16xf32>, vector<8x8x8xf32> -> vector<8x8x8xf32>
    %cst_83 = arith.constant dense<0xFF800000> : vector<8x8xf32>
    %115 = vector.multi_reduction <maximumf>, %114, %cst_83 [2] : vector<8x8x8xf32> to vector<8x8xf32>
    %116 = vector.shape_cast %115 : vector<8x8xf32> to vector<8x8x1xf32>
    %117 = vector.broadcast %116 : vector<8x8x1xf32> to vector<8x8x8xf32>
    %118 = arith.subf %114, %117 : vector<8x8x8xf32>
    %119 = math.exp %118 : vector<8x8x8xf32>
    %cst_84 = arith.constant dense<0.000000e+00> : vector<8x8xf32>
    %120 = vector.multi_reduction <add>, %119, %cst_84 [2] : vector<8x8x8xf32> to vector<8x8xf32>
    %121 = vector.shape_cast %120 : vector<8x8xf32> to vector<8x8x1xf32>
    %122 = tpu.reciprocal %121 {approx = true} : vector<8x8x1xf32> -> vector<8x8x1xf32>
    %123 = vector.broadcast %122 : vector<8x8x1xf32> to vector<8x8x8xf32>
    %124 = arith.mulf %119, %123 : vector<8x8x8xf32>
    %cst_85 = arith.constant dense<0.000000e+00> : vector<8x8x16xf32>
    %125 = tpu.matmul %124, %113, %cst_85 {dimension_numbers = #tpu.dot_dimension_numbers<[2], [1], [1], [2], [0, 0, 0, 1, 1, 2], [0], [0]>} : vector<8x8x8xf32>, vector<8x8x16xf32>, vector<8x8x16xf32> -> vector<8x8x16xf32>
    %126 = arith.addf %125, %107 : vector<8x8x16xf32>
    %cst_86 = arith.constant dense<0.000000e+00> : vector<8x8xf32>
    %127 = vector.multi_reduction <add>, %126, %cst_86 [2] : vector<8x8x16xf32> to vector<8x8xf32>
    %128 = vector.shape_cast %127 : vector<8x8xf32> to vector<8x8x1xf32>
    %cst_87 = arith.constant 1.600000e+01 : f32
    %129 = vector.broadcast %cst_87 : f32 to vector<8x8x1xf32>
    %130 = arith.divf %128, %129 : vector<8x8x1xf32>
    %cst_88 = arith.constant dense<0.000000e+00> : vector<8x1xf32>
    %131 = vector.multi_reduction <add>, %130, %cst_88 [1] : vector<8x8x1xf32> to vector<8x1xf32>
    %132 = vector.shape_cast %131 : vector<8x1xf32> to vector<8x1x1xf32>
    %cst_89 = arith.constant 8.000000e+00 : f32
    %133 = vector.broadcast %cst_89 : f32 to vector<8x1x1xf32>
    %134 = arith.divf %132, %133 : vector<8x1x1xf32>
    %135 = vector.broadcast %134 : vector<8x1x1xf32> to vector<8x8x16xf32>
    %136 = arith.subf %126, %135 : vector<8x8x16xf32>
    %137 = arith.mulf %136, %136 : vector<8x8x16xf32>
    %cst_90 = arith.constant dense<0.000000e+00> : vector<8x8xf32>
    %138 = vector.multi_reduction <add>, %137, %cst_90 [2] : vector<8x8x16xf32> to vector<8x8xf32>
    %139 = vector.shape_cast %138 : vector<8x8xf32> to vector<8x8x1xf32>
    %cst_91 = arith.constant 1.600000e+01 : f32
    %140 = vector.broadcast %cst_91 : f32 to vector<8x8x1xf32>
    %141 = arith.divf %139, %140 : vector<8x8x1xf32>
    %cst_92 = arith.constant dense<0.000000e+00> : vector<8x1xf32>
    %142 = vector.multi_reduction <add>, %141, %cst_92 [1] : vector<8x8x1xf32> to vector<8x1xf32>
    %143 = vector.shape_cast %142 : vector<8x1xf32> to vector<8x1x1xf32>
    %cst_93 = arith.constant 8.000000e+00 : f32
    %144 = vector.broadcast %cst_93 : f32 to vector<8x1x1xf32>
    %145 = arith.divf %143, %144 : vector<8x1x1xf32>
    %cst_94 = arith.constant 9.99999974E-6 : f32
    %146 = vector.broadcast %cst_94 : f32 to vector<8x1x1xf32>
    %147 = arith.addf %145, %146 : vector<8x1x1xf32>
    %148 = math.rsqrt %147 : vector<8x1x1xf32>
    %149 = vector.broadcast %148 : vector<8x1x1xf32> to vector<8x8x16xf32>
    %150 = arith.mulf %136, %149 : vector<8x8x16xf32>
    %151 = arith.mulf %150, %12 : vector<8x8x16xf32>
    %152 = arith.addf %151, %13 : vector<8x8x16xf32>
    %cst_95 = arith.constant 0.000000e+00 : f32
    %153 = vector.broadcast %cst_95 : f32 to vector<8x8x1xf32>
    %cst_96 = arith.constant 0.000000e+00 : f32
    %154 = vector.broadcast %cst_96 : f32 to vector<8x8x1xf32>
    %155 = tpu.concatenate %153, %152, %154 in 2 : vector<8x8x1xf32>, vector<8x8x16xf32>, vector<8x8x1xf32> -> vector<8x8x18xf32>
    %156 = vector.extract_strided_slice %155 {offsets = [0, 0, 0], sizes = [8, 8, 16], strides = [1, 1, 1]} : vector<8x8x18xf32> to vector<8x8x16xf32>
    %157 = vector.extract_strided_slice %14 {offsets = [0, 0, 0, 0], sizes = [1, 8, 8, 8], strides = [1, 1, 1, 1]} : vector<3x8x8x8xf32> to vector<1x8x8x8xf32>
    %158 = vector.shape_cast %157 : vector<1x8x8x8xf32> to vector<8x8x8xf32>
    %cst_97 = arith.constant dense<0.000000e+00> : vector<8x8x16xf32>
    %159 = tpu.matmul %158, %156, %cst_97 {dimension_numbers = #tpu.dot_dimension_numbers<[2], [1], [1], [2], [0, 0, 0, 1, 1, 2], [0], [0]>} : vector<8x8x8xf32>, vector<8x8x16xf32>, vector<8x8x16xf32> -> vector<8x8x16xf32>
    %160 = vector.extract_strided_slice %155 {offsets = [0, 0, 1], sizes = [8, 8, 16], strides = [1, 1, 1]} : vector<8x8x18xf32> to vector<8x8x16xf32>
    %161 = vector.extract_strided_slice %14 {offsets = [1, 0, 0, 0], sizes = [1, 8, 8, 8], strides = [1, 1, 1, 1]} : vector<3x8x8x8xf32> to vector<1x8x8x8xf32>
    %162 = vector.shape_cast %161 : vector<1x8x8x8xf32> to vector<8x8x8xf32>
    %cst_98 = arith.constant dense<0.000000e+00> : vector<8x8x16xf32>
    %163 = tpu.matmul %162, %160, %cst_98 {dimension_numbers = #tpu.dot_dimension_numbers<[2], [1], [1], [2], [0, 0, 0, 1, 1, 2], [0], [0]>} : vector<8x8x8xf32>, vector<8x8x16xf32>, vector<8x8x16xf32> -> vector<8x8x16xf32>
    %164 = arith.addf %159, %163 : vector<8x8x16xf32>
    %165 = vector.extract_strided_slice %155 {offsets = [0, 0, 2], sizes = [8, 8, 16], strides = [1, 1, 1]} : vector<8x8x18xf32> to vector<8x8x16xf32>
    %166 = vector.extract_strided_slice %14 {offsets = [2, 0, 0, 0], sizes = [1, 8, 8, 8], strides = [1, 1, 1, 1]} : vector<3x8x8x8xf32> to vector<1x8x8x8xf32>
    %167 = vector.shape_cast %166 : vector<1x8x8x8xf32> to vector<8x8x8xf32>
    %cst_99 = arith.constant dense<0.000000e+00> : vector<8x8x16xf32>
    %168 = tpu.matmul %167, %165, %cst_99 {dimension_numbers = #tpu.dot_dimension_numbers<[2], [1], [1], [2], [0, 0, 0, 1, 1, 2], [0], [0]>} : vector<8x8x8xf32>, vector<8x8x16xf32>, vector<8x8x16xf32> -> vector<8x8x16xf32>
    %169 = arith.addf %164, %168 : vector<8x8x16xf32>
    %170 = vector.broadcast %15 : vector<8x8x1xf32> to vector<8x8x16xf32>
    %171 = arith.addf %169, %170 : vector<8x8x16xf32>
    %cst_100 = arith.constant 0.000000e+00 : f32
    %172 = vector.broadcast %cst_100 : f32 to vector<8x8x1xf32>
    %cst_101 = arith.constant 0.000000e+00 : f32
    %173 = vector.broadcast %cst_101 : f32 to vector<8x8x1xf32>
    %174 = tpu.concatenate %172, %171, %173 in 2 : vector<8x8x1xf32>, vector<8x8x16xf32>, vector<8x8x1xf32> -> vector<8x8x18xf32>
    %175 = vector.extract_strided_slice %174 {offsets = [0, 0, 0], sizes = [8, 8, 16], strides = [1, 1, 1]} : vector<8x8x18xf32> to vector<8x8x16xf32>
    %176 = vector.extract_strided_slice %16 {offsets = [0, 0, 0, 0], sizes = [1, 8, 8, 8], strides = [1, 1, 1, 1]} : vector<3x8x8x8xf32> to vector<1x8x8x8xf32>
    %177 = vector.shape_cast %176 : vector<1x8x8x8xf32> to vector<8x8x8xf32>
    %cst_102 = arith.constant dense<0.000000e+00> : vector<8x8x16xf32>
    %178 = tpu.matmul %177, %175, %cst_102 {dimension_numbers = #tpu.dot_dimension_numbers<[2], [1], [1], [2], [0, 0, 0, 1, 1, 2], [0], [0]>} : vector<8x8x8xf32>, vector<8x8x16xf32>, vector<8x8x16xf32> -> vector<8x8x16xf32>
    %179 = vector.extract_strided_slice %174 {offsets = [0, 0, 1], sizes = [8, 8, 16], strides = [1, 1, 1]} : vector<8x8x18xf32> to vector<8x8x16xf32>
    %180 = vector.extract_strided_slice %16 {offsets = [1, 0, 0, 0], sizes = [1, 8, 8, 8], strides = [1, 1, 1, 1]} : vector<3x8x8x8xf32> to vector<1x8x8x8xf32>
    %181 = vector.shape_cast %180 : vector<1x8x8x8xf32> to vector<8x8x8xf32>
    %cst_103 = arith.constant dense<0.000000e+00> : vector<8x8x16xf32>
    %182 = tpu.matmul %181, %179, %cst_103 {dimension_numbers = #tpu.dot_dimension_numbers<[2], [1], [1], [2], [0, 0, 0, 1, 1, 2], [0], [0]>} : vector<8x8x8xf32>, vector<8x8x16xf32>, vector<8x8x16xf32> -> vector<8x8x16xf32>
    %183 = arith.addf %178, %182 : vector<8x8x16xf32>
    %184 = vector.extract_strided_slice %174 {offsets = [0, 0, 2], sizes = [8, 8, 16], strides = [1, 1, 1]} : vector<8x8x18xf32> to vector<8x8x16xf32>
    %185 = vector.extract_strided_slice %16 {offsets = [2, 0, 0, 0], sizes = [1, 8, 8, 8], strides = [1, 1, 1, 1]} : vector<3x8x8x8xf32> to vector<1x8x8x8xf32>
    %186 = vector.shape_cast %185 : vector<1x8x8x8xf32> to vector<8x8x8xf32>
    %cst_104 = arith.constant dense<0.000000e+00> : vector<8x8x16xf32>
    %187 = tpu.matmul %186, %184, %cst_104 {dimension_numbers = #tpu.dot_dimension_numbers<[2], [1], [1], [2], [0, 0, 0, 1, 1, 2], [0], [0]>} : vector<8x8x8xf32>, vector<8x8x16xf32>, vector<8x8x16xf32> -> vector<8x8x16xf32>
    %188 = arith.addf %183, %187 : vector<8x8x16xf32>
    %189 = vector.broadcast %17 : vector<8x8x1xf32> to vector<8x8x16xf32>
    %190 = arith.addf %188, %189 : vector<8x8x16xf32>
    %c0_105 = arith.constant 0 : index
    %c0_106 = arith.constant 0 : index
    %c0_107 = arith.constant 0 : index
    %c0_108 = arith.constant 0 : index
    %191 = vector.load %arg21[%c0_105, %c0_106, %c0_107, %c0_108] : memref<1x8x8x8xf32, #tpu.memory_space<vmem>>, vector<1x8x8x8xf32>
    %192 = vector.shape_cast %191 : vector<1x8x8x8xf32> to vector<8x8x8xf32>
    %193 = vector.shape_cast %124 : vector<8x8x8xf32> to vector<1x8x8x8xf32>
    tpu.vector_store %arg21[%c0_105, %c0_106, %c0_107, %c0_108], %193 {strides = array<i32>} : memref<1x8x8x8xf32, #tpu.memory_space<vmem>>, vector<1x8x8x8xf32>,
    %c0_109 = arith.constant 0 : index
    %c0_110 = arith.constant 0 : index
    %c0_111 = arith.constant 0 : index
    %194 = vector.load %arg1[%c0_109, %c0_110, %c0_111] : memref<8x1x16xf32, #tpu.memory_space<vmem>>, vector<8x1x16xf32>
    %195 = vector.broadcast %194 : vector<8x1x16xf32> to vector<8x8x16xf32>
    %196 = arith.mulf %190, %195 : vector<8x8x16xf32>
    %cst_112 = arith.constant dense<0.000000e+00> : vector<8x8xf32>
    %197 = vector.multi_reduction <add>, %196, %cst_112 [2] : vector<8x8x16xf32> to vector<8x8xf32>
    %c0_113 = arith.constant 0 : index
    %c0_114 = arith.constant 0 : index
    %198 = vector.load %arg2[%c0_113, %c0_114] : memref<8x1xf32, #tpu.memory_space<vmem>>, vector<8x1xf32>
    %199 = vector.broadcast %198 : vector<8x1xf32> to vector<8x8xf32>
    %200 = arith.addf %197, %199 : vector<8x8xf32>
    %c0_115 = arith.constant 0 : index
    %c0_116 = arith.constant 0 : index
    %201 = vector.load %arg20[%c0_115, %c0_116] : memref<8x8xf32, #tpu.memory_space<vmem>>, vector<8x8xf32>
    tpu.vector_store %arg20[%c0_115, %c0_116], %200 {strides = array<i32>} : memref<8x8xf32, #tpu.memory_space<vmem>>, vector<8x8xf32>,
    return
  }
}

module attributes {stable_mosaic.version = 11 : i64} {
  func.func @kernel(%arg0: memref<2x16x4xf32, #tpu.memory_space<vmem>>, %arg1: memref<2x32xf32, #tpu.memory_space<vmem>>, %arg2: memref<2x6xf32, #tpu.memory_space<vmem>>, %arg3: memref<1x1x4xf32, #tpu.memory_space<vmem>>, %arg4: memref<16x10xf32, #tpu.memory_space<vmem>>, %arg5: memref<32x10xf32, #tpu.memory_space<vmem>>, %arg6: memref<6x10xf32, #tpu.memory_space<vmem>>, %arg7: memref<1x10xf32, #tpu.memory_space<vmem>>, %arg8: memref<10x1xf32, #tpu.memory_space<vmem>>, %arg9: memref<1x1xf32, #tpu.memory_space<vmem>>, %arg10: memref<3x2x16x16xf32, #tpu.memory_space<vmem>>, %arg11: memref<2x16x1xf32, #tpu.memory_space<vmem>>, %arg12: memref<2x16x4xf32, #tpu.memory_space<vmem>>, %arg13: memref<2x16x4xf32, #tpu.memory_space<vmem>>, %arg14: memref<3x2x16x16xf32, #tpu.memory_space<vmem>>, %arg15: memref<2x16x1xf32, #tpu.memory_space<vmem>>, %arg16: memref<2x16x4xf32, #tpu.memory_space<vmem>>, %arg17: memref<2x16x4xf32, #tpu.memory_space<vmem>>, %arg18: memref<2x16x1xf32, #tpu.memory_space<vmem>>, %arg19: memref<2x16x1xf32, #tpu.memory_space<vmem>>, %arg20: memref<2x16x1xf32, #tpu.memory_space<vmem>>, %arg21: memref<2x16x4xf32, #tpu.memory_space<vmem>>, %arg22: memref<2x16x4xf32, #tpu.memory_space<vmem>>, %arg23: memref<3x2x16x16xf32, #tpu.memory_space<vmem>>, %arg24: memref<2x16x1xf32, #tpu.memory_space<vmem>>, %arg25: memref<3x2x16x16xf32, #tpu.memory_space<vmem>>, %arg26: memref<2x16x1xf32, #tpu.memory_space<vmem>>, %arg27: memref<2x1xf32, #tpu.memory_space<vmem>>, %arg28: memref<1x2x16x16xf32, #tpu.memory_space<vmem>>) attributes {dimension_semantics = [], scalar_prefetch = 0 : i64, scratch_operands = 0 : i64, tpu.core_type = #tpu.core_type<tc>} {
    %c0 = arith.constant 0 : index
    %c0_0 = arith.constant 0 : index
    %c0_1 = arith.constant 0 : index
    %0 = vector.load %arg0[%c0, %c0_0, %c0_1] : memref<2x16x4xf32, #tpu.memory_space<vmem>>, vector<2x16x4xf32>
    %c0_2 = arith.constant 0 : index
    %c0_3 = arith.constant 0 : index
    %c0_4 = arith.constant 0 : index
    %c0_5 = arith.constant 0 : index
    %1 = vector.load %arg10[%c0_2, %c0_3, %c0_4, %c0_5] : memref<3x2x16x16xf32, #tpu.memory_space<vmem>>, vector<3x2x16x16xf32>
    %c0_6 = arith.constant 0 : index
    %c0_7 = arith.constant 0 : index
    %c0_8 = arith.constant 0 : index
    %2 = vector.load %arg11[%c0_6, %c0_7, %c0_8] : memref<2x16x1xf32, #tpu.memory_space<vmem>>, vector<2x16x1xf32>
    %c0_9 = arith.constant 0 : index
    %c0_10 = arith.constant 0 : index
    %c0_11 = arith.constant 0 : index
    %3 = vector.load %arg12[%c0_9, %c0_10, %c0_11] : memref<2x16x4xf32, #tpu.memory_space<vmem>>, vector<2x16x4xf32>
    %c0_12 = arith.constant 0 : index
    %c0_13 = arith.constant 0 : index
    %c0_14 = arith.constant 0 : index
    %4 = vector.load %arg13[%c0_12, %c0_13, %c0_14] : memref<2x16x4xf32, #tpu.memory_space<vmem>>, vector<2x16x4xf32>
    %c0_15 = arith.constant 0 : index
    %c0_16 = arith.constant 0 : index
    %c0_17 = arith.constant 0 : index
    %c0_18 = arith.constant 0 : index
    %5 = vector.load %arg14[%c0_15, %c0_16, %c0_17, %c0_18] : memref<3x2x16x16xf32, #tpu.memory_space<vmem>>, vector<3x2x16x16xf32>
    %c0_19 = arith.constant 0 : index
    %c0_20 = arith.constant 0 : index
    %c0_21 = arith.constant 0 : index
    %6 = vector.load %arg15[%c0_19, %c0_20, %c0_21] : memref<2x16x1xf32, #tpu.memory_space<vmem>>, vector<2x16x1xf32>
    %c0_22 = arith.constant 0 : index
    %c0_23 = arith.constant 0 : index
    %c0_24 = arith.constant 0 : index
    %7 = vector.load %arg16[%c0_22, %c0_23, %c0_24] : memref<2x16x4xf32, #tpu.memory_space<vmem>>, vector<2x16x4xf32>
    %c0_25 = arith.constant 0 : index
    %c0_26 = arith.constant 0 : index
    %c0_27 = arith.constant 0 : index
    %8 = vector.load %arg17[%c0_25, %c0_26, %c0_27] : memref<2x16x4xf32, #tpu.memory_space<vmem>>, vector<2x16x4xf32>
    %c0_28 = arith.constant 0 : index
    %c0_29 = arith.constant 0 : index
    %c0_30 = arith.constant 0 : index
    %9 = vector.load %arg18[%c0_28, %c0_29, %c0_30] : memref<2x16x1xf32, #tpu.memory_space<vmem>>, vector<2x16x1xf32>
    %c0_31 = arith.constant 0 : index
    %c0_32 = arith.constant 0 : index
    %c0_33 = arith.constant 0 : index
    %10 = vector.load %arg19[%c0_31, %c0_32, %c0_33] : memref<2x16x1xf32, #tpu.memory_space<vmem>>, vector<2x16x1xf32>
    %c0_34 = arith.constant 0 : index
    %c0_35 = arith.constant 0 : index
    %c0_36 = arith.constant 0 : index
    %11 = vector.load %arg20[%c0_34, %c0_35, %c0_36] : memref<2x16x1xf32, #tpu.memory_space<vmem>>, vector<2x16x1xf32>
    %c0_37 = arith.constant 0 : index
    %c0_38 = arith.constant 0 : index
    %c0_39 = arith.constant 0 : index
    %12 = vector.load %arg21[%c0_37, %c0_38, %c0_39] : memref<2x16x4xf32, #tpu.memory_space<vmem>>, vector<2x16x4xf32>
    %c0_40 = arith.constant 0 : index
    %c0_41 = arith.constant 0 : index
    %c0_42 = arith.constant 0 : index
    %13 = vector.load %arg22[%c0_40, %c0_41, %c0_42] : memref<2x16x4xf32, #tpu.memory_space<vmem>>, vector<2x16x4xf32>
    %c0_43 = arith.constant 0 : index
    %c0_44 = arith.constant 0 : index
    %c0_45 = arith.constant 0 : index
    %c0_46 = arith.constant 0 : index
    %14 = vector.load %arg23[%c0_43, %c0_44, %c0_45, %c0_46] : memref<3x2x16x16xf32, #tpu.memory_space<vmem>>, vector<3x2x16x16xf32>
    %c0_47 = arith.constant 0 : index
    %c0_48 = arith.constant 0 : index
    %c0_49 = arith.constant 0 : index
    %15 = vector.load %arg24[%c0_47, %c0_48, %c0_49] : memref<2x16x1xf32, #tpu.memory_space<vmem>>, vector<2x16x1xf32>
    %c0_50 = arith.constant 0 : index
    %c0_51 = arith.constant 0 : index
    %c0_52 = arith.constant 0 : index
    %c0_53 = arith.constant 0 : index
    %16 = vector.load %arg25[%c0_50, %c0_51, %c0_52, %c0_53] : memref<3x2x16x16xf32, #tpu.memory_space<vmem>>, vector<3x2x16x16xf32>
    %c0_54 = arith.constant 0 : index
    %c0_55 = arith.constant 0 : index
    %c0_56 = arith.constant 0 : index
    %17 = vector.load %arg26[%c0_54, %c0_55, %c0_56] : memref<2x16x1xf32, #tpu.memory_space<vmem>>, vector<2x16x1xf32>
    %cst = arith.constant 0.000000e+00 : f32
    %18 = vector.broadcast %cst : f32 to vector<2x16x2xf32>
    %19 = tpu.concatenate %18, %0 in 2 : vector<2x16x2xf32>, vector<2x16x4xf32> -> vector<2x16x6xf32>
    %20 = vector.extract_strided_slice %19 {offsets = [0, 0, 0], sizes = [2, 16, 4], strides = [1, 1, 1]} : vector<2x16x6xf32> to vector<2x16x4xf32>
    %21 = vector.extract_strided_slice %1 {offsets = [0, 0, 0, 0], sizes = [1, 2, 16, 16], strides = [1, 1, 1, 1]} : vector<3x2x16x16xf32> to vector<1x2x16x16xf32>
    %22 = vector.shape_cast %21 : vector<1x2x16x16xf32> to vector<2x16x16xf32>
    %cst_57 = arith.constant dense<0.000000e+00> : vector<2x16x4xf32>
    %23 = tpu.matmul %22, %20, %cst_57 {dimension_numbers = #tpu.dot_dimension_numbers<[2], [1], [1], [2], [0, 0, 0, 1, 1, 2], [0], [0]>} : vector<2x16x16xf32>, vector<2x16x4xf32>, vector<2x16x4xf32> -> vector<2x16x4xf32>
    %24 = vector.extract_strided_slice %19 {offsets = [0, 0, 1], sizes = [2, 16, 4], strides = [1, 1, 1]} : vector<2x16x6xf32> to vector<2x16x4xf32>
    %25 = vector.extract_strided_slice %1 {offsets = [1, 0, 0, 0], sizes = [1, 2, 16, 16], strides = [1, 1, 1, 1]} : vector<3x2x16x16xf32> to vector<1x2x16x16xf32>
    %26 = vector.shape_cast %25 : vector<1x2x16x16xf32> to vector<2x16x16xf32>
    %cst_58 = arith.constant dense<0.000000e+00> : vector<2x16x4xf32>
    %27 = tpu.matmul %26, %24, %cst_58 {dimension_numbers = #tpu.dot_dimension_numbers<[2], [1], [1], [2], [0, 0, 0, 1, 1, 2], [0], [0]>} : vector<2x16x16xf32>, vector<2x16x4xf32>, vector<2x16x4xf32> -> vector<2x16x4xf32>
    %28 = arith.addf %23, %27 : vector<2x16x4xf32>
    %29 = vector.extract_strided_slice %19 {offsets = [0, 0, 2], sizes = [2, 16, 4], strides = [1, 1, 1]} : vector<2x16x6xf32> to vector<2x16x4xf32>
    %30 = vector.extract_strided_slice %1 {offsets = [2, 0, 0, 0], sizes = [1, 2, 16, 16], strides = [1, 1, 1, 1]} : vector<3x2x16x16xf32> to vector<1x2x16x16xf32>
    %31 = vector.shape_cast %30 : vector<1x2x16x16xf32> to vector<2x16x16xf32>
    %cst_59 = arith.constant dense<0.000000e+00> : vector<2x16x4xf32>
    %32 = tpu.matmul %31, %29, %cst_59 {dimension_numbers = #tpu.dot_dimension_numbers<[2], [1], [1], [2], [0, 0, 0, 1, 1, 2], [0], [0]>} : vector<2x16x16xf32>, vector<2x16x4xf32>, vector<2x16x4xf32> -> vector<2x16x4xf32>
    %33 = arith.addf %28, %32 : vector<2x16x4xf32>
    %34 = vector.broadcast %2 : vector<2x16x1xf32> to vector<2x16x4xf32>
    %35 = arith.addf %33, %34 : vector<2x16x4xf32>
    %36 = arith.addf %35, %0 : vector<2x16x4xf32>
    %cst_60 = arith.constant dense<0.000000e+00> : vector<2x16xf32>
    %37 = vector.multi_reduction <add>, %36, %cst_60 [2] : vector<2x16x4xf32> to vector<2x16xf32>
    %38 = vector.shape_cast %37 : vector<2x16xf32> to vector<2x16x1xf32>
    %cst_61 = arith.constant 4.000000e+00 : f32
    %39 = vector.broadcast %cst_61 : f32 to vector<2x16x1xf32>
    %40 = arith.divf %38, %39 : vector<2x16x1xf32>
    %cst_62 = arith.constant dense<0.000000e+00> : vector<2x1xf32>
    %41 = vector.multi_reduction <add>, %40, %cst_62 [1] : vector<2x16x1xf32> to vector<2x1xf32>
    %42 = vector.shape_cast %41 : vector<2x1xf32> to vector<2x1x1xf32>
    %cst_63 = arith.constant 1.600000e+01 : f32
    %43 = vector.broadcast %cst_63 : f32 to vector<2x1x1xf32>
    %44 = arith.divf %42, %43 : vector<2x1x1xf32>
    %45 = vector.broadcast %44 : vector<2x1x1xf32> to vector<2x16x4xf32>
    %46 = arith.subf %36, %45 : vector<2x16x4xf32>
    %47 = arith.mulf %46, %46 : vector<2x16x4xf32>
    %cst_64 = arith.constant dense<0.000000e+00> : vector<2x16xf32>
    %48 = vector.multi_reduction <add>, %47, %cst_64 [2] : vector<2x16x4xf32> to vector<2x16xf32>
    %49 = vector.shape_cast %48 : vector<2x16xf32> to vector<2x16x1xf32>
    %cst_65 = arith.constant 4.000000e+00 : f32
    %50 = vector.broadcast %cst_65 : f32 to vector<2x16x1xf32>
    %51 = arith.divf %49, %50 : vector<2x16x1xf32>
    %cst_66 = arith.constant dense<0.000000e+00> : vector<2x1xf32>
    %52 = vector.multi_reduction <add>, %51, %cst_66 [1] : vector<2x16x1xf32> to vector<2x1xf32>
    %53 = vector.shape_cast %52 : vector<2x1xf32> to vector<2x1x1xf32>
    %cst_67 = arith.constant 1.600000e+01 : f32
    %54 = vector.broadcast %cst_67 : f32 to vector<2x1x1xf32>
    %55 = arith.divf %53, %54 : vector<2x1x1xf32>
    %cst_68 = arith.constant 9.99999974E-6 : f32
    %56 = vector.broadcast %cst_68 : f32 to vector<2x1x1xf32>
    %57 = arith.addf %55, %56 : vector<2x1x1xf32>
    %58 = math.rsqrt %57 : vector<2x1x1xf32>
    %59 = vector.broadcast %58 : vector<2x1x1xf32> to vector<2x16x4xf32>
    %60 = arith.mulf %46, %59 : vector<2x16x4xf32>
    %61 = arith.mulf %60, %3 : vector<2x16x4xf32>
    %62 = arith.addf %61, %4 : vector<2x16x4xf32>
    %cst_69 = arith.constant 0.000000e+00 : f32
    %63 = vector.broadcast %cst_69 : f32 to vector<2x16x2xf32>
    %64 = tpu.concatenate %63, %62 in 2 : vector<2x16x2xf32>, vector<2x16x4xf32> -> vector<2x16x6xf32>
    %65 = vector.extract_strided_slice %64 {offsets = [0, 0, 0], sizes = [2, 16, 4], strides = [1, 1, 1]} : vector<2x16x6xf32> to vector<2x16x4xf32>
    %66 = vector.extract_strided_slice %5 {offsets = [0, 0, 0, 0], sizes = [1, 2, 16, 16], strides = [1, 1, 1, 1]} : vector<3x2x16x16xf32> to vector<1x2x16x16xf32>
    %67 = vector.shape_cast %66 : vector<1x2x16x16xf32> to vector<2x16x16xf32>
    %cst_70 = arith.constant dense<0.000000e+00> : vector<2x16x4xf32>
    %68 = tpu.matmul %67, %65, %cst_70 {dimension_numbers = #tpu.dot_dimension_numbers<[2], [1], [1], [2], [0, 0, 0, 1, 1, 2], [0], [0]>} : vector<2x16x16xf32>, vector<2x16x4xf32>, vector<2x16x4xf32> -> vector<2x16x4xf32>
    %69 = vector.extract_strided_slice %64 {offsets = [0, 0, 1], sizes = [2, 16, 4], strides = [1, 1, 1]} : vector<2x16x6xf32> to vector<2x16x4xf32>
    %70 = vector.extract_strided_slice %5 {offsets = [1, 0, 0, 0], sizes = [1, 2, 16, 16], strides = [1, 1, 1, 1]} : vector<3x2x16x16xf32> to vector<1x2x16x16xf32>
    %71 = vector.shape_cast %70 : vector<1x2x16x16xf32> to vector<2x16x16xf32>
    %cst_71 = arith.constant dense<0.000000e+00> : vector<2x16x4xf32>
    %72 = tpu.matmul %71, %69, %cst_71 {dimension_numbers = #tpu.dot_dimension_numbers<[2], [1], [1], [2], [0, 0, 0, 1, 1, 2], [0], [0]>} : vector<2x16x16xf32>, vector<2x16x4xf32>, vector<2x16x4xf32> -> vector<2x16x4xf32>
    %73 = arith.addf %68, %72 : vector<2x16x4xf32>
    %74 = vector.extract_strided_slice %64 {offsets = [0, 0, 2], sizes = [2, 16, 4], strides = [1, 1, 1]} : vector<2x16x6xf32> to vector<2x16x4xf32>
    %75 = vector.extract_strided_slice %5 {offsets = [2, 0, 0, 0], sizes = [1, 2, 16, 16], strides = [1, 1, 1, 1]} : vector<3x2x16x16xf32> to vector<1x2x16x16xf32>
    %76 = vector.shape_cast %75 : vector<1x2x16x16xf32> to vector<2x16x16xf32>
    %cst_72 = arith.constant dense<0.000000e+00> : vector<2x16x4xf32>
    %77 = tpu.matmul %76, %74, %cst_72 {dimension_numbers = #tpu.dot_dimension_numbers<[2], [1], [1], [2], [0, 0, 0, 1, 1, 2], [0], [0]>} : vector<2x16x16xf32>, vector<2x16x4xf32>, vector<2x16x4xf32> -> vector<2x16x4xf32>
    %78 = arith.addf %73, %77 : vector<2x16x4xf32>
    %79 = vector.broadcast %6 : vector<2x16x1xf32> to vector<2x16x4xf32>
    %80 = arith.addf %78, %79 : vector<2x16x4xf32>
    %81 = arith.addf %80, %62 : vector<2x16x4xf32>
    %cst_73 = arith.constant dense<0.000000e+00> : vector<2x16xf32>
    %82 = vector.multi_reduction <add>, %81, %cst_73 [2] : vector<2x16x4xf32> to vector<2x16xf32>
    %83 = vector.shape_cast %82 : vector<2x16xf32> to vector<2x16x1xf32>
    %cst_74 = arith.constant 4.000000e+00 : f32
    %84 = vector.broadcast %cst_74 : f32 to vector<2x16x1xf32>
    %85 = arith.divf %83, %84 : vector<2x16x1xf32>
    %cst_75 = arith.constant dense<0.000000e+00> : vector<2x1xf32>
    %86 = vector.multi_reduction <add>, %85, %cst_75 [1] : vector<2x16x1xf32> to vector<2x1xf32>
    %87 = vector.shape_cast %86 : vector<2x1xf32> to vector<2x1x1xf32>
    %cst_76 = arith.constant 1.600000e+01 : f32
    %88 = vector.broadcast %cst_76 : f32 to vector<2x1x1xf32>
    %89 = arith.divf %87, %88 : vector<2x1x1xf32>
    %90 = vector.broadcast %89 : vector<2x1x1xf32> to vector<2x16x4xf32>
    %91 = arith.subf %81, %90 : vector<2x16x4xf32>
    %92 = arith.mulf %91, %91 : vector<2x16x4xf32>
    %cst_77 = arith.constant dense<0.000000e+00> : vector<2x16xf32>
    %93 = vector.multi_reduction <add>, %92, %cst_77 [2] : vector<2x16x4xf32> to vector<2x16xf32>
    %94 = vector.shape_cast %93 : vector<2x16xf32> to vector<2x16x1xf32>
    %cst_78 = arith.constant 4.000000e+00 : f32
    %95 = vector.broadcast %cst_78 : f32 to vector<2x16x1xf32>
    %96 = arith.divf %94, %95 : vector<2x16x1xf32>
    %cst_79 = arith.constant dense<0.000000e+00> : vector<2x1xf32>
    %97 = vector.multi_reduction <add>, %96, %cst_79 [1] : vector<2x16x1xf32> to vector<2x1xf32>
    %98 = vector.shape_cast %97 : vector<2x1xf32> to vector<2x1x1xf32>
    %cst_80 = arith.constant 1.600000e+01 : f32
    %99 = vector.broadcast %cst_80 : f32 to vector<2x1x1xf32>
    %100 = arith.divf %98, %99 : vector<2x1x1xf32>
    %cst_81 = arith.constant 9.99999974E-6 : f32
    %101 = vector.broadcast %cst_81 : f32 to vector<2x1x1xf32>
    %102 = arith.addf %100, %101 : vector<2x1x1xf32>
    %103 = math.rsqrt %102 : vector<2x1x1xf32>
    %104 = vector.broadcast %103 : vector<2x1x1xf32> to vector<2x16x4xf32>
    %105 = arith.mulf %91, %104 : vector<2x16x4xf32>
    %106 = arith.mulf %105, %7 : vector<2x16x4xf32>
    %107 = arith.addf %106, %8 : vector<2x16x4xf32>
    %108 = vector.broadcast %9 : vector<2x16x1xf32> to vector<2x16x4xf32>
    %109 = arith.mulf %108, %107 : vector<2x16x4xf32>
    %110 = vector.broadcast %10 : vector<2x16x1xf32> to vector<2x16x4xf32>
    %111 = arith.mulf %110, %107 : vector<2x16x4xf32>
    %112 = vector.broadcast %11 : vector<2x16x1xf32> to vector<2x16x4xf32>
    %113 = arith.mulf %112, %107 : vector<2x16x4xf32>
    %cst_82 = arith.constant dense<0.000000e+00> : vector<2x16x16xf32>
    %114 = tpu.matmul %109, %111, %cst_82 {dimension_numbers = #tpu.dot_dimension_numbers<[2], [2], [1], [1], [0, 0, 0, 1, 1, 1], [0], [0]>} : vector<2x16x4xf32>, vector<2x16x4xf32>, vector<2x16x16xf32> -> vector<2x16x16xf32>
    %cst_83 = arith.constant dense<0xFF800000> : vector<2x16xf32>
    %115 = vector.multi_reduction <maximumf>, %114, %cst_83 [2] : vector<2x16x16xf32> to vector<2x16xf32>
    %116 = vector.shape_cast %115 : vector<2x16xf32> to vector<2x16x1xf32>
    %117 = vector.broadcast %116 : vector<2x16x1xf32> to vector<2x16x16xf32>
    %118 = arith.subf %114, %117 : vector<2x16x16xf32>
    %119 = math.exp %118 : vector<2x16x16xf32>
    %cst_84 = arith.constant dense<0.000000e+00> : vector<2x16xf32>
    %120 = vector.multi_reduction <add>, %119, %cst_84 [2] : vector<2x16x16xf32> to vector<2x16xf32>
    %121 = vector.shape_cast %120 : vector<2x16xf32> to vector<2x16x1xf32>
    %122 = tpu.reciprocal %121 {approx = true} : vector<2x16x1xf32> -> vector<2x16x1xf32>
    %123 = vector.broadcast %122 : vector<2x16x1xf32> to vector<2x16x16xf32>
    %124 = arith.mulf %119, %123 : vector<2x16x16xf32>
    %cst_85 = arith.constant dense<0.000000e+00> : vector<2x16x4xf32>
    %125 = tpu.matmul %124, %113, %cst_85 {dimension_numbers = #tpu.dot_dimension_numbers<[2], [1], [1], [2], [0, 0, 0, 1, 1, 2], [0], [0]>} : vector<2x16x16xf32>, vector<2x16x4xf32>, vector<2x16x4xf32> -> vector<2x16x4xf32>
    %126 = arith.addf %125, %107 : vector<2x16x4xf32>
    %cst_86 = arith.constant dense<0.000000e+00> : vector<2x16xf32>
    %127 = vector.multi_reduction <add>, %126, %cst_86 [2] : vector<2x16x4xf32> to vector<2x16xf32>
    %128 = vector.shape_cast %127 : vector<2x16xf32> to vector<2x16x1xf32>
    %cst_87 = arith.constant 4.000000e+00 : f32
    %129 = vector.broadcast %cst_87 : f32 to vector<2x16x1xf32>
    %130 = arith.divf %128, %129 : vector<2x16x1xf32>
    %cst_88 = arith.constant dense<0.000000e+00> : vector<2x1xf32>
    %131 = vector.multi_reduction <add>, %130, %cst_88 [1] : vector<2x16x1xf32> to vector<2x1xf32>
    %132 = vector.shape_cast %131 : vector<2x1xf32> to vector<2x1x1xf32>
    %cst_89 = arith.constant 1.600000e+01 : f32
    %133 = vector.broadcast %cst_89 : f32 to vector<2x1x1xf32>
    %134 = arith.divf %132, %133 : vector<2x1x1xf32>
    %135 = vector.broadcast %134 : vector<2x1x1xf32> to vector<2x16x4xf32>
    %136 = arith.subf %126, %135 : vector<2x16x4xf32>
    %137 = arith.mulf %136, %136 : vector<2x16x4xf32>
    %cst_90 = arith.constant dense<0.000000e+00> : vector<2x16xf32>
    %138 = vector.multi_reduction <add>, %137, %cst_90 [2] : vector<2x16x4xf32> to vector<2x16xf32>
    %139 = vector.shape_cast %138 : vector<2x16xf32> to vector<2x16x1xf32>
    %cst_91 = arith.constant 4.000000e+00 : f32
    %140 = vector.broadcast %cst_91 : f32 to vector<2x16x1xf32>
    %141 = arith.divf %139, %140 : vector<2x16x1xf32>
    %cst_92 = arith.constant dense<0.000000e+00> : vector<2x1xf32>
    %142 = vector.multi_reduction <add>, %141, %cst_92 [1] : vector<2x16x1xf32> to vector<2x1xf32>
    %143 = vector.shape_cast %142 : vector<2x1xf32> to vector<2x1x1xf32>
    %cst_93 = arith.constant 1.600000e+01 : f32
    %144 = vector.broadcast %cst_93 : f32 to vector<2x1x1xf32>
    %145 = arith.divf %143, %144 : vector<2x1x1xf32>
    %cst_94 = arith.constant 9.99999974E-6 : f32
    %146 = vector.broadcast %cst_94 : f32 to vector<2x1x1xf32>
    %147 = arith.addf %145, %146 : vector<2x1x1xf32>
    %148 = math.rsqrt %147 : vector<2x1x1xf32>
    %149 = vector.broadcast %148 : vector<2x1x1xf32> to vector<2x16x4xf32>
    %150 = arith.mulf %136, %149 : vector<2x16x4xf32>
    %151 = arith.mulf %150, %12 : vector<2x16x4xf32>
    %152 = arith.addf %151, %13 : vector<2x16x4xf32>
    %cst_95 = arith.constant 0.000000e+00 : f32
    %153 = vector.broadcast %cst_95 : f32 to vector<2x16x1xf32>
    %cst_96 = arith.constant 0.000000e+00 : f32
    %154 = vector.broadcast %cst_96 : f32 to vector<2x16x1xf32>
    %155 = tpu.concatenate %153, %152, %154 in 2 : vector<2x16x1xf32>, vector<2x16x4xf32>, vector<2x16x1xf32> -> vector<2x16x6xf32>
    %156 = vector.extract_strided_slice %155 {offsets = [0, 0, 0], sizes = [2, 16, 4], strides = [1, 1, 1]} : vector<2x16x6xf32> to vector<2x16x4xf32>
    %157 = vector.extract_strided_slice %14 {offsets = [0, 0, 0, 0], sizes = [1, 2, 16, 16], strides = [1, 1, 1, 1]} : vector<3x2x16x16xf32> to vector<1x2x16x16xf32>
    %158 = vector.shape_cast %157 : vector<1x2x16x16xf32> to vector<2x16x16xf32>
    %cst_97 = arith.constant dense<0.000000e+00> : vector<2x16x4xf32>
    %159 = tpu.matmul %158, %156, %cst_97 {dimension_numbers = #tpu.dot_dimension_numbers<[2], [1], [1], [2], [0, 0, 0, 1, 1, 2], [0], [0]>} : vector<2x16x16xf32>, vector<2x16x4xf32>, vector<2x16x4xf32> -> vector<2x16x4xf32>
    %160 = vector.extract_strided_slice %155 {offsets = [0, 0, 1], sizes = [2, 16, 4], strides = [1, 1, 1]} : vector<2x16x6xf32> to vector<2x16x4xf32>
    %161 = vector.extract_strided_slice %14 {offsets = [1, 0, 0, 0], sizes = [1, 2, 16, 16], strides = [1, 1, 1, 1]} : vector<3x2x16x16xf32> to vector<1x2x16x16xf32>
    %162 = vector.shape_cast %161 : vector<1x2x16x16xf32> to vector<2x16x16xf32>
    %cst_98 = arith.constant dense<0.000000e+00> : vector<2x16x4xf32>
    %163 = tpu.matmul %162, %160, %cst_98 {dimension_numbers = #tpu.dot_dimension_numbers<[2], [1], [1], [2], [0, 0, 0, 1, 1, 2], [0], [0]>} : vector<2x16x16xf32>, vector<2x16x4xf32>, vector<2x16x4xf32> -> vector<2x16x4xf32>
    %164 = arith.addf %159, %163 : vector<2x16x4xf32>
    %165 = vector.extract_strided_slice %155 {offsets = [0, 0, 2], sizes = [2, 16, 4], strides = [1, 1, 1]} : vector<2x16x6xf32> to vector<2x16x4xf32>
    %166 = vector.extract_strided_slice %14 {offsets = [2, 0, 0, 0], sizes = [1, 2, 16, 16], strides = [1, 1, 1, 1]} : vector<3x2x16x16xf32> to vector<1x2x16x16xf32>
    %167 = vector.shape_cast %166 : vector<1x2x16x16xf32> to vector<2x16x16xf32>
    %cst_99 = arith.constant dense<0.000000e+00> : vector<2x16x4xf32>
    %168 = tpu.matmul %167, %165, %cst_99 {dimension_numbers = #tpu.dot_dimension_numbers<[2], [1], [1], [2], [0, 0, 0, 1, 1, 2], [0], [0]>} : vector<2x16x16xf32>, vector<2x16x4xf32>, vector<2x16x4xf32> -> vector<2x16x4xf32>
    %169 = arith.addf %164, %168 : vector<2x16x4xf32>
    %170 = vector.broadcast %15 : vector<2x16x1xf32> to vector<2x16x4xf32>
    %171 = arith.addf %169, %170 : vector<2x16x4xf32>
    %cst_100 = arith.constant 0.000000e+00 : f32
    %172 = vector.broadcast %cst_100 : f32 to vector<2x16x1xf32>
    %cst_101 = arith.constant 0.000000e+00 : f32
    %173 = vector.broadcast %cst_101 : f32 to vector<2x16x1xf32>
    %174 = tpu.concatenate %172, %171, %173 in 2 : vector<2x16x1xf32>, vector<2x16x4xf32>, vector<2x16x1xf32> -> vector<2x16x6xf32>
    %175 = vector.extract_strided_slice %174 {offsets = [0, 0, 0], sizes = [2, 16, 4], strides = [1, 1, 1]} : vector<2x16x6xf32> to vector<2x16x4xf32>
    %176 = vector.extract_strided_slice %16 {offsets = [0, 0, 0, 0], sizes = [1, 2, 16, 16], strides = [1, 1, 1, 1]} : vector<3x2x16x16xf32> to vector<1x2x16x16xf32>
    %177 = vector.shape_cast %176 : vector<1x2x16x16xf32> to vector<2x16x16xf32>
    %cst_102 = arith.constant dense<0.000000e+00> : vector<2x16x4xf32>
    %178 = tpu.matmul %177, %175, %cst_102 {dimension_numbers = #tpu.dot_dimension_numbers<[2], [1], [1], [2], [0, 0, 0, 1, 1, 2], [0], [0]>} : vector<2x16x16xf32>, vector<2x16x4xf32>, vector<2x16x4xf32> -> vector<2x16x4xf32>
    %179 = vector.extract_strided_slice %174 {offsets = [0, 0, 1], sizes = [2, 16, 4], strides = [1, 1, 1]} : vector<2x16x6xf32> to vector<2x16x4xf32>
    %180 = vector.extract_strided_slice %16 {offsets = [1, 0, 0, 0], sizes = [1, 2, 16, 16], strides = [1, 1, 1, 1]} : vector<3x2x16x16xf32> to vector<1x2x16x16xf32>
    %181 = vector.shape_cast %180 : vector<1x2x16x16xf32> to vector<2x16x16xf32>
    %cst_103 = arith.constant dense<0.000000e+00> : vector<2x16x4xf32>
    %182 = tpu.matmul %181, %179, %cst_103 {dimension_numbers = #tpu.dot_dimension_numbers<[2], [1], [1], [2], [0, 0, 0, 1, 1, 2], [0], [0]>} : vector<2x16x16xf32>, vector<2x16x4xf32>, vector<2x16x4xf32> -> vector<2x16x4xf32>
    %183 = arith.addf %178, %182 : vector<2x16x4xf32>
    %184 = vector.extract_strided_slice %174 {offsets = [0, 0, 2], sizes = [2, 16, 4], strides = [1, 1, 1]} : vector<2x16x6xf32> to vector<2x16x4xf32>
    %185 = vector.extract_strided_slice %16 {offsets = [2, 0, 0, 0], sizes = [1, 2, 16, 16], strides = [1, 1, 1, 1]} : vector<3x2x16x16xf32> to vector<1x2x16x16xf32>
    %186 = vector.shape_cast %185 : vector<1x2x16x16xf32> to vector<2x16x16xf32>
    %cst_104 = arith.constant dense<0.000000e+00> : vector<2x16x4xf32>
    %187 = tpu.matmul %186, %184, %cst_104 {dimension_numbers = #tpu.dot_dimension_numbers<[2], [1], [1], [2], [0, 0, 0, 1, 1, 2], [0], [0]>} : vector<2x16x16xf32>, vector<2x16x4xf32>, vector<2x16x4xf32> -> vector<2x16x4xf32>
    %188 = arith.addf %183, %187 : vector<2x16x4xf32>
    %189 = vector.broadcast %17 : vector<2x16x1xf32> to vector<2x16x4xf32>
    %190 = arith.addf %188, %189 : vector<2x16x4xf32>
    %c0_105 = arith.constant 0 : index
    %c0_106 = arith.constant 0 : index
    %c0_107 = arith.constant 0 : index
    %c0_108 = arith.constant 0 : index
    %191 = vector.load %arg28[%c0_105, %c0_106, %c0_107, %c0_108] : memref<1x2x16x16xf32, #tpu.memory_space<vmem>>, vector<1x2x16x16xf32>
    %192 = vector.shape_cast %191 : vector<1x2x16x16xf32> to vector<2x16x16xf32>
    %193 = vector.shape_cast %124 : vector<2x16x16xf32> to vector<1x2x16x16xf32>
    tpu.vector_store %arg28[%c0_105, %c0_106, %c0_107, %c0_108], %193 {strides = array<i32>} : memref<1x2x16x16xf32, #tpu.memory_space<vmem>>, vector<1x2x16x16xf32>,
    %c0_109 = arith.constant 0 : index
    %c0_110 = arith.constant 0 : index
    %c0_111 = arith.constant 0 : index
    %194 = vector.load %arg3[%c0_109, %c0_110, %c0_111] : memref<1x1x4xf32, #tpu.memory_space<vmem>>, vector<1x1x4xf32>
    %195 = vector.broadcast %194 : vector<1x1x4xf32> to vector<2x16x4xf32>
    %196 = arith.mulf %190, %195 : vector<2x16x4xf32>
    %cst_112 = arith.constant dense<0.000000e+00> : vector<2x16xf32>
    %197 = vector.multi_reduction <add>, %196, %cst_112 [2] : vector<2x16x4xf32> to vector<2x16xf32>
    %c0_113 = arith.constant 0 : index
    %c0_114 = arith.constant 0 : index
    %198 = vector.load %arg4[%c0_113, %c0_114] : memref<16x10xf32, #tpu.memory_space<vmem>>, vector<16x10xf32>
    %cst_115 = arith.constant dense<0.000000e+00> : vector<2x10xf32>
    %199 = tpu.matmul %197, %198, %cst_115 {dimension_numbers = #tpu.dot_dimension_numbers<[1], [0], [0], [1], [0, 0, 1, 1], [], []>} : vector<2x16xf32>, vector<16x10xf32>, vector<2x10xf32> -> vector<2x10xf32>
    %c0_116 = arith.constant 0 : index
    %c0_117 = arith.constant 0 : index
    %200 = vector.load %arg1[%c0_116, %c0_117] : memref<2x32xf32, #tpu.memory_space<vmem>>, vector<2x32xf32>
    %c0_118 = arith.constant 0 : index
    %c0_119 = arith.constant 0 : index
    %201 = vector.load %arg5[%c0_118, %c0_119] : memref<32x10xf32, #tpu.memory_space<vmem>>, vector<32x10xf32>
    %cst_120 = arith.constant dense<0.000000e+00> : vector<2x10xf32>
    %202 = tpu.matmul %200, %201, %cst_120 {dimension_numbers = #tpu.dot_dimension_numbers<[1], [0], [0], [1], [0, 0, 1, 1], [], []>} : vector<2x32xf32>, vector<32x10xf32>, vector<2x10xf32> -> vector<2x10xf32>
    %203 = arith.addf %199, %202 : vector<2x10xf32>
    %c0_121 = arith.constant 0 : index
    %c0_122 = arith.constant 0 : index
    %204 = vector.load %arg2[%c0_121, %c0_122] : memref<2x6xf32, #tpu.memory_space<vmem>>, vector<2x6xf32>
    %c0_123 = arith.constant 0 : index
    %c0_124 = arith.constant 0 : index
    %205 = vector.load %arg6[%c0_123, %c0_124] : memref<6x10xf32, #tpu.memory_space<vmem>>, vector<6x10xf32>
    %cst_125 = arith.constant dense<0.000000e+00> : vector<2x10xf32>
    %206 = tpu.matmul %204, %205, %cst_125 {dimension_numbers = #tpu.dot_dimension_numbers<[1], [0], [0], [1], [0, 0, 1, 1], [], []>} : vector<2x6xf32>, vector<6x10xf32>, vector<2x10xf32> -> vector<2x10xf32>
    %207 = arith.addf %203, %206 : vector<2x10xf32>
    %c0_126 = arith.constant 0 : index
    %c0_127 = arith.constant 0 : index
    %208 = vector.load %arg7[%c0_126, %c0_127] : memref<1x10xf32, #tpu.memory_space<vmem>>, vector<1x10xf32>
    %209 = vector.broadcast %208 : vector<1x10xf32> to vector<2x10xf32>
    %210 = arith.addf %207, %209 : vector<2x10xf32>
    %211 = math.tanh %210 : vector<2x10xf32>
    %c0_128 = arith.constant 0 : index
    %c0_129 = arith.constant 0 : index
    %212 = vector.load %arg8[%c0_128, %c0_129] : memref<10x1xf32, #tpu.memory_space<vmem>>, vector<10x1xf32>
    %cst_130 = arith.constant dense<0.000000e+00> : vector<2x1xf32>
    %213 = tpu.matmul %211, %212, %cst_130 {dimension_numbers = #tpu.dot_dimension_numbers<[1], [0], [0], [1], [0, 0, 1, 1], [], []>} : vector<2x10xf32>, vector<10x1xf32>, vector<2x1xf32> -> vector<2x1xf32>
    %c0_131 = arith.constant 0 : index
    %c0_132 = arith.constant 0 : index
    %214 = vector.load %arg9[%c0_131, %c0_132] : memref<1x1xf32, #tpu.memory_space<vmem>>, vector<1x1xf32>
    %215 = vector.broadcast %214 : vector<1x1xf32> to vector<2x1xf32>
    %216 = arith.addf %213, %215 : vector<2x1xf32>
    %c0_133 = arith.constant 0 : index
    %c0_134 = arith.constant 0 : index
    %217 = vector.load %arg27[%c0_133, %c0_134] : memref<2x1xf32, #tpu.memory_space<vmem>>, vector<2x1xf32>
    tpu.vector_store %arg27[%c0_133, %c0_134], %216 {strides = array<i32>} : memref<2x1xf32, #tpu.memory_space<vmem>>, vector<2x1xf32>,
    return
  }
}

</mosaic_0001>

<bundles_post_ra>
// kernel: forward_fused.3
= control target key start
LH: loop header
LB: loop body
LE: loop exit
PB: predicated region body
PF: predicated region fallthrough
CT: control target
= control target key end

     0   :  { %s5206_s0 = inlined_call_operand.vmem [shape: f32[2,16,4], index: 0, kind: input, shape index: {}]   ;;  %s5207_s1 = inlined_call_operand.vmem [shape: f32[2,32], index: 1, kind: input, shape index: {}]   ;;  %s5208_s2 = inlined_call_operand.vmem [shape: f32[2,6], index: 2, kind: input, shape index: {}]   ;;  %s5209_s3 = inlined_call_operand.vmem [shape: f32[1,1,4], index: 3, kind: input, shape index: {}]   ;;  %s5210_s4 = inlined_call_operand.vmem [shape: f32[16,10], index: 4, kind: input, shape index: {}]   ;;  %s5211_s5 = inlined_call_operand.vmem [shape: f32[32,10], index: 5, kind: input, shape index: {}]   ;;  %s5212_s6 = inlined_call_operand.vmem [shape: f32[6,10], index: 6, kind: input, shape index: {}]   ;;  %s5213_s7 = inlined_call_operand.vmem [shape: f32[1,10], index: 7, kind: input, shape index: {}]   ;;  %s5214_s8 = inlined_call_operand.vmem [shape: f32[10,1], index: 8, kind: input, shape index: {}]   ;;  %s5215_s9 = inlined_call_operand.<no memory space> [shape: f32[1,1], index: 9, kind: input, shape index: {}]   ;;  %s5216_s10 = inlined_call_operand.vmem [shape: f32[3,2,16,16], index: 10, kind: input, shape index: {}]   ;;  %s5217_s11 = inlined_call_operand.vmem [shape: f32[2,16,1], index: 11, kind: input, shape index: {}]   ;;  %s5218_s12 = inlined_call_operand.vmem [shape: f32[2,16,4], index: 12, kind: input, shape index: {}]   ;;  %s5219_s13 = inlined_call_operand.vmem [shape: f32[2,16,4], index: 13, kind: input, shape index: {}]   ;;  %s5220_s14 = inlined_call_operand.vmem [shape: f32[3,2,16,16], index: 14, kind: input, shape index: {}]   ;;  %s5221_s15 = inlined_call_operand.vmem [shape: f32[2,16,1], index: 15, kind: input, shape index: {}]   ;;  %s5222_s16 = inlined_call_operand.vmem [shape: f32[2,16,4], index: 16, kind: input, shape index: {}]   ;;  %s5223_s17 = inlined_call_operand.vmem [shape: f32[2,16,4], index: 17, kind: input, shape index: {}]   ;;  %s5224_s18 = inlined_call_operand.vmem [shape: f32[2,16,1], index: 18, kind: input, shape index: {}]   ;;  %s5225_s19 = inlined_call_operand.vmem [shape: f32[2,16,1], index: 19, kind: input, shape index: {}]   ;;  %s5226_s20 = inlined_call_operand.vmem [shape: f32[2,16,1], index: 20, kind: input, shape index: {}]   ;;  %s5227_s21 = inlined_call_operand.vmem [shape: f32[2,16,4], index: 21, kind: input, shape index: {}]   ;;  %s5228_s22 = inlined_call_operand.vmem [shape: f32[2,16,4], index: 22, kind: input, shape index: {}]   ;;  %s5229_s23 = inlined_call_operand.vmem [shape: f32[3,2,16,16], index: 23, kind: input, shape index: {}]   ;;  %s5230_s24 = inlined_call_operand.vmem [shape: f32[2,16,1], index: 24, kind: input, shape index: {}]   ;;  %s5231_s25 = inlined_call_operand.vmem [shape: f32[3,2,16,16], index: 25, kind: input, shape index: {}]   ;;  %s5232_s26 = inlined_call_operand.vmem [shape: f32[2,16,1], index: 26, kind: input, shape index: {}]   ;;  %s5233_s27 = inlined_call_operand.vmem [shape: f32[2,1], index: 27, kind: output, shape index: {0}]   ;;  %s5234_s28 = inlined_call_operand.hbm [shape: f32[1,2,16,16], index: 28, kind: output, shape index: {1}]  }
   0x1   :  { %5242 = sst [smem:[#allocation6_spill]] %s5206_s0 }
   0x2   :  { %5243 = sst [smem:[#allocation7_spill]] %s5207_s1 }
   0x3   :  { %5244 = sst [smem:[#allocation8_spill]] %s5208_s2 }
   0x4   :  { %5245 = sst [smem:[#allocation9_spill]] %s5209_s3 }
   0x5   :  { %5246 = sst [smem:[#allocation10_spill]] %s5210_s4 }
   0x6   :  { %5247 = sst [smem:[#allocation11_spill]] %s5211_s5 }
   0x7   :  { %5248 = sst [smem:[#allocation12_spill]] %s5212_s6 }
   0x8   :  { %5249 = sst [smem:[#allocation13_spill]] %s5213_s7 }
   0x9   :  { %5250 = sst [smem:[#allocation14_spill]] %s5214_s8 }
   0xa   :  { %5251 = sst [smem:[#allocation15_spill]] %s5215_s9 }
   0xb   :  { %5252 = sst [smem:[#allocation16_spill]] %s5216_s10  ;;  %s5255_s9 = sld [smem:[#allocation15_spill]] }
   0xc   :  { %5253 = sst [smem:[#allocation17_spill]] %s5217_s11 }
   0xd   :  { %5254 = sst [smem:[#allocation18_spill]] %s5218_s12 }
  0x11   :  { %v34_v0 = vstv %s5255_s9 }
  0x12   :  { %35 = vst [vmem:[#allocation2] sm:$0x1] %v34_v0 }
  0x13   :  { %s5256_s6 = sld [smem:[#allocation6_spill]] }
  0x19   :  { %v4561_v1 = vld [vmem:[%s5256_s6] sm:$0xff]  ;;  %v4566_v2 = vld [vmem:[%s5256_s6 + $0x8] sm:$0xff]  ;;  %v4571_v3 = vld [vmem:[%s5256_s6 + $0x10] sm:$0xff] }
  0x1a   :  { %v4222_v4 = vpack.i.bf16 %v4566_v2, %v4561_v1  ;;  %v4578_v5 = vld [vmem:[%s5256_s6 + $0x18] sm:$0xff] }
  0x1b   :  { %36 = vsyncpa [#allocation4], 0  ;;  %s4398_s12 = smov 2   ;;  %v4227_v6 = vpack.i.bf16 %v4578_v5, %v4571_v3  ;;  %s5257_s8 = sld [smem:[#allocation16_spill]]  ;;  %vm224_vm0 = vcmask 130048   ;;  %vm211_vm1 = vcmask 15360  }
  0x1c   :  { %4223 = vrot.lane.b32.xlu0 %v4222_v4, %s4398_s12  ;;  %s4399_s30 = smov 126   ;;  %s4400_s3 = smov 127   ;;  %v4401_v25 = vmov 0   ;;  %vm3593_vm2 = vmneg %vm211_vm1  ;;  %vm763_vm4 = vcmask 31744   ;;  %v129_v34 = vld [vmem:[%s5220_s14 + $0x50] sm:$0xff]  ;;  %vm2064_vm6 = vcmask 7168  }
  0x1d   :  { %s5258_s0 = sld [smem:[#allocation17_spill]]  ;;  %4253 = vset.pattern.permute.xlu1 %v4401_v25  ;;  %4252 = vset.pattern.permute.xlu0 %v4401_v25  ;;  %vm4613_vm3 = vmpackc.low %vm3593_vm2, %vm3593_vm2  ;;  %s5261_s4 = sld [smem:[#allocation18_spill]]  ;;  %vm2069_vm7 = vcmask 39936   ;;  %vm3216_vm9 = vcmask 261120   ;;  %vm4404_vm10 = vmmov 0   ;;  %vm3305_vm11 = vcmask 130112  }
  0x1e   :  { %vm4880_vm5 = vmpackc.low %vm763_vm4, %vm763_vm4  ;;  %s4402_s10 = smov 1   ;;  %s5266_s7 = sld [smem:[#allocation9_spill]]  ;;  %vm3316_vm12 = vcmask 1041409   ;;  %vm3396_vm13 = vcmask 1045504   ;;  %vm3392_vm14 = vcmask 48128   ;;  %vm3493_vm15 = vcmask 1041408  }
  0x1f   :  { %vm5009_vm8 = vmpackc.low %vm2069_vm7, %vm2069_vm7  ;;  %s5267_s1 = sld [smem:[#allocation11_spill]]  ;;  %s5272_s29 = sld [smem:[#allocation14_spill]]  ;;  %vm3489_vm2 = vcmask 80896  }
  0x20   :  { %4228 = vrot.lane.b32.xlu0 %v4227_v6, %s4398_s12 }
  0x21   :  { %v99_v7 = vld [vmem:[%s5257_s8 + $0x20] sm:$0xff]  ;;  %v101_v14 = vld [vmem:[%s5257_s8 + $0x30] sm:$0xff]  ;;  %v100_v39 = vld [vmem:[%s5257_s8 + $0x28] sm:$0xff] }
  0x22   :  { %3811 = vmatprep.mubr.msk.f32.mxu0 %vm224_vm0, %v99_v7  ;;  %3818 = vmatprep.mubr.msk.f32.mxu1 %vm224_vm0, %v101_v14  ;;  %v95_v45 = vld [vmem:[%s5257_s8] sm:$0xff]  ;;  %v102_v46 = vld [vmem:[%s5257_s8 + $0x38] sm:$0xff]  ;;  %v97_v47 = vld [vmem:[%s5257_s8 + $0x10] sm:$0xff] }
  0x23   :  { %v107_v23 = vld [vmem:[%s5258_s0] sm:$0xff]  ;;  %v108_v24 = vld [vmem:[%s5258_s0 + $0x8] sm:$0xff]  ;;  %v110_v26 = vld [vmem:[%s5258_s0 + $0x18] sm:$0xff] }
  0x24   :  { %v109_v27 = vld [vmem:[%s5258_s0 + $0x10] sm:$0xff]  ;;  %v96_v49 = vld [vmem:[%s5257_s8 + $0x8] sm:$0xff]  ;;  %v103_v50 = vld [vmem:[%s5257_s8 + $0x40] sm:$0xff] }
  0x25   :  { %v98_v51 = vld [vmem:[%s5257_s8 + $0x18] sm:$0xff]  ;;  %v105_v52 = vld [vmem:[%s5257_s8 + $0x50] sm:$0xff]  ;;  %v104_v53 = vld [vmem:[%s5257_s8 + $0x48] sm:$0xff] }
  0x26   :  { %v106_v54 = vld [vmem:[%s5257_s8 + $0x58] sm:$0xff]  ;;  %s5273_s8 = sld [smem:[#allocation13_spill]] }
  0x8e   :  { %v4224_v8 = vpop.permute.xlu0 %4223 }
  0x8f   :  { %v4226_v9 = vunpack.i.h.bf16 %v4224_v8  ;;  %v4225_v10 = vunpack.i.l.bf16 %v4224_v8 }
  0x91   :  { %v213_v11 = vsel %vm211_vm1, 0.0, %v4226_v9  ;;  %v212_v12 = vsel %vm211_vm1, 0.0, %v4225_v10  ;;  %v4041_v13 = vpack.c.bf16 %v4226_v9, %v4225_v10 }
  0x92   :  { %v4229_v15 = vpop.permute.xlu0 %4228  ;;  %v4242_v16 = vpack.i.bf16 %v213_v11, %v212_v12 }
  0x93   :  { %v4231_v17 = vunpack.i.h.bf16 %v4229_v15  ;;  %v4230_v18 = vunpack.i.l.bf16 %v4229_v15 }
  0x94   :  { %4243 = vrot.lane.b32.xlu0 %v4242_v16, %s4399_s30  ;;  %4233 = vrot.lane.b32.xlu1 %v4242_v16, %s4400_s3 }
  0x95   :  { %v215_v19 = vsel %vm211_vm1, 0.0, %v4231_v17  ;;  %v214_v20 = vsel %vm211_vm1, 0.0, %v4230_v18  ;;  %v4047_v21 = vpack.c.bf16 %v4231_v17, %v4230_v18 }
  0x96   :  { %v4237_v22 = vpack.i.bf16 %v215_v19, %v214_v20 }
  0x98   :  { %4238 = vrot.lane.b32.xlu1 %v4237_v22, %s4400_s3  ;;  %737 = vperm.xlu0 %4252, %v107_v23  }
  0x9c   :  { %4248 = vrot.lane.b32.xlu1 %v4237_v22, %s4399_s30  ;;  %752 = vperm.xlu0 %4252, %v110_v26  }
  0xa0   :  { %742 = vperm.xlu1 %4253, %v108_v24  }
  0xa4   :  { %747 = vperm.xlu1 %4253, %v109_v27  }
 0x106   :  { %v4234_v28 = vpop.permute.xlu1 %4233  ;;  %v4244_v31 = vpop.permute.xlu0 %4243 }
 0x107   :  { %v4236_v29 = vunpack.i.h.bf16 %v4234_v28  ;;  %v4235_v30 = vunpack.i.l.bf16 %v4234_v28  ;;  %v4246_v35 = vunpack.i.h.bf16 %v4244_v31  ;;  %v4245_v36 = vunpack.i.l.bf16 %v4244_v31 }
 0x109   :  { %v4033_v32 = vpack.c.bf16 %v4236_v29, %v4235_v30  ;;  %v4053_v42 = vpack.c.bf16 %v4246_v35, %v4245_v36 }
 0x10a   :  { %v4239_v33 = vpop.permute.xlu1 %4238 }
 0x10b   :  { %v4241_v37 = vunpack.i.h.bf16 %v4239_v33  ;;  %v4240_v38 = vunpack.i.l.bf16 %v4239_v33  ;;  %4034 = vmatprep.subr.bf16.mxu0 %v4033_v32 }
 0x10c   :  { %4036 = vmatpush3.bf16.msra.mxu0 %v4033_v32 }
 0x10d   :  { %4043 = vmatprep.subr.msk.bf16.mxu0 %vm4613_vm3, %v4041_v13  ;;  %v4037_v40 = vpack.c.bf16 %v4241_v37, %v4240_v38 }
 0x10e   :  { %v4249_v41 = vpop.permute.xlu1 %4248 }
 0x10f   :  { %v4251_v43 = vunpack.i.h.bf16 %v4249_v41  ;;  %v4250_v44 = vunpack.i.l.bf16 %v4249_v41  ;;  %3812 = vmatmul.mubr.msk.f32.vlgmr.msra.gmra.mrb[0].mxu0 %vm224_vm0, %v100_v39  ;;  %4038 = vmatprep.subr.bf16.mxu1 %v4037_v40 }
 0x110   :  { %4040 = vmatpush3.bf16.msra.mxu1 %v4037_v40  ;;  %4046 = vmatpush3.bf16.msk.msra.mxu0 %vm4613_vm3, %v4041_v13 }
 0x111   :  { %4049 = vmatprep.subr.msk.bf16.mxu1 %vm4613_vm3, %v4047_v21  ;;  %4054 = vmatprep.subr.bf16.mxu0 %v4053_v42  ;;  %v4057_v48 = vpack.c.bf16 %v4251_v43, %v4250_v44 }
 0x112   :  { %3825 = vmatprep.mubr.msk.f32.mxu0 %vm224_vm0, %v95_v45 }
 0x113   :  { %3819 = vmatmul.mubr.msk.f32.vlgmr.msra.gmra.mrb[0].mxu1 %vm224_vm0, %v102_v46 }
 0x114   :  { %4052 = vmatpush3.bf16.msk.msra.mxu1 %vm4613_vm3, %v4047_v21  ;;  %3832 = vmatprep.mubr.msk.f32.mxu1 %vm224_vm0, %v97_v47 }
 0x115   :  { %4058 = vmatprep.subr.bf16.mxu1 %v4057_v48 }
 0x117   :  { %3826 = vmatmul.mubr.msk.f32.vlgmr.msra.gmra.mrb[0].mxu0 %vm224_vm0, %v96_v49  ;;  %v738_v55 = vpop.permute.xlu0 %737 }
 0x118   :  { %4056 = vmatpush3.bf16.msra.mxu0 %v4053_v42  ;;  %3839 = vmatprep.mubr.msk.f32.mxu0 %vm224_vm0, %v103_v50 }
 0x11b   :  { %3833 = vmatmul.mubr.msk.f32.vlgmr.msra.gmra.mrb[0].mxu1 %vm224_vm0, %v98_v51  ;;  %v753_v62 = vpop.permute.xlu0 %752 }
 0x11c   :  { %4060 = vmatpush3.bf16.msra.mxu1 %v4057_v48  ;;  %3846 = vmatprep.mubr.msk.f32.mxu1 %vm224_vm0, %v105_v52 }
 0x11f   :  { %3840 = vmatmul.mubr.msk.f32.vlgmr.msra.gmra.mrb[0].mxu0 %vm224_vm0, %v104_v53  ;;  %v743_v56 = vpop.permute.xlu1 %742 }
 0x123   :  { %3847 = vmatmul.mubr.msk.f32.vlgmr.msra.gmra.mrb[0].mxu1 %vm224_vm0, %v106_v54  ;;  %v748_v4 = vpop.permute.xlu1 %747 }
 0x1f2   :  { %v3841_v57 = vpop.f32.mrb[0].mxu0 }
 0x1f3   :  { %v756_v58 = vadd.f32 %v3841_v57, %v743_v56  ;;  %v635_v59 = vpop.f32.mrb[1].mxu0 }
 0x1f4   :  { %v755_v60 = vadd.f32 %v738_v55, %v635_v59 }
 0x1f5   :  { %v760_v61 = vadd.f32 %v756_v58, %v4566_v2 }
 0x1f6   :  { %v3848_v63 = vpop.f32.mrb[0].mxu1  ;;  %v759_v0 = vadd.f32 %v755_v60, %v4561_v1 }
 0x1f7   :  { %v758_v6 = vadd.f32 %v3848_v63, %v753_v62  ;;  %v722_v7 = vpop.f32.mrb[1].mxu1  ;;  %v767_v8 = vsel %vm763_vm4, %v760_v61, 0.0 }
 0x1f8   :  { %v757_v9 = vadd.f32 %v748_v4, %v722_v7  ;;  %768 = vadd.xlane.f32.xlu0 %v767_v8  ;;  %v764_v10 = vsel %vm763_vm4, %v759_v0, 0.0 }
 0x1f9   :  { %765 = vadd.xlane.f32.xlu1 %v764_v10  ;;  %v762_v11 = vadd.f32 %v758_v6, %v4578_v5 }
 0x1fa   :  { %v761_v12 = vadd.f32 %v757_v9, %v4571_v3 }
 0x1fb   :  { %v773_v2 = vsel %vm763_vm4, %v762_v11, 0.0 }
 0x1fc   :  { %v770_v13 = vsel %vm763_vm4, %v761_v12, 0.0 }
 0x1fd   :  { %771 = vadd.xlane.f32.xlu0 %v770_v13  ;;  %774 = vadd.xlane.f32.xlu1 %v773_v2 }
 0x285   :  { %v769_v1 = vpop.xlane.xlu0 %768 }
 0x286   :  { %v778_v14 = vmul.f32 0.25, %v769_v1  ;;  %v766_v15 = vpop.xlane.xlu1 %765  ;;  %v111_v1 = vld [vmem:[%s5261_s4] sm:$0xff] }
 0x287   :  { %v777_v16 = vmul.f32 0.25, %v766_v15 }
 0x289   :  { %v781_v17 = vadd.f32 %v778_v14, %v777_v16  ;;  %v112_v14 = vld [vmem:[%s5261_s4 + $0x8] sm:$0xff] }
 0x28a   :  { %v772_v18 = vpop.xlane.xlu0 %771  ;;  %v775_v19 = vpop.xlane.xlu1 %774 }
 0x28b   :  { %v782_v20 = vrot.slane %v781_v17, 4  ;;  %v779_v21 = vmul.f32 0.25, %v772_v18  ;;  %v780_v22 = vmul.f32 0.25, %v775_v19  ;;  %v116_v18 = vld [vmem:[%s5219_s13 + $0x8] sm:$0xff] }
 0x28d   :  { %v783_v23 = vadd.f32 %v782_v20, %v781_v17  ;;  %v788_v5 = vadd.f32 %v780_v22, %v779_v21  ;;  %v115_v17 = vld [vmem:[%s5219_s13] sm:$0xff]  ;;  %v113_v22 = vld [vmem:[%s5261_s4 + $0x10] sm:$0xff] }
 0x28f   :  { %v784_v24 = vrot.slane %v783_v23, 2  ;;  %v789_v3 = vrot.slane %v788_v5, 4 }
 0x291   :  { %v785_v25 = vadd.f32 %v784_v24, %v783_v23  ;;  %v790_v26 = vadd.f32 %v789_v3, %v788_v5  ;;  %v114_v23 = vld [vmem:[%s5261_s4 + $0x18] sm:$0xff] }
 0x293   :  { %v786_v27 = vrot.slane %v785_v25, 1  ;;  %v791_v28 = vrot.slane %v790_v26, 2 }
 0x295   :  { %v792_v29 = vadd.f32 %v791_v28, %v790_v26  ;;  %v787_v30 = vadd.f32 %v786_v27, %v785_v25  ;;  %v117_v26 = vld [vmem:[%s5219_s13 + $0x10] sm:$0xff]  ;;  %v118_v27 = vld [vmem:[%s5219_s13 + $0x18] sm:$0xff] }
 0x297   :  { %v793_v31 = vrot.slane %v792_v29, 1  ;;  %v796_v32 = vmul.f32 0.0625, %v787_v30 }
 0x299   :  { %v799_v33 = vsub.f32 %v760_v61, %v796_v32  ;;  %v798_v35 = vsub.f32 %v759_v0, %v796_v32  ;;  %v794_v36 = vadd.f32 %v793_v31, %v792_v29 }
 0x29b   :  { %v803_v37 = vmul.f32 %v799_v33, %v799_v33  ;;  %v802_v38 = vmul.f32 %v798_v35, %v798_v35  ;;  %v797_v39 = vmul.f32 0.0625, %v794_v36 }
 0x29d   :  { %v809_v40 = vsel %vm763_vm4, %v803_v37, 0.0  ;;  %v806_v41 = vsel %vm763_vm4, %v802_v38, 0.0  ;;  %v801_v42 = vsub.f32 %v762_v11, %v797_v39  ;;  %v800_v43 = vsub.f32 %v761_v12, %v797_v39 }
 0x29e   :  { %810 = vadd.xlane.f32.xlu1 %v809_v40  ;;  %807 = vadd.xlane.f32.xlu0 %v806_v41 }
 0x29f   :  { %v805_v44 = vmul.f32 %v801_v42, %v801_v42  ;;  %v804_v45 = vmul.f32 %v800_v43, %v800_v43 }
 0x2a1   :  { %v815_v46 = vsel %vm763_vm4, %v805_v44, 0.0  ;;  %v812_v47 = vsel %vm763_vm4, %v804_v45, 0.0 }
 0x2a2   :  { %816 = vadd.xlane.f32.xlu1 %v815_v46  ;;  %813 = vadd.xlane.f32.xlu0 %v812_v47 }
 0x32b   :  { %v808_v48 = vpop.xlane.xlu0 %807  ;;  %v811_v49 = vpop.xlane.xlu1 %810 }
 0x32c   :  { %v818_v50 = vmul.f32 0.25, %v808_v48  ;;  %v819_v51 = vmul.f32 0.25, %v811_v49 }
 0x32e   :  { %v822_v52 = vadd.f32 %v819_v51, %v818_v50  ;;  %v131_v51 = vld [vmem:[%s5221_s15] sm:$0xff] }
 0x32f   :  { %v814_v53 = vpop.xlane.xlu0 %813  ;;  %v817_v54 = vpop.xlane.xlu1 %816 }
 0x330   :  { %v823_v55 = vrot.slane %v822_v52, 4  ;;  %v820_v56 = vmul.f32 0.25, %v814_v53  ;;  %v821_v57 = vmul.f32 0.25, %v817_v54  ;;  %v132_v53 = vld [vmem:[%s5221_s15 + $0x8] sm:$0xff]  ;;  %v134_v54 = vld [vmem:[%s5221_s15 + $0x18] sm:$0xff] }
 0x332   :  { %v824_v58 = vadd.f32 %v823_v55, %v822_v52  ;;  %v829_v59 = vadd.f32 %v821_v57, %v820_v56  ;;  %v133_v52 = vld [vmem:[%s5221_s15 + $0x10] sm:$0xff] }
 0x334   :  { %v825_v60 = vrot.slane %v824_v58, 2  ;;  %v830_v61 = vrot.slane %v829_v59, 4 }
 0x336   :  { %v826_v62 = vadd.f32 %v825_v60, %v824_v58  ;;  %v831_v63 = vadd.f32 %v830_v61, %v829_v59 }
 0x338   :  { %v827_v0 = vrot.slane %v826_v62, 1  ;;  %v832_v4 = vrot.slane %v831_v63, 2 }
 0x33a   :  { %v828_v6 = vadd.f32 %v827_v0, %v826_v62  ;;  %v833_v7 = vadd.f32 %v832_v4, %v831_v63  ;;  %v124_v4 = vld [vmem:[%s5220_s14 + $0x28] sm:$0xff] }
 0x33c   :  { %v836_v8 = vmul.f32 0.0625, %v828_v6  ;;  %v834_v9 = vrot.slane %v833_v7, 1 }
 0x33e   :  { %v838_v10 = vadd.f32 1e-05, %v836_v8  ;;  %v835_v11 = vadd.f32 %v834_v9, %v833_v7 }
 0x340   :  { %4344 = vrsqrt.f32 %v838_v10  ;;  %v837_v12 = vmul.f32 0.0625, %v835_v11  ;;  %v119_v11 = vld [vmem:[%s5220_s14] sm:$0xff] }
 0x342   :  { %v839_v2 = vadd.f32 1e-05, %v837_v12  ;;  %v126_v12 = vld [vmem:[%s5220_s14 + $0x38] sm:$0xff] }
 0x344   :  { %4346 = vrsqrt.f32 %v839_v2  ;;  %v121_v2 = vld [vmem:[%s5220_s14 + $0x10] sm:$0xff] }
 0x34a   :  { %v4345_v13 = vpop.eup %4344 }
 0x34b   :  { %v842_v15 = vmul.f32 %v4345_v13, %v798_v35  ;;  %v843_v16 = vmul.f32 %v4345_v13, %v799_v33  ;;  %v123_v35 = vld [vmem:[%s5220_s14 + $0x20] sm:$0xff] }
 0x34c   :  { %3853 = vmatprep.mubr.msk.f32.mxu0 %vm224_vm0, %v123_v35 }
 0x34d   :  { %v846_v19 = vmul.f32 %v842_v15, %v111_v1  ;;  %v847_v20 = vmul.f32 %v843_v16, %v112_v14  ;;  %v120_v1 = vld [vmem:[%s5220_s14 + $0x8] sm:$0xff]  ;;  %v127_v14 = vld [vmem:[%s5220_s14 + $0x40] sm:$0xff]  ;;  %v122_v15 = vld [vmem:[%s5220_s14 + $0x18] sm:$0xff] }
 0x34e   :  { %v4347_v21 = vpop.eup %4346  ;;  %v128_v16 = vld [vmem:[%s5220_s14 + $0x48] sm:$0xff] }
 0x34f   :  { %v4695_v5 = vadd.f32 %v846_v19, %v115_v17  ;;  %v4697_v24 = vadd.f32 %v847_v20, %v116_v18  ;;  %v844_v3 = vmul.f32 %v4347_v21, %v800_v43  ;;  %v845_v25 = vmul.f32 %v4347_v21, %v801_v42  ;;  %v125_v42 = vld [vmem:[%s5220_s14 + $0x30] sm:$0xff]  ;;  %v130_v17 = vld [vmem:[%s5220_s14 + $0x58] sm:$0xff] }
 0x350   :  { %3860 = vmatprep.mubr.msk.f32.mxu1 %vm224_vm0, %v125_v42 }
 0x351   :  { %v4254_v28 = vpack.i.bf16 %v4697_v24, %v4695_v5  ;;  %v848_v29 = vmul.f32 %v844_v3, %v113_v22  ;;  %v849_v30 = vmul.f32 %v845_v25, %v114_v23 }
 0x353   :  { %4255 = vrot.lane.b32.xlu0 %v4254_v28, %s4398_s12  ;;  %v4708_v31 = vadd.f32 %v848_v29, %v117_v26  ;;  %v4710_v32 = vadd.f32 %v849_v30, %v118_v27 }
 0x355   :  { %v4259_v33 = vpack.i.bf16 %v4710_v32, %v4708_v31 }
 0x357   :  { %4260 = vrot.lane.b32.xlu1 %v4259_v33, %s4398_s12 }
 0x3c5   :  { %v4256_v36 = vpop.permute.xlu0 %4255 }
 0x3c6   :  { %v4258_v37 = vunpack.i.h.bf16 %v4256_v36  ;;  %v4257_v38 = vunpack.i.l.bf16 %v4256_v36 }
 0x3c8   :  { %v871_v39 = vsel %vm211_vm1, 0.0, %v4258_v37  ;;  %v870_v40 = vsel %vm211_vm1, 0.0, %v4257_v38  ;;  %v4069_v41 = vpack.c.bf16 %v4258_v37, %v4257_v38 }
 0x3c9   :  { %v4261_v43 = vpop.permute.xlu1 %4260  ;;  %v4264_v44 = vpack.i.bf16 %v871_v39, %v870_v40 }
 0x3ca   :  { %v4263_v45 = vunpack.i.h.bf16 %v4261_v43  ;;  %v4262_v46 = vunpack.i.l.bf16 %v4261_v43 }
 0x3cb   :  { %4265 = vrot.lane.b32.xlu1 %v4264_v44, %s4400_s3 }
 0x3cc   :  { %v873_v47 = vsel %vm211_vm1, 0.0, %v4263_v45  ;;  %v872_v48 = vsel %vm211_vm1, 0.0, %v4262_v46  ;;  %v4075_v49 = vpack.c.bf16 %v4263_v45, %v4262_v46 }
 0x3cd   :  { %v4269_v50 = vpack.i.bf16 %v873_v47, %v872_v48 }
 0x3cf   :  { %4275 = vrot.lane.b32.xlu1 %v4264_v44, %s4399_s30  ;;  %4270 = vrot.lane.b32.xlu0 %v4269_v50, %s4400_s3 }
 0x3d3   :  { %1394 = vperm.xlu1 %4253, %v131_v51   ;;  %4280 = vrot.lane.b32.xlu0 %v4269_v50, %s4399_s30 }
 0x3d7   :  { %1404 = vperm.xlu1 %4253, %v133_v52   ;;  %1399 = vperm.xlu0 %4252, %v132_v53  }
 0x3db   :  { %1409 = vperm.xlu0 %4252, %v134_v54  }
 0x43d   :  { %v4266_v55 = vpop.permute.xlu1 %4265 }
 0x43e   :  { %v4268_v56 = vunpack.i.h.bf16 %v4266_v55  ;;  %v4267_v57 = vunpack.i.l.bf16 %v4266_v55 }
 0x440   :  { %v4061_v58 = vpack.c.bf16 %v4268_v56, %v4267_v57 }
 0x441   :  { %v4276_v59 = vpop.permute.xlu1 %4275  ;;  %v4271_v60 = vpop.permute.xlu0 %4270 }
 0x442   :  { %v4278_v61 = vunpack.i.h.bf16 %v4276_v59  ;;  %v4277_v62 = vunpack.i.l.bf16 %v4276_v59  ;;  %v4273_v63 = vunpack.i.h.bf16 %v4271_v60  ;;  %v4272_v0 = vunpack.i.l.bf16 %v4271_v60  ;;  %4062 = vmatprep.subr.bf16.mxu0 %v4061_v58 }
 0x443   :  { %4064 = vmatpush3.bf16.msra.mxu0 %v4061_v58 }
 0x444   :  { %v4065_v6 = vpack.c.bf16 %v4273_v63, %v4272_v0  ;;  %4071 = vmatprep.subr.msk.bf16.mxu0 %vm4613_vm3, %v4069_v41  ;;  %v4081_v8 = vpack.c.bf16 %v4278_v61, %v4277_v62 }
 0x445   :  { %v4281_v7 = vpop.permute.xlu0 %4280 }
 0x446   :  { %v4283_v9 = vunpack.i.h.bf16 %v4281_v7  ;;  %v4282_v10 = vunpack.i.l.bf16 %v4281_v7  ;;  %3854 = vmatmul.mubr.msk.f32.vlgmr.msra.gmra.mrb[2].mxu0 %vm224_vm0, %v124_v4  ;;  %4066 = vmatprep.subr.bf16.mxu1 %v4065_v6 }
 0x447   :  { %4068 = vmatpush3.bf16.msra.mxu1 %v4065_v6  ;;  %4074 = vmatpush3.bf16.msk.msra.mxu0 %vm4613_vm3, %v4069_v41 }
 0x448   :  { %4077 = vmatprep.subr.msk.bf16.mxu1 %vm4613_vm3, %v4075_v49  ;;  %4082 = vmatprep.subr.bf16.mxu0 %v4081_v8  ;;  %v4085_v13 = vpack.c.bf16 %v4283_v9, %v4282_v10 }
 0x449   :  { %3867 = vmatprep.mubr.msk.f32.mxu0 %vm224_vm0, %v119_v11 }
 0x44a   :  { %3861 = vmatmul.mubr.msk.f32.vlgmr.msra.gmra.mrb[2].mxu1 %vm224_vm0, %v126_v12 }
 0x44b   :  { %4080 = vmatpush3.bf16.msk.msra.mxu1 %vm4613_vm3, %v4075_v49  ;;  %3874 = vmatprep.mubr.msk.f32.mxu1 %vm224_vm0, %v121_v2  ;;  %v148_v2 = vld [vmem:[%s5225_s19 + $0x8] sm:$0xff] }
 0x44c   :  { %4086 = vmatprep.subr.bf16.mxu1 %v4085_v13 }
 0x44e   :  { %3868 = vmatmul.mubr.msk.f32.vlgmr.msra.gmra.mrb[2].mxu0 %vm224_vm0, %v120_v1  ;;  %v147_v1 = vld [vmem:[%s5225_s19] sm:$0xff] }
 0x44f   :  { %4084 = vmatpush3.bf16.msra.mxu0 %v4081_v8  ;;  %3881 = vmatprep.mubr.msk.f32.mxu0 %vm224_vm0, %v127_v14  ;;  %v143_v14 = vld [vmem:[%s5224_s18] sm:$0xff] }
 0x452   :  { %3875 = vmatmul.mubr.msk.f32.vlgmr.msra.gmra.mrb[2].mxu1 %vm224_vm0, %v122_v15  ;;  %v1395_v19 = vpop.permute.xlu1 %1394  ;;  %v150_v15 = vld [vmem:[%s5225_s19 + $0x18] sm:$0xff] }
 0x453   :  { %4088 = vmatpush3.bf16.msra.mxu1 %v4085_v13  ;;  %3888 = vmatprep.mubr.msk.f32.mxu1 %vm224_vm0, %v129_v34  ;;  %v149_v13 = vld [vmem:[%s5225_s19 + $0x10] sm:$0xff]  ;;  %v144_v34 = vld [vmem:[%s5224_s18 + $0x8] sm:$0xff]  ;;  %s5269_s19 = sld [smem:[#allocation7_spill]] }
 0x456   :  { %3882 = vmatmul.mubr.msk.f32.vlgmr.msra.gmra.mrb[2].mxu0 %vm224_vm0, %v128_v16  ;;  %v1400_v18 = vpop.permute.xlu0 %1399  ;;  %v1405_v28 = vpop.permute.xlu1 %1404  ;;  %v145_v16 = vld [vmem:[%s5224_s18 + $0x10] sm:$0xff] }
 0x45a   :  { %3889 = vmatmul.mubr.msk.f32.vlgmr.msra.gmra.mrb[2].mxu1 %vm224_vm0, %v130_v17  ;;  %v1410_v25 = vpop.permute.xlu0 %1409  ;;  %v146_v17 = vld [vmem:[%s5224_s18 + $0x18] sm:$0xff] }
 0x529   :  { %v3883_v20 = vpop.f32.mrb[2].mxu0 }
 0x52a   :  { %v1413_v21 = vadd.f32 %v3883_v20, %v1400_v18  ;;  %v1292_v22 = vpop.f32.mrb[3].mxu0 }
 0x52b   :  { %v1412_v23 = vadd.f32 %v1395_v19, %v1292_v22 }
 0x52c   :  { %v1417_v3 = vadd.f32 %v1413_v21, %v4697_v24 }
 0x52d   :  { %v3890_v26 = vpop.f32.mrb[2].mxu1  ;;  %v1416_v27 = vadd.f32 %v1412_v23, %v4695_v5 }
 0x52e   :  { %v1415_v29 = vadd.f32 %v3890_v26, %v1410_v25  ;;  %v1379_v30 = vpop.f32.mrb[3].mxu1  ;;  %v1423_v33 = vsel %vm763_vm4, %v1417_v3, 0.0 }
 0x52f   :  { %v1414_v35 = vadd.f32 %v1405_v28, %v1379_v30  ;;  %1424 = vadd.xlane.f32.xlu0 %v1423_v33  ;;  %v1420_v36 = vsel %vm763_vm4, %v1416_v27, 0.0 }
 0x530   :  { %1421 = vadd.xlane.f32.xlu1 %v1420_v36  ;;  %v1419_v37 = vadd.f32 %v1415_v29, %v4710_v32 }
 0x531   :  { %v1418_v38 = vadd.f32 %v1414_v35, %v4708_v31 }
 0x532   :  { %v1429_v24 = vsel %vm763_vm4, %v1419_v37, 0.0 }
 0x533   :  { %v1426_v39 = vsel %vm763_vm4, %v1418_v38, 0.0 }
 0x534   :  { %1430 = vadd.xlane.f32.xlu1 %v1429_v24  ;;  %1427 = vadd.xlane.f32.xlu0 %v1426_v39 }
 0x5bc   :  { %v1425_v5 = vpop.xlane.xlu0 %1424 }
 0x5bd   :  { %v1433_v40 = vmul.f32 0.25, %v1425_v5  ;;  %v1422_v41 = vpop.xlane.xlu1 %1421 }
 0x5be   :  { %v1432_v42 = vmul.f32 0.25, %v1422_v41 }
 0x5c0   :  { %v1436_v43 = vadd.f32 %v1433_v40, %v1432_v42 }
 0x5c1   :  { %v1431_v44 = vpop.xlane.xlu1 %1430  ;;  %v1428_v45 = vpop.xlane.xlu0 %1427 }
 0x5c2   :  { %v1437_v46 = vrot.slane %v1436_v43, 4  ;;  %v1435_v47 = vmul.f32 0.25, %v1431_v44  ;;  %v1434_v48 = vmul.f32 0.25, %v1428_v45 }
 0x5c4   :  { %v1438_v49 = vadd.f32 %v1437_v46, %v1436_v43  ;;  %v1443_v32 = vadd.f32 %v1435_v47, %v1434_v48  ;;  %v136_v48 = vld [vmem:[%s5222_s16 + $0x8] sm:$0xff] }
 0x5c6   :  { %v1439_v50 = vrot.slane %v1438_v49, 2  ;;  %v1444_v31 = vrot.slane %v1443_v32, 4 }
 0x5c8   :  { %v1440_v51 = vadd.f32 %v1439_v50, %v1438_v49  ;;  %v1445_v52 = vadd.f32 %v1444_v31, %v1443_v32  ;;  %v135_v32 = vld [vmem:[%s5222_s16] sm:$0xff] }
 0x5ca   :  { %v1441_v53 = vrot.slane %v1440_v51, 1  ;;  %v1446_v54 = vrot.slane %v1445_v52, 2 }
 0x5cc   :  { %v1447_v55 = vadd.f32 %v1446_v54, %v1445_v52  ;;  %v1442_v56 = vadd.f32 %v1441_v53, %v1440_v51  ;;  %v140_v51 = vld [vmem:[%s5223_s17 + $0x8] sm:$0xff]  ;;  %v139_v52 = vld [vmem:[%s5223_s17] sm:$0xff] }
 0x5ce   :  { %v1448_v57 = vrot.slane %v1447_v55, 1  ;;  %v1450_v58 = vmul.f32 0.0625, %v1442_v56  ;;  %v137_v56 = vld [vmem:[%s5222_s16 + $0x10] sm:$0xff] }
 0x5d0   :  { %v4799_v59 = vsub.f32 %v1417_v3, %v1450_v58  ;;  %v4801_v60 = vsub.f32 %v1416_v27, %v1450_v58  ;;  %v1449_v61 = vadd.f32 %v1448_v57, %v1447_v55 }
 0x5d2   :  { %v1457_v62 = vmul.f32 %v4799_v59, %v4799_v59  ;;  %v1456_v63 = vmul.f32 %v4801_v60, %v4801_v60  ;;  %v1451_v0 = vmul.f32 0.0625, %v1449_v61  ;;  %v138_v61 = vld [vmem:[%s5222_s16 + $0x18] sm:$0xff] }
 0x5d4   :  { %v1463_v4 = vsel %vm763_vm4, %v1457_v62, 0.0  ;;  %v1460_v6 = vsel %vm763_vm4, %v1456_v63, 0.0  ;;  %v4809_v7 = vsub.f32 %v1419_v37, %v1451_v0  ;;  %v4811_v8 = vsub.f32 %v1418_v38, %v1451_v0  ;;  %v141_v63 = vld [vmem:[%s5223_s17 + $0x10] sm:$0xff] }
 0x5d5   :  { %1464 = vadd.xlane.f32.xlu1 %v1463_v4  ;;  %1461 = vadd.xlane.f32.xlu0 %v1460_v6 }
 0x5d6   :  { %v1459_v9 = vmul.f32 %v4809_v7, %v4809_v7  ;;  %v1458_v10 = vmul.f32 %v4811_v8, %v4811_v8 }
 0x5d8   :  { %v1469_v11 = vsel %vm763_vm4, %v1459_v9, 0.0  ;;  %v1466_v12 = vsel %vm763_vm4, %v1458_v10, 0.0  ;;  %v142_v10 = vld [vmem:[%s5223_s17 + $0x18] sm:$0xff]  ;;  %s5268_s17 = sld [smem:[#allocation10_spill]] }
 0x5d9   :  { %1470 = vadd.xlane.f32.xlu1 %v1469_v11  ;;  %1467 = vadd.xlane.f32.xlu0 %v1466_v12 }
 0x5ea   :  { %1539 = vperm.xlu1 %4253, %v148_v2  }
 0x5ee   :  { %1544 = vperm.xlu1 %4253, %v149_v13  }
 0x5ef   :  { %1534 = vperm.xlu0 %4252, %v147_v1  }
 0x5f2   :  { %1510 = vperm.xlu1 %4253, %v143_v14  }
 0x5f3   :  { %1549 = vperm.xlu0 %4252, %v150_v15  }
 0x5f6   :  { %1515 = vperm.xlu1 %4253, %v144_v34  }
 0x5f7   :  { %1520 = vperm.xlu0 %4252, %v145_v16  }
 0x5fb   :  { %1525 = vperm.xlu0 %4252, %v146_v17  }
 0x662   :  { %v1465_v18 = vpop.xlane.xlu1 %1464  ;;  %v1462_v19 = vpop.xlane.xlu0 %1461 }
 0x663   :  { %v1473_v20 = vmul.f32 0.25, %v1465_v18  ;;  %v1472_v21 = vmul.f32 0.25, %v1462_v19 }
 0x665   :  { %v1476_v22 = vadd.f32 %v1473_v20, %v1472_v21 }
 0x666   :  { %v1471_v23 = vpop.xlane.xlu1 %1470  ;;  %v1468_v3 = vpop.xlane.xlu0 %1467 }
 0x667   :  { %v1477_v25 = vrot.slane %v1476_v22, 4  ;;  %v1475_v26 = vmul.f32 0.25, %v1471_v23  ;;  %v1474_v27 = vmul.f32 0.25, %v1468_v3 }
 0x669   :  { %v1478_v28 = vadd.f32 %v1477_v25, %v1476_v22  ;;  %v1483_v29 = vadd.f32 %v1475_v26, %v1474_v27 }
 0x66a   :  { %v1540_v45 = vpop.permute.xlu1 %1539 }
 0x66b   :  { %v1479_v30 = vrot.slane %v1478_v28, 2  ;;  %v1484_v33 = vrot.slane %v1483_v29, 4 }
 0x66d   :  { %v1480_v35 = vadd.f32 %v1479_v30, %v1478_v28  ;;  %v1485_v36 = vadd.f32 %v1484_v33, %v1483_v29  ;;  %v152_v29 = vld [vmem:[%s5226_s20 + $0x8] sm:$0xff]  ;;  %v151_v30 = vld [vmem:[%s5226_s20] sm:$0xff] }
 0x66e   :  { %v1535_v46 = vpop.permute.xlu0 %1534  ;;  %v1545_v49 = vpop.permute.xlu1 %1544 }
 0x66f   :  { %v1481_v37 = vrot.slane %v1480_v35, 1  ;;  %v1486_v38 = vrot.slane %v1485_v36, 2 }
 0x671   :  { %v1482_v24 = vadd.f32 %v1481_v37, %v1480_v35  ;;  %v1487_v39 = vadd.f32 %v1486_v38, %v1485_v36 }
 0x672   :  { %v1550_v57 = vpop.permute.xlu0 %1549  ;;  %v1511_v0 = vpop.permute.xlu1 %1510 }
 0x673   :  { %v1490_v5 = vmul.f32 0.0625, %v1482_v24  ;;  %v1488_v40 = vrot.slane %v1487_v39, 1 }
 0x675   :  { %v1492_v41 = vadd.f32 1e-05, %v1490_v5  ;;  %v1489_v42 = vadd.f32 %v1488_v40, %v1487_v39 }
 0x676   :  { %v1521_v1 = vpop.permute.xlu0 %1520  ;;  %v1516_v17 = vpop.permute.xlu1 %1515 }
 0x677   :  { %4348 = vrsqrt.f32 %v1492_v41  ;;  %v1491_v43 = vmul.f32 0.0625, %v1489_v42 }
 0x679   :  { %v1493_v44 = vadd.f32 1e-05, %v1491_v43 }
 0x67a   :  { %v1526_v19 = vpop.permute.xlu0 %1525 }
 0x67b   :  { %4350 = vrsqrt.f32 %v1493_v44 }
 0x681   :  { %v4349_v47 = vpop.eup %4348 }
 0x682   :  { %v1497_v50 = vmul.f32 %v4349_v47, %v4799_v59  ;;  %v1496_v31 = vmul.f32 %v4349_v47, %v4801_v60 }
 0x684   :  { %v1501_v53 = vmul.f32 %v1497_v50, %v136_v48  ;;  %v1500_v54 = vmul.f32 %v1496_v31, %v135_v32 }
 0x685   :  { %v4351_v55 = vpop.eup %4350 }
 0x686   :  { %v4860_v58 = vadd.f32 %v1501_v53, %v140_v51  ;;  %v1498_v59 = vmul.f32 %v4351_v55, %v4811_v8  ;;  %v4863_v60 = vadd.f32 %v1500_v54, %v139_v52  ;;  %v1499_v62 = vmul.f32 %v4351_v55, %v4809_v7  ;;  %v153_v55 = vld [vmem:[%s5226_s20 + $0x10] sm:$0xff] }
 0x688   :  { %v1553_v4 = vmul.f32 %v1540_v45, %v4860_v58  ;;  %v1502_v6 = vmul.f32 %v1498_v59, %v137_v56  ;;  %v1552_v9 = vmul.f32 %v1535_v46, %v4863_v60  ;;  %v1528_v8 = vmul.f32 %v1511_v0, %v4863_v60  ;;  %v154_v56 = vld [vmem:[%s5226_s20 + $0x18] sm:$0xff]  ;;  %s5270_s20 = sld [smem:[#allocation12_spill]] }
 0x689   :  { %v1503_v11 = vmul.f32 %v1499_v62, %v138_v61  ;;  %v1529_v18 = vmul.f32 %v1516_v17, %v4860_v58 }
 0x68a   :  { %v4884_v12 = vadd.f32 %v1502_v6, %v141_v63  ;;  %v4089_v2 = vpack.c.bf16 %v1553_v4, %v1552_v9  ;;  %3895 = vmatprep.mubr.msk.f32.mxu0 %vm763_vm4, %v1528_v8 }
 0x68b   :  { %v4887_v13 = vadd.f32 %v1503_v11, %v142_v10 }
 0x68c   :  { %v1554_v14 = vmul.f32 %v1545_v49, %v4884_v12  ;;  %v1530_v15 = vmul.f32 %v1521_v1, %v4884_v12  ;;  %4091 = vmatprep.subr.msk.bf16.mxu0 %vm4880_vm5, %v4089_v2 }
 0x68d   :  { %v1555_v34 = vmul.f32 %v1550_v57, %v4887_v13  ;;  %4094 = vmatpush3.bf16.xpose.msk.msra.mxu0 %vm4880_vm5, %v4089_v2  ;;  %v1531_v20 = vmul.f32 %v1526_v19, %v4887_v13 }
 0x68e   :  { %3902 = vmatprep.mubr.msk.f32.mxu1 %vm763_vm4, %v1530_v15 }
 0x68f   :  { %v4095_v16 = vpack.c.bf16 %v1555_v34, %v1554_v14 }
 0x691   :  { %4097 = vmatprep.subr.msk.bf16.mxu1 %vm4880_vm5, %v4095_v16 }
 0x692   :  { %4100 = vmatpush3.bf16.xpose.msk.msra.mxu1 %vm4880_vm5, %v4095_v16 }
 0x694   :  { %3896 = vmatmul.mubr.msk.f32.vlgmr.msra.gmra.mrb[4].mxu0 %vm763_vm4, %v1529_v18 }
 0x699   :  { %3903 = vmatmul.mubr.msk.f32.vlgmr.msra.gmra.mrb[4].mxu1 %vm763_vm4, %v1531_v20 }
 0x767   :  { %v3897_v21 = vpop.f32.mrb[4].mxu0 }
 0x768   :  { %v1658_v22 = vpop.f32.mrb[5].mxu0  ;;  %v1757_v28 = vsel %vm224_vm0, %v3897_v21, -inf }
 0x769   :  { %v1754_v23 = vsel %vm224_vm0, %v1658_v22, -inf }
 0x76a   :  { %1755 = vmax.xlane.f32.xlu1 %v1754_v23 }
 0x76c   :  { %v3904_v3 = vpop.f32.mrb[4].mxu1 }
 0x76d   :  { %v1745_v25 = vpop.f32.mrb[5].mxu1  ;;  %v1763_v26 = vsel %vm224_vm0, %v3904_v3, -inf }
 0x76e   :  { %1764 = vmax.xlane.f32.xlu1 %v1763_v26  ;;  %v1760_v27 = vsel %vm224_vm0, %v1745_v25, -inf }
 0x76f   :  { %1761 = vmax.xlane.f32.xlu0 %v1760_v27 }
 0x773   :  { %1758 = vmax.xlane.f32.xlu0 %v1757_v28 }
 0x77f   :  { %1563 = vperm.xlu1 %4253, %v152_v29  }
 0x789   :  { %1558 = vperm.xlu0 %4252, %v151_v30  }
 0x7f7   :  { %v1756_v33 = vpop.xlane.xlu1 %1755 }
 0x7f8   :  { %v1766_v39 = vsub.f32 %v1658_v22, %v1756_v33 }
 0x7fa   :  { %v1770_v42 = vmul.f32 1.442695, %v1766_v39 }
 0x7fb   :  { %v1765_v35 = vpop.xlane.xlu1 %1764 }
 0x7fc   :  { %v1769_v36 = vsub.f32 %v3904_v3, %v1765_v35  ;;  %v1762_v37 = vpop.xlane.xlu0 %1761 }
 0x7fd   :  { %v1768_v38 = vsub.f32 %v1745_v25, %v1762_v37 }
 0x7fe   :  { %v1776_v24 = vmul.f32 1.442695, %v1769_v36 }
 0x7ff   :  { %v1774_v5 = vmul.f32 1.442695, %v1768_v38  ;;  %v1564_v44 = vpop.permute.xlu1 %1563 }
 0x800   :  { %4352 = vpow2.f32 %v1776_v24  ;;  %v1759_v40 = vpop.xlane.xlu0 %1758  ;;  %v1577_v46 = vmul.f32 %v1564_v44, %v4860_v58 }
 0x801   :  { %v1767_v41 = vsub.f32 %v3897_v21, %v1759_v40  ;;  %4354 = vpow2.f32 %v1774_v5 }
 0x803   :  { %v1772_v43 = vmul.f32 1.442695, %v1767_v41 }
 0x805   :  { %4356 = vpow2.f32 %v1772_v43 }
 0x806   :  { %4358 = vpow2.f32 %v1770_v42 }
 0x808   :  { %v1559_v45 = vpop.permute.xlu0 %1558 }
 0x809   :  { %v1576_v47 = vmul.f32 %v1559_v45, %v4863_v60 }
 0x80a   :  { %v4353_v48 = vpop.eup %4352 }
 0x80b   :  { %v4101_v49 = vpack.c.bf16 %v1577_v46, %v1576_v47  ;;  %v1787_v32 = vsel %vm224_vm0, %v4353_v48, 0.0  ;;  %v4355_v50 = vpop.eup %4354 }
 0x80c   :  { %1788 = vadd.xlane.f32.xlu1 %v1787_v32  ;;  %v1784_v51 = vsel %vm224_vm0, %v4355_v50, 0.0 }
 0x80d   :  { %4102 = vmatprep.subr.bf16.mxu0 %v4101_v49 }
 0x80e   :  { %4104 = vmatpush3.bf16.msra.mxu0 %v4101_v49 }
 0x80f   :  { %v4357_v31 = vpop.eup %4356 }
 0x810   :  { %1785 = vadd.xlane.f32.xlu1 %v1784_v51  ;;  %v1781_v52 = vsel %vm224_vm0, %v4357_v31, 0.0  ;;  %v4359_v53 = vpop.eup %4358 }
 0x811   :  { %1782 = vadd.xlane.f32.xlu0 %v1781_v52  ;;  %v1778_v54 = vsel %vm224_vm0, %v4359_v53, 0.0 }
 0x815   :  { %1779 = vadd.xlane.f32.xlu0 %v1778_v54 }
 0x821   :  { %1568 = vperm.xlu1 %4253, %v153_v55  }
 0x82b   :  { %1573 = vperm.xlu0 %4252, %v154_v56  }
 0x899   :  { %v1789_v57 = vpop.xlane.xlu1 %1788 }
 0x89a   :  { %4360 = vrcp.f32 %v1789_v57 }
 0x89d   :  { %v1786_v59 = vpop.xlane.xlu1 %1785 }
 0x89e   :  { %4362 = vrcp.f32 %v1786_v59  ;;  %v1783_v61 = vpop.xlane.xlu0 %1782 }
 0x89f   :  { %4364 = vrcp.f32 %v1783_v61 }
 0x8a1   :  { %v1569_v6 = vpop.permute.xlu1 %1568 }
 0x8a2   :  { %v1780_v62 = vpop.xlane.xlu0 %1779  ;;  %v1578_v7 = vmul.f32 %v1569_v6, %v4884_v12 }
 0x8a3   :  { %4366 = vrcp.f32 %v1780_v62 }
 0x8a4   :  { %v4361_v63 = vpop.eup %4360 }
 0x8a5   :  { %v1797_v0 = vmul.f32 %v4361_v63, %v4353_v48 }
 0x8a7   :  { %3185 = vst.msk [vmem:[#allocation3 + $0x18] sm:$0xff] %vm224_vm0, %v1797_v0 }
 0x8a8   :  { %v4363_v4 = vpop.eup %4362 }
 0x8a9   :  { %v4365_v9 = vpop.eup %4364  ;;  %v1796_v8 = vmul.f32 %v4363_v4, %v4355_v50 }
 0x8aa   :  { %v1795_v10 = vmul.f32 %v4365_v9, %v4357_v31  ;;  %v1574_v11 = vpop.permute.xlu0 %1573 }
 0x8ab   :  { %v1579_v2 = vmul.f32 %v1574_v11, %v4887_v13  ;;  %3916 = vmatprep.mubr.msk.f32.mxu1 %vm224_vm0, %v1796_v8  ;;  %3184 = vst.msk [vmem:[#allocation3 + $0x10] sm:$0xff] %vm224_vm0, %v1796_v8 }
 0x8ac   :  { %3183 = vst.msk [vmem:[#allocation3 + $0x8] sm:$0xff] %vm224_vm0, %v1795_v10 }
 0x8ad   :  { %v4367_v1 = vpop.eup %4366  ;;  %v4105_v14 = vpack.c.bf16 %v1579_v2, %v1578_v7 }
 0x8ae   :  { %v1794_v15 = vmul.f32 %v4367_v1, %v4359_v53 }
 0x8af   :  { %4106 = vmatprep.subr.bf16.mxu1 %v4105_v14 }
 0x8b0   :  { %3909 = vmatprep.mubr.msk.f32.mxu0 %vm224_vm0, %v1794_v15  ;;  %3182 = vst.msk [vmem:[#allocation3] sm:$0xff] %vm224_vm0, %v1794_v15  ;;  %4108 = vmatpush3.bf16.msra.mxu1 %v4105_v14 }
 0x8b1   :  { %3910 = vmatmul.mubr.msk.f32.vlgmr.msra.gmra.mrb[6].mxu0 %vm224_vm0, %v1795_v10 }
 0x8b3   :  { %3917 = vmatmul.mubr.msk.f32.vlgmr.msra.gmra.mrb[6].mxu1 %vm224_vm0, %v1797_v0 }
 0x984   :  { %v3911_v34 = vpop.f32.mrb[6].mxu0 }
 0x985   :  { %v1876_v16 = vadd.f32 %v3911_v34, %v4860_v58  ;;  %v1870_v17 = vpop.f32.mrb[7].mxu0 }
 0x986   :  { %v1871_v18 = vadd.f32 %v1870_v17, %v4863_v60  ;;  %v3918_v19 = vpop.f32.mrb[6].mxu1 }
 0x987   :  { %v1951_v20 = vpop.f32.mrb[7].mxu1  ;;  %v1963_v21 = vsel %vm763_vm4, %v1876_v16, 0.0  ;;  %v1957_v22 = vadd.f32 %v3918_v19, %v4887_v13 }
 0x988   :  { %v1952_v23 = vadd.f32 %v1951_v20, %v4884_v12  ;;  %1964 = vadd.xlane.f32.xlu0 %v1963_v21  ;;  %v1960_v3 = vsel %vm763_vm4, %v1871_v18, 0.0 }
 0x989   :  { %1961 = vadd.xlane.f32.xlu1 %v1960_v3  ;;  %v1969_v58 = vsel %vm763_vm4, %v1957_v22, 0.0 }
 0x98a   :  { %v1966_v25 = vsel %vm763_vm4, %v1952_v23, 0.0 }
 0x98c   :  { %1967 = vadd.xlane.f32.xlu0 %v1966_v25 }
 0x98d   :  { %1970 = vadd.xlane.f32.xlu1 %v1969_v58  ;;  %v155_v58 = vld [vmem:[%s5227_s21] sm:$0xff] }
 0xa15   :  { %v1965_v26 = vpop.xlane.xlu0 %1964 }
 0xa16   :  { %v1973_v60 = vmul.f32 0.25, %v1965_v26  ;;  %v1962_v27 = vpop.xlane.xlu1 %1961  ;;  %v156_v26 = vld [vmem:[%s5227_s21 + $0x8] sm:$0xff] }
 0xa17   :  { %v1972_v28 = vmul.f32 0.25, %v1962_v27 }
 0xa19   :  { %v1976_v29 = vadd.f32 %v1973_v60, %v1972_v28  ;;  %v1968_v30 = vpop.xlane.xlu0 %1967  ;;  %v159_v28 = vld [vmem:[%s5228_s22] sm:$0xff] }
 0xa1a   :  { %v1974_v33 = vmul.f32 0.25, %v1968_v30  ;;  %v1971_v13 = vpop.xlane.xlu1 %1970 }
 0xa1b   :  { %v1977_v35 = vrot.slane %v1976_v29, 4  ;;  %v1975_v12 = vmul.f32 0.25, %v1971_v13 }
 0xa1d   :  { %v1978_v36 = vadd.f32 %v1977_v35, %v1976_v29  ;;  %v1983_v37 = vadd.f32 %v1975_v12, %v1974_v33  ;;  %v160_v29 = vld [vmem:[%s5228_s22 + $0x8] sm:$0xff]  ;;  %v157_v35 = vld [vmem:[%s5227_s21 + $0x10] sm:$0xff]  ;;  %v158_v12 = vld [vmem:[%s5227_s21 + $0x18] sm:$0xff] }
 0xa1f   :  { %v1979_v38 = vrot.slane %v1978_v36, 2  ;;  %v1984_v24 = vrot.slane %v1983_v37, 4 }
 0xa21   :  { %v1980_v39 = vadd.f32 %v1979_v38, %v1978_v36  ;;  %v1985_v5 = vadd.f32 %v1984_v24, %v1983_v37 }
 0xa23   :  { %v1981_v40 = vrot.slane %v1980_v39, 1  ;;  %v1986_v41 = vrot.slane %v1985_v5, 2 }
 0xa25   :  { %v1987_v42 = vadd.f32 %v1986_v41, %v1985_v5  ;;  %v1982_v43 = vadd.f32 %v1981_v40, %v1980_v39  ;;  %v161_v39 = vld [vmem:[%s5228_s22 + $0x10] sm:$0xff]  ;;  %v162_v5 = vld [vmem:[%s5228_s22 + $0x18] sm:$0xff] }
 0xa27   :  { %v1988_v44 = vrot.slane %v1987_v42, 1  ;;  %v1990_v45 = vmul.f32 0.0625, %v1982_v43 }
 0xa29   :  { %v1993_v46 = vsub.f32 %v1876_v16, %v1990_v45  ;;  %v1992_v47 = vsub.f32 %v1871_v18, %v1990_v45  ;;  %v1989_v48 = vadd.f32 %v1988_v44, %v1987_v42 }
 0xa2b   :  { %v1997_v49 = vmul.f32 %v1993_v46, %v1993_v46  ;;  %v1996_v32 = vmul.f32 %v1992_v47, %v1992_v47  ;;  %v1991_v50 = vmul.f32 0.0625, %v1989_v48 }
 0xa2d   :  { %v2003_v31 = vsel %vm763_vm4, %v1997_v49, 0.0  ;;  %v2000_v51 = vsel %vm763_vm4, %v1996_v32, 0.0  ;;  %v1995_v52 = vsub.f32 %v1957_v22, %v1991_v50  ;;  %v1994_v53 = vsub.f32 %v1952_v23, %v1991_v50 }
 0xa2e   :  { %2004 = vadd.xlane.f32.xlu1 %v2003_v31  ;;  %2001 = vadd.xlane.f32.xlu0 %v2000_v51 }
 0xa2f   :  { %v1999_v54 = vmul.f32 %v1995_v52, %v1995_v52  ;;  %v1998_v55 = vmul.f32 %v1994_v53, %v1994_v53 }
 0xa31   :  { %v2009_v56 = vsel %vm763_vm4, %v1999_v54, 0.0  ;;  %v2006_v57 = vsel %vm763_vm4, %v1998_v55, 0.0  ;;  %v169_v54 = vld [vmem:[%s5229_s23 + $0x30] sm:$0xff] }
 0xa32   :  { %2010 = vadd.xlane.f32.xlu1 %v2009_v56  ;;  %2007 = vadd.xlane.f32.xlu0 %v2006_v57 }
 0xa33   :  { %3930 = vmatprep.mubr.msk.f32.mxu1 %vm224_vm0, %v169_v54 }
 0xabb   :  { %v2005_v59 = vpop.xlane.xlu1 %2004  ;;  %v2002_v61 = vpop.xlane.xlu0 %2001 }
 0xabc   :  { %v2013_v62 = vmul.f32 0.25, %v2005_v59  ;;  %v2012_v63 = vmul.f32 0.25, %v2002_v61 }
 0xabe   :  { %v2016_v0 = vadd.f32 %v2013_v62, %v2012_v63 }
 0xabf   :  { %v2011_v4 = vpop.xlane.xlu1 %2010  ;;  %v2008_v6 = vpop.xlane.xlu0 %2007 }
 0xac0   :  { %v2017_v9 = vrot.slane %v2016_v0, 4  ;;  %v2015_v8 = vmul.f32 0.25, %v2011_v4  ;;  %v2014_v10 = vmul.f32 0.25, %v2008_v6  ;;  %v175_v6 = vld [vmem:[%s5230_s24] sm:$0xff] }
 0xac2   :  { %v2018_v11 = vadd.f32 %v2017_v9, %v2016_v0  ;;  %v2023_v7 = vadd.f32 %v2015_v8, %v2014_v10  ;;  %v176_v9 = vld [vmem:[%s5230_s24 + $0x8] sm:$0xff]  ;;  %v177_v8 = vld [vmem:[%s5230_s24 + $0x10] sm:$0xff]  ;;  %v178_v10 = vld [vmem:[%s5230_s24 + $0x18] sm:$0xff] }
 0xac4   :  { %v2019_v2 = vrot.slane %v2018_v11, 2  ;;  %v2024_v1 = vrot.slane %v2023_v7, 4 }
 0xac6   :  { %v2020_v14 = vadd.f32 %v2019_v2, %v2018_v11  ;;  %v2025_v15 = vadd.f32 %v2024_v1, %v2023_v7 }
 0xac8   :  { %v2021_v34 = vrot.slane %v2020_v14, 1  ;;  %v2026_v16 = vrot.slane %v2025_v15, 2 }
 0xaca   :  { %v2022_v17 = vadd.f32 %v2021_v34, %v2020_v14  ;;  %v2027_v18 = vadd.f32 %v2026_v16, %v2025_v15  ;;  %v189_v34 = vld [vmem:[%s5231_s25 + $0x50] sm:$0xff] }
 0xacc   :  { %v2030_v19 = vmul.f32 0.0625, %v2022_v17  ;;  %v2028_v20 = vrot.slane %v2027_v18, 1 }
 0xace   :  { %v2032_v21 = vadd.f32 1e-05, %v2030_v19  ;;  %v2029_v22 = vadd.f32 %v2028_v20, %v2027_v18  ;;  %v168_v20 = vld [vmem:[%s5229_s23 + $0x28] sm:$0xff] }
 0xad0   :  { %4368 = vrsqrt.f32 %v2032_v21  ;;  %v2031_v23 = vmul.f32 0.0625, %v2029_v22 }
 0xad2   :  { %v2033_v3 = vadd.f32 1e-05, %v2031_v23 }
 0xad4   :  { %4370 = vrsqrt.f32 %v2033_v3 }
 0xada   :  { %v4369_v25 = vpop.eup %4368 }
 0xadb   :  { %v2036_v60 = vmul.f32 %v4369_v25, %v1992_v47  ;;  %v2037_v27 = vmul.f32 %v4369_v25, %v1993_v46  ;;  %v167_v47 = vld [vmem:[%s5229_s23 + $0x20] sm:$0xff] }
 0xadc   :  { %3923 = vmatprep.mubr.msk.f32.mxu0 %vm224_vm0, %v167_v47 }
 0xadd   :  { %v2040_v30 = vmul.f32 %v2036_v60, %v155_v58  ;;  %v2041_v33 = vmul.f32 %v2037_v27, %v156_v26  ;;  %v163_v58 = vld [vmem:[%s5229_s23] sm:$0xff]  ;;  %v170_v26 = vld [vmem:[%s5229_s23 + $0x38] sm:$0xff]  ;;  %v165_v60 = vld [vmem:[%s5229_s23 + $0x10] sm:$0xff] }
 0xade   :  { %v4371_v13 = vpop.eup %4370 }
 0xadf   :  { %v2044_v36 = vadd.f32 %v2040_v30, %v159_v28  ;;  %v2045_v37 = vadd.f32 %v2041_v33, %v160_v29  ;;  %v2038_v38 = vmul.f32 %v4371_v13, %v1994_v53  ;;  %v2039_v24 = vmul.f32 %v4371_v13, %v1995_v52  ;;  %v164_v28 = vld [vmem:[%s5229_s23 + $0x8] sm:$0xff]  ;;  %v171_v29 = vld [vmem:[%s5229_s23 + $0x40] sm:$0xff]  ;;  %v166_v30 = vld [vmem:[%s5229_s23 + $0x18] sm:$0xff] }
 0xae0   :  { %v173_v33 = vld [vmem:[%s5229_s23 + $0x50] sm:$0xff]  ;;  %v172_v13 = vld [vmem:[%s5229_s23 + $0x48] sm:$0xff] }
 0xae1   :  { %v4284_v40 = vpack.i.bf16 %v2045_v37, %v2044_v36  ;;  %v2042_v41 = vmul.f32 %v2038_v38, %v157_v35  ;;  %v2043_v42 = vmul.f32 %v2039_v24, %v158_v12  ;;  %v174_v35 = vld [vmem:[%s5229_s23 + $0x58] sm:$0xff]  ;;  %s5271_s23 = sld [smem:[#allocation8_spill]] }
 0xae3   :  { %4285 = vrot.lane.b32.xlu0 %v4284_v40, %s4402_s10  ;;  %v2046_v43 = vadd.f32 %v2042_v41, %v161_v39  ;;  %v2047_v44 = vadd.f32 %v2043_v42, %v162_v5 }
 0xae5   :  { %v4289_v45 = vpack.i.bf16 %v2047_v44, %v2046_v43 }
 0xae7   :  { %4290 = vrot.lane.b32.xlu1 %v4289_v45, %s4402_s10 }
 0xb55   :  { %v4286_v46 = vpop.permute.xlu0 %4285 }
 0xb56   :  { %v4288_v48 = vunpack.i.h.bf16 %v4286_v46  ;;  %v4287_v49 = vunpack.i.l.bf16 %v4286_v46 }
 0xb58   :  { %v2066_v32 = vsel %vm2064_vm6, 0.0, %v4288_v48  ;;  %v2065_v50 = vsel %vm2064_vm6, 0.0, %v4287_v49 }
 0xb59   :  { %v2071_v31 = vsel %vm2069_vm7, %v2066_v32, 0.0  ;;  %v2070_v51 = vsel %vm2069_vm7, %v2065_v50, 0.0  ;;  %v4117_v52 = vpack.c.bf16 %v2066_v32, %v2065_v50  ;;  %v4291_v53 = vpop.permute.xlu1 %4290  ;;  %v183_v32 = vld [vmem:[%s5231_s25 + $0x20] sm:$0xff] }
 0xb5a   :  { %v4293_v55 = vunpack.i.h.bf16 %v4291_v53  ;;  %v4292_v56 = vunpack.i.l.bf16 %v4291_v53  ;;  %v4294_v57 = vpack.i.bf16 %v2071_v31, %v2070_v51 }
 0xb5c   :  { %v2068_v59 = vsel %vm2064_vm6, 0.0, %v4293_v55  ;;  %v2067_v61 = vsel %vm2064_vm6, 0.0, %v4292_v56  ;;  %4295 = vrot.lane.b32.xlu1 %v4294_v57, %s4400_s3  ;;  %v185_v55 = vld [vmem:[%s5231_s25 + $0x30] sm:$0xff] }
 0xb5d   :  { %v2073_v62 = vsel %vm2069_vm7, %v2068_v59, 0.0  ;;  %v2072_v63 = vsel %vm2069_vm7, %v2067_v61, 0.0  ;;  %v4123_v0 = vpack.c.bf16 %v2068_v59, %v2067_v61 }
 0xb5e   :  { %v4299_v4 = vpack.i.bf16 %v2073_v62, %v2072_v63 }
 0xb60   :  { %4300 = vrot.lane.b32.xlu0 %v4299_v4, %s4400_s3  ;;  %4305 = vrot.lane.b32.xlu1 %v4294_v57, %s4399_s30 }
 0xb64   :  { %4310 = vrot.lane.b32.xlu0 %v4299_v4, %s4399_s30  ;;  %2594 = vperm.xlu1 %4253, %v175_v6  }
 0xb68   :  { %2599 = vperm.xlu0 %4252, %v176_v9   ;;  %2604 = vperm.xlu1 %4253, %v177_v8   ;;  %v191_v9 = vld [vmem:[%s5232_s26] sm:$0xff]  ;;  %v192_v8 = vld [vmem:[%s5232_s26 + $0x8] sm:$0xff] }
 0xb6c   :  { %2609 = vperm.xlu0 %4252, %v178_v10   ;;  %v193_v10 = vld [vmem:[%s5232_s26 + $0x10] sm:$0xff] }
 0xbce   :  { %v4296_v11 = vpop.permute.xlu1 %4295 }
 0xbcf   :  { %v4298_v7 = vunpack.i.h.bf16 %v4296_v11  ;;  %v4297_v2 = vunpack.i.l.bf16 %v4296_v11  ;;  %v194_v11 = vld [vmem:[%s5232_s26 + $0x18] sm:$0xff] }
 0xbd1   :  { %v4109_v1 = vpack.c.bf16 %v4298_v7, %v4297_v2 }
 0xbd2   :  { %v4301_v14 = vpop.permute.xlu0 %4300  ;;  %v4306_v15 = vpop.permute.xlu1 %4305 }
 0xbd3   :  { %v4303_v16 = vunpack.i.h.bf16 %v4301_v14  ;;  %v4302_v17 = vunpack.i.l.bf16 %v4301_v14  ;;  %v4308_v18 = vunpack.i.h.bf16 %v4306_v15  ;;  %v4307_v19 = vunpack.i.l.bf16 %v4306_v15  ;;  %4110 = vmatprep.subr.bf16.mxu0 %v4109_v1 }
 0xbd4   :  { %4112 = vmatpush3.bf16.msra.mxu0 %v4109_v1 }
 0xbd5   :  { %v4113_v21 = vpack.c.bf16 %v4303_v16, %v4302_v17  ;;  %4119 = vmatprep.subr.msk.bf16.mxu0 %vm5009_vm8, %v4117_v52  ;;  %v4129_v23 = vpack.c.bf16 %v4308_v18, %v4307_v19 }
 0xbd6   :  { %v4311_v22 = vpop.permute.xlu0 %4310 }
 0xbd7   :  { %v4313_v3 = vunpack.i.h.bf16 %v4311_v22  ;;  %v4312_v25 = vunpack.i.l.bf16 %v4311_v22  ;;  %3924 = vmatmul.mubr.msk.f32.vlgmr.msra.gmra.mrb[8].mxu0 %vm224_vm0, %v168_v20  ;;  %4114 = vmatprep.subr.bf16.mxu1 %v4113_v21 }
 0xbd8   :  { %4116 = vmatpush3.bf16.msra.mxu1 %v4113_v21  ;;  %4122 = vmatpush3.bf16.msk.msra.mxu0 %vm5009_vm8, %v4117_v52  ;;  %v184_v21 = vld [vmem:[%s5231_s25 + $0x28] sm:$0xff] }
 0xbd9   :  { %4125 = vmatprep.subr.msk.bf16.mxu1 %vm5009_vm8, %v4123_v0  ;;  %4130 = vmatprep.subr.bf16.mxu0 %v4129_v23  ;;  %v4133_v27 = vpack.c.bf16 %v4313_v3, %v4312_v25 }
 0xbda   :  { %3937 = vmatprep.mubr.msk.f32.mxu0 %vm224_vm0, %v163_v58 }
 0xbdb   :  { %3931 = vmatmul.mubr.msk.f32.vlgmr.msra.gmra.mrb[8].mxu1 %vm224_vm0, %v170_v26  ;;  %v179_v26 = vld [vmem:[%s5231_s25] sm:$0xff] }
 0xbdc   :  { %4128 = vmatpush3.bf16.msk.msra.mxu1 %vm5009_vm8, %v4123_v0  ;;  %3944 = vmatprep.mubr.msk.f32.mxu1 %vm224_vm0, %v165_v60  ;;  %v186_v60 = vld [vmem:[%s5231_s25 + $0x38] sm:$0xff] }
 0xbdd   :  { %4134 = vmatprep.subr.bf16.mxu1 %v4133_v27 }
 0xbdf   :  { %3938 = vmatmul.mubr.msk.f32.vlgmr.msra.gmra.mrb[8].mxu0 %vm224_vm0, %v164_v28 }
 0xbe0   :  { %4132 = vmatpush3.bf16.msra.mxu0 %v4129_v23  ;;  %3951 = vmatprep.mubr.msk.f32.mxu0 %vm224_vm0, %v171_v29  ;;  %v180_v29 = vld [vmem:[%s5231_s25 + $0x8] sm:$0xff] }
 0xbe3   :  { %3945 = vmatmul.mubr.msk.f32.vlgmr.msra.gmra.mrb[8].mxu1 %vm224_vm0, %v166_v30  ;;  %v2595_v36 = vpop.permute.xlu1 %2594  ;;  %v187_v30 = vld [vmem:[%s5231_s25 + $0x40] sm:$0xff] }
 0xbe4   :  { %4136 = vmatpush3.bf16.msra.mxu1 %v4133_v27  ;;  %3958 = vmatprep.mubr.msk.f32.mxu1 %vm224_vm0, %v173_v33  ;;  %v181_v27 = vld [vmem:[%s5231_s25 + $0x10] sm:$0xff]  ;;  %v182_v33 = vld [vmem:[%s5231_s25 + $0x18] sm:$0xff] }
 0xbe7   :  { %3952 = vmatmul.mubr.msk.f32.vlgmr.msra.gmra.mrb[8].mxu0 %vm224_vm0, %v172_v13  ;;  %v2600_v12 = vpop.permute.xlu0 %2599  ;;  %v2605_v42 = vpop.permute.xlu1 %2604  ;;  %v188_v13 = vld [vmem:[%s5231_s25 + $0x48] sm:$0xff] }
 0xbe8   :  { %3965 = vmatprep.mubr.msk.f32.mxu0 %vm224_vm0, %v183_v32 }
 0xbeb   :  { %3959 = vmatmul.mubr.msk.f32.vlgmr.msra.gmra.mrb[8].mxu1 %vm224_vm0, %v174_v35  ;;  %v2610_v5 = vpop.permute.xlu0 %2609  ;;  %v190_v35 = vld [vmem:[%s5231_s25 + $0x58] sm:$0xff] }
 0xbec   :  { %3972 = vmatprep.mubr.msk.f32.mxu1 %vm224_vm0, %v185_v55  ;;  %v4403_v55 = vmov 0.0|0.0  }
 0xcba   :  { %v3953_v37 = vpop.f32.mrb[8].mxu0 }
 0xcbb   :  { %v2613_v38 = vadd.f32 %v3953_v37, %v2600_v12  ;;  %v2492_v24 = vpop.f32.mrb[9].mxu0 }
 0xcbc   :  { %v2612_v39 = vadd.f32 %v2595_v36, %v2492_v24 }
 0xcbe   :  { %v4314_v40 = vpack.i.bf16 %v2613_v38, %v2612_v39  ;;  %v3960_v41 = vpop.f32.mrb[8].mxu1  ;;  %v3673_v38 = vld [vmem:[%s5266_s7] ss:$0 sm:$0xff] }
 0xcbf   :  { %v2615_v43 = vadd.f32 %v3960_v41, %v2610_v5  ;;  %v2579_v44 = vpop.f32.mrb[9].mxu1 }
 0xcc0   :  { %v2614_v45 = vadd.f32 %v2605_v42, %v2579_v44  ;;  %4315 = vrot.lane.b32.xlu1 %v4314_v40, %s4402_s10 }
 0xcc2   :  { %v4319_v46 = vpack.i.bf16 %v2615_v43, %v2614_v45 }
 0xcc4   :  { %4320 = vrot.lane.b32.xlu0 %v4319_v46, %s4402_s10 }
 0xd32   :  { %v4316_v47 = vpop.permute.xlu1 %4315 }
 0xd33   :  { %v4318_v48 = vunpack.i.h.bf16 %v4316_v47  ;;  %v4317_v49 = vunpack.i.l.bf16 %v4316_v47 }
 0xd35   :  { %v2633_v50 = vsel %vm2064_vm6, 0.0, %v4318_v48  ;;  %v2632_v31 = vsel %vm2064_vm6, 0.0, %v4317_v49 }
 0xd36   :  { %v2637_v51 = vsel %vm2069_vm7, %v2633_v50, 0.0  ;;  %v2636_v52 = vsel %vm2069_vm7, %v2632_v31, 0.0  ;;  %v4145_v53 = vpack.c.bf16 %v2633_v50, %v2632_v31  ;;  %v4321_v54 = vpop.permute.xlu0 %4320 }
 0xd37   :  { %v4323_v56 = vunpack.i.h.bf16 %v4321_v54  ;;  %v4322_v57 = vunpack.i.l.bf16 %v4321_v54  ;;  %v4324_v59 = vpack.i.bf16 %v2637_v51, %v2636_v52  ;;  %v3212_v52 = vld [vmem:[%s5267_s1] sm:$0xff] }
 0xd39   :  { %v2635_v61 = vsel %vm2064_vm6, 0.0, %v4323_v56  ;;  %v2634_v62 = vsel %vm2064_vm6, 0.0, %v4322_v57  ;;  %4325 = vrot.lane.b32.xlu1 %v4324_v59, %s4400_s3  ;;  %v3214_v56 = vld [vmem:[%s5267_s1 + $0x10] sm:$0xff]  ;;  %v3215_v57 = vld [vmem:[%s5267_s1 + $0x18] sm:$0xff] }
 0xd3a   :  { %v2639_v63 = vsel %vm2069_vm7, %v2635_v61, 0.0  ;;  %v2638_v0 = vsel %vm2069_vm7, %v2634_v62, 0.0  ;;  %v4151_v4 = vpack.c.bf16 %v2635_v61, %v2634_v62  ;;  %v4169_v61 = vpack.c.bf16 %v3215_v57, %v3214_v56  ;;  %v3210_v62 = vld [vmem:[%s5268_s17 + $0x8] sm:$0xff] }
 0xd3b   :  { %v4329_v6 = vpack.i.bf16 %v2639_v63, %v2638_v0  ;;  %v3211_v0 = vld [vmem:[%s5269_s19] sm:$0x3] }
 0xd3d   :  { %4330 = vrot.lane.b32.xlu0 %v4329_v6, %s4400_s3  ;;  %4335 = vrot.lane.b32.xlu1 %v4324_v59, %s4399_s30  ;;  %v3209_v59 = vld [vmem:[%s5268_s17] sm:$0xff] }
 0xd3e   :  { %v4172_v63 = vpack.c.bf16 %v3210_v62, %v3209_v59 }
 0xd41   :  { %4340 = vrot.lane.b32.xlu0 %v4329_v6, %s4399_s30  ;;  %3160 = vperm.xlu1 %4253, %v191_v9   ;;  %v3294_v6 = vlaneseq }
 0xd43   :  { %v3295_v9 = vand.u32 127, %v3294_v6 }
 0xd45   :  { %3165 = vperm.xlu0 %4252, %v192_v8   ;;  %3170 = vperm.xlu1 %4253, %v193_v10   ;;  %v3297_v8 = vshrl.u32 %v3294_v6, 7  ;;  %v3300_v10 = vadd.s32 4294967288, %v3295_v9 }
 0xd49   :  { %3175 = vperm.xlu0 %4252, %v194_v11   ;;  %v3303_v11 = vsub.s32 %v3300_v10, %v3297_v8 }
 0xdab   :  { %v4326_v7 = vpop.permute.xlu1 %4325 }
 0xdac   :  { %v4328_v2 = vunpack.i.h.bf16 %v4326_v7  ;;  %v4327_v1 = vunpack.i.l.bf16 %v4326_v7 }
 0xdae   :  { %v4137_v14 = vpack.c.bf16 %v4328_v2, %v4327_v1  ;;  %v3298_v2 = vsub.s32 %v3295_v9, %v3297_v8 }
 0xdaf   :  { %v4331_v15 = vpop.permute.xlu0 %4330  ;;  %v4336_v16 = vpop.permute.xlu1 %4335 }
 0xdb0   :  { %v4333_v17 = vunpack.i.h.bf16 %v4331_v15  ;;  %v4332_v18 = vunpack.i.l.bf16 %v4331_v15  ;;  %v4338_v19 = vunpack.i.h.bf16 %v4336_v16  ;;  %v4337_v20 = vunpack.i.l.bf16 %v4336_v16  ;;  %4138 = vmatprep.subr.bf16.mxu0 %v4137_v14 }
 0xdb1   :  { %4140 = vmatpush3.bf16.msra.mxu0 %v4137_v14 }
 0xdb2   :  { %v4141_v22 = vpack.c.bf16 %v4333_v17, %v4332_v18  ;;  %4147 = vmatprep.subr.msk.bf16.mxu0 %vm5009_vm8, %v4145_v53  ;;  %v4157_v3 = vpack.c.bf16 %v4338_v19, %v4337_v20 }
 0xdb3   :  { %v4341_v23 = vpop.permute.xlu0 %4340 }
 0xdb4   :  { %v4343_v25 = vunpack.i.h.bf16 %v4341_v23  ;;  %v4342_v58 = vunpack.i.l.bf16 %v4341_v23  ;;  %3966 = vmatmul.mubr.msk.f32.vlgmr.msra.gmra.mrb[10].mxu0 %vm224_vm0, %v184_v21  ;;  %4142 = vmatprep.subr.bf16.mxu1 %v4141_v22 }
 0xdb5   :  { %4144 = vmatpush3.bf16.msra.mxu1 %v4141_v22  ;;  %4150 = vmatpush3.bf16.msk.msra.mxu0 %vm5009_vm8, %v4145_v53  ;;  %v3213_v53 = vld [vmem:[%s5267_s1 + $0x8] sm:$0xff]  ;;  %v3391_v22 = vld [vmem:[%s5270_s20] sm:$0x3f]  ;;  %s4407_s1 = smov [#allocation3]  }
 0xdb6   :  { %4153 = vmatprep.subr.msk.bf16.mxu1 %vm5009_vm8, %v4151_v4  ;;  %4158 = vmatprep.subr.bf16.mxu0 %v4157_v3  ;;  %v4161_v28 = vpack.c.bf16 %v4343_v25, %v4342_v58  ;;  %v4166_v54 = vpack.c.bf16 %v3213_v53, %v3212_v52  ;;  %s3576_s5 = sshll.u32 %s4407_s1, 4  ;;  %s3577_s5 = int_to_ptr.vmem [resolvable:$true] %s3576_s5 }
 0xdb7   :  { %3979 = vmatprep.mubr.msk.f32.mxu0 %vm224_vm0, %v179_v26  ;;  %v3480_v26 = vld [vmem:[%s5272_s29] sm:$0xff]  ;;  %s4374_s3 = scalar_lea.vmem %s3577_s5, 512  ;;  %p4379_p1 = scmp.lt.s32.totalorder %s3577_s5, %s3577_s5 }
 0xdb8   :  { %3973 = vmatmul.mubr.msk.f32.vlgmr.msra.gmra.mrb[10].mxu1 %vm224_vm0, %v186_v60  ;;  %v3481_v60 = vld [vmem:[%s5272_s29 + $0x8] sm:$0x3]  ;;  %p4375_p0 = scmp.ne.s32.totalorder %s3577_s5, %s4374_s3  ;;  %p4380_p2 = scmp.lt.s32.totalorder %s4374_s3, %s4374_s3 }
 0xdb9   :  { %4156 = vmatpush3.bf16.msk.msra.mxu1 %vm5009_vm8, %v4151_v4  ;;  %3986 = vmatprep.mubr.msk.f32.mxu1 %vm224_vm0, %v181_v27  ;;  %v4405_v4 = vmov 0.0   ;;  %v4175_v27 = vpack.c.bf16 %v3481_v60, %v3480_v26 }
 0xdba   :  { %4162 = vmatprep.subr.bf16.mxu1 %v4161_v28  ;;  %p4381_p3 = por %p4380_p2, %p4379_p1 }
 0xdbc   :  { %3980 = vmatmul.mubr.msk.f32.vlgmr.msra.gmra.mrb[10].mxu0 %vm224_vm0, %v180_v29  ;;  %p4382_p4 = pnand %p4381_p3, %p4375_p0 }
 0xdbd   :  { %4160 = vmatpush3.bf16.msra.mxu0 %v4157_v3  ;;  %3993 = vmatprep.mubr.msk.f32.mxu0 %vm224_vm0, %v187_v30  ;;  %v3390_v3 = vld [vmem:[%s5271_s23] sm:$0x3] }
 0xdbe   :  { %4165 = vmatprep.subr.bf16.mxu0 %v4403_v55 }
 0xdc0   :  { %3987 = vmatmul.mubr.msk.f32.vlgmr.msra.gmra.mrb[10].mxu1 %vm224_vm0, %v182_v33  ;;  %v3161_v36 = vpop.permute.xlu1 %3160 }
 0xdc1   :  { %4164 = vmatpush3.bf16.msra.mxu1 %v4161_v28  ;;  %4000 = vmatprep.mubr.msk.f32.mxu1 %vm224_vm0, %v189_v34  ;;  %v3678_v34 = vld [vmem:[%s5273_s8] ss:$0 sm:$0xff] }
 0xdc2   :  { %4171 = vmatprep.subr.bf16.mxu1 %v4403_v55 }
 0xdc4   :  { %3994 = vmatmul.mubr.msk.f32.vlgmr.msra.gmra.mrb[10].mxu0 %vm224_vm0, %v188_v13  ;;  %v3166_v12 = vpop.permute.xlu0 %3165  ;;  %v3171_v44 = vpop.permute.xlu1 %3170 }
 0xdc5   :  { %4167 = vmatpush3.bf16.msra.mxu0 %v4166_v54  ;;  %4011 = vmatprep.mubr.msk.f32.mxu0 %vm4404_vm10, %v4405_v4 }
 0xdc6   :  { %4168 = vmatprep.subr.bf16.mxu0 %v4403_v55 }
 0xdc8   :  { %4001 = vmatmul.mubr.msk.f32.vlgmr.msra.gmra.mrb[10].mxu1 %vm224_vm0, %v190_v35  ;;  %v3176_v41 = vpop.permute.xlu0 %3175 }
 0xdc9   :  { %4170 = vmatpush3.bf16.msra.mxu0 %v4169_v61  ;;  %4173 = vmatpush3.bf16.msra.mxu1 %v4172_v63 }
 0xdca   :  { %4018 = vmatprep.mubr.msk.f32.mxu1 %vm4404_vm10, %v4405_v4  ;;  %4021 = vmatprep.subr.mxu1 %v4405_v4 }
 0xdcb   :  { %4174 = vmatprep.subr.bf16.mxu0 %v4403_v55 }
 0xdcc   :  { %4012 = vmatmul.mubr.msk.f32.vlgmr.msra.gmra.mrb[12].mxu0 %vm3216_vm9, %v3211_v0 }
 0xdcd   :  { %4030 = vmatprep.mubr.msk.f32.mxu0 %vm4404_vm10, %v4405_v4 }
 0xe97   :  { %v3995_v37 = vpop.f32.mrb[10].mxu0 }
 0xe98   :  { %v3179_v24 = vadd.f32 %v3995_v37, %v3166_v12  ;;  %v3058_v39 = vpop.f32.mrb[11].mxu0 }
 0xe99   :  { %v3178_v5 = vadd.f32 %v3161_v36, %v3058_v39 }
 0xe9a   :  { %v3194_v40 = vmul.f32 %v3673_v38, %v3179_v24 }
 0xe9b   :  { %v4002_v42 = vpop.f32.mrb[10].mxu1  ;;  %v3193_v43 = vmul.f32 %v3673_v38, %v3178_v5 }
 0xe9c   :  { %v3181_v45 = vadd.f32 %v4002_v42, %v3176_v41  ;;  %v3145_v46 = vpop.f32.mrb[11].mxu1  ;;  %v3200_v47 = vsel %vm763_vm4, %v3194_v40, 0.0 }
 0xe9d   :  { %v3180_v48 = vadd.f32 %v3171_v44, %v3145_v46  ;;  %3201 = vadd.xlane.f32.xlu0 %v3200_v47  ;;  %v3197_v49 = vsel %vm763_vm4, %v3193_v43, 0.0 }
 0xe9e   :  { %3198 = vadd.xlane.f32.xlu1 %v3197_v49  ;;  %v3196_v32 = vmul.f32 %v3673_v38, %v3181_v45 }
 0xe9f   :  { %v3195_v50 = vmul.f32 %v3673_v38, %v3180_v48  ;;  %v3286_v25 = vpop.f32.mrb[12].mxu0 }
 0xea0   :  { %v3206_v31 = vsel %vm763_vm4, %v3196_v32, 0.0  ;;  %v4013_v58 = vpop.f32.mrb[13].mxu0 }
 0xea1   :  { %v3203_v51 = vsel %vm763_vm4, %v3195_v50, 0.0 }
 0xea2   :  { %3204 = vadd.xlane.f32.xlu0 %v3203_v51  ;;  %3207 = vadd.xlane.f32.xlu1 %v3206_v31 }
 0xf2a   :  { %v3202_v7 = vpop.xlane.xlu0 %3201 }
 0xf2b   :  { %v3199_v1 = vpop.xlane.xlu1 %3198  ;;  %v3304_v14 = vrot.slane %v3202_v7, %v3303_v11 }
 0xf2c   :  { %v3299_v15 = vrot.slane %v3199_v1, %v3298_v2 }
 0xf2e   :  { %v3306_v20 = vsel %vm3305_vm11, %v3304_v14, %v3299_v15 }
 0xf2f   :  { %v3205_v16 = vpop.xlane.xlu0 %3204  ;;  %v3208_v17 = vpop.xlane.xlu1 %3207 }
 0xf30   :  { %v3310_v18 = vrot.slane %v3205_v16, %v3298_v2  ;;  %v3314_v19 = vrot.slane %v3208_v17, %v3303_v11 }
 0xf32   :  { %v3315_v21 = vsel %vm3305_vm11, %v3314_v19, %v3310_v18 }
 0xf33   :  { %v3317_v23 = vsel %vm3316_vm12, %v3315_v21, %v3306_v20 }
 0xf34   :  { %4019 = vmatmul.mubr.msk.f32.vlgmr.msra.gmra.mrb[12].mxu1 %vm224_vm0, %v3317_v23  ;;  %vm4406_vm0 = vmmov 1  }
 0xf35   :  { %4022 = vmatpush3.msk.msra.mxu1 %vm3396_vm13, %v3391_v22  ;;  %4023 = vmatprep.mubr.msk.f32.mxu1 %vm4404_vm10, %v4405_v4  ;;  %vm4176_vm1 = vmpackc.low %vm3493_vm15, %vm4406_vm0 }
 0xf36   :  { %4177 = vmatpush3.bf16.msk.msra.mxu0 %vm4176_vm1, %v4175_v27 }
 0xf38   :  { %4024 = vmatmul.mubr.msk.f32.vlgmr.msra.gmra.mrb[14].mxu1 %vm3392_vm14, %v3390_v3 }
0x1007   :  { %v3386_v28 = vpop.f32.mrb[12].mxu1 }
0x1008   :  { %v3387_v29 = vadd.f32 %v3386_v28, %v3286_v25  ;;  %v4020_v30 = vpop.f32.mrb[13].mxu1 }
0x100b   :  { %v3466_v33 = vpop.f32.mrb[14].mxu1 }
0x100c   :  { %v3470_v13 = vadd.f32 %v3466_v33, %v3387_v29  ;;  %v4025_v35 = vpop.f32.mrb[15].mxu1 }
0x100e   :  { %v3478_v12 = vadd.f32 %v3678_v34, %v3470_v13 }
0x1010   :  { %4372 = vtanh.f32 %v3478_v12 }
0x101a   :  { %v4373_v36 = vpop.eup %4372 }
0x101b   :  { %4031 = vmatmul.mubr.msk.f32.vlgmr.msra.gmra.mrb[14].mxu0 %vm3489_vm2, %v4373_v36 }
0x101c   :  { %4385 = shalt.err (!%p4382_p4)
}
0x101d   :  { %s4386_s6 = scalar_lea.hbm %s5234_s28, 512 }
0x101e   :  { %p4387_p5 = scmp.ne.s32.totalorder %s5234_s28, %s4386_s6  ;;  %p4390_p6 = scmp.lt.u32.totalorder %s4386_s6, %s5234_s28 }
0x1020   :  { %p4392_p7 = pnand %p4390_p6, %p4387_p5 }
0x1022   :  { %4395 = shalt.err (!%p4392_p7)
}
0x1023   :  { %s4408_s4 = smov 128   ;;  %s4409_s21 = smov 8   ;;  %v3679_v37 = vld [vmem:[#allocation2] ss:$0 sm:$0xff]  ;;  %vm3567_vm3 = vcmask 1024  }
0x1024   :  { %3582 = dma.vmem_to_hbm [thread:$0]  %s3577_s5, 512, %s5234_s28, [#allocation4], %s4408_s4, %s4408_s4, %s4409_s21  }
0x10ee   :  { %v3563_v38 = vpop.f32.mrb[14].mxu0 }
0x10ef   :  { %v3564_v24 = vadd.f32 %v3679_v37, %v3563_v38  ;;  %v4032_v39 = vpop.f32.mrb[15].mxu0 }
0x10f1   :  { %3568 = vst.msk [vmem:[%s5233_s27] sm:$0x3] %vm3567_vm3, %v3564_v24 }
0x10f2   :  { %4396 = dma.done.wait [#allocation4], 512  }
0x10f3   :  { %4397 = vsyncadd [#allocation4], 4294966784 }
0x10f4   :  { %3588 = vsyncpa [#allocation4], 1 }

// kernel: forward_fused.2
= control target key start
LH: loop header
LB: loop body
LE: loop exit
PB: predicated region body
PF: predicated region fallthrough
CT: control target
= control target key end

     0   :  { %s13563_s0 = inlined_call_operand.vmem [shape: f32[8,8,16], index: 0, kind: input, shape index: {}]   ;;  %s13564_s1 = inlined_call_operand.hbm [shape: f32[8,1,16], index: 1, kind: input, shape index: {}]   ;;  %s13565_s2 = inlined_call_operand.vmem [shape: f32[8,1], index: 2, kind: input, shape index: {}]   ;;  %s13566_s3 = inlined_call_operand.vmem [shape: f32[3,8,8,8], index: 3, kind: input, shape index: {}]   ;;  %s13567_s4 = inlined_call_operand.vmem [shape: f32[8,8,1], index: 4, kind: input, shape index: {}]   ;;  %s13568_s5 = inlined_call_operand.vmem [shape: f32[8,8,16], index: 5, kind: input, shape index: {}]   ;;  %s13569_s6 = inlined_call_operand.vmem [shape: f32[8,8,16], index: 6, kind: input, shape index: {}]   ;;  %s13570_s7 = inlined_call_operand.vmem [shape: f32[3,8,8,8], index: 7, kind: input, shape index: {}]   ;;  %s13571_s8 = inlined_call_operand.vmem [shape: f32[8,8,1], index: 8, kind: input, shape index: {}]   ;;  %s13572_s9 = inlined_call_operand.vmem [shape: f32[8,8,16], index: 9, kind: input, shape index: {}]   ;;  %s13573_s10 = inlined_call_operand.hbm [shape: f32[8,8,16], index: 10, kind: input, shape index: {}]   ;;  %s13574_s11 = inlined_call_operand.vmem [shape: f32[8,8,1], index: 11, kind: input, shape index: {}]   ;;  %s13575_s12 = inlined_call_operand.vmem [shape: f32[8,8,1], index: 12, kind: input, shape index: {}]   ;;  %s13576_s13 = inlined_call_operand.vmem [shape: f32[8,8,1], index: 13, kind: input, shape index: {}]   ;;  %s13577_s14 = inlined_call_operand.hbm [shape: f32[8,8,16], index: 14, kind: input, shape index: {}]   ;;  %s13578_s15 = inlined_call_operand.hbm [shape: f32[8,8,16], index: 15, kind: input, shape index: {}]   ;;  %s13579_s16 = inlined_call_operand.vmem [shape: f32[3,8,8,8], index: 16, kind: input, shape index: {}]   ;;  %s13580_s17 = inlined_call_operand.vmem [shape: f32[8,8,1], index: 17, kind: input, shape index: {}]   ;;  %s13581_s18 = inlined_call_operand.vmem [shape: f32[3,8,8,8], index: 18, kind: input, shape index: {}]   ;;  %s13582_s19 = inlined_call_operand.vmem [shape: f32[8,8,1], index: 19, kind: input, shape index: {}]   ;;  %s13583_s20 = inlined_call_operand.vmem [shape: f32[8,8], index: 20, kind: output, shape index: {0}]   ;;  %s13584_s21 = inlined_call_operand.hbm [shape: f32[1,8,8,8], index: 21, kind: output, shape index: {1}]  }
   0x1   :  { %13594 = sst [smem:[#allocation15_spill]] %s13563_s0 }
   0x2   :  { %13595 = sst [smem:[#allocation16_spill]] %s13564_s1 }
   0x3   :  { %13596 = sst [smem:[#allocation17_spill]] %s13565_s2 }
   0x4   :  { %13597 = sst [smem:[#allocation18_spill]] %s13566_s3 }
   0x5   :  { %13598 = sst [smem:[#allocation19_spill]] %s13567_s4 }
   0x6   :  { %13599 = sst [smem:[#allocation20_spill]] %s13568_s5 }
   0x7   :  { %13600 = sst [smem:[#allocation21_spill]] %s13583_s20 }
   0x8   :  { %27 = vsyncpa [#allocation3], 0 }
   0x9   :  { %28 = vsyncpa [#allocation6], 0 }
   0xa   :  { %29 = vsyncpa [#allocation9], 0 }
   0xb   :  { %30 = vsyncpa [#allocation4], 0  ;;  %s11535_s2 = smov [#allocation5]   ;;  %s11417_s3 = scalar_lea.hbm %s13573_s10, 1024 }
   0xc   :  { %s66_s25 = sshll.u32 %s11535_s2, 4  ;;  %p11418_p0 = scmp.ne.s32.totalorder %s13573_s10, %s11417_s3  ;;  %s67_s25 = int_to_ptr.vmem [resolvable:$true] %s66_s25 }
   0xd   :  { %p11421_p1 = scmp.lt.u32.totalorder %s11417_s3, %s13573_s10 }
   0xf   :  { %p11423_p2 = pnand %p11421_p1, %p11418_p0 }
  0x11   :  { %11426 = shalt.err (!%p11423_p2)
}
  0x12   :  { %s11427_s30 = scalar_lea.vmem %s67_s25, 1024  ;;  %p11432_p4 = scmp.lt.s32.totalorder %s67_s25, %s67_s25 }
  0x13   :  { %p11428_p3 = scmp.ne.s32.totalorder %s67_s25, %s11427_s30  ;;  %p11433_p5 = scmp.lt.s32.totalorder %s11427_s30, %s11427_s30 }
  0x15   :  { %p11434_p6 = por %p11433_p5, %p11432_p4 }
  0x17   :  { %p11435_p7 = pnand %p11434_p6, %p11428_p3 }
  0x19   :  { %11438 = shalt.err (!%p11435_p7)
}
  0x1a   :  { %s13590_s5 = smov 128   ;;  %s13592_s22 = smov 8  }
  0x1b   :  { %72 = dma.hbm_to_vmem [thread:$0]  %s13573_s10, 1024, %s67_s25, [#allocation6], %s13590_s5, %s13590_s5, %s13592_s22  }
  0x1c   :  { %s11538_s24 = smov [#allocation2]   ;;  %s13601_s3 = sld [smem:[#allocation16_spill]] }
  0x1d   :  { %s38_s2 = sshll.u32 %s11538_s24, 4  ;;  %s39_s2 = int_to_ptr.vmem [resolvable:$true] %s38_s2 }
  0x22   :  { %s11439_s28 = scalar_lea.hbm %s13601_s3, 128 }
  0x23   :  { %p11440_p8 = scmp.ne.s32.totalorder %s13601_s3, %s11439_s28  ;;  %p11443_p9 = scmp.lt.u32.totalorder %s11439_s28, %s13601_s3 }
  0x25   :  { %p11445_p10 = pnand %p11443_p9, %p11440_p8 }
  0x27   :  { %11448 = shalt.err (!%p11445_p10)
}
  0x28   :  { %s11449_s20 = scalar_lea.vmem %s39_s2, 128  ;;  %p11454_p12 = scmp.lt.s32.totalorder %s39_s2, %s39_s2 }
  0x29   :  { %p11450_p11 = scmp.ne.s32.totalorder %s39_s2, %s11449_s20  ;;  %p11455_p13 = scmp.lt.s32.totalorder %s11449_s20, %s11449_s20 }
  0x2b   :  { %p11456_p0 = por %p11455_p13, %p11454_p12 }
  0x2d   :  { %p11457_p1 = pnand %p11456_p0, %p11450_p11 }
  0x2f   :  { %11460 = shalt.err (!%p11457_p1)
}
  0x30   :  { %s11539_s10 = smov 16   ;;  %s11540_s25 = smov 1  }
  0x31   :  { %44 = dma.hbm_to_vmem [thread:$0]  %s13601_s3, 128, %s39_s2, [#allocation3], %s11539_s10, %s11539_s10, %s11540_s25  }
  0x32   :  { %s11541_s24 = smov [#allocation7]   ;;  %s11542_s27 = smov [#allocation8]  }
  0x33   :  { %s84_s26 = sshll.u32 %s11541_s24, 4  ;;  %s96_s28 = sshll.u32 %s11542_s27, 4  ;;  %s85_s26 = int_to_ptr.vmem [resolvable:$true] %s84_s26  ;;  %s11688_s28 = int_to_ptr.vmem [resolvable:$true] %s96_s28 }
  0x34   :  { %s11461_s20 = scalar_lea.hbm %s13577_s14, 1024 }
  0x35   :  { %p11462_p2 = scmp.ne.s32.totalorder %s13577_s14, %s11461_s20  ;;  %p11465_p3 = scmp.lt.u32.totalorder %s11461_s20, %s13577_s14 }
  0x37   :  { %p11467_p4 = pnand %p11465_p3, %p11462_p2 }
  0x39   :  { %11470 = shalt.err (!%p11467_p4)
}
  0x3a   :  { %s11471_s2 = scalar_lea.vmem %s85_s26, 1024  ;;  %p11476_p6 = scmp.lt.s32.totalorder %s85_s26, %s85_s26 }
  0x3b   :  { %p11472_p5 = scmp.ne.s32.totalorder %s85_s26, %s11471_s2  ;;  %p11477_p7 = scmp.lt.s32.totalorder %s11471_s2, %s11471_s2 }
  0x3d   :  { %p11478_p8 = por %p11477_p7, %p11476_p6 }
  0x3f   :  { %p11479_p9 = pnand %p11478_p8, %p11472_p5 }
  0x41   :  { %11482 = shalt.err (!%p11479_p9)
}
  0x42   :  { %s13602_s3 = smov 8   ;;  %s13603_s10 = smov 128  }
  0x43   :  { %90 = dma.hbm_to_vmem [thread:$0]  %s13577_s14, 1024, %s85_s26, [#allocation6], %s13603_s10, %s13603_s10, %s13602_s3  }
  0x44   :  { %s11483_s5 = scalar_lea.hbm %s13578_s15, 1024 }
  0x45   :  { %p11484_p10 = scmp.ne.s32.totalorder %s13578_s15, %s11483_s5  ;;  %p11487_p11 = scmp.lt.u32.totalorder %s11483_s5, %s13578_s15 }
  0x47   :  { %p11489_p12 = pnand %p11487_p11, %p11484_p10 }
  0x49   :  { %11492 = shalt.err (!%p11489_p12)
}
  0x4a   :  { %s11493_s4 = scalar_lea.vmem %s11688_s28, 1024  ;;  %p11498_p0 = scmp.lt.s32.totalorder %s11688_s28, %s11688_s28 }
  0x4b   :  { %p11494_p13 = scmp.ne.s32.totalorder %s11688_s28, %s11493_s4  ;;  %p11499_p1 = scmp.lt.s32.totalorder %s11493_s4, %s11493_s4 }
  0x4d   :  { %p11500_p2 = por %p11499_p1, %p11498_p0 }
  0x4f   :  { %p11501_p3 = pnand %p11500_p2, %p11494_p13 }
  0x51   :  { %11504 = shalt.err (!%p11501_p3)
}
  0x52   :  { %102 = dma.hbm_to_vmem [thread:$0]  %s13578_s15, 1024, %s11688_s28, [#allocation9], %s13603_s10, %s13603_s10, %s13602_s3  }
  0x53   :  { %11527 = dma.done.wait [#allocation3], 128  }
  0x54   :  { %11528 = vsyncadd [#allocation3], 4294967168 }
  0x55   :  { %11529 = dma.done.wait [#allocation6], 2048  }
  0x56   :  { %11530 = vsyncadd [#allocation6], 4294965248 }
  0x57   :  { %11531 = dma.done.wait [#allocation9], 1024  }
  0x58   :  { %11532 = vsyncadd [#allocation9], 4294966272  ;;  %s13604_s23 = sld [smem:[#allocation15_spill]]  ;;  %s11543_s27 = smov 2   ;;  %v11544_v8 = vmov 0.0   ;;  %vm11545_vm0 = vmmov 0  }
  0x59   :  { %10760 = vmatprep.subr.mxu0 %v11544_v8  ;;  %10765 = vmatprep.subr.mxu1 %v11544_v8  ;;  %vm363_vm1 = vcmask 15360   ;;  %s11547_s1 = smov 126   ;;  %s13605_s28 = sld [smem:[#allocation19_spill]]  ;;  %v11548_v27 = vmov 0   ;;  %vm376_vm2 = vcmask 64512   ;;  %vm2245_vm4 = vcmask 130048  }
  0x5a   :  { %10762 = vmatprep.mubr.msk.f32.mxu0 %vm11545_vm0, %v11544_v8  ;;  %10767 = vmatprep.mubr.msk.f32.mxu1 %vm11545_vm0, %v11544_v8  ;;  %s13606_s20 = sld [smem:[#allocation18_spill]]  ;;  %vm11901_vm3 = vmneg %vm363_vm1  ;;  %s13609_s0 = sld [smem:[#allocation20_spill]]  ;;  %v195_v48 = vld [vmem:[%s13570_s7 + $0x80] sm:$0xff]  ;;  %vm6312_vm5 = vcmask 7168   ;;  %vm6321_vm6 = vcmask 138240  }
  0x5b   :  { %11336 = vset.pattern.permute.xlu1 %v11548_v27  ;;  %11335 = vset.pattern.permute.xlu0 %v11548_v27 }
  0x5e   :  { %v11728_v0 = vld [vmem:[%s13604_s23] sm:$0xff]  ;;  %v11733_v1 = vld [vmem:[%s13604_s23 + $0x10] sm:$0xff]  ;;  %v11742_v2 = vld [vmem:[%s13604_s23 + $0x8] sm:$0xff] }
  0x5f   :  { %339 = vrot.lane.b32.xlu0 %v11728_v0, %s11543_s27  ;;  %343 = vrot.lane.b32.xlu1 %v11733_v1, %s11543_s27  ;;  %v11747_v3 = vld [vmem:[%s13604_s23 + $0x18] sm:$0xff]  ;;  %v11756_v4 = vld [vmem:[%s13604_s23 + $0x20] sm:$0xff] }
  0x60   :  { %v11761_v5 = vld [vmem:[%s13604_s23 + $0x28] sm:$0xff]  ;;  %v11770_v6 = vld [vmem:[%s13604_s23 + $0x30] sm:$0xff]  ;;  %v11775_v7 = vld [vmem:[%s13604_s23 + $0x38] sm:$0xff]  ;;  %s11546_s23 = smov 127  }
  0x61   :  { %v156_v25 = vld [vmem:[%s13605_s28 + $0x8] sm:$0xff]  ;;  %v155_v26 = vld [vmem:[%s13605_s28] sm:$0xff]  ;;  %v157_v28 = vld [vmem:[%s13605_s28 + $0x10] sm:$0xff] }
  0x62   :  { %v158_v29 = vld [vmem:[%s13605_s28 + $0x18] sm:$0xff]  ;;  %v159_v30 = vld [vmem:[%s13605_s28 + $0x20] sm:$0xff]  ;;  %v160_v31 = vld [vmem:[%s13605_s28 + $0x28] sm:$0xff] }
  0x63   :  { %341 = vrot.lane.b32.xlu0 %v11742_v2, %s11543_s27  ;;  %345 = vrot.lane.b32.xlu1 %v11747_v3, %s11543_s27  ;;  %v161_v32 = vld [vmem:[%s13605_s28 + $0x30] sm:$0xff]  ;;  %v162_v33 = vld [vmem:[%s13605_s28 + $0x38] sm:$0xff]  ;;  %s13610_s28 = sld [smem:[#allocation17_spill]] }
  0x64   :  { %v139_v34 = vld [vmem:[%s13606_s20 + $0x40] sm:$0xff]  ;;  %v140_v36 = vld [vmem:[%s13606_s20 + $0x48] sm:$0xff]  ;;  %v141_v37 = vld [vmem:[%s13606_s20 + $0x50] sm:$0xff] }
  0x65   :  { %v142_v40 = vld [vmem:[%s13606_s20 + $0x58] sm:$0xff]  ;;  %v143_v41 = vld [vmem:[%s13606_s20 + $0x60] sm:$0xff]  ;;  %v144_v44 = vld [vmem:[%s13606_s20 + $0x68] sm:$0xff] }
  0x66   :  { %v145_v45 = vld [vmem:[%s13606_s20 + $0x70] sm:$0xff]  ;;  %v146_v49 = vld [vmem:[%s13606_s20 + $0x78] sm:$0xff]  ;;  %v131_v51 = vld [vmem:[%s13606_s20] sm:$0xff] }
  0x67   :  { %347 = vrot.lane.b32.xlu0 %v11756_v4, %s11543_s27  ;;  %349 = vrot.lane.b32.xlu1 %v11761_v5, %s11543_s27  ;;  %v132_v52 = vld [vmem:[%s13606_s20 + $0x8] sm:$0xff]  ;;  %v133_v53 = vld [vmem:[%s13606_s20 + $0x10] sm:$0xff] }
  0x68   :  { %v134_v54 = vld [vmem:[%s13606_s20 + $0x18] sm:$0xff]  ;;  %v135_v55 = vld [vmem:[%s13606_s20 + $0x20] sm:$0xff]  ;;  %v136_v57 = vld [vmem:[%s13606_s20 + $0x28] sm:$0xff] }
  0x69   :  { %v137_v58 = vld [vmem:[%s13606_s20 + $0x30] sm:$0xff]  ;;  %v138_v61 = vld [vmem:[%s13606_s20 + $0x38] sm:$0xff]  ;;  %v147_v62 = vld [vmem:[%s13606_s20 + $0x80] sm:$0xff] }
  0x6b   :  { %351 = vrot.lane.b32.xlu0 %v11770_v6, %s11543_s27  ;;  %353 = vrot.lane.b32.xlu1 %v11775_v7, %s11543_s27 }
  0xd1   :  { %v11787_v9 = vpop.permute.xlu0 %339  ;;  %v11789_v10 = vpop.permute.xlu1 %343 }
  0xd2   :  { %v364_v11 = vsel %vm363_vm1, 0.0, %v11787_v9  ;;  %v366_v12 = vsel %vm363_vm1, 0.0, %v11789_v10 }
  0xd3   :  { %373 = vrot.lane.b32.xlu0 %v364_v11, %s11546_s23 }
  0xd5   :  { %v11796_v13 = vpop.permute.xlu0 %341  ;;  %v11798_v14 = vpop.permute.xlu1 %345 }
  0xd6   :  { %v365_v15 = vsel %vm363_vm1, 0.0, %v11796_v13  ;;  %v367_v16 = vsel %vm363_vm1, 0.0, %v11798_v14 }
  0xd7   :  { %528 = vrot.lane.b32.xlu0 %v366_v12, %s11546_s23  ;;  %451 = vrot.lane.b32.xlu1 %v365_v15, %s11546_s23 }
  0xd9   :  { %v11806_v17 = vpop.permute.xlu0 %347  ;;  %v11808_v18 = vpop.permute.xlu1 %349 }
  0xda   :  { %v368_v19 = vsel %vm363_vm1, 0.0, %v11806_v17  ;;  %v369_v20 = vsel %vm363_vm1, 0.0, %v11808_v18 }
  0xdb   :  { %605 = vrot.lane.b32.xlu1 %v367_v16, %s11546_s23  ;;  %682 = vrot.lane.b32.xlu0 %v368_v19, %s11546_s23 }
  0xdd   :  { %v11816_v21 = vpop.permute.xlu0 %351  ;;  %v11818_v22 = vpop.permute.xlu1 %353 }
  0xde   :  { %v370_v23 = vsel %vm363_vm1, 0.0, %v11816_v21  ;;  %v371_v24 = vsel %vm363_vm1, 0.0, %v11818_v22 }
  0xdf   :  { %759 = vrot.lane.b32.xlu1 %v369_v20, %s11546_s23  ;;  %836 = vrot.lane.b32.xlu0 %v370_v23, %s11546_s23 }
  0xe3   :  { %913 = vrot.lane.b32.xlu1 %v371_v24, %s11546_s23  ;;  %1573 = vrot.lane.b32.xlu0 %v364_v11, %s11547_s1 }
  0xe7   :  { %1649 = vrot.lane.b32.xlu1 %v365_v15, %s11547_s1  ;;  %1725 = vrot.lane.b32.xlu0 %v366_v12, %s11547_s1  ;;  %v150_v12 = vld [vmem:[%s13606_s20 + $0x98] sm:$0xff] }
  0xeb   :  { %1801 = vrot.lane.b32.xlu1 %v367_v16, %s11547_s1  ;;  %1877 = vrot.lane.b32.xlu0 %v368_v19, %s11547_s1  ;;  %v152_v16 = vld [vmem:[%s13606_s20 + $0xa8] sm:$0xff]  ;;  %v154_v19 = vld [vmem:[%s13606_s20 + $0xb8] sm:$0xff] }
  0xef   :  { %1953 = vrot.lane.b32.xlu1 %v369_v20, %s11547_s1  ;;  %2029 = vrot.lane.b32.xlu0 %v370_v23, %s11547_s1 }
  0xf3   :  { %2105 = vrot.lane.b32.xlu1 %v371_v24, %s11547_s1  ;;  %2191 = vperm.xlu0 %11335, %v155_v26  }
  0xf7   :  { %2196 = vperm.xlu1 %11336, %v156_v25   ;;  %2206 = vperm.xlu0 %11335, %v158_v29  }
  0xfb   :  { %2201 = vperm.xlu1 %11336, %v157_v28   ;;  %2216 = vperm.xlu0 %11335, %v160_v31  }
  0xff   :  { %2211 = vperm.xlu1 %11336, %v159_v30   ;;  %2226 = vperm.xlu0 %11335, %v162_v33  }
 0x103   :  { %2221 = vperm.xlu1 %11336, %v161_v32  }
 0x145   :  { %v374_v35 = vpop.permute.xlu0 %373 }
 0x146   :  { %10761 = vmatpush3.msra.mxu0 %v374_v35 }
 0x147   :  { %10763 = vmatmul.mubr.msk.f32.vlgmr.msra.gmra.mrb[0].mxu0 %vm376_vm2, %v139_v34  ;;  %10770 = vmatprep.subr.mxu0 %v11544_v8 }
 0x148   :  { %10772 = vmatprep.mubr.msk.f32.mxu0 %vm11545_vm0, %v11544_v8 }
 0x149   :  { %v452_v38 = vpop.permute.xlu1 %451  ;;  %v529_v39 = vpop.permute.xlu0 %528 }
 0x14a   :  { %10766 = vmatpush3.msra.mxu1 %v452_v38  ;;  %10771 = vmatpush3.msra.mxu0 %v529_v39 }
 0x14b   :  { %10768 = vmatmul.mubr.msk.f32.vlgmr.msra.gmra.mrb[0].mxu1 %vm376_vm2, %v140_v36  ;;  %10773 = vmatmul.mubr.msk.f32.vlgmr.msra.gmra.mrb[2].mxu0 %vm376_vm2, %v141_v37 }
 0x14c   :  { %10775 = vmatprep.subr.mxu1 %v11544_v8  ;;  %10780 = vmatprep.subr.mxu0 %v11544_v8 }
 0x14d   :  { %v606_v42 = vpop.permute.xlu1 %605  ;;  %v683_v43 = vpop.permute.xlu0 %682  ;;  %10777 = vmatprep.mubr.msk.f32.mxu1 %vm11545_vm0, %v11544_v8  ;;  %10782 = vmatprep.mubr.msk.f32.mxu0 %vm11545_vm0, %v11544_v8 }
 0x14e   :  { %10776 = vmatpush3.msra.mxu1 %v606_v42  ;;  %10781 = vmatpush3.msra.mxu0 %v683_v43 }
 0x14f   :  { %10778 = vmatmul.mubr.msk.f32.vlgmr.msra.gmra.mrb[2].mxu1 %vm376_vm2, %v142_v40  ;;  %10783 = vmatmul.mubr.msk.f32.vlgmr.msra.gmra.mrb[4].mxu0 %vm376_vm2, %v143_v41 }
 0x150   :  { %10785 = vmatprep.subr.mxu1 %v11544_v8  ;;  %10790 = vmatprep.subr.mxu0 %v11544_v8 }
 0x151   :  { %v760_v46 = vpop.permute.xlu1 %759  ;;  %v837_v47 = vpop.permute.xlu0 %836  ;;  %10787 = vmatprep.mubr.msk.f32.mxu1 %vm11545_vm0, %v11544_v8  ;;  %10792 = vmatprep.mubr.msk.f32.mxu0 %vm11545_vm0, %v11544_v8 }
 0x152   :  { %10786 = vmatpush3.msra.mxu1 %v760_v46  ;;  %10791 = vmatpush3.msra.mxu0 %v837_v47 }
 0x153   :  { %10788 = vmatmul.mubr.msk.f32.vlgmr.msra.gmra.mrb[4].mxu1 %vm376_vm2, %v144_v44  ;;  %10793 = vmatmul.mubr.msk.f32.vlgmr.msra.gmra.mrb[6].mxu0 %vm376_vm2, %v145_v45 }
 0x154   :  { %10800 = vmatprep.subr.mxu0 %v11544_v8  ;;  %10795 = vmatprep.subr.mxu1 %v11544_v8 }
 0x155   :  { %10801 = vmatpush3.msk.msra.mxu0 %vm11901_vm3, %v11787_v9  ;;  %v914_v50 = vpop.permute.xlu1 %913  ;;  %10797 = vmatprep.mubr.msk.f32.mxu1 %vm11545_vm0, %v11544_v8  ;;  %v1574_v56 = vpop.permute.xlu0 %1573  ;;  %v148_v9 = vld [vmem:[%s13606_s20 + $0x88] sm:$0xff] }
 0x156   :  { %10796 = vmatpush3.msra.mxu1 %v914_v50  ;;  %10802 = vmatprep.mubr.msk.f32.mxu0 %vm11545_vm0, %v11544_v8 }
 0x157   :  { %10810 = vmatprep.subr.mxu0 %v11544_v8  ;;  %10798 = vmatmul.mubr.msk.f32.vlgmr.msra.gmra.mrb[6].mxu1 %vm376_vm2, %v146_v49 }
 0x158   :  { %10803 = vmatmul.mubr.msk.f32.vlgmr.msra.gmra.mrb[8].mxu0 %vm376_vm2, %v131_v51  ;;  %10805 = vmatprep.subr.mxu1 %v11544_v8 }
 0x159   :  { %10811 = vmatpush3.msk.msra.mxu0 %vm11901_vm3, %v11789_v10  ;;  %10806 = vmatpush3.msk.msra.mxu1 %vm11901_vm3, %v11796_v13  ;;  %v1650_v59 = vpop.permute.xlu1 %1649  ;;  %v1726_v60 = vpop.permute.xlu0 %1725  ;;  %v149_v10 = vld [vmem:[%s13606_s20 + $0x90] sm:$0xff]  ;;  %v151_v13 = vld [vmem:[%s13606_s20 + $0xa0] sm:$0xff] }
 0x15a   :  { %10807 = vmatprep.mubr.msk.f32.mxu1 %vm11545_vm0, %v11544_v8  ;;  %10812 = vmatprep.mubr.msk.f32.mxu0 %vm11545_vm0, %v11544_v8 }
 0x15b   :  { %10815 = vmatprep.subr.mxu1 %v11544_v8  ;;  %10820 = vmatprep.subr.mxu0 %v11544_v8 }
 0x15c   :  { %10808 = vmatmul.mubr.msk.f32.vlgmr.msra.gmra.mrb[8].mxu1 %vm376_vm2, %v132_v52  ;;  %10813 = vmatmul.mubr.msk.f32.vlgmr.msra.gmra.mrb[10].mxu0 %vm376_vm2, %v133_v53 }
 0x15d   :  { %10816 = vmatpush3.msk.msra.mxu1 %vm11901_vm3, %v11798_v14  ;;  %10821 = vmatpush3.msk.msra.mxu0 %vm11901_vm3, %v11806_v17  ;;  %v1802_v63 = vpop.permute.xlu1 %1801  ;;  %v1878_v11 = vpop.permute.xlu0 %1877  ;;  %v153_v17 = vld [vmem:[%s13606_s20 + $0xb0] sm:$0xff] }
 0x15e   :  { %10817 = vmatprep.mubr.msk.f32.mxu1 %vm11545_vm0, %v11544_v8  ;;  %10822 = vmatprep.mubr.msk.f32.mxu0 %vm11545_vm0, %v11544_v8 }
 0x15f   :  { %10825 = vmatprep.subr.mxu1 %v11544_v8  ;;  %10830 = vmatprep.subr.mxu0 %v11544_v8 }
 0x160   :  { %10818 = vmatmul.mubr.msk.f32.vlgmr.msra.gmra.mrb[10].mxu1 %vm376_vm2, %v134_v54  ;;  %10823 = vmatmul.mubr.msk.f32.vlgmr.msra.gmra.mrb[12].mxu0 %vm376_vm2, %v135_v55 }
 0x161   :  { %10826 = vmatpush3.msk.msra.mxu1 %vm11901_vm3, %v11808_v18  ;;  %10831 = vmatpush3.msk.msra.mxu0 %vm11901_vm3, %v11816_v21  ;;  %v1954_v14 = vpop.permute.xlu1 %1953  ;;  %v2030_v15 = vpop.permute.xlu0 %2029 }
 0x162   :  { %10827 = vmatprep.mubr.msk.f32.mxu1 %vm11545_vm0, %v11544_v8  ;;  %10832 = vmatprep.mubr.msk.f32.mxu0 %vm11545_vm0, %v11544_v8 }
 0x163   :  { %10835 = vmatprep.subr.mxu1 %v11544_v8  ;;  %10840 = vmatprep.subr.mxu0 %v11544_v8 }
 0x164   :  { %10828 = vmatmul.mubr.msk.f32.vlgmr.msra.gmra.mrb[12].mxu1 %vm376_vm2, %v136_v57  ;;  %10833 = vmatmul.mubr.msk.f32.vlgmr.msra.gmra.mrb[14].mxu0 %vm376_vm2, %v137_v58 }
 0x165   :  { %10836 = vmatpush3.msk.msra.mxu1 %vm11901_vm3, %v11818_v22  ;;  %10841 = vmatpush3.msra.mxu0 %v1574_v56  ;;  %v2106_v18 = vpop.permute.xlu1 %2105 }
 0x166   :  { %10837 = vmatprep.mubr.msk.f32.mxu1 %vm11545_vm0, %v11544_v8  ;;  %10842 = vmatprep.mubr.msk.f32.mxu0 %vm11545_vm0, %v11544_v8 }
 0x167   :  { %10845 = vmatprep.subr.mxu1 %v11544_v8  ;;  %10850 = vmatprep.subr.mxu0 %v11544_v8 }
 0x168   :  { %10838 = vmatmul.mubr.msk.f32.vlgmr.msra.gmra.mrb[14].mxu1 %vm376_vm2, %v138_v61  ;;  %10843 = vmatmul.mubr.msk.f32.vlgmr.msra.gmra.mrb[16].mxu0 %vm376_vm2, %v147_v62 }
 0x169   :  { %10846 = vmatpush3.msra.mxu1 %v1650_v59  ;;  %10851 = vmatpush3.msra.mxu0 %v1726_v60 }
 0x16a   :  { %10847 = vmatprep.mubr.msk.f32.mxu1 %vm11545_vm0, %v11544_v8  ;;  %10852 = vmatprep.mubr.msk.f32.mxu0 %vm11545_vm0, %v11544_v8 }
 0x16b   :  { %10855 = vmatprep.subr.mxu1 %v11544_v8  ;;  %10860 = vmatprep.subr.mxu0 %v11544_v8 }
 0x16c   :  { %10848 = vmatmul.mubr.msk.f32.vlgmr.msra.gmra.mrb[16].mxu1 %vm376_vm2, %v148_v9  ;;  %10853 = vmatmul.mubr.msk.f32.vlgmr.msra.gmra.mrb[18].mxu0 %vm376_vm2, %v149_v10 }
 0x16d   :  { %10856 = vmatpush3.msra.mxu1 %v1802_v63  ;;  %10861 = vmatpush3.msra.mxu0 %v1878_v11 }
 0x16e   :  { %10857 = vmatprep.mubr.msk.f32.mxu1 %vm11545_vm0, %v11544_v8  ;;  %10862 = vmatprep.mubr.msk.f32.mxu0 %vm11545_vm0, %v11544_v8 }
 0x16f   :  { %10865 = vmatprep.subr.mxu1 %v11544_v8  ;;  %10870 = vmatprep.subr.mxu0 %v11544_v8 }
 0x170   :  { %10858 = vmatmul.mubr.msk.f32.vlgmr.msra.gmra.mrb[18].mxu1 %vm376_vm2, %v150_v12  ;;  %10863 = vmatmul.mubr.msk.f32.vlgmr.msra.gmra.mrb[20].mxu0 %vm376_vm2, %v151_v13 }
 0x171   :  { %10866 = vmatpush3.msra.mxu1 %v1954_v14  ;;  %10871 = vmatpush3.msra.mxu0 %v2030_v15 }
 0x172   :  { %10867 = vmatprep.mubr.msk.f32.mxu1 %vm11545_vm0, %v11544_v8  ;;  %10872 = vmatprep.mubr.msk.f32.mxu0 %vm11545_vm0, %v11544_v8  ;;  %v2192_v53 = vpop.permute.xlu0 %2191 }
 0x173   :  { %10875 = vmatprep.subr.mxu1 %v11544_v8  ;;  %10880 = vmatprep.subr.mxu0 %v11544_v8 }
 0x174   :  { %10868 = vmatmul.mubr.msk.f32.vlgmr.msra.gmra.mrb[20].mxu1 %vm376_vm2, %v152_v16  ;;  %10873 = vmatmul.mubr.msk.f32.vlgmr.msra.gmra.mrb[22].mxu0 %vm376_vm2, %v153_v17 }
 0x175   :  { %10876 = vmatpush3.msra.mxu1 %v2106_v18  ;;  %10877 = vmatprep.mubr.msk.f32.mxu1 %vm11545_vm0, %v11544_v8 }
 0x176   :  { %10882 = vmatprep.mubr.msk.f32.mxu0 %vm11545_vm0, %v11544_v8  ;;  %10885 = vmatprep.subr.mxu1 %v11544_v8  ;;  %v2197_v45 = vpop.permute.xlu1 %2196  ;;  %v2207_v12 = vpop.permute.xlu0 %2206 }
 0x178   :  { %10878 = vmatmul.mubr.msk.f32.vlgmr.msra.gmra.mrb[22].mxu1 %vm376_vm2, %v154_v19 }
 0x179   :  { %10887 = vmatprep.mubr.msk.f32.mxu1 %vm11545_vm0, %v11544_v8 }
 0x17a   :  { %v2202_v60 = vpop.permute.xlu1 %2201 }
 0x21a   :  { %v446_v20 = vpop.f32.mrb[0].mxu0 }
 0x21b   :  { %v10764_v21 = vpop.f32.mrb[1].mxu0 }
 0x21c   :  { %v2212_v21 = vpop.permute.xlu1 %2211 }
 0x21e   :  { %v523_v22 = vpop.f32.mrb[0].mxu1  ;;  %v600_v23 = vpop.f32.mrb[2].mxu0 }
 0x21f   :  { %v10769_v24 = vpop.f32.mrb[1].mxu1  ;;  %v10774_v25 = vpop.f32.mrb[3].mxu0 }
 0x222   :  { %v677_v26 = vpop.f32.mrb[2].mxu1  ;;  %v754_v27 = vpop.f32.mrb[4].mxu0 }
 0x223   :  { %v10779_v28 = vpop.f32.mrb[3].mxu1  ;;  %v10784_v29 = vpop.f32.mrb[5].mxu0 }
 0x226   :  { %v831_v30 = vpop.f32.mrb[4].mxu1  ;;  %v908_v31 = vpop.f32.mrb[6].mxu0 }
 0x227   :  { %v10789_v32 = vpop.f32.mrb[5].mxu1  ;;  %v10794_v33 = vpop.f32.mrb[7].mxu0 }
 0x22a   :  { %v985_v34 = vpop.f32.mrb[6].mxu1 }
 0x22b   :  { %v1058_v35 = vpop.f32.mrb[8].mxu0  ;;  %v10799_v36 = vpop.f32.mrb[7].mxu1 }
 0x22c   :  { %v1059_v37 = vadd.f32 %v1058_v35, %v446_v20  ;;  %v10804_v38 = vpop.f32.mrb[9].mxu0 }
 0x22f   :  { %v1131_v39 = vpop.f32.mrb[8].mxu1  ;;  %v1204_v40 = vpop.f32.mrb[10].mxu0 }
 0x230   :  { %v1132_v41 = vadd.f32 %v1131_v39, %v523_v22  ;;  %v1205_v42 = vadd.f32 %v1204_v40, %v600_v23  ;;  %v10809_v43 = vpop.f32.mrb[9].mxu1  ;;  %v10814_v44 = vpop.f32.mrb[11].mxu0 }
 0x233   :  { %v1277_v46 = vpop.f32.mrb[10].mxu1  ;;  %v1350_v47 = vpop.f32.mrb[12].mxu0 }
 0x234   :  { %v1278_v49 = vadd.f32 %v1277_v46, %v677_v26  ;;  %v1351_v50 = vadd.f32 %v1350_v47, %v754_v27  ;;  %v10819_v51 = vpop.f32.mrb[11].mxu1  ;;  %v10824_v52 = vpop.f32.mrb[13].mxu0 }
 0x237   :  { %v1423_v54 = vpop.f32.mrb[12].mxu1  ;;  %v1496_v55 = vpop.f32.mrb[14].mxu0 }
 0x238   :  { %v1424_v56 = vadd.f32 %v1423_v54, %v831_v30  ;;  %v1497_v57 = vadd.f32 %v1496_v55, %v908_v31  ;;  %v10829_v58 = vpop.f32.mrb[13].mxu1  ;;  %v10834_v59 = vpop.f32.mrb[15].mxu0 }
 0x23b   :  { %v1569_v61 = vpop.f32.mrb[14].mxu1  ;;  %v1645_v62 = vpop.f32.mrb[16].mxu0 }
 0x23c   :  { %v1570_v63 = vadd.f32 %v1569_v61, %v985_v34  ;;  %v2181_v9 = vadd.f32 %v1645_v62, %v1059_v37  ;;  %v10839_v10 = vpop.f32.mrb[15].mxu1  ;;  %v10844_v11 = vpop.f32.mrb[17].mxu0 }
 0x23e   :  { %v2229_v13 = vadd.f32 %v2192_v53, %v2181_v9 }
 0x23f   :  { %v1721_v14 = vpop.f32.mrb[16].mxu1  ;;  %v1797_v15 = vpop.f32.mrb[18].mxu0 }
 0x240   :  { %v2182_v16 = vadd.f32 %v1721_v14, %v1132_v41  ;;  %v2183_v17 = vadd.f32 %v1797_v15, %v1205_v42  ;;  %v10849_v18 = vpop.f32.mrb[17].mxu1  ;;  %v10854_v19 = vpop.f32.mrb[19].mxu0  ;;  %v12057_v20 = vadd.f32 %v2229_v13, %v11728_v0 }
 0x241   :  { %v2217_v0 = vpop.permute.xlu0 %2216 }
 0x242   :  { %v2230_v22 = vadd.f32 %v2197_v45, %v2182_v16  ;;  %v2231_v23 = vadd.f32 %v2202_v60, %v2183_v17  ;;  %v2246_v24 = vsel %vm2245_vm4, %v12057_v20, 0.0 }
 0x243   :  { %v1873_v25 = vpop.f32.mrb[18].mxu1  ;;  %v1949_v26 = vpop.f32.mrb[20].mxu0  ;;  %2247 = vadd.xlane.f32.xlu1 %v2246_v24 }
 0x244   :  { %v2184_v27 = vadd.f32 %v1873_v25, %v1278_v49  ;;  %v2185_v28 = vadd.f32 %v1949_v26, %v1351_v50  ;;  %v10859_v29 = vpop.f32.mrb[19].mxu1  ;;  %v10864_v30 = vpop.f32.mrb[21].mxu0  ;;  %v12062_v31 = vadd.f32 %v2230_v22, %v11742_v2  ;;  %v12065_v32 = vadd.f32 %v2231_v23, %v11733_v1 }
 0x245   :  { %v2222_v2 = vpop.permute.xlu1 %2221  ;;  %v2227_v51 = vpop.permute.xlu0 %2226 }
 0x246   :  { %v2232_v33 = vadd.f32 %v2207_v12, %v2184_v27  ;;  %v2233_v34 = vadd.f32 %v2212_v21, %v2185_v28  ;;  %v2249_v35 = vsel %vm2245_vm4, %v12062_v31, 0.0  ;;  %v2252_v1 = vsel %vm2245_vm4, %v12065_v32, 0.0 }
 0x247   :  { %v2025_v36 = vpop.f32.mrb[20].mxu1  ;;  %2250 = vadd.xlane.f32.xlu0 %v2249_v35  ;;  %v2101_v37 = vpop.f32.mrb[22].mxu0 }
 0x248   :  { %v2186_v38 = vadd.f32 %v2025_v36, %v1424_v56  ;;  %v2187_v39 = vadd.f32 %v2101_v37, %v1497_v57  ;;  %v10869_v40 = vpop.f32.mrb[21].mxu1  ;;  %v10874_v41 = vpop.f32.mrb[23].mxu0  ;;  %v12070_v42 = vadd.f32 %v2232_v33, %v11747_v3  ;;  %v12077_v46 = vadd.f32 %v2233_v34, %v11756_v4 }
 0x24a   :  { %v2234_v43 = vadd.f32 %v2217_v0, %v2186_v38  ;;  %v2235_v44 = vadd.f32 %v2222_v2, %v2187_v39  ;;  %v2255_v45 = vsel %vm2245_vm4, %v12070_v42, 0.0  ;;  %v2258_v53 = vsel %vm2245_vm4, %v12077_v46, 0.0 }
 0x24b   :  { %v2177_v47 = vpop.f32.mrb[22].mxu1  ;;  %2253 = vadd.xlane.f32.xlu0 %v2252_v1  ;;  %2256 = vadd.xlane.f32.xlu1 %v2255_v45 }
 0x24c   :  { %v2188_v49 = vadd.f32 %v2177_v47, %v1570_v63  ;;  %v10879_v50 = vpop.f32.mrb[23].mxu1  ;;  %v12080_v3 = vadd.f32 %v2234_v43, %v11761_v5  ;;  %v12087_v55 = vadd.f32 %v2235_v44, %v11770_v6 }
 0x24e   :  { %v2236_v52 = vadd.f32 %v2227_v51, %v2188_v49  ;;  %v2261_v54 = vsel %vm2245_vm4, %v12080_v3, 0.0  ;;  %v2264_v5 = vsel %vm2245_vm4, %v12087_v55, 0.0 }
 0x24f   :  { %2259 = vadd.xlane.f32.xlu0 %v2258_v53  ;;  %2262 = vadd.xlane.f32.xlu1 %v2261_v54 }
 0x250   :  { %v12090_v4 = vadd.f32 %v2236_v52, %v11775_v7 }
 0x252   :  { %v2267_v56 = vsel %vm2245_vm4, %v12090_v4, 0.0 }
 0x253   :  { %2265 = vadd.xlane.f32.xlu0 %v2264_v5  ;;  %2268 = vadd.xlane.f32.xlu1 %v2267_v56 }
 0x2d0   :  { %v2248_v57 = vpop.xlane.xlu1 %2247 }
 0x2d1   :  { %v2271_v58 = vmul.f32 0.0625, %v2248_v57 }
 0x2d3   :  { %v2279_v59 = vrot.slane %v2271_v58, 4 }
 0x2d4   :  { %v2251_v60 = vpop.xlane.xlu0 %2250 }
 0x2d5   :  { %v2280_v61 = vadd.f32 %v2279_v59, %v2271_v58  ;;  %v2272_v6 = vmul.f32 0.0625, %v2251_v60 }
 0x2d7   :  { %v2281_v62 = vrot.slane %v2280_v61, 2  ;;  %v2285_v63 = vrot.slane %v2272_v6, 4 }
 0x2d8   :  { %v2257_v9 = vpop.xlane.xlu1 %2256  ;;  %v2254_v10 = vpop.xlane.xlu0 %2253 }
 0x2d9   :  { %v2282_v7 = vadd.f32 %v2281_v62, %v2280_v61  ;;  %v2286_v11 = vadd.f32 %v2285_v63, %v2272_v6  ;;  %v2274_v12 = vmul.f32 0.0625, %v2257_v9  ;;  %v2273_v13 = vmul.f32 0.0625, %v2254_v10 }
 0x2db   :  { %v2283_v14 = vrot.slane %v2282_v7, 1  ;;  %v2287_v15 = vrot.slane %v2286_v11, 2  ;;  %v2297_v16 = vrot.slane %v2274_v12, 4  ;;  %v2291_v17 = vrot.slane %v2273_v13, 4 }
 0x2dc   :  { %v2263_v18 = vpop.xlane.xlu1 %2262  ;;  %v2260_v19 = vpop.xlane.xlu0 %2259 }
 0x2dd   :  { %v2288_v21 = vadd.f32 %v2287_v15, %v2286_v11  ;;  %v2298_v22 = vadd.f32 %v2297_v16, %v2274_v12  ;;  %v2292_v23 = vadd.f32 %v2291_v17, %v2273_v13  ;;  %v2276_v24 = vmul.f32 0.0625, %v2263_v18 }
 0x2de   :  { %v2275_v25 = vmul.f32 0.0625, %v2260_v19  ;;  %v2284_v26 = vadd.f32 %v2283_v14, %v2282_v7 }
 0x2df   :  { %v2289_v27 = vrot.slane %v2288_v21, 1  ;;  %v2299_v28 = vrot.slane %v2298_v22, 2  ;;  %v2293_v29 = vrot.slane %v2292_v23, 2  ;;  %v2309_v30 = vrot.slane %v2276_v24, 4 }
 0x2e0   :  { %v2303_v0 = vrot.slane %v2275_v25, 4  ;;  %v2269_v33 = vpop.xlane.xlu1 %2268  ;;  %v2266_v34 = vpop.xlane.xlu0 %2265  ;;  %v2328_v35 = vmul.f32 0.125, %v2284_v26 }
 0x2e1   :  { %v2300_v36 = vadd.f32 %v2299_v28, %v2298_v22  ;;  %v2294_v37 = vadd.f32 %v2293_v29, %v2292_v23  ;;  %v2310_v38 = vadd.f32 %v2309_v30, %v2276_v24  ;;  %v2278_v39 = vmul.f32 0.0625, %v2269_v33 }
 0x2e2   :  { %v2304_v40 = vadd.f32 %v2303_v0, %v2275_v25  ;;  %v2277_v41 = vmul.f32 0.0625, %v2266_v34  ;;  %v12097_v2 = vsub.f32 %v12057_v20, %v2328_v35  ;;  %v2290_v1 = vadd.f32 %v2289_v27, %v2288_v21 }
 0x2e3   :  { %v2301_v43 = vrot.slane %v2300_v36, 1  ;;  %v2295_v44 = vrot.slane %v2294_v37, 1  ;;  %v2311_v45 = vrot.slane %v2310_v38, 2  ;;  %v2321_v47 = vrot.slane %v2278_v39, 4 }
 0x2e4   :  { %v2305_v49 = vrot.slane %v2304_v40, 2  ;;  %v2315_v50 = vrot.slane %v2277_v41, 4  ;;  %v2344_v51 = vmul.f32 %v12097_v2, %v12097_v2  ;;  %v2329_v52 = vmul.f32 0.125, %v2290_v1 }
 0x2e5   :  { %v2312_v53 = vadd.f32 %v2311_v45, %v2310_v38  ;;  %v2322_v54 = vadd.f32 %v2321_v47, %v2278_v39  ;;  %v2302_v5 = vadd.f32 %v2301_v43, %v2300_v36  ;;  %v2296_v56 = vadd.f32 %v2295_v44, %v2294_v37 }
 0x2e6   :  { %v2306_v57 = vadd.f32 %v2305_v49, %v2304_v40  ;;  %v2316_v58 = vadd.f32 %v2315_v50, %v2277_v41  ;;  %v2352_v20 = vsel %vm2245_vm4, %v2344_v51, 0.0  ;;  %v12103_v59 = vsub.f32 %v12062_v31, %v2329_v52 }
 0x2e7   :  { %v2313_v60 = vrot.slane %v2312_v53, 1  ;;  %v2323_v61 = vrot.slane %v2322_v54, 2  ;;  %2353 = vadd.xlane.f32.xlu0 %v2352_v20  ;;  %v2331_v6 = vmul.f32 0.125, %v2302_v5  ;;  %v2330_v62 = vmul.f32 0.125, %v2296_v56 }
 0x2e8   :  { %v2307_v63 = vrot.slane %v2306_v57, 1  ;;  %v2317_v9 = vrot.slane %v2316_v58, 2  ;;  %v2345_v10 = vmul.f32 %v12103_v59, %v12103_v59 }
 0x2e9   :  { %v2324_v7 = vadd.f32 %v2323_v61, %v2322_v54  ;;  %v12108_v11 = vsub.f32 %v12070_v42, %v2331_v6  ;;  %v12111_v12 = vsub.f32 %v12065_v32, %v2330_v62  ;;  %v2314_v13 = vadd.f32 %v2313_v60, %v2312_v53 }
 0x2ea   :  { %v2318_v31 = vadd.f32 %v2317_v9, %v2316_v58  ;;  %v2355_v14 = vsel %vm2245_vm4, %v2345_v10, 0.0  ;;  %v2308_v15 = vadd.f32 %v2307_v63, %v2306_v57 }
 0x2eb   :  { %v2325_v16 = vrot.slane %v2324_v7, 1  ;;  %2356 = vadd.xlane.f32.xlu1 %v2355_v14  ;;  %v2347_v17 = vmul.f32 %v12108_v11, %v12108_v11  ;;  %v2346_v18 = vmul.f32 %v12111_v12, %v12111_v12  ;;  %v2333_v19 = vmul.f32 0.125, %v2314_v13 }
 0x2ec   :  { %v2319_v21 = vrot.slane %v2318_v31, 1  ;;  %v2332_v42 = vmul.f32 0.125, %v2308_v15 }
 0x2ed   :  { %v2361_v22 = vsel %vm2245_vm4, %v2347_v17, 0.0  ;;  %v2358_v32 = vsel %vm2245_vm4, %v2346_v18, 0.0  ;;  %v12121_v23 = vsub.f32 %v12080_v3, %v2333_v19  ;;  %v2326_v24 = vadd.f32 %v2325_v16, %v2324_v7 }
 0x2ee   :  { %2359 = vadd.xlane.f32.xlu0 %v2358_v32  ;;  %v12124_v25 = vsub.f32 %v12077_v46, %v2332_v42  ;;  %v2320_v26 = vadd.f32 %v2319_v21, %v2318_v31 }
 0x2ef   :  { %2362 = vadd.xlane.f32.xlu1 %v2361_v22  ;;  %v2349_v27 = vmul.f32 %v12121_v23, %v12121_v23  ;;  %v2335_v28 = vmul.f32 0.125, %v2326_v24 }
 0x2f0   :  { %v2348_v29 = vmul.f32 %v12124_v25, %v12124_v25  ;;  %v2334_v30 = vmul.f32 0.125, %v2320_v26 }
 0x2f1   :  { %v2367_v0 = vsel %vm2245_vm4, %v2349_v27, 0.0  ;;  %v12132_v3 = vsub.f32 %v12090_v4, %v2335_v28 }
 0x2f2   :  { %v2364_v33 = vsel %vm2245_vm4, %v2348_v29, 0.0  ;;  %v12136_v46 = vsub.f32 %v12087_v55, %v2334_v30 }
 0x2f3   :  { %2368 = vadd.xlane.f32.xlu1 %v2367_v0  ;;  %2365 = vadd.xlane.f32.xlu0 %v2364_v33  ;;  %v2351_v34 = vmul.f32 %v12132_v3, %v12132_v3 }
 0x2f4   :  { %v2350_v35 = vmul.f32 %v12136_v46, %v12136_v46 }
 0x2f5   :  { %v2373_v36 = vsel %vm2245_vm4, %v2351_v34, 0.0 }
 0x2f6   :  { %v2370_v37 = vsel %vm2245_vm4, %v2350_v35, 0.0 }
 0x2f7   :  { %2374 = vadd.xlane.f32.xlu1 %v2373_v36  ;;  %2371 = vadd.xlane.f32.xlu0 %v2370_v37 }
 0x374   :  { %v2354_v4 = vpop.xlane.xlu0 %2353 }
 0x375   :  { %v2376_v38 = vmul.f32 0.0625, %v2354_v4 }
 0x377   :  { %v2384_v39 = vrot.slane %v2376_v38, 4 }
 0x378   :  { %v2357_v40 = vpop.xlane.xlu1 %2356 }
 0x379   :  { %v2385_v55 = vadd.f32 %v2384_v39, %v2376_v38  ;;  %v2377_v41 = vmul.f32 0.0625, %v2357_v40 }
 0x37b   :  { %v2386_v1 = vrot.slane %v2385_v55, 2  ;;  %v2390_v43 = vrot.slane %v2377_v41, 4  ;;  %v2360_v44 = vpop.xlane.xlu0 %2359 }
 0x37c   :  { %v2363_v45 = vpop.xlane.xlu1 %2362  ;;  %v2378_v47 = vmul.f32 0.0625, %v2360_v44 }
 0x37d   :  { %v2387_v49 = vadd.f32 %v2386_v1, %v2385_v55  ;;  %v2391_v50 = vadd.f32 %v2390_v43, %v2377_v41  ;;  %v2379_v51 = vmul.f32 0.0625, %v2363_v45 }
 0x37e   :  { %v2396_v52 = vrot.slane %v2378_v47, 4 }
 0x37f   :  { %v2388_v53 = vrot.slane %v2387_v49, 1  ;;  %v2392_v54 = vrot.slane %v2391_v50, 2  ;;  %v2402_v5 = vrot.slane %v2379_v51, 4 }
 0x380   :  { %v2397_v56 = vadd.f32 %v2396_v52, %v2378_v47  ;;  %v2369_v57 = vpop.xlane.xlu1 %2368  ;;  %v2366_v58 = vpop.xlane.xlu0 %2365 }
 0x381   :  { %v2389_v20 = vadd.f32 %v2388_v53, %v2387_v49  ;;  %v2393_v60 = vadd.f32 %v2392_v54, %v2391_v50  ;;  %v2403_v61 = vadd.f32 %v2402_v5, %v2379_v51  ;;  %v2381_v6 = vmul.f32 0.0625, %v2369_v57 }
 0x382   :  { %v2398_v62 = vrot.slane %v2397_v56, 2  ;;  %v2380_v63 = vmul.f32 0.0625, %v2366_v58  ;;  %v163_v58 = vld [vmem:[%s13609_s0] sm:$0xff] }
 0x383   :  { %v2432_v9 = vmul.f32 0.125, %v2389_v20  ;;  %v2394_v10 = vrot.slane %v2393_v60, 1  ;;  %v2404_v7 = vrot.slane %v2403_v61, 2  ;;  %v2414_v13 = vrot.slane %v2381_v6, 4 }
 0x384   :  { %v2399_v31 = vadd.f32 %v2398_v62, %v2397_v56  ;;  %v2408_v14 = vrot.slane %v2380_v63, 4  ;;  %v2375_v15 = vpop.xlane.xlu1 %2374  ;;  %v2372_v16 = vpop.xlane.xlu0 %2371  ;;  %v171_v62 = vld [vmem:[%s13569_s6] sm:$0xff] }
 0x385   :  { %v2440_v17 = vadd.f32 1e-05, %v2432_v9  ;;  %v2395_v18 = vadd.f32 %v2394_v10, %v2393_v60  ;;  %v2405_v19 = vadd.f32 %v2404_v7, %v2403_v61  ;;  %v2415_v21 = vadd.f32 %v2414_v13, %v2381_v6  ;;  %v164_v13 = vld [vmem:[%s13609_s0 + $0x8] sm:$0xff] }
 0x386   :  { %v2400_v42 = vrot.slane %v2399_v31, 1  ;;  %v2409_v22 = vadd.f32 %v2408_v14, %v2380_v63  ;;  %v2383_v32 = vmul.f32 0.0625, %v2375_v15  ;;  %v2382_v24 = vmul.f32 0.0625, %v2372_v16  ;;  %v172_v16 = vld [vmem:[%s13569_s6 + $0x8] sm:$0xff] }
 0x387   :  { %11337 = vrsqrt.f32 %v2440_v17  ;;  %v2433_v26 = vmul.f32 0.125, %v2395_v18  ;;  %v2406_v27 = vrot.slane %v2405_v19, 1  ;;  %v2416_v28 = vrot.slane %v2415_v21, 2 }
 0x388   :  { %v2401_v29 = vadd.f32 %v2400_v42, %v2399_v31  ;;  %v2410_v30 = vrot.slane %v2409_v22, 2  ;;  %v2426_v0 = vrot.slane %v2383_v32, 4  ;;  %v2420_v33 = vrot.slane %v2382_v24, 4 }
 0x389   :  { %v2441_v34 = vadd.f32 1e-05, %v2433_v26  ;;  %v2407_v35 = vadd.f32 %v2406_v27, %v2405_v19  ;;  %v2417_v36 = vadd.f32 %v2416_v28, %v2415_v21  ;;  %v165_v19 = vld [vmem:[%s13609_s0 + $0x10] sm:$0xff]  ;;  %v174_v26 = vld [vmem:[%s13569_s6 + $0x18] sm:$0xff] }
 0x38a   :  { %v2434_v37 = vmul.f32 0.125, %v2401_v29  ;;  %v2411_v4 = vadd.f32 %v2410_v30, %v2409_v22  ;;  %v2427_v38 = vadd.f32 %v2426_v0, %v2383_v32  ;;  %v2421_v39 = vadd.f32 %v2420_v33, %v2382_v24  ;;  %v173_v24 = vld [vmem:[%s13569_s6 + $0x10] sm:$0xff] }
 0x38b   :  { %11339 = vrsqrt.f32 %v2441_v34  ;;  %v2435_v40 = vmul.f32 0.125, %v2407_v35  ;;  %v2418_v55 = vrot.slane %v2417_v36, 1  ;;  %v167_v34 = vld [vmem:[%s13609_s0 + $0x20] sm:$0xff]  ;;  %v176_v35 = vld [vmem:[%s13569_s6 + $0x28] sm:$0xff] }
 0x38c   :  { %v2442_v41 = vadd.f32 1e-05, %v2434_v37  ;;  %v2412_v1 = vrot.slane %v2411_v4, 1  ;;  %v2428_v43 = vrot.slane %v2427_v38, 2  ;;  %v2422_v44 = vrot.slane %v2421_v39, 2 }
 0x38d   :  { %v2443_v45 = vadd.f32 1e-05, %v2435_v40  ;;  %v2419_v47 = vadd.f32 %v2418_v55, %v2417_v36  ;;  %v170_v40 = vld [vmem:[%s13609_s0 + $0x38] sm:$0xff] }
 0x38e   :  { %11341 = vrsqrt.f32 %v2442_v41  ;;  %v2413_v49 = vadd.f32 %v2412_v1, %v2411_v4  ;;  %v2429_v50 = vadd.f32 %v2428_v43, %v2427_v38  ;;  %v2423_v51 = vadd.f32 %v2422_v44, %v2421_v39  ;;  %v169_v1 = vld [vmem:[%s13609_s0 + $0x30] sm:$0xff]  ;;  %v178_v43 = vld [vmem:[%s13569_s6 + $0x38] sm:$0xff] }
 0x38f   :  { %11343 = vrsqrt.f32 %v2443_v45  ;;  %v2437_v52 = vmul.f32 0.125, %v2419_v47 }
 0x390   :  { %v2436_v53 = vmul.f32 0.125, %v2413_v49  ;;  %v2430_v54 = vrot.slane %v2429_v50, 1  ;;  %v2424_v5 = vrot.slane %v2423_v51, 1 }
 0x391   :  { %v11338_v56 = vpop.eup %11337  ;;  %v2445_v57 = vadd.f32 1e-05, %v2437_v52 }
 0x392   :  { %v2444_v20 = vadd.f32 1e-05, %v2436_v53  ;;  %v2431_v60 = vadd.f32 %v2430_v54, %v2429_v50  ;;  %v2425_v61 = vadd.f32 %v2424_v5, %v2423_v51  ;;  %v2456_v6 = vmul.f32 %v11338_v56, %v12097_v2 }
 0x393   :  { %11345 = vrsqrt.f32 %v2445_v57 }
 0x394   :  { %11347 = vrsqrt.f32 %v2444_v20  ;;  %v2439_v63 = vmul.f32 0.125, %v2431_v60  ;;  %v2438_v9 = vmul.f32 0.125, %v2425_v61  ;;  %v2464_v10 = vmul.f32 %v2456_v6, %v163_v58 }
 0x395   :  { %v11340_v7 = vpop.eup %11339 }
 0x396   :  { %v2447_v31 = vadd.f32 1e-05, %v2439_v63  ;;  %v2446_v14 = vadd.f32 1e-05, %v2438_v9  ;;  %v12154_v15 = vadd.f32 %v2464_v10, %v171_v62  ;;  %v2457_v2 = vmul.f32 %v11340_v7, %v12103_v59  ;;  %v166_v59 = vld [vmem:[%s13609_s0 + $0x18] sm:$0xff]  ;;  %v204_v10 = vld [vmem:[%s13571_s8 + $0x8] sm:$0xff] }
 0x397   :  { %v203_v7 = vld [vmem:[%s13571_s8] sm:$0xff] }
 0x398   :  { %v11342_v17 = vpop.eup %11341  ;;  %11349 = vrsqrt.f32 %v2447_v31  ;;  %2488 = vrot.lane.b32.xlu0 %v12154_v15, %s11543_s27  ;;  %v2465_v18 = vmul.f32 %v2457_v2, %v164_v13  ;;  %v206_v13 = vld [vmem:[%s13571_s8 + $0x18] sm:$0xff]  ;;  %v205_v31 = vld [vmem:[%s13571_s8 + $0x10] sm:$0xff]  ;;  %v207_v2 = vld [vmem:[%s13571_s8 + $0x20] sm:$0xff] }
 0x399   :  { %v11344_v21 = vpop.eup %11343  ;;  %11351 = vrsqrt.f32 %v2446_v14  ;;  %v2458_v42 = vmul.f32 %v11342_v17, %v12111_v12  ;;  %v208_v14 = vld [vmem:[%s13571_s8 + $0x28] sm:$0xff]  ;;  %v209_v17 = vld [vmem:[%s13571_s8 + $0x30] sm:$0xff] }
 0x39a   :  { %v12169_v22 = vadd.f32 %v2465_v18, %v172_v16  ;;  %v2459_v32 = vmul.f32 %v11344_v21, %v12108_v11  ;;  %v168_v11 = vld [vmem:[%s13609_s0 + $0x28] sm:$0xff]  ;;  %v210_v16 = vld [vmem:[%s13571_s8 + $0x38] sm:$0xff]  ;;  %v187_v18 = vld [vmem:[%s13570_s7 + $0x40] sm:$0xff] }
 0x39b   :  { %v2466_v27 = vmul.f32 %v2458_v42, %v165_v19  ;;  %v188_v21 = vld [vmem:[%s13570_s7 + $0x48] sm:$0xff]  ;;  %v189_v42 = vld [vmem:[%s13570_s7 + $0x50] sm:$0xff] }
 0x39c   :  { %2490 = vrot.lane.b32.xlu1 %v12169_v22, %s11543_s27  ;;  %v2467_v28 = vmul.f32 %v2459_v32, %v166_v59  ;;  %v190_v32 = vld [vmem:[%s13570_s7 + $0x58] sm:$0xff] }
 0x39d   :  { %v11346_v29 = vpop.eup %11345  ;;  %v12180_v30 = vadd.f32 %v2466_v27, %v173_v24  ;;  %v192_v27 = vld [vmem:[%s13570_s7 + $0x68] sm:$0xff] }
 0x39e   :  { %v11348_v12 = vpop.eup %11347  ;;  %v12185_v0 = vadd.f32 %v2467_v28, %v174_v26  ;;  %v2461_v33 = vmul.f32 %v11346_v29, %v12121_v23  ;;  %v175_v23 = vld [vmem:[%s13569_s6 + $0x20] sm:$0xff] }
 0x39f   :  { %v2460_v36 = vmul.f32 %v11348_v12, %v12124_v25  ;;  %v191_v29 = vld [vmem:[%s13570_s7 + $0x60] sm:$0xff]  ;;  %v194_v12 = vld [vmem:[%s13570_s7 + $0x78] sm:$0xff] }
 0x3a0   :  { %2494 = vrot.lane.b32.xlu0 %v12185_v0, %s11543_s27  ;;  %2492 = vrot.lane.b32.xlu1 %v12180_v30, %s11543_s27  ;;  %v2469_v37 = vmul.f32 %v2461_v33, %v168_v11 }
 0x3a1   :  { %v2468_v4 = vmul.f32 %v2460_v36, %v167_v34  ;;  %v193_v34 = vld [vmem:[%s13570_s7 + $0x70] sm:$0xff]  ;;  %v179_v36 = vld [vmem:[%s13570_s7] sm:$0xff] }
 0x3a2   :  { %v11350_v38 = vpop.eup %11349  ;;  %v12202_v39 = vadd.f32 %v2469_v37, %v176_v35  ;;  %v180_v37 = vld [vmem:[%s13570_s7 + $0x8] sm:$0xff] }
 0x3a3   :  { %v11352_v25 = vpop.eup %11351  ;;  %v12207_v55 = vadd.f32 %v2468_v4, %v175_v23  ;;  %v2463_v41 = vmul.f32 %v11350_v38, %v12132_v3  ;;  %v177_v3 = vld [vmem:[%s13569_s6 + $0x30] sm:$0xff]  ;;  %v182_v4 = vld [vmem:[%s13570_s7 + $0x18] sm:$0xff]  ;;  %v183_v38 = vld [vmem:[%s13570_s7 + $0x20] sm:$0xff] }
 0x3a4   :  { %2498 = vrot.lane.b32.xlu0 %v12202_v39, %s11543_s27  ;;  %v2462_v44 = vmul.f32 %v11352_v25, %v12136_v46  ;;  %v181_v23 = vld [vmem:[%s13570_s7 + $0x10] sm:$0xff]  ;;  %v184_v25 = vld [vmem:[%s13570_s7 + $0x28] sm:$0xff] }
 0x3a5   :  { %2496 = vrot.lane.b32.xlu1 %v12207_v55, %s11543_s27  ;;  %v2471_v45 = vmul.f32 %v2463_v41, %v170_v40 }
 0x3a6   :  { %v2470_v47 = vmul.f32 %v2462_v44, %v169_v1  ;;  %v185_v1 = vld [vmem:[%s13570_s7 + $0x30] sm:$0xff] }
 0x3a7   :  { %v12224_v49 = vadd.f32 %v2471_v45, %v178_v43  ;;  %v186_v43 = vld [vmem:[%s13570_s7 + $0x38] sm:$0xff] }
 0x3a8   :  { %v12226_v50 = vadd.f32 %v2470_v47, %v177_v3  ;;  %v196_v3 = vld [vmem:[%s13570_s7 + $0x88] sm:$0xff]  ;;  %v197_v47 = vld [vmem:[%s13570_s7 + $0x90] sm:$0xff] }
 0x3a9   :  { %2502 = vrot.lane.b32.xlu0 %v12224_v49, %s11543_s27 }
 0x3aa   :  { %2500 = vrot.lane.b32.xlu1 %v12226_v50, %s11543_s27 }
 0x40a   :  { %v12232_v46 = vpop.permute.xlu0 %2488 }
 0x40b   :  { %v2512_v51 = vsel %vm363_vm1, 0.0, %v12232_v46 }
 0x40c   :  { %2521 = vrot.lane.b32.xlu1 %v2512_v51, %s11546_s23 }
 0x40e   :  { %v12237_v52 = vpop.permute.xlu1 %2490 }
 0x40f   :  { %v2513_v53 = vsel %vm363_vm1, 0.0, %v12237_v52 }
 0x410   :  { %2598 = vrot.lane.b32.xlu0 %v2513_v53, %s11546_s23 }
 0x412   :  { %v12242_v54 = vpop.permute.xlu1 %2492  ;;  %v12244_v5 = vpop.permute.xlu0 %2494 }
 0x413   :  { %v2514_v56 = vsel %vm363_vm1, 0.0, %v12242_v54  ;;  %v2515_v57 = vsel %vm363_vm1, 0.0, %v12244_v5 }
 0x414   :  { %2675 = vrot.lane.b32.xlu1 %v2514_v56, %s11546_s23  ;;  %2752 = vrot.lane.b32.xlu0 %v2515_v57, %s11546_s23 }
 0x416   :  { %v12252_v58 = vpop.permute.xlu0 %2498 }
 0x417   :  { %v12254_v20 = vpop.permute.xlu1 %2496  ;;  %v2517_v60 = vsel %vm363_vm1, 0.0, %v12252_v58 }
 0x418   :  { %v2516_v61 = vsel %vm363_vm1, 0.0, %v12254_v20  ;;  %2906 = vrot.lane.b32.xlu0 %v2517_v60, %s11546_s23 }
 0x419   :  { %2829 = vrot.lane.b32.xlu1 %v2516_v61, %s11546_s23 }
 0x41b   :  { %v12262_v6 = vpop.permute.xlu0 %2502 }
 0x41c   :  { %v12264_v62 = vpop.permute.xlu1 %2500  ;;  %v2519_v63 = vsel %vm363_vm1, 0.0, %v12262_v6 }
 0x41d   :  { %v2518_v9 = vsel %vm363_vm1, 0.0, %v12264_v62  ;;  %3060 = vrot.lane.b32.xlu0 %v2519_v63, %s11546_s23 }
 0x41e   :  { %2983 = vrot.lane.b32.xlu1 %v2518_v9, %s11546_s23 }
 0x421   :  { %3796 = vrot.lane.b32.xlu0 %v2513_v53, %s11547_s1  ;;  %v199_v53 = vld [vmem:[%s13570_s7 + $0xa0] sm:$0xff] }
 0x422   :  { %3720 = vrot.lane.b32.xlu1 %v2512_v51, %s11547_s1  ;;  %v198_v51 = vld [vmem:[%s13570_s7 + $0x98] sm:$0xff] }
 0x425   :  { %3948 = vrot.lane.b32.xlu0 %v2515_v57, %s11547_s1  ;;  %v201_v57 = vld [vmem:[%s13570_s7 + $0xb0] sm:$0xff] }
 0x426   :  { %3872 = vrot.lane.b32.xlu1 %v2514_v56, %s11547_s1 }
 0x429   :  { %4100 = vrot.lane.b32.xlu0 %v2517_v60, %s11547_s1 }
 0x42a   :  { %4024 = vrot.lane.b32.xlu1 %v2516_v61, %s11547_s1 }
 0x42d   :  { %4252 = vrot.lane.b32.xlu0 %v2519_v63, %s11547_s1 }
 0x42e   :  { %4176 = vrot.lane.b32.xlu1 %v2518_v9, %s11547_s1 }
 0x431   :  { %4343 = vperm.xlu0 %11335, %v204_v10  }
 0x432   :  { %4338 = vperm.xlu1 %11336, %v203_v7  }
 0x435   :  { %4353 = vperm.xlu0 %11335, %v206_v13  }
 0x436   :  { %4348 = vperm.xlu1 %11336, %v205_v31  }
 0x439   :  { %4363 = vperm.xlu0 %11335, %v208_v14  }
 0x43a   :  { %4358 = vperm.xlu1 %11336, %v207_v2  }
 0x43d   :  { %4373 = vperm.xlu0 %11335, %v210_v16  }
 0x43e   :  { %4368 = vperm.xlu1 %11336, %v209_v17  }
 0x47e   :  { %v2522_v19 = vpop.permute.xlu1 %2521 }
 0x47f   :  { %10881 = vmatpush3.msra.mxu0 %v2522_v19 }
 0x480   :  { %10883 = vmatmul.mubr.msk.f32.vlgmr.msra.gmra.mrb[24].mxu0 %vm376_vm2, %v187_v18  ;;  %10890 = vmatprep.subr.mxu0 %v11544_v8 }
 0x481   :  { %10892 = vmatprep.mubr.msk.f32.mxu0 %vm11545_vm0, %v11544_v8 }
 0x482   :  { %v2599_v59 = vpop.permute.xlu0 %2598 }
 0x483   :  { %10886 = vmatpush3.msra.mxu1 %v2599_v59 }
 0x484   :  { %10888 = vmatmul.mubr.msk.f32.vlgmr.msra.gmra.mrb[24].mxu1 %vm376_vm2, %v188_v21  ;;  %10895 = vmatprep.subr.mxu1 %v11544_v8 }
 0x485   :  { %10897 = vmatprep.mubr.msk.f32.mxu1 %vm11545_vm0, %v11544_v8 }
 0x486   :  { %v2676_v24 = vpop.permute.xlu1 %2675  ;;  %v2753_v26 = vpop.permute.xlu0 %2752 }
 0x487   :  { %10891 = vmatpush3.msra.mxu0 %v2676_v24  ;;  %10896 = vmatpush3.msra.mxu1 %v2753_v26 }
 0x488   :  { %10893 = vmatmul.mubr.msk.f32.vlgmr.msra.gmra.mrb[26].mxu0 %vm376_vm2, %v189_v42  ;;  %10898 = vmatmul.mubr.msk.f32.vlgmr.msra.gmra.mrb[26].mxu1 %vm376_vm2, %v190_v32 }
 0x489   :  { %10900 = vmatprep.subr.mxu0 %v11544_v8  ;;  %10905 = vmatprep.subr.mxu1 %v11544_v8 }
 0x48a   :  { %v2907_v28 = vpop.permute.xlu0 %2906  ;;  %10902 = vmatprep.mubr.msk.f32.mxu0 %vm11545_vm0, %v11544_v8  ;;  %10907 = vmatprep.mubr.msk.f32.mxu1 %vm11545_vm0, %v11544_v8 }
 0x48b   :  { %v2830_v11 = vpop.permute.xlu1 %2829  ;;  %10906 = vmatpush3.msra.mxu1 %v2907_v28 }
 0x48c   :  { %10901 = vmatpush3.msra.mxu0 %v2830_v11  ;;  %10908 = vmatmul.mubr.msk.f32.vlgmr.msra.gmra.mrb[28].mxu1 %vm376_vm2, %v192_v27 }
 0x48d   :  { %10903 = vmatmul.mubr.msk.f32.vlgmr.msra.gmra.mrb[28].mxu0 %vm376_vm2, %v191_v29  ;;  %10910 = vmatprep.subr.mxu0 %v11544_v8 }
 0x48e   :  { %10915 = vmatprep.subr.mxu1 %v11544_v8  ;;  %10912 = vmatprep.mubr.msk.f32.mxu0 %vm11545_vm0, %v11544_v8 }
 0x48f   :  { %v3061_v33 = vpop.permute.xlu0 %3060  ;;  %10917 = vmatprep.mubr.msk.f32.mxu1 %vm11545_vm0, %v11544_v8 }
 0x490   :  { %v2984_v35 = vpop.permute.xlu1 %2983  ;;  %10916 = vmatpush3.msra.mxu1 %v3061_v33 }
 0x491   :  { %10911 = vmatpush3.msra.mxu0 %v2984_v35  ;;  %10918 = vmatmul.mubr.msk.f32.vlgmr.msra.gmra.mrb[30].mxu1 %vm376_vm2, %v194_v12 }
 0x492   :  { %10913 = vmatmul.mubr.msk.f32.vlgmr.msra.gmra.mrb[30].mxu0 %vm376_vm2, %v193_v34  ;;  %10920 = vmatprep.subr.mxu0 %v11544_v8 }
 0x493   :  { %10925 = vmatprep.subr.mxu1 %v11544_v8  ;;  %10921 = vmatpush3.msk.msra.mxu0 %vm11901_vm3, %v12232_v46  ;;  %v3797_v41 = vpop.permute.xlu0 %3796 }
 0x494   :  { %10926 = vmatpush3.msk.msra.mxu1 %vm11901_vm3, %v12237_v52  ;;  %10922 = vmatprep.mubr.msk.f32.mxu0 %vm11545_vm0, %v11544_v8  ;;  %v3721_v40 = vpop.permute.xlu1 %3720 }
 0x495   :  { %10927 = vmatprep.mubr.msk.f32.mxu1 %vm11545_vm0, %v11544_v8  ;;  %10930 = vmatprep.subr.mxu0 %v11544_v8 }
 0x496   :  { %10935 = vmatprep.subr.mxu1 %v11544_v8  ;;  %10923 = vmatmul.mubr.msk.f32.vlgmr.msra.gmra.mrb[32].mxu0 %vm376_vm2, %v179_v36 }
 0x497   :  { %10928 = vmatmul.mubr.msk.f32.vlgmr.msra.gmra.mrb[32].mxu1 %vm376_vm2, %v180_v37  ;;  %10931 = vmatpush3.msk.msra.mxu0 %vm11901_vm3, %v12242_v54  ;;  %v3949_v45 = vpop.permute.xlu0 %3948  ;;  %v200_v54 = vld [vmem:[%s13570_s7 + $0xa8] sm:$0xff] }
 0x498   :  { %10936 = vmatpush3.msk.msra.mxu1 %vm11901_vm3, %v12244_v5  ;;  %10932 = vmatprep.mubr.msk.f32.mxu0 %vm11545_vm0, %v11544_v8  ;;  %v3873_v44 = vpop.permute.xlu1 %3872 }
 0x499   :  { %10937 = vmatprep.mubr.msk.f32.mxu1 %vm11545_vm0, %v11544_v8  ;;  %10940 = vmatprep.subr.mxu0 %v11544_v8 }
 0x49a   :  { %10945 = vmatprep.subr.mxu1 %v11544_v8  ;;  %10933 = vmatmul.mubr.msk.f32.vlgmr.msra.gmra.mrb[34].mxu0 %vm376_vm2, %v181_v23 }
 0x49b   :  { %10938 = vmatmul.mubr.msk.f32.vlgmr.msra.gmra.mrb[34].mxu1 %vm376_vm2, %v182_v4  ;;  %10941 = vmatpush3.msk.msra.mxu0 %vm11901_vm3, %v12254_v20  ;;  %v4101_v52 = vpop.permute.xlu0 %4100 }
 0x49c   :  { %10946 = vmatpush3.msk.msra.mxu1 %vm11901_vm3, %v12252_v58  ;;  %10942 = vmatprep.mubr.msk.f32.mxu0 %vm11545_vm0, %v11544_v8  ;;  %v4025_v46 = vpop.permute.xlu1 %4024  ;;  %v202_v58 = vld [vmem:[%s13570_s7 + $0xb8] sm:$0xff] }
 0x49d   :  { %10947 = vmatprep.mubr.msk.f32.mxu1 %vm11545_vm0, %v11544_v8  ;;  %10950 = vmatprep.subr.mxu0 %v11544_v8 }
 0x49e   :  { %10955 = vmatprep.subr.mxu1 %v11544_v8  ;;  %10943 = vmatmul.mubr.msk.f32.vlgmr.msra.gmra.mrb[36].mxu0 %vm376_vm2, %v183_v38 }
 0x49f   :  { %10948 = vmatmul.mubr.msk.f32.vlgmr.msra.gmra.mrb[36].mxu1 %vm376_vm2, %v184_v25  ;;  %10951 = vmatpush3.msk.msra.mxu0 %vm11901_vm3, %v12264_v62  ;;  %v4253_v56 = vpop.permute.xlu0 %4252 }
 0x4a0   :  { %10956 = vmatpush3.msk.msra.mxu1 %vm11901_vm3, %v12262_v6  ;;  %10952 = vmatprep.mubr.msk.f32.mxu0 %vm11545_vm0, %v11544_v8  ;;  %v4177_v5 = vpop.permute.xlu1 %4176 }
 0x4a1   :  { %10957 = vmatprep.mubr.msk.f32.mxu1 %vm11545_vm0, %v11544_v8  ;;  %10960 = vmatprep.subr.mxu0 %v11544_v8 }
 0x4a2   :  { %10965 = vmatprep.subr.mxu1 %v11544_v8  ;;  %10953 = vmatmul.mubr.msk.f32.vlgmr.msra.gmra.mrb[38].mxu0 %vm376_vm2, %v185_v1 }
 0x4a3   :  { %10958 = vmatmul.mubr.msk.f32.vlgmr.msra.gmra.mrb[38].mxu1 %vm376_vm2, %v186_v43  ;;  %10961 = vmatpush3.msra.mxu0 %v3721_v40 }
 0x4a4   :  { %10966 = vmatpush3.msra.mxu1 %v3797_v41  ;;  %10962 = vmatprep.mubr.msk.f32.mxu0 %vm11545_vm0, %v11544_v8 }
 0x4a5   :  { %10967 = vmatprep.mubr.msk.f32.mxu1 %vm11545_vm0, %v11544_v8  ;;  %10970 = vmatprep.subr.mxu0 %v11544_v8 }
 0x4a6   :  { %10975 = vmatprep.subr.mxu1 %v11544_v8  ;;  %10963 = vmatmul.mubr.msk.f32.vlgmr.msra.gmra.mrb[40].mxu0 %vm376_vm2, %v195_v48 }
 0x4a7   :  { %10968 = vmatmul.mubr.msk.f32.vlgmr.msra.gmra.mrb[40].mxu1 %vm376_vm2, %v196_v3  ;;  %10971 = vmatpush3.msra.mxu0 %v3873_v44 }
 0x4a8   :  { %10976 = vmatpush3.msra.mxu1 %v3949_v45  ;;  %10972 = vmatprep.mubr.msk.f32.mxu0 %vm11545_vm0, %v11544_v8 }
 0x4a9   :  { %10977 = vmatprep.mubr.msk.f32.mxu1 %vm11545_vm0, %v11544_v8  ;;  %10980 = vmatprep.subr.mxu0 %v11544_v8 }
 0x4aa   :  { %10985 = vmatprep.subr.mxu1 %v11544_v8  ;;  %10973 = vmatmul.mubr.msk.f32.vlgmr.msra.gmra.mrb[42].mxu0 %vm376_vm2, %v197_v47 }
 0x4ab   :  { %10978 = vmatmul.mubr.msk.f32.vlgmr.msra.gmra.mrb[42].mxu1 %vm376_vm2, %v198_v51  ;;  %10981 = vmatpush3.msra.mxu0 %v4025_v46 }
 0x4ac   :  { %10986 = vmatpush3.msra.mxu1 %v4101_v52  ;;  %10982 = vmatprep.mubr.msk.f32.mxu0 %vm11545_vm0, %v11544_v8 }
 0x4ad   :  { %10987 = vmatprep.mubr.msk.f32.mxu1 %vm11545_vm0, %v11544_v8  ;;  %10990 = vmatprep.subr.mxu0 %v11544_v8 }
 0x4ae   :  { %10995 = vmatprep.subr.mxu1 %v11544_v8  ;;  %10983 = vmatmul.mubr.msk.f32.vlgmr.msra.gmra.mrb[44].mxu0 %vm376_vm2, %v199_v53 }
 0x4af   :  { %10988 = vmatmul.mubr.msk.f32.vlgmr.msra.gmra.mrb[44].mxu1 %vm376_vm2, %v200_v54  ;;  %10991 = vmatpush3.msra.mxu0 %v4177_v5 }
 0x4b0   :  { %10996 = vmatpush3.msra.mxu1 %v4253_v56  ;;  %10992 = vmatprep.mubr.msk.f32.mxu0 %vm11545_vm0, %v11544_v8  ;;  %v4344_v1 = vpop.permute.xlu0 %4343 }
 0x4b1   :  { %10997 = vmatprep.mubr.msk.f32.mxu1 %vm11545_vm0, %v11544_v8  ;;  %11000 = vmatprep.subr.mxu0 %v11544_v8  ;;  %v4339_v4 = vpop.permute.xlu1 %4338 }
 0x4b2   :  { %10993 = vmatmul.mubr.msk.f32.vlgmr.msra.gmra.mrb[46].mxu0 %vm376_vm2, %v201_v57  ;;  %11005 = vmatprep.subr.mxu1 %v11544_v8 }
 0x4b3   :  { %10998 = vmatmul.mubr.msk.f32.vlgmr.msra.gmra.mrb[46].mxu1 %vm376_vm2, %v202_v58  ;;  %11002 = vmatprep.mubr.msk.f32.mxu0 %vm11545_vm0, %v11544_v8 }
 0x4b4   :  { %11007 = vmatprep.mubr.msk.f32.mxu1 %vm11545_vm0, %v11544_v8  ;;  %v4354_v54 = vpop.permute.xlu0 %4353 }
 0x4b5   :  { %v4349_v46 = vpop.permute.xlu1 %4348 }
 0x553   :  { %v2593_v20 = vpop.f32.mrb[24].mxu0 }
 0x554   :  { %v10884_v60 = vpop.f32.mrb[25].mxu0 }
 0x557   :  { %v2670_v61 = vpop.f32.mrb[24].mxu1 }
 0x558   :  { %v10889_v6 = vpop.f32.mrb[25].mxu1 }
 0x55b   :  { %v2747_v62 = vpop.f32.mrb[26].mxu0  ;;  %v2824_v63 = vpop.f32.mrb[26].mxu1 }
 0x55c   :  { %v10894_v9 = vpop.f32.mrb[27].mxu0  ;;  %v10899_v10 = vpop.f32.mrb[27].mxu1 }
 0x55d   :  { %v4359_v10 = vpop.permute.xlu1 %4358 }
 0x55f   :  { %v2978_v7 = vpop.f32.mrb[28].mxu1 }
 0x560   :  { %v2901_v13 = vpop.f32.mrb[28].mxu0  ;;  %v10909_v31 = vpop.f32.mrb[29].mxu1 }
 0x561   :  { %v10904_v14 = vpop.f32.mrb[29].mxu0 }
 0x564   :  { %v3132_v2 = vpop.f32.mrb[30].mxu1 }
 0x565   :  { %v3055_v16 = vpop.f32.mrb[30].mxu0  ;;  %v10919_v17 = vpop.f32.mrb[31].mxu1 }
 0x566   :  { %v10914_v18 = vpop.f32.mrb[31].mxu0 }
 0x569   :  { %v3205_v19 = vpop.f32.mrb[32].mxu0 }
 0x56a   :  { %v3206_v21 = vadd.f32 %v3205_v19, %v2593_v20  ;;  %v3278_v59 = vpop.f32.mrb[32].mxu1  ;;  %v10924_v42 = vpop.f32.mrb[33].mxu0 }
 0x56b   :  { %v3279_v32 = vadd.f32 %v3278_v59, %v2670_v61  ;;  %v10929_v24 = vpop.f32.mrb[33].mxu1  ;;  %v4364_v19 = vpop.permute.xlu0 %4363 }
 0x56d   :  { %v3351_v26 = vpop.f32.mrb[34].mxu0 }
 0x56e   :  { %v3352_v27 = vadd.f32 %v3351_v26, %v2747_v62  ;;  %v3424_v28 = vpop.f32.mrb[34].mxu1  ;;  %v10934_v29 = vpop.f32.mrb[35].mxu0 }
 0x56f   :  { %v3425_v11 = vadd.f32 %v3424_v28, %v2824_v63  ;;  %v10939_v12 = vpop.f32.mrb[35].mxu1 }
 0x571   :  { %v3497_v33 = vpop.f32.mrb[36].mxu0 }
 0x572   :  { %v3498_v34 = vadd.f32 %v3497_v33, %v2901_v13  ;;  %v3570_v35 = vpop.f32.mrb[36].mxu1  ;;  %v10944_v36 = vpop.f32.mrb[37].mxu0 }
 0x573   :  { %v3571_v37 = vadd.f32 %v3570_v35, %v2978_v7  ;;  %v10949_v23 = vpop.f32.mrb[37].mxu1 }
 0x574   :  { %v237_v23 = vld [vmem:[%s13575_s12 + $0x10] sm:$0xff] }
 0x575   :  { %v3643_v38 = vpop.f32.mrb[38].mxu0 }
 0x576   :  { %v3644_v40 = vadd.f32 %v3643_v38, %v3055_v16  ;;  %v3716_v25 = vpop.f32.mrb[38].mxu1  ;;  %v10954_v41 = vpop.f32.mrb[39].mxu0  ;;  %v238_v38 = vld [vmem:[%s13575_s12 + $0x18] sm:$0xff] }
 0x577   :  { %v3717_v43 = vadd.f32 %v3716_v25, %v3132_v2  ;;  %v10959_v44 = vpop.f32.mrb[39].mxu1 }
 0x579   :  { %v3792_v45 = vpop.f32.mrb[40].mxu0 }
 0x57a   :  { %v4328_v48 = vadd.f32 %v3792_v45, %v3206_v21  ;;  %v3868_v3 = vpop.f32.mrb[40].mxu1  ;;  %v10964_v47 = vpop.f32.mrb[41].mxu0 }
 0x57b   :  { %v4329_v51 = vadd.f32 %v3868_v3, %v3279_v32  ;;  %v10969_v52 = vpop.f32.mrb[41].mxu1 }
 0x57c   :  { %v4376_v53 = vadd.f32 %v4339_v4, %v4328_v48  ;;  %v228_v4 = vld [vmem:[%s13574_s11 + $0x8] sm:$0xff] }
 0x57d   :  { %v4377_v5 = vadd.f32 %v4344_v1, %v4329_v51  ;;  %v3944_v56 = vpop.f32.mrb[42].mxu0 }
 0x57e   :  { %v4330_v57 = vadd.f32 %v3944_v56, %v3352_v27  ;;  %v4020_v58 = vpop.f32.mrb[42].mxu1  ;;  %v10974_v20 = vpop.f32.mrb[43].mxu0  ;;  %v12497_v60 = vadd.f32 %v4376_v53, %v12154_v15 }
 0x57f   :  { %v4331_v61 = vadd.f32 %v4020_v58, %v3425_v11  ;;  %v10979_v6 = vpop.f32.mrb[43].mxu1  ;;  %v12500_v62 = vadd.f32 %v4377_v5, %v12169_v22 }
 0x580   :  { %v4378_v63 = vadd.f32 %v4349_v46, %v4330_v57  ;;  %v4392_v9 = vsel %vm2245_vm4, %v12497_v60, 0.0 }
 0x581   :  { %v4379_v7 = vadd.f32 %v4354_v54, %v4331_v61  ;;  %v4096_v13 = vpop.f32.mrb[44].mxu0  ;;  %4393 = vadd.xlane.f32.xlu1 %v4392_v9  ;;  %v4395_v31 = vsel %vm2245_vm4, %v12500_v62, 0.0 }
 0x582   :  { %v4332_v14 = vadd.f32 %v4096_v13, %v3498_v34  ;;  %v4172_v2 = vpop.f32.mrb[44].mxu1  ;;  %4396 = vadd.xlane.f32.xlu0 %v4395_v31  ;;  %v10984_v15 = vpop.f32.mrb[45].mxu0  ;;  %v12507_v16 = vadd.f32 %v4378_v63, %v12180_v30 }
 0x583   :  { %v4333_v22 = vadd.f32 %v4172_v2, %v3571_v37  ;;  %v10989_v17 = vpop.f32.mrb[45].mxu1  ;;  %v12510_v18 = vadd.f32 %v4379_v7, %v12185_v0  ;;  %v4369_v0 = vpop.permute.xlu1 %4368  ;;  %v227_v37 = vld [vmem:[%s13574_s11] sm:$0xff] }
 0x584   :  { %v4380_v21 = vadd.f32 %v4359_v10, %v4332_v14  ;;  %v4398_v59 = vsel %vm2245_vm4, %v12507_v16, 0.0 }
 0x585   :  { %v4381_v42 = vadd.f32 %v4364_v19, %v4333_v22  ;;  %v4248_v32 = vpop.f32.mrb[46].mxu0  ;;  %v4401_v24 = vsel %vm2245_vm4, %v12510_v18, 0.0 }
 0x586   :  { %v4334_v26 = vadd.f32 %v4248_v32, %v3644_v40  ;;  %v4324_v27 = vpop.f32.mrb[46].mxu1  ;;  %4399 = vadd.xlane.f32.xlu0 %v4398_v59  ;;  %4402 = vadd.xlane.f32.xlu1 %v4401_v24  ;;  %v12517_v30 = vadd.f32 %v4380_v21, %v12207_v55  ;;  %v10994_v28 = vpop.f32.mrb[47].mxu0 }
 0x587   :  { %v4335_v29 = vadd.f32 %v4324_v27, %v3717_v43  ;;  %v12520_v11 = vadd.f32 %v4381_v42, %v12202_v39  ;;  %v10999_v12 = vpop.f32.mrb[47].mxu1  ;;  %v236_v39 = vld [vmem:[%s13575_s12 + $0x8] sm:$0xff]  ;;  %v4374_v40 = vpop.permute.xlu0 %4373  ;;  %v229_v43 = vld [vmem:[%s13574_s11 + $0x10] sm:$0xff] }
 0x588   :  { %v4382_v33 = vadd.f32 %v4369_v0, %v4334_v26  ;;  %v4404_v34 = vsel %vm2245_vm4, %v12517_v30, 0.0 }
 0x589   :  { %v4407_v35 = vsel %vm2245_vm4, %v12520_v11, 0.0  ;;  %v4383_v25 = vadd.f32 %v4374_v40, %v4335_v29 }
 0x58a   :  { %4405 = vadd.xlane.f32.xlu0 %v4404_v34  ;;  %4408 = vadd.xlane.f32.xlu1 %v4407_v35  ;;  %v12527_v36 = vadd.f32 %v4382_v33, %v12226_v50  ;;  %v235_v50 = vld [vmem:[%s13575_s12] sm:$0xff] }
 0x58b   :  { %v12550_v41 = vadd.f32 %v4383_v25, %v12224_v49 }
 0x58c   :  { %v4410_v55 = vsel %vm2245_vm4, %v12527_v36, 0.0 }
 0x58d   :  { %v4413_v1 = vsel %vm2245_vm4, %v12550_v41, 0.0 }
 0x58e   :  { %4411 = vadd.xlane.f32.xlu0 %v4410_v55 }
 0x59b   :  { %4679 = vperm.xlu1 %11336, %v236_v39  }
 0x59f   :  { %4626 = vperm.xlu1 %11336, %v227_v37  }
 0x5a3   :  { %4684 = vperm.xlu1 %11336, %v237_v23  }
 0x5a4   :  { %4674 = vperm.xlu0 %11335, %v235_v50  }
 0x5a8   :  { %4631 = vperm.xlu0 %11335, %v228_v4  }
 0x5ac   :  { %4689 = vperm.xlu0 %11335, %v238_v38  }
 0x5c7   :  { %4414 = vadd.xlane.f32.xlu1 %v4413_v1 }
 0x5d8   :  { %4636 = vperm.xlu1 %11336, %v229_v43  }
 0x60e   :  { %v4394_v44 = vpop.xlane.xlu1 %4393 }
 0x60f   :  { %v4416_v45 = vmul.f32 0.0625, %v4394_v44  ;;  %v4397_v48 = vpop.xlane.xlu0 %4396 }
 0x610   :  { %v4417_v3 = vmul.f32 0.0625, %v4397_v48 }
 0x611   :  { %v4424_v47 = vrot.slane %v4416_v45, 4 }
 0x612   :  { %v4430_v46 = vrot.slane %v4417_v3, 4 }
 0x613   :  { %v4425_v51 = vadd.f32 %v4424_v47, %v4416_v45  ;;  %v4403_v52 = vpop.xlane.xlu1 %4402  ;;  %v4400_v53 = vpop.xlane.xlu0 %4399 }
 0x614   :  { %v4431_v49 = vadd.f32 %v4430_v46, %v4417_v3  ;;  %v4419_v54 = vmul.f32 0.0625, %v4403_v52  ;;  %v4418_v5 = vmul.f32 0.0625, %v4400_v53 }
 0x615   :  { %v4426_v56 = vrot.slane %v4425_v51, 2 }
 0x616   :  { %v4432_v57 = vrot.slane %v4431_v49, 2  ;;  %v4442_v58 = vrot.slane %v4419_v54, 4  ;;  %v4436_v20 = vrot.slane %v4418_v5, 4 }
 0x617   :  { %v4427_v61 = vadd.f32 %v4426_v56, %v4425_v51  ;;  %v4409_v6 = vpop.xlane.xlu1 %4408  ;;  %v4406_v63 = vpop.xlane.xlu0 %4405 }
 0x618   :  { %v4433_v9 = vadd.f32 %v4432_v57, %v4431_v49  ;;  %v4443_v10 = vadd.f32 %v4442_v58, %v4419_v54  ;;  %v4437_v7 = vadd.f32 %v4436_v20, %v4418_v5  ;;  %v4421_v13 = vmul.f32 0.0625, %v4409_v6 }
 0x619   :  { %v4428_v31 = vrot.slane %v4427_v61, 1  ;;  %v4420_v14 = vmul.f32 0.0625, %v4406_v63 }
 0x61a   :  { %v4434_v2 = vrot.slane %v4433_v9, 1  ;;  %v4444_v15 = vrot.slane %v4443_v10, 2  ;;  %v4438_v22 = vrot.slane %v4437_v7, 2  ;;  %v4454_v17 = vrot.slane %v4421_v13, 4 }
 0x61b   :  { %v4448_v19 = vrot.slane %v4420_v14, 4  ;;  %v4412_v21 = vpop.xlane.xlu0 %4411  ;;  %v4429_v59 = vadd.f32 %v4428_v31, %v4427_v61  ;;  %v239_v31 = vld [vmem:[%s13575_s12 + $0x20] sm:$0xff] }
 0x61c   :  { %v4445_v42 = vadd.f32 %v4444_v15, %v4443_v10  ;;  %v4439_v32 = vadd.f32 %v4438_v22, %v4437_v7  ;;  %v4455_v24 = vadd.f32 %v4454_v17, %v4421_v13  ;;  %v4422_v26 = vmul.f32 0.0625, %v4412_v21  ;;  %v232_v22 = vld [vmem:[%s13574_s11 + $0x28] sm:$0xff] }
 0x61d   :  { %v4449_v27 = vadd.f32 %v4448_v19, %v4420_v14  ;;  %v4472_v28 = vmul.f32 0.125, %v4429_v59  ;;  %v4435_v0 = vadd.f32 %v4434_v2, %v4433_v9  ;;  %v12602_v14 = vpop.permute.xlu1 %4679  ;;  %v240_v2 = vld [vmem:[%s13575_s12 + $0x28] sm:$0xff]  ;;  %v242_v19 = vld [vmem:[%s13575_s12 + $0x38] sm:$0xff] }
 0x61e   :  { %v4446_v29 = vrot.slane %v4445_v42, 1  ;;  %v4440_v12 = vrot.slane %v4439_v32, 1  ;;  %v4456_v33 = vrot.slane %v4455_v24, 2  ;;  %v4460_v34 = vrot.slane %v4422_v26, 4 }
 0x61f   :  { %v4450_v35 = vrot.slane %v4449_v27, 2  ;;  %v12558_v55 = vsub.f32 %v12497_v60, %v4472_v28  ;;  %v4473_v39 = vmul.f32 0.125, %v4435_v0 }
 0x620   :  { %v4447_v37 = vadd.f32 %v4446_v29, %v4445_v42  ;;  %v4457_v23 = vadd.f32 %v4456_v33, %v4455_v24  ;;  %v4461_v50 = vadd.f32 %v4460_v34, %v4422_v26  ;;  %v4441_v4 = vadd.f32 %v4440_v12, %v4439_v32  ;;  %v234_v42 = vld [vmem:[%s13574_s11 + $0x38] sm:$0xff] }
 0x621   :  { %v4451_v38 = vadd.f32 %v4450_v35, %v4449_v27  ;;  %v4488_v40 = vmul.f32 %v12558_v55, %v12558_v55  ;;  %v12563_v25 = vsub.f32 %v12500_v62, %v4473_v39  ;;  %v12610_v15 = vpop.permute.xlu1 %4626  ;;  %v231_v35 = vld [vmem:[%s13574_s11 + $0x20] sm:$0xff]  ;;  %v241_v39 = vld [vmem:[%s13575_s12 + $0x30] sm:$0xff] }
 0x622   :  { %v4458_v1 = vrot.slane %v4457_v23, 1  ;;  %v4462_v43 = vrot.slane %v4461_v50, 2  ;;  %v4475_v44 = vmul.f32 0.125, %v4447_v37  ;;  %v4474_v45 = vmul.f32 0.125, %v4441_v4 }
 0x623   :  { %v4452_v48 = vrot.slane %v4451_v38, 1  ;;  %v4496_v60 = vsel %vm2245_vm4, %v4488_v40, 0.0  ;;  %v4489_v3 = vmul.f32 %v12563_v25, %v12563_v25  ;;  %v12638_v37 = vpop.permute.xlu0 %4674 }
 0x624   :  { %v4459_v47 = vadd.f32 %v4458_v1, %v4457_v23  ;;  %v4463_v46 = vadd.f32 %v4462_v43, %v4461_v50  ;;  %4497 = vadd.xlane.f32.xlu0 %v4496_v60  ;;  %v12569_v51 = vsub.f32 %v12510_v18, %v4475_v44  ;;  %v12572_v52 = vsub.f32 %v12507_v16, %v4474_v45 }
 0x625   :  { %v4453_v62 = vadd.f32 %v4452_v48, %v4451_v38  ;;  %v4499_v53 = vsel %vm2245_vm4, %v4489_v3, 0.0  ;;  %v12615_v17 = vpop.permute.xlu1 %4684 }
 0x626   :  { %v4464_v49 = vrot.slane %v4463_v46, 1  ;;  %4500 = vadd.xlane.f32.xlu1 %v4499_v53  ;;  %v4491_v54 = vmul.f32 %v12569_v51, %v12569_v51  ;;  %v4490_v5 = vmul.f32 %v12572_v52, %v12572_v52  ;;  %v4477_v56 = vmul.f32 0.125, %v4459_v47 }
 0x627   :  { %v4476_v57 = vmul.f32 0.125, %v4453_v62  ;;  %v12640_v23 = vpop.permute.xlu0 %4631 }
 0x628   :  { %v4465_v58 = vadd.f32 %v4464_v49, %v4463_v46  ;;  %v4505_v18 = vsel %vm2245_vm4, %v4491_v54, 0.0  ;;  %v4502_v20 = vsel %vm2245_vm4, %v4490_v5, 0.0  ;;  %v12582_v16 = vsub.f32 %v12520_v11, %v4477_v56 }
 0x629   :  { %4503 = vadd.xlane.f32.xlu0 %v4502_v20  ;;  %v12585_v61 = vsub.f32 %v12517_v30, %v4476_v57 }
 0x62a   :  { %4506 = vadd.xlane.f32.xlu1 %v4505_v18  ;;  %v4493_v6 = vmul.f32 %v12582_v16, %v12582_v16  ;;  %v4478_v63 = vmul.f32 0.125, %v4465_v58 }
 0x62b   :  { %v4492_v9 = vmul.f32 %v12585_v61, %v12585_v61  ;;  %v12642_v50 = vpop.permute.xlu0 %4689 }
 0x62c   :  { %v4511_v10 = vsel %vm2245_vm4, %v4493_v6, 0.0  ;;  %v12593_v7 = vsub.f32 %v12527_v36, %v4478_v63  ;;  %v230_v36 = vld [vmem:[%s13574_s11 + $0x18] sm:$0xff] }
 0x62d   :  { %v4508_v11 = vsel %vm2245_vm4, %v4492_v9, 0.0 }
 0x62e   :  { %4512 = vadd.xlane.f32.xlu1 %v4511_v10  ;;  %4509 = vadd.xlane.f32.xlu0 %v4508_v11  ;;  %v4494_v30 = vmul.f32 %v12593_v7, %v12593_v7 }
 0x630   :  { %v4514_v13 = vsel %vm2245_vm4, %v4494_v30, 0.0 }
 0x632   :  { %4515 = vadd.xlane.f32.xlu0 %v4514_v13 }
 0x63f   :  { %4694 = vperm.xlu1 %11336, %v239_v31  }
 0x648   :  { %4641 = vperm.xlu0 %11335, %v230_v36  }
 0x64c   :  { %4699 = vperm.xlu0 %11335, %v240_v2  }
 0x650   :  { %4651 = vperm.xlu0 %11335, %v232_v22  }
 0x654   :  { %4709 = vperm.xlu0 %11335, %v242_v19   ;;  %v4415_v21 = vpop.xlane.xlu1 %4414 }
 0x655   :  { %v4423_v59 = vmul.f32 0.0625, %v4415_v21 }
 0x657   :  { %v4466_v32 = vrot.slane %v4423_v59, 4 }
 0x658   :  { %4661 = vperm.xlu0 %11335, %v234_v42   ;;  %v12644_v4 = vpop.permute.xlu1 %4636 }
 0x659   :  { %v4467_v24 = vadd.f32 %v4466_v32, %v4423_v59 }
 0x65b   :  { %v4468_v26 = vrot.slane %v4467_v24, 2 }
 0x65d   :  { %v4469_v27 = vadd.f32 %v4468_v26, %v4467_v24 }
 0x65f   :  { %v4470_v28 = vrot.slane %v4469_v27, 1 }
 0x661   :  { %v4471_v0 = vadd.f32 %v4470_v28, %v4469_v27 }
 0x663   :  { %v4479_v29 = vmul.f32 0.125, %v4471_v0 }
 0x665   :  { %v12624_v12 = vsub.f32 %v12550_v41, %v4479_v29  ;;  %v233_v41 = vld [vmem:[%s13574_s11 + $0x30] sm:$0xff] }
 0x667   :  { %v4495_v33 = vmul.f32 %v12624_v12, %v12624_v12 }
 0x669   :  { %v4517_v34 = vsel %vm2245_vm4, %v4495_v33, 0.0 }
 0x66a   :  { %4518 = vadd.xlane.f32.xlu1 %v4517_v34 }
 0x67b   :  { %4646 = vperm.xlu1 %11336, %v231_v35  }
 0x67f   :  { %4704 = vperm.xlu1 %11336, %v241_v39  }
 0x683   :  { %4656 = vperm.xlu1 %11336, %v233_v41  }
 0x6b1   :  { %v4498_v38 = vpop.xlane.xlu0 %4497 }
 0x6b2   :  { %v4520_v40 = vmul.f32 0.0625, %v4498_v38 }
 0x6b3   :  { %v4501_v1 = vpop.xlane.xlu1 %4500 }
 0x6b4   :  { %v4521_v43 = vmul.f32 0.0625, %v4501_v1  ;;  %v4528_v44 = vrot.slane %v4520_v40, 4 }
 0x6b6   :  { %v4534_v45 = vrot.slane %v4521_v43, 4  ;;  %v4529_v48 = vadd.f32 %v4528_v44, %v4520_v40  ;;  %v4504_v60 = vpop.xlane.xlu0 %4503 }
 0x6b7   :  { %v4507_v3 = vpop.xlane.xlu1 %4506  ;;  %v4522_v47 = vmul.f32 0.0625, %v4504_v60 }
 0x6b8   :  { %v4535_v46 = vadd.f32 %v4534_v45, %v4521_v43  ;;  %v4530_v62 = vrot.slane %v4529_v48, 2  ;;  %v4523_v53 = vmul.f32 0.0625, %v4507_v3 }
 0x6b9   :  { %v4540_v49 = vrot.slane %v4522_v47, 4 }
 0x6ba   :  { %v4536_v54 = vrot.slane %v4535_v46, 2  ;;  %v4531_v5 = vadd.f32 %v4530_v62, %v4529_v48  ;;  %v4546_v56 = vrot.slane %v4523_v53, 4 }
 0x6bb   :  { %v4541_v57 = vadd.f32 %v4540_v49, %v4522_v47  ;;  %v4513_v58 = vpop.xlane.xlu1 %4512  ;;  %v4510_v18 = vpop.xlane.xlu0 %4509 }
 0x6bc   :  { %v4537_v20 = vadd.f32 %v4536_v54, %v4535_v46  ;;  %v4532_v6 = vrot.slane %v4531_v5, 1  ;;  %v4547_v63 = vadd.f32 %v4546_v56, %v4523_v53  ;;  %v4525_v9 = vmul.f32 0.0625, %v4513_v58 }
 0x6bd   :  { %v4542_v10 = vrot.slane %v4541_v57, 2  ;;  %v4524_v11 = vmul.f32 0.0625, %v4510_v18 }
 0x6be   :  { %v4538_v30 = vrot.slane %v4537_v20, 1  ;;  %v4533_v13 = vadd.f32 %v4532_v6, %v4531_v5  ;;  %v4548_v31 = vrot.slane %v4547_v63, 2  ;;  %v4558_v36 = vrot.slane %v4525_v9, 4  ;;  %v212_v6 = vld [vmem:[%s13572_s9 + $0x8] sm:$0xff] }
 0x6bf   :  { %v4543_v2 = vadd.f32 %v4542_v10, %v4541_v57  ;;  %v4552_v22 = vrot.slane %v4524_v11, 4  ;;  %v4516_v29 = vpop.xlane.xlu0 %4515  ;;  %v211_v57 = vld [vmem:[%s13572_s9] sm:$0xff] }
 0x6c0   :  { %v4539_v19 = vadd.f32 %v4538_v30, %v4537_v20  ;;  %v4576_v21 = vmul.f32 0.125, %v4533_v13  ;;  %v4549_v59 = vadd.f32 %v4548_v31, %v4547_v63  ;;  %v4559_v42 = vadd.f32 %v4558_v36, %v4525_v9  ;;  %v219_v20 = vld [vmem:[#allocation5] sm:$0xff] }
 0x6c1   :  { %v4544_v32 = vrot.slane %v4543_v2, 1  ;;  %v4553_v24 = vadd.f32 %v4552_v22, %v4524_v11  ;;  %v4526_v1 = vmul.f32 0.0625, %v4516_v29  ;;  %v220_v11 = vld [vmem:[#allocation5 + $0x8] sm:$0xff]  ;;  %v214_v22 = vld [vmem:[%s13572_s9 + $0x18] sm:$0xff] }
 0x6c2   :  { %v4577_v26 = vmul.f32 0.125, %v4539_v19  ;;  %v4584_v27 = vadd.f32 1e-05, %v4576_v21  ;;  %v4550_v28 = vrot.slane %v4549_v59, 1  ;;  %v4560_v0 = vrot.slane %v4559_v42, 2 }
 0x6c3   :  { %v4545_v33 = vadd.f32 %v4544_v32, %v4543_v2  ;;  %v4554_v34 = vrot.slane %v4553_v24, 2  ;;  %v4564_v46 = vrot.slane %v4526_v1, 4  ;;  %v221_v32 = vld [vmem:[#allocation5 + $0x10] sm:$0xff] }
 0x6c4   :  { %v4585_v35 = vadd.f32 1e-05, %v4577_v26  ;;  %11353 = vrsqrt.f32 %v4584_v27  ;;  %v4551_v39 = vadd.f32 %v4550_v28, %v4549_v59  ;;  %v4561_v41 = vadd.f32 %v4560_v0, %v4559_v42 }
 0x6c5   :  { %v4578_v38 = vmul.f32 0.125, %v4545_v33  ;;  %v4555_v40 = vadd.f32 %v4554_v34, %v4553_v24  ;;  %v4565_v5 = vadd.f32 %v4564_v46, %v4526_v1  ;;  %v222_v24 = vld [vmem:[#allocation5 + $0x18] sm:$0xff] }
 0x6c6   :  { %11355 = vrsqrt.f32 %v4585_v35  ;;  %v4579_v43 = vmul.f32 0.125, %v4551_v39  ;;  %v4562_v44 = vrot.slane %v4561_v41, 1  ;;  %v215_v33 = vld [vmem:[%s13572_s9 + $0x20] sm:$0xff] }
 0x6c7   :  { %v4586_v45 = vadd.f32 1e-05, %v4578_v38  ;;  %v4556_v48 = vrot.slane %v4555_v40, 1  ;;  %v4566_v9 = vrot.slane %v4565_v5, 2  ;;  %v4642_v21 = vpop.permute.xlu0 %4641 }
 0x6c8   :  { %v4587_v60 = vadd.f32 1e-05, %v4579_v43  ;;  %v4563_v3 = vadd.f32 %v4562_v44, %v4561_v41  ;;  %v224_v41 = vld [vmem:[#allocation5 + $0x28] sm:$0xff] }
 0x6c9   :  { %11357 = vrsqrt.f32 %v4586_v45  ;;  %v4557_v47 = vadd.f32 %v4556_v48, %v4555_v40  ;;  %v4567_v19 = vadd.f32 %v4566_v9, %v4565_v5  ;;  %v223_v40 = vld [vmem:[#allocation5 + $0x20] sm:$0xff]  ;;  %v4695_v48 = vpop.permute.xlu1 %4694  ;;  %v217_v5 = vld [vmem:[%s13572_s9 + $0x30] sm:$0xff] }
 0x6ca   :  { %11359 = vrsqrt.f32 %v4587_v60  ;;  %v4581_v62 = vmul.f32 0.125, %v4563_v3 }
 0x6cb   :  { %v4580_v53 = vmul.f32 0.125, %v4557_v47  ;;  %v4568_v34 = vrot.slane %v4567_v19, 1  ;;  %v4700_v43 = vpop.permute.xlu0 %4699 }
 0x6cc   :  { %v4589_v49 = vadd.f32 1e-05, %v4581_v62 }
 0x6cd   :  { %v4588_v54 = vadd.f32 1e-05, %v4580_v53 }
 0x6ce   :  { %v11354_v56 = vpop.eup %11353  ;;  %11361 = vrsqrt.f32 %v4589_v49 }
 0x6cf   :  { %v4600_v58 = vmul.f32 %v11354_v56, %v12558_v55  ;;  %11363 = vrsqrt.f32 %v4588_v54  ;;  %v213_v55 = vld [vmem:[%s13572_s9 + $0x10] sm:$0xff]  ;;  %v4652_v47 = vpop.permute.xlu0 %4651 }
 0x6d0   :  { %v11356_v18 = vpop.eup %11355 }
 0x6d1   :  { %v4601_v63 = vmul.f32 %v11356_v18, %v12563_v25  ;;  %v4608_v10 = vmul.f32 %v4600_v58, %v211_v57 }
 0x6d3   :  { %v11358_v30 = vpop.eup %11357  ;;  %v12654_v13 = vadd.f32 %v4608_v10, %v219_v20  ;;  %v4609_v31 = vmul.f32 %v4601_v63, %v212_v6  ;;  %v225_v20 = vld [vmem:[#allocation5 + $0x30] sm:$0xff] }
 0x6d4   :  { %v11360_v36 = vpop.eup %11359  ;;  %v4602_v2 = vmul.f32 %v11358_v30, %v12572_v52 }
 0x6d5   :  { %v4603_v25 = vmul.f32 %v11360_v36, %v12569_v51  ;;  %v4712_v59 = vmul.f32 %v12638_v37, %v12654_v13  ;;  %v12666_v42 = vadd.f32 %v4609_v31, %v220_v11  ;;  %v216_v51 = vld [vmem:[%s13572_s9 + $0x28] sm:$0xff]  ;;  %v4664_v0 = vmul.f32 %v12610_v15, %v12654_v13 }
 0x6d6   :  { %v4610_v26 = vmul.f32 %v4602_v2, %v213_v55 }
 0x6d7   :  { %v4611_v27 = vmul.f32 %v4603_v25, %v214_v22  ;;  %11001 = vmatpush3.xpose.msk.msra.mxu0 %vm2245_vm4, %v4712_v59  ;;  %v4713_v52 = vmul.f32 %v12602_v14, %v12666_v42  ;;  %v4665_v15 = vmul.f32 %v12640_v23, %v12666_v42  ;;  %v4569_v23 = vadd.f32 %v4568_v34, %v4567_v19 }
 0x6d8   :  { %v11362_v28 = vpop.eup %11361  ;;  %11010 = vmatprep.subr.mxu0 %v11544_v8  ;;  %v12677_v37 = vadd.f32 %v4610_v26, %v221_v32  ;;  %v226_v32 = vld [vmem:[#allocation5 + $0x38] sm:$0xff] }
 0x6d9   :  { %v11364_v29 = vpop.eup %11363  ;;  %v12682_v35 = vadd.f32 %v4611_v27, %v222_v24  ;;  %v4605_v14 = vmul.f32 %v11362_v28, %v12582_v16  ;;  %11006 = vmatpush3.xpose.msk.msra.mxu1 %vm2245_vm4, %v4713_v52  ;;  %v4710_v24 = vpop.permute.xlu0 %4709 }
 0x6da   :  { %v4604_v39 = vmul.f32 %v11364_v29, %v12585_v61  ;;  %11003 = vmatmul.mubr.msk.f32.vlgmr.msra.gmra.mrb[48].mxu0 %vm2245_vm4, %v4664_v0  ;;  %11015 = vmatprep.subr.mxu1 %v11544_v8  ;;  %v4714_v38 = vmul.f32 %v12615_v17, %v12677_v37  ;;  %v4666_v17 = vmul.f32 %v12644_v4, %v12677_v37  ;;  %v4582_v4 = vmul.f32 0.125, %v4569_v23  ;;  %v244_v23 = vld [vmem:[%s13576_s13 + $0x8] sm:$0xff] }
 0x6db   :  { %v4613_v1 = vmul.f32 %v4605_v14, %v216_v51  ;;  %v4715_v16 = vmul.f32 %v12642_v50, %v12682_v35  ;;  %11012 = vmatprep.mubr.msk.f32.mxu0 %vm11545_vm0, %v11544_v8  ;;  %v4667_v45 = vmul.f32 %v4642_v21, %v12682_v35  ;;  %v218_v21 = vld [vmem:[%s13572_s9 + $0x38] sm:$0xff] }
 0x6dc   :  { %v4612_v61 = vmul.f32 %v4604_v39, %v215_v33  ;;  %11008 = vmatmul.mubr.msk.f32.vlgmr.msra.gmra.mrb[48].mxu1 %vm2245_vm4, %v4665_v15  ;;  %11011 = vmatpush3.xpose.msk.msra.mxu0 %vm2245_vm4, %v4714_v38  ;;  %v4590_v62 = vadd.f32 1e-05, %v4582_v4 }
 0x6dd   :  { %v12699_v44 = vadd.f32 %v4613_v1, %v224_v41  ;;  %11016 = vmatpush3.xpose.msk.msra.mxu1 %vm2245_vm4, %v4715_v16  ;;  %11017 = vmatprep.mubr.msk.f32.mxu1 %vm11545_vm0, %v11544_v8  ;;  %v4662_v28 = vpop.permute.xlu0 %4661 }
 0x6de   :  { %v12706_v50 = vadd.f32 %v4612_v61, %v223_v40  ;;  %11020 = vmatprep.subr.mxu0 %v11544_v8  ;;  %11025 = vmatprep.subr.mxu1 %v11544_v8  ;;  %11365 = vrsqrt.f32 %v4590_v62 }
 0x6df   :  { %v4717_v60 = vmul.f32 %v4700_v43, %v12699_v44  ;;  %11013 = vmatmul.mubr.msk.f32.vlgmr.msra.gmra.mrb[50].mxu0 %vm2245_vm4, %v4666_v17  ;;  %v4669_v46 = vmul.f32 %v4652_v47, %v12699_v44  ;;  %v243_v47 = vld [vmem:[%s13576_s13] sm:$0xff] }
 0x6e0   :  { %v4716_v3 = vmul.f32 %v4695_v48, %v12706_v50  ;;  %11018 = vmatmul.mubr.msk.f32.vlgmr.msra.gmra.mrb[50].mxu1 %vm2245_vm4, %v4667_v45  ;;  %11022 = vmatprep.mubr.msk.f32.mxu0 %vm11545_vm0, %v11544_v8 }
 0x6e1   :  { %11026 = vmatpush3.xpose.msk.msra.mxu1 %vm2245_vm4, %v4717_v60  ;;  %11027 = vmatprep.mubr.msk.f32.mxu1 %vm11545_vm0, %v11544_v8 }
 0x6e2   :  { %11021 = vmatpush3.xpose.msk.msra.mxu0 %vm2245_vm4, %v4716_v3  ;;  %11035 = vmatprep.subr.mxu1 %v11544_v8 }
 0x6e3   :  { %11030 = vmatprep.subr.mxu0 %v11544_v8 }
 0x6e4   :  { %11028 = vmatmul.mubr.msk.f32.vlgmr.msra.gmra.mrb[52].mxu1 %vm2245_vm4, %v4669_v46  ;;  %v246_v46 = vld [vmem:[%s13576_s13 + $0x18] sm:$0xff] }
 0x6e5   :  { %11037 = vmatprep.mubr.msk.f32.mxu1 %vm11545_vm0, %v11544_v8 }
 0x6e8   :  { %v11366_v53 = vpop.eup %11365 }
 0x6e9   :  { %v4606_v49 = vmul.f32 %v11366_v53, %v12593_v7 }
 0x6eb   :  { %v4614_v58 = vmul.f32 %v4606_v49, %v217_v5  ;;  %v245_v5 = vld [vmem:[%s13576_s13 + $0x10] sm:$0xff] }
 0x6ed   :  { %v12733_v10 = vadd.f32 %v4614_v58, %v225_v20 }
 0x6f7   :  { %v4519_v54 = vpop.xlane.xlu1 %4518 }
 0x6f8   :  { %v4527_v56 = vmul.f32 0.0625, %v4519_v54  ;;  %v248_v54 = vld [vmem:[%s13576_s13 + $0x28] sm:$0xff] }
 0x6fa   :  { %v4570_v57 = vrot.slane %v4527_v56, 4 }
 0x6fb   :  { %v4647_v18 = vpop.permute.xlu1 %4646 }
 0x6fc   :  { %v4571_v6 = vadd.f32 %v4570_v57, %v4527_v56  ;;  %v4668_v63 = vmul.f32 %v4647_v18, %v12706_v50  ;;  %v247_v56 = vld [vmem:[%s13576_s13 + $0x20] sm:$0xff] }
 0x6fe   :  { %v4572_v9 = vrot.slane %v4571_v6, 2  ;;  %11023 = vmatmul.mubr.msk.f32.vlgmr.msra.gmra.mrb[52].mxu0 %vm2245_vm4, %v4668_v63 }
 0x6ff   :  { %v4705_v11 = vpop.permute.xlu1 %4704  ;;  %11032 = vmatprep.mubr.msk.f32.mxu0 %vm11545_vm0, %v11544_v8 }
 0x700   :  { %v4573_v7 = vadd.f32 %v4572_v9, %v4571_v6  ;;  %v4718_v30 = vmul.f32 %v4705_v11, %v12733_v10 }
 0x702   :  { %v4574_v31 = vrot.slane %v4573_v7, 1  ;;  %11031 = vmatpush3.xpose.msk.msra.mxu0 %vm2245_vm4, %v4718_v30 }
 0x703   :  { %v4657_v55 = vpop.permute.xlu1 %4656  ;;  %11040 = vmatprep.subr.mxu0 %v11544_v8 }
 0x704   :  { %v4575_v36 = vadd.f32 %v4574_v31, %v4573_v7  ;;  %v4670_v2 = vmul.f32 %v4657_v55, %v12733_v10 }
 0x706   :  { %v4583_v22 = vmul.f32 0.125, %v4575_v36  ;;  %11033 = vmatmul.mubr.msk.f32.vlgmr.msra.gmra.mrb[54].mxu0 %vm2245_vm4, %v4670_v2 }
 0x707   :  { %11042 = vmatprep.mubr.msk.f32.mxu0 %vm11545_vm0, %v11544_v8 }
 0x708   :  { %v4591_v19 = vadd.f32 1e-05, %v4583_v22 }
 0x70a   :  { %11367 = vrsqrt.f32 %v4591_v19 }
 0x714   :  { %v11368_v25 = vpop.eup %11367 }
 0x715   :  { %v4607_v59 = vmul.f32 %v11368_v25, %v12624_v12 }
 0x717   :  { %v4615_v26 = vmul.f32 %v4607_v59, %v218_v21 }
 0x719   :  { %v12748_v27 = vadd.f32 %v4615_v26, %v226_v32 }
 0x71b   :  { %v4719_v52 = vmul.f32 %v4710_v24, %v12748_v27  ;;  %v4671_v51 = vmul.f32 %v4662_v28, %v12748_v27 }
 0x71d   :  { %11036 = vmatpush3.xpose.msk.msra.mxu1 %vm2245_vm4, %v4719_v52 }
 0x71e   :  { %11045 = vmatprep.subr.mxu1 %v11544_v8 }
 0x720   :  { %11038 = vmatmul.mubr.msk.f32.vlgmr.msra.gmra.mrb[54].mxu1 %vm2245_vm4, %v4671_v51 }
 0x721   :  { %11047 = vmatprep.mubr.msk.f32.mxu1 %vm11545_vm0, %v11544_v8 }
 0x7ad   :  { %v4840_v12 = vpop.f32.mrb[48].mxu0 }
 0x7ae   :  { %v11004_v0 = vpop.f32.mrb[49].mxu0  ;;  %v5376_v29 = vsel %vm376_vm2, %v4840_v12, -inf }
 0x7af   :  { %v4916_v33 = vpop.f32.mrb[48].mxu1  ;;  %5377 = vmax.xlane.f32.xlu1 %v5376_v29 }
 0x7b0   :  { %v11009_v34 = vpop.f32.mrb[49].mxu1  ;;  %v5379_v14 = vsel %vm376_vm2, %v4916_v33, -inf }
 0x7b1   :  { %5380 = vmax.xlane.f32.xlu0 %v5379_v14 }
 0x7b2   :  { %v4992_v39 = vpop.f32.mrb[50].mxu0 }
 0x7b3   :  { %v5068_v41 = vpop.f32.mrb[50].mxu1  ;;  %v11014_v15 = vpop.f32.mrb[51].mxu0  ;;  %v5382_v38 = vsel %vm376_vm2, %v4992_v39, -inf }
 0x7b4   :  { %v11019_v40 = vpop.f32.mrb[51].mxu1  ;;  %v5385_v1 = vsel %vm376_vm2, %v5068_v41, -inf }
 0x7b5   :  { %5383 = vmax.xlane.f32.xlu0 %v5382_v38  ;;  %5386 = vmax.xlane.f32.xlu1 %v5385_v1 }
 0x7b7   :  { %v5220_v43 = vpop.f32.mrb[52].mxu1 }
 0x7b8   :  { %v11029_v16 = vpop.f32.mrb[53].mxu1  ;;  %v5391_v61 = vsel %vm376_vm2, %v5220_v43, -inf }
 0x7b9   :  { %5392 = vmax.xlane.f32.xlu1 %v5391_v61 }
 0x7ca   :  { %4727 = vperm.xlu1 %11336, %v244_v23  }
 0x7d1   :  { %v12765_v17 = vpop.f32.mrb[52].mxu0 }
 0x7d2   :  { %v11024_v45 = vpop.f32.mrb[53].mxu0  ;;  %v5388_v48 = vsel %vm376_vm2, %v12765_v17, -inf }
 0x7d3   :  { %5389 = vmax.xlane.f32.xlu0 %v5388_v48  ;;  %v250_v45 = vld [vmem:[%s13576_s13 + $0x38] sm:$0xff] }
 0x7d9   :  { %v12769_v60 = vpop.f32.mrb[54].mxu0 }
 0x7da   :  { %v11034_v3 = vpop.f32.mrb[55].mxu0  ;;  %v5394_v4 = vsel %vm376_vm2, %v12769_v60, -inf }
 0x7db   :  { %5395 = vmax.xlane.f32.xlu0 %v5394_v4  ;;  %v249_v3 = vld [vmem:[%s13576_s13 + $0x30] sm:$0xff] }
 0x7f1   :  { %4722 = vperm.xlu0 %11335, %v243_v47  }
 0x7f3   :  { %v12779_v62 = vpop.f32.mrb[54].mxu1 }
 0x7f4   :  { %v11039_v53 = vpop.f32.mrb[55].mxu1  ;;  %v5397_v49 = vsel %vm376_vm2, %v12779_v62, -inf }
 0x7f5   :  { %4737 = vperm.xlu0 %11335, %v246_v46   ;;  %5398 = vmax.xlane.f32.xlu1 %v5397_v49 }
 0x7f9   :  { %4747 = vperm.xlu0 %11335, %v248_v54  }
 0x806   :  { %4732 = vperm.xlu1 %11336, %v245_v5  }
 0x80a   :  { %4742 = vperm.xlu1 %11336, %v247_v56  }
 0x83c   :  { %v5378_v57 = vpop.xlane.xlu1 %5377 }
 0x83d   :  { %v5400_v58 = vsub.f32 %v4840_v12, %v5378_v57 }
 0x83e   :  { %v5381_v18 = vpop.xlane.xlu0 %5380 }
 0x83f   :  { %v5408_v20 = vmul.f32 1.442695, %v5400_v58  ;;  %v5401_v6 = vsub.f32 %v4916_v33, %v5381_v18 }
 0x841   :  { %11369 = vpow2.f32 %v5408_v20  ;;  %v5410_v63 = vmul.f32 1.442695, %v5401_v6 }
 0x842   :  { %v5387_v9 = vpop.xlane.xlu1 %5386  ;;  %v5384_v11 = vpop.xlane.xlu0 %5383 }
 0x843   :  { %11371 = vpow2.f32 %v5410_v63  ;;  %v5403_v7 = vsub.f32 %v5068_v41, %v5387_v9  ;;  %v5402_v30 = vsub.f32 %v4992_v39, %v5384_v11 }
 0x845   :  { %v5414_v31 = vmul.f32 1.442695, %v5403_v7  ;;  %v5412_v55 = vmul.f32 1.442695, %v5402_v30 }
 0x846   :  { %v5393_v36 = vpop.xlane.xlu1 %5392 }
 0x847   :  { %11373 = vpow2.f32 %v5414_v31  ;;  %v5405_v2 = vsub.f32 %v5220_v43, %v5393_v36 }
 0x848   :  { %11375 = vpow2.f32 %v5412_v55 }
 0x849   :  { %v5418_v22 = vmul.f32 1.442695, %v5405_v2 }
 0x84a   :  { %v4728_v19 = vpop.permute.xlu1 %4727 }
 0x84b   :  { %v12792_v25 = vpop.eup %11369  ;;  %11377 = vpow2.f32 %v5418_v22  ;;  %v4761_v21 = vmul.f32 %v4728_v19, %v12666_v42 }
 0x84c   :  { %v5424_v59 = vsel %vm376_vm2, %v12792_v25, 0.0 }
 0x84d   :  { %v12797_v32 = vpop.eup %11371  ;;  %11046 = vmatpush3.msra.mxu1 %v4761_v21  ;;  %5425 = vadd.xlane.f32.xlu0 %v5424_v59 }
 0x84e   :  { %v5427_v24 = vsel %vm376_vm2, %v12797_v32, 0.0  ;;  %11055 = vmatprep.subr.mxu1 %v11544_v8 }
 0x84f   :  { %5428 = vadd.xlane.f32.xlu1 %v5427_v24 }
 0x851   :  { %v12802_v26 = vpop.eup %11373 }
 0x852   :  { %v12804_v52 = vpop.eup %11375  ;;  %v5433_v28 = vsel %vm376_vm2, %v12802_v26, 0.0 }
 0x853   :  { %5434 = vadd.xlane.f32.xlu1 %v5433_v28  ;;  %v5430_v51 = vsel %vm376_vm2, %v12804_v52, 0.0 }
 0x854   :  { %5431 = vadd.xlane.f32.xlu0 %v5430_v51 }
 0x855   :  { %v12810_v12 = vpop.eup %11377 }
 0x856   :  { %v5439_v0 = vsel %vm376_vm2, %v12810_v12, 0.0 }
 0x857   :  { %5440 = vadd.xlane.f32.xlu1 %v5439_v0 }
 0x860   :  { %v5390_v29 = vpop.xlane.xlu0 %5389 }
 0x861   :  { %v5404_v33 = vsub.f32 %v12765_v17, %v5390_v29 }
 0x863   :  { %v5416_v34 = vmul.f32 1.442695, %v5404_v33 }
 0x865   :  { %11379 = vpow2.f32 %v5416_v34 }
 0x868   :  { %v5396_v14 = vpop.xlane.xlu0 %5395 }
 0x869   :  { %v5406_v39 = vsub.f32 %v12769_v60, %v5396_v14 }
 0x86b   :  { %v5420_v41 = vmul.f32 1.442695, %v5406_v39 }
 0x86d   :  { %11381 = vpow2.f32 %v5420_v41 }
 0x86f   :  { %v12816_v15 = vpop.eup %11379 }
 0x870   :  { %v4723_v38 = vpop.permute.xlu0 %4722  ;;  %v5436_v40 = vsel %vm376_vm2, %v12816_v15, 0.0 }
 0x871   :  { %v4760_v1 = vmul.f32 %v4723_v38, %v12654_v13  ;;  %5437 = vadd.xlane.f32.xlu0 %v5436_v40 }
 0x873   :  { %11041 = vmatpush3.msra.mxu0 %v4760_v1 }
 0x874   :  { %11050 = vmatprep.subr.mxu0 %v11544_v8  ;;  %v4738_v4 = vpop.permute.xlu0 %4737 }
 0x875   :  { %v4763_v63 = vmul.f32 %v4738_v4, %v12682_v35 }
 0x877   :  { %v12822_v43 = vpop.eup %11381 }
 0x878   :  { %v5442_v16 = vsel %vm376_vm2, %v12822_v43, 0.0  ;;  %v4748_v46 = vpop.permute.xlu0 %4747 }
 0x879   :  { %5443 = vadd.xlane.f32.xlu0 %v5442_v16  ;;  %v4765_v30 = vmul.f32 %v4748_v46, %v12699_v44 }
 0x882   :  { %v5399_v61 = vpop.xlane.xlu1 %5398 }
 0x883   :  { %v5407_v23 = vsub.f32 %v12779_v62, %v5399_v61 }
 0x885   :  { %v5422_v17 = vmul.f32 1.442695, %v5407_v23 }
 0x886   :  { %v4733_v47 = vpop.permute.xlu1 %4732 }
 0x887   :  { %11383 = vpow2.f32 %v5422_v17  ;;  %v4762_v20 = vmul.f32 %v4733_v47, %v12677_v37 }
 0x88a   :  { %v4743_v62 = vpop.permute.xlu1 %4742 }
 0x88b   :  { %v4764_v55 = vmul.f32 %v4743_v62, %v12706_v50 }
 0x88f   :  { %4757 = vperm.xlu0 %11335, %v250_v45  }
 0x891   :  { %v12830_v48 = vpop.eup %11383 }
 0x892   :  { %v5445_v60 = vsel %vm376_vm2, %v12830_v48, 0.0 }
 0x893   :  { %5446 = vadd.xlane.f32.xlu1 %v5445_v60 }
 0x8a4   :  { %4752 = vperm.xlu1 %11336, %v249_v3  }
 0x8da   :  { %v5426_v53 = vpop.xlane.xlu0 %5425 }
 0x8db   :  { %11385 = vrcp.f32 %v5426_v53 }
 0x8dc   :  { %v5429_v49 = vpop.xlane.xlu1 %5428 }
 0x8dd   :  { %11387 = vrcp.f32 %v5429_v49 }
 0x8e0   :  { %v5435_v54 = vpop.xlane.xlu1 %5434 }
 0x8e1   :  { %11389 = vrcp.f32 %v5435_v54  ;;  %v5432_v5 = vpop.xlane.xlu0 %5431 }
 0x8e2   :  { %11391 = vrcp.f32 %v5432_v5 }
 0x8e4   :  { %v5441_v56 = vpop.xlane.xlu1 %5440 }
 0x8e5   :  { %v11386_v57 = vpop.eup %11385  ;;  %11393 = vrcp.f32 %v5441_v56 }
 0x8e6   :  { %v5456_v58 = vmul.f32 %v11386_v57, %v12792_v25 }
 0x8e7   :  { %v11388_v18 = vpop.eup %11387 }
 0x8e8   :  { %11043 = vmatmul.mubr.msk.f32.vlgmr.msra.gmra.mrb[56].mxu0 %vm376_vm2, %v5456_v58  ;;  %10106 = vst.msk [vmem:[#allocation10] sm:$0xff] %vm376_vm2, %v5456_v58  ;;  %v5457_v6 = vmul.f32 %v11388_v18, %v12797_v32 }
 0x8e9   :  { %11051 = vmatpush3.msra.mxu0 %v4762_v20  ;;  %11052 = vmatprep.mubr.msk.f32.mxu0 %vm11545_vm0, %v11544_v8 }
 0x8ea   :  { %11048 = vmatmul.mubr.msk.f32.vlgmr.msra.gmra.mrb[56].mxu1 %vm376_vm2, %v5457_v6  ;;  %10107 = vst.msk [vmem:[#allocation10 + $0x8] sm:$0xff] %vm376_vm2, %v5457_v6  ;;  %11060 = vmatprep.subr.mxu0 %v11544_v8 }
 0x8eb   :  { %v11390_v9 = vpop.eup %11389  ;;  %11056 = vmatpush3.msra.mxu1 %v4763_v63  ;;  %11057 = vmatprep.mubr.msk.f32.mxu1 %vm11545_vm0, %v11544_v8 }
 0x8ec   :  { %v11392_v11 = vpop.eup %11391  ;;  %11065 = vmatprep.subr.mxu1 %v11544_v8  ;;  %v5459_v7 = vmul.f32 %v11390_v9, %v12802_v26 }
 0x8ed   :  { %v5458_v31 = vmul.f32 %v11392_v11, %v12804_v52 }
 0x8ee   :  { %11058 = vmatmul.mubr.msk.f32.vlgmr.msra.gmra.mrb[58].mxu1 %vm376_vm2, %v5459_v7  ;;  %10109 = vst.msk [vmem:[#allocation10 + $0x18] sm:$0xff] %vm376_vm2, %v5459_v7 }
 0x8ef   :  { %v11394_v36 = vpop.eup %11393  ;;  %11053 = vmatmul.mubr.msk.f32.vlgmr.msra.gmra.mrb[58].mxu0 %vm376_vm2, %v5458_v31  ;;  %10108 = vst.msk [vmem:[#allocation10 + $0x10] sm:$0xff] %vm376_vm2, %v5458_v31  ;;  %11066 = vmatpush3.msra.mxu1 %v4765_v30 }
 0x8f0   :  { %11061 = vmatpush3.msra.mxu0 %v4764_v55  ;;  %11067 = vmatprep.mubr.msk.f32.mxu1 %vm11545_vm0, %v11544_v8  ;;  %v5461_v2 = vmul.f32 %v11394_v36, %v12810_v12 }
 0x8f1   :  { %11062 = vmatprep.mubr.msk.f32.mxu0 %vm11545_vm0, %v11544_v8  ;;  %11075 = vmatprep.subr.mxu1 %v11544_v8 }
 0x8f2   :  { %11068 = vmatmul.mubr.msk.f32.vlgmr.msra.gmra.mrb[60].mxu1 %vm376_vm2, %v5461_v2  ;;  %10111 = vst.msk [vmem:[#allocation10 + $0x28] sm:$0xff] %vm376_vm2, %v5461_v2  ;;  %11070 = vmatprep.subr.mxu0 %v11544_v8 }
 0x8f3   :  { %11077 = vmatprep.mubr.msk.f32.mxu1 %vm11545_vm0, %v11544_v8 }
 0x8fe   :  { %v5438_v22 = vpop.xlane.xlu0 %5437 }
 0x8ff   :  { %11395 = vrcp.f32 %v5438_v22 }
 0x906   :  { %v5444_v19 = vpop.xlane.xlu0 %5443 }
 0x907   :  { %11397 = vrcp.f32 %v5444_v19 }
 0x909   :  { %v11396_v25 = vpop.eup %11395 }
 0x90a   :  { %v5460_v21 = vmul.f32 %v11396_v25, %v12816_v15 }
 0x90c   :  { %11063 = vmatmul.mubr.msk.f32.vlgmr.msra.gmra.mrb[60].mxu0 %vm376_vm2, %v5460_v21  ;;  %10110 = vst.msk [vmem:[#allocation10 + $0x20] sm:$0xff] %vm376_vm2, %v5460_v21 }
 0x90d   :  { %11072 = vmatprep.mubr.msk.f32.mxu0 %vm11545_vm0, %v11544_v8 }
 0x90e   :  { %v4758_v59 = vpop.permute.xlu0 %4757 }
 0x90f   :  { %v4767_v32 = vmul.f32 %v4758_v59, %v12748_v27 }
 0x911   :  { %v11398_v24 = vpop.eup %11397  ;;  %11076 = vmatpush3.msra.mxu1 %v4767_v32 }
 0x912   :  { %v5462_v26 = vmul.f32 %v11398_v24, %v12822_v43  ;;  %11085 = vmatprep.subr.mxu1 %v11544_v8 }
 0x914   :  { %10112 = vst.msk [vmem:[#allocation10 + $0x30] sm:$0xff] %vm376_vm2, %v5462_v26 }
 0x920   :  { %v5447_v52 = vpop.xlane.xlu1 %5446 }
 0x921   :  { %11399 = vrcp.f32 %v5447_v52 }
 0x924   :  { %v4753_v28 = vpop.permute.xlu1 %4752 }
 0x925   :  { %v4766_v51 = vmul.f32 %v4753_v28, %v12733_v10 }
 0x927   :  { %11071 = vmatpush3.msra.mxu0 %v4766_v51 }
 0x928   :  { %11073 = vmatmul.mubr.msk.f32.vlgmr.msra.gmra.mrb[62].mxu0 %vm376_vm2, %v5462_v26  ;;  %11080 = vmatprep.subr.mxu0 %v11544_v8 }
 0x929   :  { %11082 = vmatprep.mubr.msk.f32.mxu0 %vm11545_vm0, %v11544_v8 }
 0x92b   :  { %v11400_v12 = vpop.eup %11399 }
 0x92c   :  { %v5463_v0 = vmul.f32 %v11400_v12, %v12830_v48 }
 0x92e   :  { %11078 = vmatmul.mubr.msk.f32.vlgmr.msra.gmra.mrb[62].mxu1 %vm376_vm2, %v5463_v0  ;;  %10113 = vst.msk [vmem:[#allocation10 + $0x38] sm:$0xff] %vm376_vm2, %v5463_v0 }
 0x92f   :  { %11087 = vmatprep.mubr.msk.f32.mxu1 %vm11545_vm0, %v11544_v8 }
 0x9bb   :  { %v5533_v29 = vpop.f32.mrb[56].mxu0 }
 0x9bc   :  { %v12890_v33 = vadd.f32 %v5533_v29, %v12654_v13  ;;  %v11044_v34 = vpop.f32.mrb[57].mxu0 }
 0x9bd   :  { %v5606_v14 = vpop.f32.mrb[56].mxu1 }
 0x9be   :  { %v12893_v39 = vadd.f32 %v5606_v14, %v12666_v42  ;;  %v11049_v41 = vpop.f32.mrb[57].mxu1  ;;  %v6048_v15 = vsel %vm2245_vm4, %v12890_v33, 0.0 }
 0x9bf   :  { %6049 = vadd.xlane.f32.xlu1 %v6048_v15 }
 0x9c0   :  { %v6051_v38 = vsel %vm2245_vm4, %v12893_v39, 0.0 }
 0x9c1   :  { %6052 = vadd.xlane.f32.xlu0 %v6051_v38  ;;  %v5752_v40 = vpop.f32.mrb[58].mxu1 }
 0x9c2   :  { %v12900_v1 = vadd.f32 %v5752_v40, %v12682_v35  ;;  %v5679_v13 = vpop.f32.mrb[58].mxu0  ;;  %v11059_v43 = vpop.f32.mrb[59].mxu1 }
 0x9c3   :  { %v12903_v16 = vadd.f32 %v5679_v13, %v12677_v37  ;;  %v11054_v42 = vpop.f32.mrb[59].mxu0 }
 0x9c4   :  { %v6057_v61 = vsel %vm2245_vm4, %v12900_v1, 0.0 }
 0x9c5   :  { %v5898_v23 = vpop.f32.mrb[60].mxu1  ;;  %6058 = vadd.xlane.f32.xlu1 %v6057_v61  ;;  %v6054_v17 = vsel %vm2245_vm4, %v12903_v16, 0.0 }
 0x9c6   :  { %v12910_v45 = vadd.f32 %v5898_v23, %v12699_v44  ;;  %6055 = vadd.xlane.f32.xlu0 %v6054_v17  ;;  %v11069_v35 = vpop.f32.mrb[61].mxu1 }
 0x9c8   :  { %v6063_v48 = vsel %vm2245_vm4, %v12910_v45, 0.0 }
 0x9c9   :  { %6064 = vadd.xlane.f32.xlu1 %v6063_v48 }
 0x9df   :  { %v5825_v37 = vpop.f32.mrb[60].mxu0 }
 0x9e0   :  { %v12915_v60 = vadd.f32 %v5825_v37, %v12706_v50  ;;  %v11064_v3 = vpop.f32.mrb[61].mxu0 }
 0x9e2   :  { %v6060_v4 = vsel %vm2245_vm4, %v12915_v60, 0.0 }
 0x9e3   :  { %6061 = vadd.xlane.f32.xlu0 %v6060_v4 }
 0x9fb   :  { %v5971_v47 = vpop.f32.mrb[62].mxu0 }
 0x9fc   :  { %v12920_v46 = vadd.f32 %v5971_v47, %v12733_v10  ;;  %v11074_v44 = vpop.f32.mrb[63].mxu0 }
 0x9fe   :  { %v6066_v62 = vsel %vm2245_vm4, %v12920_v46, 0.0 }
 0x9ff   :  { %6067 = vadd.xlane.f32.xlu0 %v6066_v62 }
 0xa01   :  { %v6044_v53 = vpop.f32.mrb[62].mxu1 }
 0xa02   :  { %v12925_v49 = vadd.f32 %v6044_v53, %v12748_v27  ;;  %v11079_v50 = vpop.f32.mrb[63].mxu1 }
 0xa04   :  { %v6069_v54 = vsel %vm2245_vm4, %v12925_v49, 0.0 }
 0xa05   :  { %6070 = vadd.xlane.f32.xlu1 %v6069_v54 }
 0xa4c   :  { %v6050_v5 = vpop.xlane.xlu1 %6049 }
 0xa4d   :  { %v6072_v56 = vmul.f32 0.0625, %v6050_v5 }
 0xa4e   :  { %v6053_v57 = vpop.xlane.xlu0 %6052 }
 0xa4f   :  { %v6080_v58 = vrot.slane %v6072_v56, 4  ;;  %v6073_v10 = vmul.f32 0.0625, %v6053_v57 }
 0xa51   :  { %v6081_v18 = vadd.f32 %v6080_v58, %v6072_v56  ;;  %v6086_v20 = vrot.slane %v6073_v10, 4 }
 0xa52   :  { %v6059_v6 = vpop.xlane.xlu1 %6058 }
 0xa53   :  { %v6082_v63 = vrot.slane %v6081_v18, 2  ;;  %v6087_v9 = vadd.f32 %v6086_v20, %v6073_v10  ;;  %v6075_v11 = vmul.f32 0.0625, %v6059_v6  ;;  %v6056_v7 = vpop.xlane.xlu0 %6055 }
 0xa54   :  { %v6074_v30 = vmul.f32 0.0625, %v6056_v7 }
 0xa55   :  { %v6083_v27 = vadd.f32 %v6082_v63, %v6081_v18  ;;  %v6088_v31 = vrot.slane %v6087_v9, 2  ;;  %v6098_v55 = vrot.slane %v6075_v11, 4 }
 0xa56   :  { %v6092_v36 = vrot.slane %v6074_v30, 4  ;;  %v6065_v2 = vpop.xlane.xlu1 %6064 }
 0xa57   :  { %v6084_v22 = vrot.slane %v6083_v27, 1  ;;  %v6089_v19 = vadd.f32 %v6088_v31, %v6087_v9  ;;  %v6099_v25 = vadd.f32 %v6098_v55, %v6075_v11  ;;  %v6077_v21 = vmul.f32 0.0625, %v6065_v2 }
 0xa58   :  { %v6093_v59 = vadd.f32 %v6092_v36, %v6074_v30 }
 0xa59   :  { %v6085_v32 = vadd.f32 %v6084_v22, %v6083_v27  ;;  %v6090_v24 = vrot.slane %v6089_v19, 1  ;;  %v6100_v26 = vrot.slane %v6099_v25, 2  ;;  %v6110_v52 = vrot.slane %v6077_v21, 4 }
 0xa5a   :  { %v6094_v28 = vrot.slane %v6093_v59, 2 }
 0xa5b   :  { %v6128_v51 = vmul.f32 0.125, %v6085_v32  ;;  %v6091_v12 = vadd.f32 %v6090_v24, %v6089_v19  ;;  %v6101_v0 = vadd.f32 %v6100_v26, %v6099_v25  ;;  %v6111_v29 = vadd.f32 %v6110_v52, %v6077_v21 }
 0xa5c   :  { %v6095_v34 = vadd.f32 %v6094_v28, %v6093_v59 }
 0xa5d   :  { %v6129_v14 = vmul.f32 0.125, %v6091_v12  ;;  %v6102_v41 = vrot.slane %v6101_v0, 1  ;;  %v6112_v15 = vrot.slane %v6111_v29, 2  ;;  %v12930_v38 = vsub.f32 %v12890_v33, %v6128_v51 }
 0xa5e   :  { %v6096_v40 = vrot.slane %v6095_v34, 1 }
 0xa5f   :  { %v6103_v13 = vadd.f32 %v6102_v41, %v6101_v0  ;;  %v6113_v43 = vadd.f32 %v6112_v15, %v6111_v29  ;;  %v6144_v42 = vmul.f32 %v12930_v38, %v12930_v38  ;;  %v12935_v61 = vsub.f32 %v12893_v39, %v6129_v14 }
 0xa60   :  { %v6097_v23 = vadd.f32 %v6096_v40, %v6095_v34 }
 0xa61   :  { %v6131_v17 = vmul.f32 0.125, %v6103_v13  ;;  %v6114_v35 = vrot.slane %v6113_v43, 1  ;;  %v6152_v48 = vsel %vm2245_vm4, %v6144_v42, 0.0  ;;  %v6145_v37 = vmul.f32 %v12935_v61, %v12935_v61 }
 0xa62   :  { %v6130_v3 = vmul.f32 0.125, %v6097_v23  ;;  %6153 = vadd.xlane.f32.xlu0 %v6152_v48 }
 0xa63   :  { %v6115_v33 = vadd.f32 %v6114_v35, %v6113_v43  ;;  %v6155_v4 = vsel %vm2245_vm4, %v6145_v37, 0.0  ;;  %v12942_v47 = vsub.f32 %v12900_v1, %v6131_v17 }
 0xa64   :  { %6156 = vadd.xlane.f32.xlu1 %v6155_v4  ;;  %v12945_v39 = vsub.f32 %v12903_v16, %v6130_v3 }
 0xa65   :  { %v6133_v44 = vmul.f32 0.125, %v6115_v33  ;;  %v6147_v62 = vmul.f32 %v12942_v47, %v12942_v47 }
 0xa66   :  { %v6146_v53 = vmul.f32 %v12945_v39, %v12945_v39 }
 0xa67   :  { %v6161_v50 = vsel %vm2245_vm4, %v6147_v62, 0.0  ;;  %v12953_v54 = vsub.f32 %v12910_v45, %v6133_v44 }
 0xa68   :  { %6162 = vadd.xlane.f32.xlu1 %v6161_v50  ;;  %v6158_v1 = vsel %vm2245_vm4, %v6146_v53, 0.0 }
 0xa69   :  { %6159 = vadd.xlane.f32.xlu0 %v6158_v1  ;;  %v6149_v16 = vmul.f32 %v12953_v54, %v12953_v54 }
 0xa6b   :  { %v6167_v5 = vsel %vm2245_vm4, %v6149_v16, 0.0 }
 0xa6c   :  { %6168 = vadd.xlane.f32.xlu1 %v6167_v5 }
 0xa70   :  { %v6062_v56 = vpop.xlane.xlu0 %6061 }
 0xa71   :  { %v6076_v57 = vmul.f32 0.0625, %v6062_v56 }
 0xa73   :  { %v6104_v58 = vrot.slane %v6076_v57, 4 }
 0xa75   :  { %v6105_v10 = vadd.f32 %v6104_v58, %v6076_v57 }
 0xa77   :  { %v6106_v18 = vrot.slane %v6105_v10, 2 }
 0xa79   :  { %v6107_v20 = vadd.f32 %v6106_v18, %v6105_v10 }
 0xa7b   :  { %v6108_v6 = vrot.slane %v6107_v20, 1 }
 0xa7d   :  { %v6109_v63 = vadd.f32 %v6108_v6, %v6107_v20 }
 0xa7f   :  { %v6132_v45 = vmul.f32 0.125, %v6109_v63 }
 0xa81   :  { %v12960_v9 = vsub.f32 %v12915_v60, %v6132_v45 }
 0xa83   :  { %v6148_v11 = vmul.f32 %v12960_v9, %v12960_v9 }
 0xa85   :  { %v6164_v7 = vsel %vm2245_vm4, %v6148_v11, 0.0 }
 0xa86   :  { %6165 = vadd.xlane.f32.xlu0 %v6164_v7 }
 0xa8c   :  { %v6068_v30 = vpop.xlane.xlu0 %6067 }
 0xa8d   :  { %v6078_v27 = vmul.f32 0.0625, %v6068_v30 }
 0xa8f   :  { %v6116_v31 = vrot.slane %v6078_v27, 4 }
 0xa91   :  { %v6117_v55 = vadd.f32 %v6116_v31, %v6078_v27 }
 0xa92   :  { %v6071_v36 = vpop.xlane.xlu1 %6070 }
 0xa93   :  { %v6118_v2 = vrot.slane %v6117_v55, 2  ;;  %v6079_v22 = vmul.f32 0.0625, %v6071_v36 }
 0xa95   :  { %v6119_v19 = vadd.f32 %v6118_v2, %v6117_v55  ;;  %v6122_v25 = vrot.slane %v6079_v22, 4 }
 0xa97   :  { %v6120_v21 = vrot.slane %v6119_v19, 1  ;;  %v6123_v59 = vadd.f32 %v6122_v25, %v6079_v22 }
 0xa99   :  { %v6121_v32 = vadd.f32 %v6120_v21, %v6119_v19  ;;  %v6124_v60 = vrot.slane %v6123_v59, 2 }
 0xa9b   :  { %v6134_v24 = vmul.f32 0.125, %v6121_v32  ;;  %v6125_v26 = vadd.f32 %v6124_v60, %v6123_v59 }
 0xa9d   :  { %v6126_v52 = vrot.slane %v6125_v26, 1  ;;  %v12966_v28 = vsub.f32 %v12920_v46, %v6134_v24 }
 0xa9f   :  { %v6127_v51 = vadd.f32 %v6126_v52, %v6125_v26  ;;  %v6150_v12 = vmul.f32 %v12966_v28, %v12966_v28 }
 0xaa1   :  { %v6135_v0 = vmul.f32 0.125, %v6127_v51  ;;  %v6170_v29 = vsel %vm2245_vm4, %v6150_v12, 0.0 }
 0xaa2   :  { %6171 = vadd.xlane.f32.xlu0 %v6170_v29 }
 0xaa3   :  { %v12972_v34 = vsub.f32 %v12925_v49, %v6135_v0  ;;  %v251_v0 = vld [vmem:[#allocation7] sm:$0xff] }
 0xaa5   :  { %v6151_v14 = vmul.f32 %v12972_v34, %v12972_v34 }
 0xaa7   :  { %v6173_v41 = vsel %vm2245_vm4, %v6151_v14, 0.0 }
 0xaa8   :  { %6174 = vadd.xlane.f32.xlu1 %v6173_v41  ;;  %v252_v41 = vld [vmem:[#allocation7 + $0x8] sm:$0xff] }
 0xaef   :  { %v6154_v15 = vpop.xlane.xlu0 %6153 }
 0xaf0   :  { %v6176_v46 = vmul.f32 0.0625, %v6154_v15  ;;  %v259_v15 = vld [vmem:[#allocation8] sm:$0xff] }
 0xaf1   :  { %v6157_v40 = vpop.xlane.xlu1 %6156 }
 0xaf2   :  { %v6177_v13 = vmul.f32 0.0625, %v6157_v40  ;;  %v6184_v43 = vrot.slane %v6176_v46, 4 }
 0xaf4   :  { %v6190_v42 = vrot.slane %v6177_v13, 4  ;;  %v6185_v23 = vadd.f32 %v6184_v43, %v6176_v46 }
 0xaf5   :  { %v6163_v17 = vpop.xlane.xlu1 %6162 }
 0xaf6   :  { %v6191_v35 = vadd.f32 %v6190_v42, %v6177_v13  ;;  %v6186_v48 = vrot.slane %v6185_v23, 2  ;;  %v6179_v37 = vmul.f32 0.0625, %v6163_v17  ;;  %v6160_v3 = vpop.xlane.xlu0 %6159  ;;  %v260_v13 = vld [vmem:[#allocation8 + $0x8] sm:$0xff]  ;;  %v254_v17 = vld [vmem:[#allocation7 + $0x18] sm:$0xff] }
 0xaf7   :  { %v6178_v49 = vmul.f32 0.0625, %v6160_v3 }
 0xaf8   :  { %v6192_v33 = vrot.slane %v6191_v35, 2  ;;  %v6187_v4 = vadd.f32 %v6186_v48, %v6185_v23  ;;  %v6202_v44 = vrot.slane %v6179_v37, 4 }
 0xaf9   :  { %v6196_v62 = vrot.slane %v6178_v49, 4  ;;  %v6169_v53 = vpop.xlane.xlu1 %6168 }
 0xafa   :  { %v6193_v50 = vadd.f32 %v6192_v33, %v6191_v35  ;;  %v6188_v1 = vrot.slane %v6187_v4, 1  ;;  %v6203_v16 = vadd.f32 %v6202_v44, %v6179_v37  ;;  %v6181_v5 = vmul.f32 0.0625, %v6169_v53  ;;  %v262_v33 = vld [vmem:[#allocation8 + $0x18] sm:$0xff]  ;;  %v261_v44 = vld [vmem:[#allocation8 + $0x10] sm:$0xff] }
 0xafb   :  { %v6197_v56 = vadd.f32 %v6196_v62, %v6178_v49  ;;  %v253_v49 = vld [vmem:[#allocation7 + $0x10] sm:$0xff] }
 0xafc   :  { %v6194_v57 = vrot.slane %v6193_v50, 1  ;;  %v6189_v58 = vadd.f32 %v6188_v1, %v6187_v4  ;;  %v6204_v10 = vrot.slane %v6203_v16, 2  ;;  %v6214_v18 = vrot.slane %v6181_v5, 4  ;;  %v256_v1 = vld [vmem:[#allocation7 + $0x28] sm:$0xff] }
 0xafd   :  { %v6198_v20 = vrot.slane %v6197_v56, 2 }
 0xafe   :  { %v6195_v6 = vadd.f32 %v6194_v57, %v6193_v50  ;;  %v6232_v63 = vmul.f32 0.125, %v6189_v58  ;;  %v6205_v45 = vadd.f32 %v6204_v10, %v6203_v16  ;;  %v6215_v11 = vadd.f32 %v6214_v18, %v6181_v5  ;;  %v264_v58 = vld [vmem:[#allocation8 + $0x28] sm:$0xff] }
 0xaff   :  { %v6199_v7 = vadd.f32 %v6198_v20, %v6197_v56 }
 0xb00   :  { %v6233_v30 = vmul.f32 0.125, %v6195_v6  ;;  %v6240_v27 = vadd.f32 1e-05, %v6232_v63  ;;  %v6206_v31 = vrot.slane %v6205_v45, 1  ;;  %v6216_v55 = vrot.slane %v6215_v11, 2 }
 0xb01   :  { %v6200_v36 = vrot.slane %v6199_v7, 1 }
 0xb02   :  { %v6241_v2 = vadd.f32 1e-05, %v6233_v30  ;;  %11401 = vrsqrt.f32 %v6240_v27  ;;  %v6207_v22 = vadd.f32 %v6206_v31, %v6205_v45  ;;  %v6217_v19 = vadd.f32 %v6216_v55, %v6215_v11  ;;  %v255_v30 = vld [vmem:[#allocation7 + $0x20] sm:$0xff] }
 0xb03   :  { %v6201_v25 = vadd.f32 %v6200_v36, %v6199_v7  ;;  %v263_v55 = vld [vmem:[#allocation8 + $0x20] sm:$0xff] }
 0xb04   :  { %11403 = vrsqrt.f32 %v6241_v2  ;;  %v6235_v21 = vmul.f32 0.125, %v6207_v22  ;;  %v6218_v59 = vrot.slane %v6217_v19, 1 }
 0xb05   :  { %v6234_v32 = vmul.f32 0.125, %v6201_v25 }
 0xb06   :  { %v6243_v60 = vadd.f32 1e-05, %v6235_v21  ;;  %v6219_v24 = vadd.f32 %v6218_v59, %v6217_v19 }
 0xb07   :  { %v6242_v26 = vadd.f32 1e-05, %v6234_v32 }
 0xb08   :  { %11405 = vrsqrt.f32 %v6243_v60  ;;  %v6237_v52 = vmul.f32 0.125, %v6219_v24 }
 0xb09   :  { %11407 = vrsqrt.f32 %v6242_v26 }
 0xb0a   :  { %v6245_v51 = vadd.f32 1e-05, %v6237_v52 }
 0xb0c   :  { %v11402_v12 = vpop.eup %11401  ;;  %11409 = vrsqrt.f32 %v6245_v51 }
 0xb0d   :  { %v6256_v29 = vmul.f32 %v11402_v12, %v12930_v38 }
 0xb0e   :  { %v11404_v14 = vpop.eup %11403 }
 0xb0f   :  { %v6257_v46 = vmul.f32 %v11404_v14, %v12935_v61  ;;  %v6264_v40 = vmul.f32 %v6256_v29, %v251_v0 }
 0xb11   :  { %v6265_v43 = vmul.f32 %v6257_v46, %v252_v41  ;;  %v6272_v42 = vadd.f32 %v6264_v40, %v259_v15  ;;  %v257_v46 = vld [vmem:[#allocation7 + $0x30] sm:$0xff] }
 0xb12   :  { %v11406_v23 = vpop.eup %11405 }
 0xb13   :  { %v11408_v35 = vpop.eup %11407  ;;  %v6166_v48 = vpop.xlane.xlu0 %6165  ;;  %v6273_v37 = vadd.f32 %v6265_v43, %v260_v13  ;;  %6288 = vrot.lane.b32.xlu0 %v6272_v42, %s11540_s25  ;;  %v6259_v3 = vmul.f32 %v11406_v23, %v12942_v47  ;;  %v265_v13 = vld [vmem:[#allocation8 + $0x30] sm:$0xff] }
 0xb14   :  { %v6180_v38 = vmul.f32 0.0625, %v6166_v48  ;;  %v6258_v4 = vmul.f32 %v11408_v35, %v12945_v39  ;;  %v266_v48 = vld [vmem:[#allocation8 + $0x38] sm:$0xff] }
 0xb15   :  { %6290 = vrot.lane.b32.xlu1 %v6273_v37, %s11540_s25  ;;  %v6267_v61 = vmul.f32 %v6259_v3, %v254_v17  ;;  %v258_v17 = vld [vmem:[#allocation7 + $0x38] sm:$0xff] }
 0xb16   :  { %v11410_v62 = vpop.eup %11409  ;;  %v6208_v53 = vrot.slane %v6180_v38, 4  ;;  %v6266_v50 = vmul.f32 %v6258_v4, %v253_v49 }
 0xb17   :  { %v6275_v16 = vadd.f32 %v6267_v61, %v262_v33  ;;  %v6261_v5 = vmul.f32 %v11410_v62, %v12953_v54 }
 0xb18   :  { %v6209_v56 = vadd.f32 %v6208_v53, %v6180_v38  ;;  %v6274_v57 = vadd.f32 %v6266_v50, %v261_v44 }
 0xb19   :  { %6294 = vrot.lane.b32.xlu0 %v6275_v16, %s11540_s25  ;;  %v6269_v47 = vmul.f32 %v6261_v5, %v256_v1 }
 0xb1a   :  { %v6210_v10 = vrot.slane %v6209_v56, 2  ;;  %6292 = vrot.lane.b32.xlu1 %v6274_v57, %s11540_s25 }
 0xb1b   :  { %v6277_v39 = vadd.f32 %v6269_v47, %v264_v58 }
 0xb1c   :  { %v6211_v18 = vadd.f32 %v6210_v10, %v6209_v56 }
 0xb1d   :  { %6298 = vrot.lane.b32.xlu0 %v6277_v39, %s11540_s25 }
 0xb1e   :  { %v6212_v20 = vrot.slane %v6211_v18, 1 }
 0xb20   :  { %v6213_v6 = vadd.f32 %v6212_v20, %v6211_v18 }
 0xb22   :  { %v6236_v63 = vmul.f32 0.125, %v6213_v6 }
 0xb24   :  { %v6244_v45 = vadd.f32 1e-05, %v6236_v63 }
 0xb26   :  { %11411 = vrsqrt.f32 %v6244_v45  ;;  %v291_v45 = vld [vmem:[%s13580_s17] sm:$0xff] }
 0xb2f   :  { %v6172_v11 = vpop.xlane.xlu0 %6171 }
 0xb30   :  { %v11412_v54 = vpop.eup %11411  ;;  %v6182_v7 = vmul.f32 0.0625, %v6172_v11  ;;  %v293_v11 = vld [vmem:[%s13580_s17 + $0x10] sm:$0xff] }
 0xb31   :  { %v6260_v27 = vmul.f32 %v11412_v54, %v12960_v9  ;;  %v292_v54 = vld [vmem:[%s13580_s17 + $0x8] sm:$0xff] }
 0xb32   :  { %v6220_v31 = vrot.slane %v6182_v7, 4 }
 0xb33   :  { %v6268_v36 = vmul.f32 %v6260_v27, %v255_v30  ;;  %v294_v30 = vld [vmem:[%s13580_s17 + $0x18] sm:$0xff]  ;;  %v297_v27 = vld [vmem:[%s13580_s17 + $0x30] sm:$0xff] }
 0xb34   :  { %v6221_v2 = vadd.f32 %v6220_v31, %v6182_v7  ;;  %v295_v7 = vld [vmem:[%s13580_s17 + $0x20] sm:$0xff]  ;;  %v296_v31 = vld [vmem:[%s13580_s17 + $0x28] sm:$0xff] }
 0xb35   :  { %v6175_v22 = vpop.xlane.xlu1 %6174  ;;  %v6276_v19 = vadd.f32 %v6268_v36, %v263_v55  ;;  %v298_v55 = vld [vmem:[%s13580_s17 + $0x38] sm:$0xff]  ;;  %v275_v36 = vld [vmem:[%s13579_s16 + $0x40] sm:$0xff] }
 0xb36   :  { %v6222_v25 = vrot.slane %v6221_v2, 2  ;;  %v6183_v21 = vmul.f32 0.0625, %v6175_v22  ;;  %v276_v22 = vld [vmem:[%s13579_s16 + $0x48] sm:$0xff] }
 0xb37   :  { %6296 = vrot.lane.b32.xlu1 %v6276_v19, %s11540_s25 }
 0xb38   :  { %v6223_v59 = vadd.f32 %v6222_v25, %v6221_v2  ;;  %v6226_v32 = vrot.slane %v6183_v21, 4 }
 0xb3a   :  { %v6224_v60 = vrot.slane %v6223_v59, 1  ;;  %v6227_v24 = vadd.f32 %v6226_v32, %v6183_v21  ;;  %v278_v21 = vld [vmem:[%s13579_s16 + $0x58] sm:$0xff]  ;;  %v277_v32 = vld [vmem:[%s13579_s16 + $0x50] sm:$0xff] }
 0xb3c   :  { %v6225_v26 = vadd.f32 %v6224_v60, %v6223_v59  ;;  %v6228_v52 = vrot.slane %v6227_v24, 2 }
 0xb3e   :  { %v6238_v51 = vmul.f32 0.125, %v6225_v26  ;;  %v6229_v12 = vadd.f32 %v6228_v52, %v6227_v24  ;;  %v280_v24 = vld [vmem:[%s13579_s16 + $0x68] sm:$0xff]  ;;  %v279_v26 = vld [vmem:[%s13579_s16 + $0x60] sm:$0xff] }
 0xb40   :  { %v6246_v0 = vadd.f32 1e-05, %v6238_v51  ;;  %v6230_v9 = vrot.slane %v6229_v12, 1  ;;  %v281_v51 = vld [vmem:[%s13579_s16 + $0x70] sm:$0xff] }
 0xb42   :  { %11413 = vrsqrt.f32 %v6246_v0  ;;  %v6231_v29 = vadd.f32 %v6230_v9, %v6229_v12  ;;  %v267_v0 = vld [vmem:[%s13579_s16] sm:$0xff]  ;;  %v282_v9 = vld [vmem:[%s13579_s16 + $0x78] sm:$0xff] }
 0xb44   :  { %v6239_v14 = vmul.f32 0.125, %v6231_v29 }
 0xb46   :  { %v6247_v41 = vadd.f32 1e-05, %v6239_v14  ;;  %v269_v14 = vld [vmem:[%s13579_s16 + $0x10] sm:$0xff] }
 0xb48   :  { %11415 = vrsqrt.f32 %v6247_v41  ;;  %v268_v41 = vld [vmem:[%s13579_s16 + $0x8] sm:$0xff] }
 0xb4c   :  { %v11414_v15 = vpop.eup %11413 }
 0xb4d   :  { %v6262_v40 = vmul.f32 %v11414_v15, %v12966_v28  ;;  %v271_v15 = vld [vmem:[%s13579_s16 + $0x20] sm:$0xff] }
 0xb4f   :  { %v6270_v43 = vmul.f32 %v6262_v40, %v257_v46  ;;  %v270_v40 = vld [vmem:[%s13579_s16 + $0x18] sm:$0xff] }
 0xb51   :  { %v6278_v42 = vadd.f32 %v6270_v43, %v265_v13  ;;  %v273_v13 = vld [vmem:[%s13579_s16 + $0x30] sm:$0xff]  ;;  %v272_v43 = vld [vmem:[%s13579_s16 + $0x28] sm:$0xff] }
 0xb52   :  { %v11416_v23 = vpop.eup %11415 }
 0xb53   :  { %6300 = vrot.lane.b32.xlu1 %v6278_v42, %s11540_s25  ;;  %v6263_v35 = vmul.f32 %v11416_v23, %v12972_v34 }
 0xb55   :  { %v6271_v37 = vmul.f32 %v6263_v35, %v258_v17  ;;  %v283_v17 = vld [vmem:[%s13579_s16 + $0x80] sm:$0xff]  ;;  %v274_v35 = vld [vmem:[%s13579_s16 + $0x38] sm:$0xff] }
 0xb57   :  { %v6279_v3 = vadd.f32 %v6271_v37, %v266_v48  ;;  %v285_v48 = vld [vmem:[%s13579_s16 + $0x90] sm:$0xff] }
 0xb59   :  { %6302 = vrot.lane.b32.xlu0 %v6279_v3, %s11540_s25 }
 0xb85   :  { %v6289_v49 = vpop.permute.xlu0 %6288 }
 0xb86   :  { %v12994_v38 = vsel %vm6312_vm5, 0.0, %v6289_v49  ;;  %v284_v49 = vld [vmem:[%s13579_s16 + $0x88] sm:$0xff] }
 0xb87   :  { %v6291_v28 = vpop.permute.xlu1 %6290  ;;  %v6322_v33 = vsel %vm6321_vm6, %v12994_v38, 0.0 }
 0xb88   :  { %v12999_v4 = vsel %vm6312_vm5, 0.0, %v6291_v28  ;;  %6331 = vrot.lane.b32.xlu1 %v6322_v33, %s11546_s23  ;;  %v286_v28 = vld [vmem:[%s13579_s16 + $0x98] sm:$0xff] }
 0xb89   :  { %v6323_v34 = vsel %vm6321_vm6, %v12999_v4, 0.0 }
 0xb8a   :  { %6408 = vrot.lane.b32.xlu0 %v6323_v34, %s11546_s23 }
 0xb8b   :  { %v6295_v61 = vpop.permute.xlu0 %6294 }
 0xb8c   :  { %v6293_v44 = vpop.permute.xlu1 %6292  ;;  %v13006_v62 = vsel %vm6312_vm5, 0.0, %v6295_v61  ;;  %v288_v61 = vld [vmem:[%s13579_s16 + $0xa8] sm:$0xff] }
 0xb8d   :  { %v13009_v53 = vsel %vm6312_vm5, 0.0, %v6293_v44  ;;  %v6325_v50 = vsel %vm6321_vm6, %v13006_v62, 0.0 }
 0xb8e   :  { %v6324_v1 = vsel %vm6321_vm6, %v13009_v53, 0.0  ;;  %6562 = vrot.lane.b32.xlu0 %v6325_v50, %s11546_s23 }
 0xb8f   :  { %6485 = vrot.lane.b32.xlu1 %v6324_v1, %s11546_s23  ;;  %v6299_v16 = vpop.permute.xlu0 %6298 }
 0xb90   :  { %v13018_v5 = vsel %vm6312_vm5, 0.0, %v6299_v16 }
 0xb91   :  { %v6327_v56 = vsel %vm6321_vm6, %v13018_v5, 0.0 }
 0xb92   :  { %6716 = vrot.lane.b32.xlu0 %v6327_v56, %s11546_s23 }
 0xba9   :  { %v6297_v57 = vpop.permute.xlu1 %6296 }
 0xbaa   :  { %v13024_v58 = vsel %vm6312_vm5, 0.0, %v6297_v57 }
 0xbab   :  { %v6326_v47 = vsel %vm6321_vm6, %v13024_v58, 0.0 }
 0xbac   :  { %6639 = vrot.lane.b32.xlu1 %v6326_v47, %s11546_s23 }
 0xbc5   :  { %v6301_v10 = vpop.permute.xlu1 %6300 }
 0xbc6   :  { %v13030_v39 = vsel %vm6312_vm5, 0.0, %v6301_v10 }
 0xbc7   :  { %v6328_v18 = vsel %vm6321_vm6, %v13030_v39, 0.0 }
 0xbc8   :  { %6793 = vrot.lane.b32.xlu1 %v6328_v18, %s11546_s23 }
 0xbcb   :  { %v6303_v20 = vpop.permute.xlu0 %6302 }
 0xbcc   :  { %v13036_v6 = vsel %vm6312_vm5, 0.0, %v6303_v20  ;;  %7530 = vrot.lane.b32.xlu1 %v6322_v33, %s11547_s1 }
 0xbcd   :  { %v6329_v63 = vsel %vm6321_vm6, %v13036_v6, 0.0 }
 0xbce   :  { %6870 = vrot.lane.b32.xlu0 %v6329_v63, %s11546_s23 }
 0xbd0   :  { %7682 = vrot.lane.b32.xlu1 %v6324_v1, %s11547_s1 }
 0xbd2   :  { %7606 = vrot.lane.b32.xlu0 %v6323_v34, %s11547_s1  ;;  %v289_v34 = vld [vmem:[%s13579_s16 + $0xb0] sm:$0xff] }
 0xbd4   :  { %7834 = vrot.lane.b32.xlu1 %v6326_v47, %s11547_s1 }
 0xbd6   :  { %7758 = vrot.lane.b32.xlu0 %v6325_v50, %s11547_s1 }
 0xbd8   :  { %7986 = vrot.lane.b32.xlu1 %v6328_v18, %s11547_s1 }
 0xbda   :  { %7910 = vrot.lane.b32.xlu0 %v6327_v56, %s11547_s1 }
 0xbdc   :  { %8148 = vperm.xlu1 %11336, %v291_v45  }
 0xbde   :  { %8062 = vrot.lane.b32.xlu0 %v6329_v63, %s11547_s1 }
 0xbe0   :  { %8158 = vperm.xlu1 %11336, %v293_v11  }
 0xbe2   :  { %8153 = vperm.xlu0 %11335, %v292_v54  }
 0xbe4   :  { %8168 = vperm.xlu1 %11336, %v295_v7  }
 0xbe6   :  { %8163 = vperm.xlu0 %11335, %v294_v30  }
 0xbe8   :  { %8178 = vperm.xlu1 %11336, %v297_v27  }
 0xbea   :  { %8173 = vperm.xlu0 %11335, %v296_v31  }
 0xbee   :  { %8183 = vperm.xlu0 %11335, %v298_v55  }
 0xbfa   :  { %v6332_v2 = vpop.permute.xlu1 %6331 }
 0xbfb   :  { %11081 = vmatpush3.msra.mxu0 %v6332_v2 }
 0xbfc   :  { %v6409_v19 = vpop.permute.xlu0 %6408  ;;  %11090 = vmatprep.subr.mxu0 %v11544_v8  ;;  %11083 = vmatmul.mubr.msk.f32.vlgmr.msra.gmra.mrb[64].mxu0 %vm376_vm2, %v275_v36 }
 0xbfd   :  { %11086 = vmatpush3.msra.mxu1 %v6409_v19  ;;  %11092 = vmatprep.mubr.msk.f32.mxu0 %vm11545_vm0, %v11544_v8 }
 0xbfe   :  { %11095 = vmatprep.subr.mxu1 %v11544_v8  ;;  %11088 = vmatmul.mubr.msk.f32.vlgmr.msra.gmra.mrb[64].mxu1 %vm376_vm2, %v276_v22 }
 0xbff   :  { %11097 = vmatprep.mubr.msk.f32.mxu1 %vm11545_vm0, %v11544_v8 }
 0xc00   :  { %v6563_v25 = vpop.permute.xlu0 %6562 }
 0xc01   :  { %v6486_v59 = vpop.permute.xlu1 %6485  ;;  %11096 = vmatpush3.msra.mxu1 %v6563_v25 }
 0xc02   :  { %11091 = vmatpush3.msra.mxu0 %v6486_v59  ;;  %11105 = vmatprep.subr.mxu1 %v11544_v8 }
 0xc03   :  { %11098 = vmatmul.mubr.msk.f32.vlgmr.msra.gmra.mrb[66].mxu1 %vm376_vm2, %v278_v21  ;;  %11100 = vmatprep.subr.mxu0 %v11544_v8 }
 0xc04   :  { %v6717_v60 = vpop.permute.xlu0 %6716  ;;  %11093 = vmatmul.mubr.msk.f32.vlgmr.msra.gmra.mrb[66].mxu0 %vm376_vm2, %v277_v32  ;;  %11107 = vmatprep.mubr.msk.f32.mxu1 %vm11545_vm0, %v11544_v8 }
 0xc05   :  { %11106 = vmatpush3.msra.mxu1 %v6717_v60  ;;  %11102 = vmatprep.mubr.msk.f32.mxu0 %vm11545_vm0, %v11544_v8 }
 0xc06   :  { %11115 = vmatprep.subr.mxu1 %v11544_v8 }
 0xc07   :  { %11108 = vmatmul.mubr.msk.f32.vlgmr.msra.gmra.mrb[68].mxu1 %vm376_vm2, %v280_v24 }
 0xc08   :  { %11117 = vmatprep.mubr.msk.f32.mxu1 %vm11545_vm0, %v11544_v8 }
 0xc1e   :  { %v6640_v52 = vpop.permute.xlu1 %6639 }
 0xc1f   :  { %11101 = vmatpush3.msra.mxu0 %v6640_v52 }
 0xc20   :  { %11103 = vmatmul.mubr.msk.f32.vlgmr.msra.gmra.mrb[68].mxu0 %vm376_vm2, %v279_v26  ;;  %11110 = vmatprep.subr.mxu0 %v11544_v8 }
 0xc21   :  { %11112 = vmatprep.mubr.msk.f32.mxu0 %vm11545_vm0, %v11544_v8 }
 0xc3a   :  { %v6794_v12 = vpop.permute.xlu1 %6793 }
 0xc3b   :  { %11111 = vmatpush3.msra.mxu0 %v6794_v12 }
 0xc3c   :  { %11113 = vmatmul.mubr.msk.f32.vlgmr.msra.gmra.mrb[70].mxu0 %vm376_vm2, %v281_v51  ;;  %11120 = vmatprep.subr.mxu0 %v11544_v8 }
 0xc3d   :  { %11121 = vmatpush3.msk.msra.mxu0 %vm6321_vm6, %v12994_v38  ;;  %11122 = vmatprep.mubr.msk.f32.mxu0 %vm11545_vm0, %v11544_v8  ;;  %v287_v38 = vld [vmem:[%s13579_s16 + $0xa0] sm:$0xff] }
 0xc3e   :  { %11130 = vmatprep.subr.mxu0 %v11544_v8  ;;  %v7531_v46 = vpop.permute.xlu1 %7530 }
 0xc40   :  { %11123 = vmatmul.mubr.msk.f32.vlgmr.msra.gmra.mrb[72].mxu0 %vm376_vm2, %v267_v0  ;;  %v6871_v29 = vpop.permute.xlu0 %6870 }
 0xc41   :  { %11131 = vmatpush3.msk.msra.mxu0 %vm6321_vm6, %v13009_v53  ;;  %11116 = vmatpush3.msra.mxu1 %v6871_v29 }
 0xc42   :  { %11118 = vmatmul.mubr.msk.f32.vlgmr.msra.gmra.mrb[70].mxu1 %vm376_vm2, %v282_v9  ;;  %11125 = vmatprep.subr.mxu1 %v11544_v8  ;;  %v7683_v42 = vpop.permute.xlu1 %7682 }
 0xc43   :  { %11126 = vmatpush3.msk.msra.mxu1 %vm6321_vm6, %v12999_v4  ;;  %11132 = vmatprep.mubr.msk.f32.mxu0 %vm11545_vm0, %v11544_v8 }
 0xc44   :  { %11140 = vmatprep.subr.mxu0 %v11544_v8  ;;  %11133 = vmatmul.mubr.msk.f32.vlgmr.msra.gmra.mrb[74].mxu0 %vm376_vm2, %v269_v14  ;;  %v7607_v23 = vpop.permute.xlu0 %7606 }
 0xc45   :  { %11141 = vmatpush3.msk.msra.mxu0 %vm6321_vm6, %v13024_v58  ;;  %11127 = vmatprep.mubr.msk.f32.mxu1 %vm11545_vm0, %v11544_v8 }
 0xc46   :  { %11135 = vmatprep.subr.mxu1 %v11544_v8  ;;  %11128 = vmatmul.mubr.msk.f32.vlgmr.msra.gmra.mrb[72].mxu1 %vm376_vm2, %v268_v41  ;;  %v7835_v37 = vpop.permute.xlu1 %7834 }
 0xc47   :  { %11136 = vmatpush3.msk.msra.mxu1 %vm6321_vm6, %v13006_v62  ;;  %11142 = vmatprep.mubr.msk.f32.mxu0 %vm11545_vm0, %v11544_v8  ;;  %v290_v62 = vld [vmem:[%s13579_s16 + $0xb8] sm:$0xff] }
 0xc48   :  { %11150 = vmatprep.subr.mxu0 %v11544_v8  ;;  %11143 = vmatmul.mubr.msk.f32.vlgmr.msra.gmra.mrb[76].mxu0 %vm376_vm2, %v271_v15  ;;  %v7759_v3 = vpop.permute.xlu0 %7758 }
 0xc49   :  { %11151 = vmatpush3.msk.msra.mxu0 %vm6321_vm6, %v13030_v39  ;;  %11137 = vmatprep.mubr.msk.f32.mxu1 %vm11545_vm0, %v11544_v8 }
 0xc4a   :  { %11145 = vmatprep.subr.mxu1 %v11544_v8  ;;  %11138 = vmatmul.mubr.msk.f32.vlgmr.msra.gmra.mrb[74].mxu1 %vm376_vm2, %v270_v40  ;;  %v7987_v33 = vpop.permute.xlu1 %7986 }
 0xc4b   :  { %11146 = vmatpush3.msk.msra.mxu1 %vm6321_vm6, %v13018_v5  ;;  %11152 = vmatprep.mubr.msk.f32.mxu0 %vm11545_vm0, %v11544_v8 }
 0xc4c   :  { %11160 = vmatprep.subr.mxu0 %v11544_v8  ;;  %11153 = vmatmul.mubr.msk.f32.vlgmr.msra.gmra.mrb[78].mxu0 %vm376_vm2, %v273_v13  ;;  %v7911_v4 = vpop.permute.xlu0 %7910 }
 0xc4d   :  { %11161 = vmatpush3.msra.mxu0 %v7531_v46  ;;  %11147 = vmatprep.mubr.msk.f32.mxu1 %vm11545_vm0, %v11544_v8 }
 0xc4e   :  { %11155 = vmatprep.subr.mxu1 %v11544_v8  ;;  %11148 = vmatmul.mubr.msk.f32.vlgmr.msra.gmra.mrb[76].mxu1 %vm376_vm2, %v272_v43 }
 0xc4f   :  { %11156 = vmatpush3.msk.msra.mxu1 %vm6321_vm6, %v13036_v6  ;;  %11162 = vmatprep.mubr.msk.f32.mxu0 %vm11545_vm0, %v11544_v8 }
 0xc50   :  { %11170 = vmatprep.subr.mxu0 %v11544_v8  ;;  %11163 = vmatmul.mubr.msk.f32.vlgmr.msra.gmra.mrb[80].mxu0 %vm376_vm2, %v283_v17  ;;  %v8063_v44 = vpop.permute.xlu0 %8062 }
 0xc51   :  { %11171 = vmatpush3.msra.mxu0 %v7683_v42  ;;  %11157 = vmatprep.mubr.msk.f32.mxu1 %vm11545_vm0, %v11544_v8 }
 0xc52   :  { %11165 = vmatprep.subr.mxu1 %v11544_v8  ;;  %11158 = vmatmul.mubr.msk.f32.vlgmr.msra.gmra.mrb[78].mxu1 %vm376_vm2, %v274_v35 }
 0xc53   :  { %11166 = vmatpush3.msra.mxu1 %v7607_v23  ;;  %11172 = vmatprep.mubr.msk.f32.mxu0 %vm11545_vm0, %v11544_v8 }
 0xc54   :  { %11180 = vmatprep.subr.mxu0 %v11544_v8  ;;  %11173 = vmatmul.mubr.msk.f32.vlgmr.msra.gmra.mrb[82].mxu0 %vm376_vm2, %v285_v48 }
 0xc55   :  { %11181 = vmatpush3.msra.mxu0 %v7835_v37  ;;  %11167 = vmatprep.mubr.msk.f32.mxu1 %vm11545_vm0, %v11544_v8 }
 0xc56   :  { %11175 = vmatprep.subr.mxu1 %v11544_v8  ;;  %11168 = vmatmul.mubr.msk.f32.vlgmr.msra.gmra.mrb[80].mxu1 %vm376_vm2, %v284_v49 }
 0xc57   :  { %11176 = vmatpush3.msra.mxu1 %v7759_v3  ;;  %11182 = vmatprep.mubr.msk.f32.mxu0 %vm11545_vm0, %v11544_v8 }
 0xc58   :  { %11190 = vmatprep.subr.mxu0 %v11544_v8  ;;  %11183 = vmatmul.mubr.msk.f32.vlgmr.msra.gmra.mrb[84].mxu0 %vm376_vm2, %v287_v38 }
 0xc59   :  { %11191 = vmatpush3.msra.mxu0 %v7987_v33  ;;  %11177 = vmatprep.mubr.msk.f32.mxu1 %vm11545_vm0, %v11544_v8 }
 0xc5a   :  { %11185 = vmatprep.subr.mxu1 %v11544_v8  ;;  %11178 = vmatmul.mubr.msk.f32.vlgmr.msra.gmra.mrb[82].mxu1 %vm376_vm2, %v286_v28 }
 0xc5b   :  { %11186 = vmatpush3.msra.mxu1 %v7911_v4  ;;  %11192 = vmatprep.mubr.msk.f32.mxu0 %vm11545_vm0, %v11544_v8  ;;  %v8149_v59 = vpop.permute.xlu1 %8148 }
 0xc5c   :  { %11193 = vmatmul.mubr.msk.f32.vlgmr.msra.gmra.mrb[86].mxu0 %vm376_vm2, %v289_v34  ;;  %11187 = vmatprep.mubr.msk.f32.mxu1 %vm11545_vm0, %v11544_v8 }
 0xc5d   :  { %11195 = vmatprep.subr.mxu1 %v11544_v8  ;;  %11200 = vmatprep.subr.mxu0 %v11544_v8 }
 0xc5e   :  { %11188 = vmatmul.mubr.msk.f32.vlgmr.msra.gmra.mrb[84].mxu1 %vm376_vm2, %v288_v61  ;;  %11202 = vmatprep.mubr.msk.f32.mxu0 %vm11545_vm0, %v11544_v8 }
 0xc5f   :  { %11196 = vmatpush3.msra.mxu1 %v8063_v44  ;;  %11197 = vmatprep.mubr.msk.f32.mxu1 %vm11545_vm0, %v11544_v8  ;;  %v8159_v29 = vpop.permute.xlu1 %8158 }
 0xc60   :  { %11205 = vmatprep.subr.mxu1 %v11544_v8 }
 0xc61   :  { %v8154_v15 = vpop.permute.xlu0 %8153 }
 0xc62   :  { %11198 = vmatmul.mubr.msk.f32.vlgmr.msra.gmra.mrb[86].mxu1 %vm376_vm2, %v290_v62 }
 0xc63   :  { %11207 = vmatprep.mubr.msk.f32.mxu1 %vm11545_vm0, %v11544_v8  ;;  %v8169_v48 = vpop.permute.xlu1 %8168 }
 0xc65   :  { %v8164_v38 = vpop.permute.xlu0 %8163 }
 0xccf   :  { %v6403_v53 = vpop.f32.mrb[64].mxu0 }
 0xcd0   :  { %v11084_v50 = vpop.f32.mrb[65].mxu0 }
 0xcd1   :  { %v6480_v1 = vpop.f32.mrb[64].mxu1 }
 0xcd2   :  { %v11089_v16 = vpop.f32.mrb[65].mxu1 }
 0xcd6   :  { %v6634_v5 = vpop.f32.mrb[66].mxu1 }
 0xcd7   :  { %v6557_v56 = vpop.f32.mrb[66].mxu0  ;;  %v11099_v57 = vpop.f32.mrb[67].mxu1 }
 0xcd8   :  { %v11094_v58 = vpop.f32.mrb[67].mxu0  ;;  %v8174_v57 = vpop.permute.xlu0 %8173 }
 0xcda   :  { %v6788_v47 = vpop.f32.mrb[68].mxu1 }
 0xcdb   :  { %v11109_v10 = vpop.f32.mrb[69].mxu1 }
 0xcf3   :  { %v6711_v39 = vpop.f32.mrb[68].mxu0 }
 0xcf4   :  { %v11104_v18 = vpop.f32.mrb[69].mxu0 }
 0xd0f   :  { %v6865_v20 = vpop.f32.mrb[70].mxu0 }
 0xd10   :  { %v11114_v6 = vpop.f32.mrb[71].mxu0 }
 0xd13   :  { %v7015_v63 = vpop.f32.mrb[72].mxu0 }
 0xd14   :  { %v7016_v45 = vadd.f32 %v7015_v63, %v6403_v53  ;;  %v11124_v11 = vpop.f32.mrb[73].mxu0 }
 0xd15   :  { %v6942_v54 = vpop.f32.mrb[70].mxu1 }
 0xd16   :  { %v11119_v7 = vpop.f32.mrb[71].mxu1 }
 0xd17   :  { %v7161_v30 = vpop.f32.mrb[74].mxu0 }
 0xd18   :  { %v7162_v27 = vadd.f32 %v7161_v30, %v6557_v56  ;;  %v11134_v31 = vpop.f32.mrb[75].mxu0 }
 0xd19   :  { %v7088_v55 = vpop.f32.mrb[72].mxu1 }
 0xd1a   :  { %v7089_v36 = vadd.f32 %v7088_v55, %v6480_v1  ;;  %v11129_v2 = vpop.f32.mrb[73].mxu1  ;;  %v8179_v1 = vpop.permute.xlu1 %8178 }
 0xd1b   :  { %v7307_v22 = vpop.f32.mrb[76].mxu0 }
 0xd1c   :  { %v7308_v19 = vadd.f32 %v7307_v22, %v6711_v39  ;;  %v11144_v25 = vpop.f32.mrb[77].mxu0 }
 0xd1d   :  { %v7234_v21 = vpop.f32.mrb[74].mxu1 }
 0xd1e   :  { %v7235_v32 = vadd.f32 %v7234_v21, %v6634_v5  ;;  %v11139_v60 = vpop.f32.mrb[75].mxu1 }
 0xd1f   :  { %v7453_v24 = vpop.f32.mrb[78].mxu0 }
 0xd20   :  { %v7454_v26 = vadd.f32 %v7453_v24, %v6865_v20  ;;  %v11154_v52 = vpop.f32.mrb[79].mxu0 }
 0xd21   :  { %v7380_v51 = vpop.f32.mrb[76].mxu1 }
 0xd22   :  { %v7381_v12 = vadd.f32 %v7380_v51, %v6788_v47  ;;  %v11149_v0 = vpop.f32.mrb[77].mxu1 }
 0xd23   :  { %v7602_v9 = vpop.f32.mrb[80].mxu0 }
 0xd24   :  { %v8138_v14 = vadd.f32 %v7602_v9, %v7016_v45  ;;  %v11164_v41 = vpop.f32.mrb[81].mxu0  ;;  %v8184_v45 = vpop.permute.xlu0 %8183 }
 0xd25   :  { %v7526_v46 = vpop.f32.mrb[78].mxu1  ;;  %v323_v41 = vld [vmem:[%s13582_s19] sm:$0xff] }
 0xd26   :  { %v8186_v40 = vadd.f32 %v8149_v59, %v8138_v14  ;;  %v7527_v13 = vadd.f32 %v7526_v46, %v6942_v54  ;;  %v11159_v43 = vpop.f32.mrb[79].mxu1  ;;  %v324_v46 = vld [vmem:[%s13582_s19 + $0x8] sm:$0xff] }
 0xd27   :  { %v7754_v42 = vpop.f32.mrb[82].mxu0  ;;  %v329_v43 = vld [vmem:[%s13582_s19 + $0x30] sm:$0xff] }
 0xd28   :  { %v8140_v23 = vadd.f32 %v7754_v42, %v7162_v27  ;;  %8202 = vrot.lane.b32.xlu1 %v8186_v40, %s11540_s25  ;;  %v11174_v17 = vpop.f32.mrb[83].mxu0  ;;  %v327_v40 = vld [vmem:[%s13582_s19 + $0x20] sm:$0xff]  ;;  %v328_v42 = vld [vmem:[%s13582_s19 + $0x28] sm:$0xff] }
 0xd29   :  { %v7678_v35 = vpop.f32.mrb[80].mxu1  ;;  %v307_v17 = vld [vmem:[%s13581_s18 + $0x40] sm:$0xff] }
 0xd2a   :  { %v8188_v37 = vadd.f32 %v8159_v29, %v8140_v23  ;;  %v8139_v3 = vadd.f32 %v7678_v35, %v7089_v36  ;;  %v11169_v49 = vpop.f32.mrb[81].mxu1  ;;  %v330_v23 = vld [vmem:[%s13582_s19 + $0x38] sm:$0xff] }
 0xd2b   :  { %v7906_v28 = vpop.f32.mrb[84].mxu0 }
 0xd2c   :  { %v8187_v33 = vadd.f32 %v8154_v15, %v8139_v3  ;;  %v8142_v4 = vadd.f32 %v7906_v28, %v7308_v19  ;;  %8206 = vrot.lane.b32.xlu1 %v8188_v37, %s11540_s25  ;;  %v11184_v34 = vpop.f32.mrb[85].mxu0  ;;  %v325_v15 = vld [vmem:[%s13582_s19 + $0x10] sm:$0xff]  ;;  %v308_v3 = vld [vmem:[%s13581_s18 + $0x48] sm:$0xff] }
 0xd2d   :  { %v7830_v61 = vpop.f32.mrb[82].mxu1  ;;  %v313_v34 = vld [vmem:[%s13581_s18 + $0x70] sm:$0xff] }
 0xd2e   :  { %v8190_v44 = vadd.f32 %v8169_v48, %v8142_v4  ;;  %v8141_v62 = vadd.f32 %v7830_v61, %v7235_v32  ;;  %v11179_v53 = vpop.f32.mrb[83].mxu1  ;;  %8204 = vrot.lane.b32.xlu0 %v8187_v33, %s11540_s25  ;;  %v309_v48 = vld [vmem:[%s13581_s18 + $0x50] sm:$0xff]  ;;  %v310_v33 = vld [vmem:[%s13581_s18 + $0x58] sm:$0xff] }
 0xd2f   :  { %v8058_v50 = vpop.f32.mrb[86].mxu0  ;;  %v299_v53 = vld [vmem:[%s13581_s18] sm:$0xff] }
 0xd30   :  { %v8189_v16 = vadd.f32 %v8164_v38, %v8141_v62  ;;  %v8144_v5 = vadd.f32 %v8058_v50, %v7454_v26  ;;  %8210 = vrot.lane.b32.xlu1 %v8190_v44, %s11540_s25  ;;  %v11194_v56 = vpop.f32.mrb[87].mxu0  ;;  %v311_v38 = vld [vmem:[%s13581_s18 + $0x60] sm:$0xff]  ;;  %v312_v44 = vld [vmem:[%s13581_s18 + $0x68] sm:$0xff]  ;;  %v314_v50 = vld [vmem:[%s13581_s18 + $0x78] sm:$0xff] }
 0xd31   :  { %v7982_v58 = vpop.f32.mrb[84].mxu1  ;;  %v303_v56 = vld [vmem:[%s13581_s18 + $0x20] sm:$0xff] }
 0xd32   :  { %v8192_v47 = vadd.f32 %v8179_v1, %v8144_v5  ;;  %v8143_v10 = vadd.f32 %v7982_v58, %v7381_v12  ;;  %v11189_v39 = vpop.f32.mrb[85].mxu1  ;;  %8208 = vrot.lane.b32.xlu0 %v8189_v16, %s11540_s25  ;;  %v301_v16 = vld [vmem:[%s13581_s18 + $0x10] sm:$0xff]  ;;  %v300_v5 = vld [vmem:[%s13581_s18 + $0x8] sm:$0xff]  ;;  %v302_v58 = vld [vmem:[%s13581_s18 + $0x18] sm:$0xff] }
 0xd34   :  { %v8191_v18 = vadd.f32 %v8174_v57, %v8143_v10  ;;  %8214 = vrot.lane.b32.xlu1 %v8192_v47, %s11540_s25  ;;  %v305_v47 = vld [vmem:[%s13581_s18 + $0x30] sm:$0xff]  ;;  %v304_v10 = vld [vmem:[%s13581_s18 + $0x28] sm:$0xff] }
 0xd35   :  { %v8134_v20 = vpop.f32.mrb[86].mxu1 }
 0xd36   :  { %v8145_v6 = vadd.f32 %v8134_v20, %v7527_v13  ;;  %v11199_v63 = vpop.f32.mrb[87].mxu1  ;;  %8212 = vrot.lane.b32.xlu0 %v8191_v18, %s11540_s25  ;;  %v326_v13 = vld [vmem:[%s13582_s19 + $0x18] sm:$0xff]  ;;  %v315_v20 = vld [vmem:[%s13581_s18 + $0x80] sm:$0xff] }
 0xd37   :  { %v317_v63 = vld [vmem:[%s13581_s18 + $0x90] sm:$0xff] }
 0xd38   :  { %v8193_v11 = vadd.f32 %v8184_v45, %v8145_v6  ;;  %v306_v6 = vld [vmem:[%s13581_s18 + $0x38] sm:$0xff] }
 0xd3a   :  { %8216 = vrot.lane.b32.xlu0 %v8193_v11, %s11540_s25 }
 0xd9a   :  { %v8203_v54 = vpop.permute.xlu1 %8202 }
 0xd9b   :  { %v13266_v7 = vsel %vm6312_vm5, 0.0, %v8203_v54  ;;  %v316_v54 = vld [vmem:[%s13581_s18 + $0x88] sm:$0xff] }
 0xd9c   :  { %v8234_v30 = vsel %vm6321_vm6, %v13266_v7, 0.0 }
 0xd9d   :  { %8243 = vrot.lane.b32.xlu1 %v8234_v30, %s11546_s23 }
 0xd9e   :  { %v8207_v27 = vpop.permute.xlu1 %8206 }
 0xd9f   :  { %v13272_v31 = vsel %vm6312_vm5, 0.0, %v8207_v27 }
 0xda0   :  { %v8236_v55 = vsel %vm6321_vm6, %v13272_v31, 0.0  ;;  %v8205_v36 = vpop.permute.xlu0 %8204 }
 0xda1   :  { %v13277_v2 = vsel %vm6312_vm5, 0.0, %v8205_v36  ;;  %8397 = vrot.lane.b32.xlu1 %v8236_v55, %s11546_s23  ;;  %v320_v36 = vld [vmem:[%s13581_s18 + $0xa8] sm:$0xff] }
 0xda2   :  { %v8235_v22 = vsel %vm6321_vm6, %v13277_v2, 0.0  ;;  %v8211_v19 = vpop.permute.xlu1 %8210 }
 0xda3   :  { %v13283_v25 = vsel %vm6312_vm5, 0.0, %v8211_v19  ;;  %8320 = vrot.lane.b32.xlu0 %v8235_v22, %s11546_s23 }
 0xda4   :  { %v8238_v21 = vsel %vm6321_vm6, %v13283_v25, 0.0  ;;  %v8209_v59 = vpop.permute.xlu0 %8208 }
 0xda5   :  { %v13289_v32 = vsel %vm6312_vm5, 0.0, %v8209_v59  ;;  %8551 = vrot.lane.b32.xlu1 %v8238_v21, %s11546_s23 }
 0xda6   :  { %v8237_v60 = vsel %vm6321_vm6, %v13289_v32, 0.0  ;;  %v8215_v24 = vpop.permute.xlu1 %8214 }
 0xda7   :  { %v13295_v26 = vsel %vm6312_vm5, 0.0, %v8215_v24  ;;  %8474 = vrot.lane.b32.xlu0 %v8237_v60, %s11546_s23 }
 0xda8   :  { %v8240_v52 = vsel %vm6321_vm6, %v13295_v26, 0.0  ;;  %v8213_v51 = vpop.permute.xlu0 %8212 }
 0xda9   :  { %v13301_v12 = vsel %vm6312_vm5, 0.0, %v8213_v51  ;;  %8705 = vrot.lane.b32.xlu1 %v8240_v52, %s11546_s23 }
 0xdaa   :  { %v8239_v0 = vsel %vm6321_vm6, %v13301_v12, 0.0 }
 0xdab   :  { %8628 = vrot.lane.b32.xlu0 %v8239_v0, %s11546_s23 }
 0xdac   :  { %v8217_v9 = vpop.permute.xlu0 %8216 }
 0xdad   :  { %v13308_v29 = vsel %vm6312_vm5, 0.0, %v8217_v9  ;;  %9442 = vrot.lane.b32.xlu1 %v8234_v30, %s11547_s1  ;;  %v318_v30 = vld [vmem:[%s13581_s18 + $0x98] sm:$0xff] }
 0xdae   :  { %v8241_v14 = vsel %vm6321_vm6, %v13308_v29, 0.0 }
 0xdaf   :  { %8782 = vrot.lane.b32.xlu0 %v8241_v14, %s11546_s23 }
 0xdb1   :  { %9594 = vrot.lane.b32.xlu1 %v8236_v55, %s11547_s1  ;;  %v321_v55 = vld [vmem:[%s13581_s18 + $0xb0] sm:$0xff] }
 0xdb3   :  { %9518 = vrot.lane.b32.xlu0 %v8235_v22, %s11547_s1  ;;  %v322_v22 = vld [vmem:[%s13581_s18 + $0xb8] sm:$0xff] }
 0xdb5   :  { %9746 = vrot.lane.b32.xlu1 %v8238_v21, %s11547_s1 }
 0xdb7   :  { %9670 = vrot.lane.b32.xlu0 %v8237_v60, %s11547_s1 }
 0xdb9   :  { %9898 = vrot.lane.b32.xlu1 %v8240_v52, %s11547_s1 }
 0xdbb   :  { %9822 = vrot.lane.b32.xlu0 %v8239_v0, %s11547_s1 }
 0xdbd   :  { %10060 = vperm.xlu1 %11336, %v323_v41  }
 0xdbf   :  { %9974 = vrot.lane.b32.xlu0 %v8241_v14, %s11547_s1  ;;  %s11549_s1 = smov [#allocation10]  }
 0xdc0   :  { %s10344_s26 = sshll.u32 %s11549_s1, 4  ;;  %s10345_s26 = int_to_ptr.vmem [resolvable:$true] %s10344_s26 }
 0xdc1   :  { %10070 = vperm.xlu1 %11336, %v325_v15   ;;  %s11505_s30 = scalar_lea.vmem %s10345_s26, 1024  ;;  %p11510_p5 = scmp.lt.s32.totalorder %s10345_s26, %s10345_s26 }
 0xdc2   :  { %p11506_p4 = scmp.ne.s32.totalorder %s10345_s26, %s11505_s30  ;;  %p11511_p6 = scmp.lt.s32.totalorder %s11505_s30, %s11505_s30 }
 0xdc3   :  { %10065 = vperm.xlu0 %11335, %v324_v46  }
 0xdc4   :  { %p11512_p7 = por %p11511_p6, %p11510_p5 }
 0xdc5   :  { %10080 = vperm.xlu1 %11336, %v327_v40  }
 0xdc6   :  { %p11513_p8 = pnand %p11512_p7, %p11506_p4 }
 0xdc7   :  { %10075 = vperm.xlu0 %11335, %v326_v13  }
 0xdc9   :  { %10090 = vperm.xlu1 %11336, %v329_v43  }
 0xdcb   :  { %10085 = vperm.xlu0 %11335, %v328_v42  }
 0xdcf   :  { %10095 = vperm.xlu0 %11335, %v330_v23  }
 0xe0f   :  { %v8244_v35 = vpop.permute.xlu1 %8243 }
 0xe10   :  { %11201 = vmatpush3.msra.mxu0 %v8244_v35 }
 0xe11   :  { %11203 = vmatmul.mubr.msk.f32.vlgmr.msra.gmra.mrb[88].mxu0 %vm376_vm2, %v307_v17  ;;  %11210 = vmatprep.subr.mxu0 %v11544_v8 }
 0xe12   :  { %11212 = vmatprep.mubr.msk.f32.mxu0 %vm11545_vm0, %v11544_v8 }
 0xe13   :  { %v8398_v37 = vpop.permute.xlu1 %8397 }
 0xe14   :  { %11211 = vmatpush3.msra.mxu0 %v8398_v37 }
 0xe15   :  { %11213 = vmatmul.mubr.msk.f32.vlgmr.msra.gmra.mrb[90].mxu0 %vm376_vm2, %v309_v48  ;;  %v8321_v49 = vpop.permute.xlu0 %8320  ;;  %11220 = vmatprep.subr.mxu0 %v11544_v8 }
 0xe16   :  { %11206 = vmatpush3.msra.mxu1 %v8321_v49  ;;  %11222 = vmatprep.mubr.msk.f32.mxu0 %vm11545_vm0, %v11544_v8 }
 0xe17   :  { %v8552_v28 = vpop.permute.xlu1 %8551  ;;  %11208 = vmatmul.mubr.msk.f32.vlgmr.msra.gmra.mrb[88].mxu1 %vm376_vm2, %v308_v3  ;;  %11215 = vmatprep.subr.mxu1 %v11544_v8 }
 0xe18   :  { %11221 = vmatpush3.msra.mxu0 %v8552_v28  ;;  %11217 = vmatprep.mubr.msk.f32.mxu1 %vm11545_vm0, %v11544_v8 }
 0xe19   :  { %11223 = vmatmul.mubr.msk.f32.vlgmr.msra.gmra.mrb[92].mxu0 %vm376_vm2, %v311_v38  ;;  %v8475_v4 = vpop.permute.xlu0 %8474  ;;  %11230 = vmatprep.subr.mxu0 %v11544_v8 }
 0xe1a   :  { %11216 = vmatpush3.msra.mxu1 %v8475_v4  ;;  %11232 = vmatprep.mubr.msk.f32.mxu0 %vm11545_vm0, %v11544_v8 }
 0xe1b   :  { %v8706_v61 = vpop.permute.xlu1 %8705  ;;  %11218 = vmatmul.mubr.msk.f32.vlgmr.msra.gmra.mrb[90].mxu1 %vm376_vm2, %v310_v33  ;;  %11225 = vmatprep.subr.mxu1 %v11544_v8 }
 0xe1c   :  { %11231 = vmatpush3.msra.mxu0 %v8706_v61  ;;  %11227 = vmatprep.mubr.msk.f32.mxu1 %vm11545_vm0, %v11544_v8 }
 0xe1d   :  { %11233 = vmatmul.mubr.msk.f32.vlgmr.msra.gmra.mrb[94].mxu0 %vm376_vm2, %v313_v34  ;;  %11240 = vmatprep.subr.mxu0 %v11544_v8  ;;  %v8629_v62 = vpop.permute.xlu0 %8628 }
 0xe1e   :  { %11226 = vmatpush3.msra.mxu1 %v8629_v62  ;;  %11241 = vmatpush3.msk.msra.mxu0 %vm6321_vm6, %v13266_v7  ;;  %v319_v7 = vld [vmem:[%s13581_s18 + $0xa0] sm:$0xff] }
 0xe1f   :  { %11228 = vmatmul.mubr.msk.f32.vlgmr.msra.gmra.mrb[92].mxu1 %vm376_vm2, %v312_v44  ;;  %11242 = vmatprep.mubr.msk.f32.mxu0 %vm11545_vm0, %v11544_v8  ;;  %v9443_v57 = vpop.permute.xlu1 %9442 }
 0xe20   :  { %11250 = vmatprep.subr.mxu0 %v11544_v8  ;;  %11235 = vmatprep.subr.mxu1 %v11544_v8 }
 0xe21   :  { %11243 = vmatmul.mubr.msk.f32.vlgmr.msra.gmra.mrb[96].mxu0 %vm376_vm2, %v299_v53  ;;  %v8783_v1 = vpop.permute.xlu0 %8782  ;;  %11237 = vmatprep.mubr.msk.f32.mxu1 %vm11545_vm0, %v11544_v8 }
 0xe22   :  { %11251 = vmatpush3.msk.msra.mxu0 %vm6321_vm6, %v13272_v31  ;;  %11236 = vmatpush3.msra.mxu1 %v8783_v1 }
 0xe23   :  { %11238 = vmatmul.mubr.msk.f32.vlgmr.msra.gmra.mrb[94].mxu1 %vm376_vm2, %v314_v50  ;;  %11245 = vmatprep.subr.mxu1 %v11544_v8  ;;  %v9595_v39 = vpop.permute.xlu1 %9594 }
 0xe24   :  { %11246 = vmatpush3.msk.msra.mxu1 %vm6321_vm6, %v13277_v2  ;;  %11252 = vmatprep.mubr.msk.f32.mxu0 %vm11545_vm0, %v11544_v8 }
 0xe25   :  { %11260 = vmatprep.subr.mxu0 %v11544_v8  ;;  %11253 = vmatmul.mubr.msk.f32.vlgmr.msra.gmra.mrb[98].mxu0 %vm376_vm2, %v301_v16  ;;  %v9519_v18 = vpop.permute.xlu0 %9518 }
 0xe26   :  { %11261 = vmatpush3.msk.msra.mxu0 %vm6321_vm6, %v13283_v25  ;;  %11247 = vmatprep.mubr.msk.f32.mxu1 %vm11545_vm0, %v11544_v8 }
 0xe27   :  { %11255 = vmatprep.subr.mxu1 %v11544_v8  ;;  %11248 = vmatmul.mubr.msk.f32.vlgmr.msra.gmra.mrb[96].mxu1 %vm376_vm2, %v300_v5  ;;  %v9747_v45 = vpop.permute.xlu1 %9746 }
 0xe28   :  { %11256 = vmatpush3.msk.msra.mxu1 %vm6321_vm6, %v13289_v32  ;;  %11262 = vmatprep.mubr.msk.f32.mxu0 %vm11545_vm0, %v11544_v8 }
 0xe29   :  { %11270 = vmatprep.subr.mxu0 %v11544_v8  ;;  %11263 = vmatmul.mubr.msk.f32.vlgmr.msra.gmra.mrb[100].mxu0 %vm376_vm2, %v303_v56  ;;  %v9671_v11 = vpop.permute.xlu0 %9670  ;;  %v10528_v56 = vld [vmem:[#allocation2] ss:$0 sm:$0xff] }
 0xe2a   :  { %11271 = vmatpush3.msk.msra.mxu0 %vm6321_vm6, %v13295_v26  ;;  %11257 = vmatprep.mubr.msk.f32.mxu1 %vm11545_vm0, %v11544_v8 }
 0xe2b   :  { %11265 = vmatprep.subr.mxu1 %v11544_v8  ;;  %11258 = vmatmul.mubr.msk.f32.vlgmr.msra.gmra.mrb[98].mxu1 %vm376_vm2, %v302_v58  ;;  %v9899_v27 = vpop.permute.xlu1 %9898 }
 0xe2c   :  { %11266 = vmatpush3.msk.msra.mxu1 %vm6321_vm6, %v13301_v12  ;;  %11272 = vmatprep.mubr.msk.f32.mxu0 %vm11545_vm0, %v11544_v8 }
 0xe2d   :  { %11280 = vmatprep.subr.mxu0 %v11544_v8  ;;  %11273 = vmatmul.mubr.msk.f32.vlgmr.msra.gmra.mrb[102].mxu0 %vm376_vm2, %v305_v47  ;;  %v9823_v31 = vpop.permute.xlu0 %9822 }
 0xe2e   :  { %11281 = vmatpush3.msra.mxu0 %v9443_v57  ;;  %11267 = vmatprep.mubr.msk.f32.mxu1 %vm11545_vm0, %v11544_v8 }
 0xe2f   :  { %11275 = vmatprep.subr.mxu1 %v11544_v8  ;;  %11268 = vmatmul.mubr.msk.f32.vlgmr.msra.gmra.mrb[100].mxu1 %vm376_vm2, %v304_v10 }
 0xe30   :  { %11276 = vmatpush3.msk.msra.mxu1 %vm6321_vm6, %v13308_v29  ;;  %11282 = vmatprep.mubr.msk.f32.mxu0 %vm11545_vm0, %v11544_v8 }
 0xe31   :  { %11290 = vmatprep.subr.mxu0 %v11544_v8  ;;  %11283 = vmatmul.mubr.msk.f32.vlgmr.msra.gmra.mrb[104].mxu0 %vm376_vm2, %v315_v20  ;;  %v9975_v2 = vpop.permute.xlu0 %9974 }
 0xe32   :  { %11291 = vmatpush3.msra.mxu0 %v9595_v39  ;;  %11277 = vmatprep.mubr.msk.f32.mxu1 %vm11545_vm0, %v11544_v8 }
 0xe33   :  { %11285 = vmatprep.subr.mxu1 %v11544_v8  ;;  %11278 = vmatmul.mubr.msk.f32.vlgmr.msra.gmra.mrb[102].mxu1 %vm376_vm2, %v306_v6 }
 0xe34   :  { %11286 = vmatpush3.msra.mxu1 %v9519_v18  ;;  %11292 = vmatprep.mubr.msk.f32.mxu0 %vm11545_vm0, %v11544_v8 }
 0xe35   :  { %11300 = vmatprep.subr.mxu0 %v11544_v8  ;;  %11293 = vmatmul.mubr.msk.f32.vlgmr.msra.gmra.mrb[106].mxu0 %vm376_vm2, %v317_v63 }
 0xe36   :  { %11301 = vmatpush3.msra.mxu0 %v9747_v45  ;;  %11287 = vmatprep.mubr.msk.f32.mxu1 %vm11545_vm0, %v11544_v8 }
 0xe37   :  { %11295 = vmatprep.subr.mxu1 %v11544_v8  ;;  %11288 = vmatmul.mubr.msk.f32.vlgmr.msra.gmra.mrb[104].mxu1 %vm376_vm2, %v316_v54 }
 0xe38   :  { %11296 = vmatpush3.msra.mxu1 %v9671_v11  ;;  %11302 = vmatprep.mubr.msk.f32.mxu0 %vm11545_vm0, %v11544_v8 }
 0xe39   :  { %11310 = vmatprep.subr.mxu0 %v11544_v8  ;;  %11303 = vmatmul.mubr.msk.f32.vlgmr.msra.gmra.mrb[108].mxu0 %vm376_vm2, %v319_v7 }
 0xe3a   :  { %11311 = vmatpush3.msra.mxu0 %v9899_v27  ;;  %11297 = vmatprep.mubr.msk.f32.mxu1 %vm11545_vm0, %v11544_v8 }
 0xe3b   :  { %11305 = vmatprep.subr.mxu1 %v11544_v8  ;;  %11298 = vmatmul.mubr.msk.f32.vlgmr.msra.gmra.mrb[106].mxu1 %vm376_vm2, %v318_v30 }
 0xe3c   :  { %11306 = vmatpush3.msra.mxu1 %v9823_v31  ;;  %11312 = vmatprep.mubr.msk.f32.mxu0 %vm11545_vm0, %v11544_v8  ;;  %v10061_v34 = vpop.permute.xlu1 %10060  ;;  %v10529_v31 = vld [vmem:[#allocation2 + $0x1] ss:$0 sm:$0xff] }
 0xe3d   :  { %11313 = vmatmul.mubr.msk.f32.vlgmr.msra.gmra.mrb[110].mxu0 %vm376_vm2, %v321_v55  ;;  %11307 = vmatprep.mubr.msk.f32.mxu1 %vm11545_vm0, %v11544_v8 }
 0xe3e   :  { %11315 = vmatprep.subr.mxu1 %v11544_v8 }
 0xe3f   :  { %11308 = vmatmul.mubr.msk.f32.vlgmr.msra.gmra.mrb[108].mxu1 %vm376_vm2, %v320_v36 }
 0xe40   :  { %11316 = vmatpush3.msra.mxu1 %v9975_v2  ;;  %11317 = vmatprep.mubr.msk.f32.mxu1 %vm11545_vm0, %v11544_v8  ;;  %v10071_v10 = vpop.permute.xlu1 %10070 }
 0xe42   :  { %v10066_v16 = vpop.permute.xlu0 %10065 }
 0xe43   :  { %11318 = vmatmul.mubr.msk.f32.vlgmr.msra.gmra.mrb[110].mxu1 %vm376_vm2, %v322_v22  ;;  %v10530_v22 = vld [vmem:[#allocation2 + $0x2] ss:$0 sm:$0xff] }
 0xe46   :  { %v10076_v7 = vpop.permute.xlu0 %10075 }
 0xee4   :  { %v8315_v19 = vpop.f32.mrb[88].mxu0 }
 0xee5   :  { %v11204_v25 = vpop.f32.mrb[89].mxu0 }
 0xee8   :  { %v8469_v21 = vpop.f32.mrb[90].mxu0 }
 0xee9   :  { %v11214_v59 = vpop.f32.mrb[91].mxu0 }
 0xeea   :  { %v8392_v32 = vpop.f32.mrb[88].mxu1 }
 0xeeb   :  { %v11209_v60 = vpop.f32.mrb[89].mxu1 }
 0xeec   :  { %v8623_v24 = vpop.f32.mrb[92].mxu0 }
 0xeed   :  { %v11224_v26 = vpop.f32.mrb[93].mxu0 }
 0xeee   :  { %v8546_v52 = vpop.f32.mrb[90].mxu1  ;;  %v10531_v26 = vld [vmem:[#allocation2 + $0x3] ss:$0 sm:$0xff] }
 0xeef   :  { %v11219_v51 = vpop.f32.mrb[91].mxu1 }
 0xef0   :  { %v8777_v12 = vpop.f32.mrb[94].mxu0 }
 0xef1   :  { %v11234_v0 = vpop.f32.mrb[95].mxu0 }
 0xef2   :  { %v8700_v9 = vpop.f32.mrb[92].mxu1 }
 0xef3   :  { %v11229_v8 = vpop.f32.mrb[93].mxu1 }
 0xef4   :  { %v8927_v29 = vpop.f32.mrb[96].mxu0  ;;  %v10086_v8 = vpop.permute.xlu0 %10085 }
 0xef5   :  { %v8928_v14 = vadd.f32 %v8927_v29, %v8315_v19  ;;  %v11244_v41 = vpop.f32.mrb[97].mxu0  ;;  %v10081_v19 = vpop.permute.xlu1 %10080 }
 0xef6   :  { %v8854_v15 = vpop.f32.mrb[94].mxu1 }
 0xef7   :  { %v11239_v46 = vpop.f32.mrb[95].mxu1 }
 0xef8   :  { %v9073_v40 = vpop.f32.mrb[98].mxu0 }
 0xef9   :  { %v9074_v13 = vadd.f32 %v9073_v40, %v8469_v21  ;;  %v11254_v43 = vpop.f32.mrb[99].mxu0  ;;  %v10091_v40 = vpop.permute.xlu1 %10090 }
 0xefa   :  { %v9000_v42 = vpop.f32.mrb[96].mxu1  ;;  %v10533_v43 = vld [vmem:[#allocation2 + $0x5] ss:$0 sm:$0xff] }
 0xefb   :  { %v9001_v23 = vadd.f32 %v9000_v42, %v8392_v32  ;;  %v11249_v17 = vpop.f32.mrb[97].mxu1 }
 0xefc   :  { %v9219_v35 = vpop.f32.mrb[100].mxu0 }
 0xefd   :  { %v9220_v48 = vadd.f32 %v9219_v35, %v8623_v24  ;;  %v11264_v37 = vpop.f32.mrb[101].mxu0 }
 0xefe   :  { %v9146_v3 = vpop.f32.mrb[98].mxu1  ;;  %v10534_v37 = vld [vmem:[#allocation2 + $0x6] ss:$0 sm:$0xff] }
 0xeff   :  { %v9147_v49 = vadd.f32 %v9146_v3, %v8546_v52  ;;  %v11259_v38 = vpop.f32.mrb[99].mxu1 }
 0xf00   :  { %v9365_v28 = vpop.f32.mrb[102].mxu0 }
 0xf01   :  { %v9366_v33 = vadd.f32 %v9365_v28, %v8777_v12  ;;  %v11274_v4 = vpop.f32.mrb[103].mxu0  ;;  %v10096_v28 = vpop.permute.xlu0 %10095 }
 0xf02   :  { %v9292_v61 = vpop.f32.mrb[100].mxu1 }
 0xf03   :  { %v9293_v44 = vadd.f32 %v9292_v61, %v8700_v9  ;;  %v11269_v62 = vpop.f32.mrb[101].mxu1 }
 0xf04   :  { %v9514_v53 = vpop.f32.mrb[104].mxu0 }
 0xf05   :  { %v10050_v50 = vadd.f32 %v9514_v53, %v8928_v14  ;;  %v11284_v1 = vpop.f32.mrb[105].mxu0  ;;  %v10532_v14 = vld [vmem:[#allocation2 + $0x4] ss:$0 sm:$0xff] }
 0xf06   :  { %v9438_v5 = vpop.f32.mrb[102].mxu1  ;;  %v10202_v1 = vld [vmem:[%s13610_s28] sm:$0xff] }
 0xf07   :  { %v10098_v57 = vadd.f32 %v10061_v34, %v10050_v50  ;;  %v9439_v58 = vadd.f32 %v9438_v5, %v8854_v15  ;;  %v11279_v47 = vpop.f32.mrb[103].mxu1 }
 0xf08   :  { %v9666_v39 = vpop.f32.mrb[106].mxu0 }
 0xf09   :  { %v10052_v18 = vadd.f32 %v9666_v39, %v9074_v13  ;;  %v11294_v20 = vpop.f32.mrb[107].mxu0  ;;  %v10170_v6 = vmul.f32 %v10528_v56, %v10098_v57 }
 0xf0a   :  { %v9590_v63 = vpop.f32.mrb[104].mxu1 }
 0xf0b   :  { %v10051_v45 = vadd.f32 %v9590_v63, %v9001_v23  ;;  %v10178_v11 = vsel %vm2245_vm4, %v10170_v6, 0.0  ;;  %v11289_v54 = vpop.f32.mrb[105].mxu1  ;;  %v10100_v30 = vadd.f32 %v10071_v10, %v10052_v18 }
 0xf0c   :  { %v9818_v27 = vpop.f32.mrb[108].mxu0  ;;  %10179 = vadd.xlane.f32.xlu1 %v10178_v11 }
 0xf0d   :  { %v10099_v55 = vadd.f32 %v10066_v16, %v10051_v45  ;;  %v10054_v36 = vadd.f32 %v9818_v27, %v9220_v48  ;;  %v11304_v2 = vpop.f32.mrb[109].mxu0  ;;  %v10172_v24 = vmul.f32 %v10530_v22, %v10100_v30  ;;  %v10207_v16 = vlaneseq }
 0xf0e   :  { %v9742_v25 = vpop.f32.mrb[106].mxu1 }
 0xf0f   :  { %v10053_v21 = vadd.f32 %v9742_v25, %v9147_v49  ;;  %v11299_v59 = vpop.f32.mrb[107].mxu1  ;;  %v10171_v32 = vmul.f32 %v10529_v31, %v10099_v55  ;;  %v10102_v52 = vadd.f32 %v10081_v19, %v10054_v36  ;;  %v10184_v13 = vsel %vm2245_vm4, %v10172_v24, 0.0 }
 0xf10   :  { %v9970_v60 = vpop.f32.mrb[110].mxu0  ;;  %v10208_v5 = vshrl.u32 %v10207_v16, 7  ;;  %v10288_v56 = vand.u32 127, %v10207_v16 }
 0xf11   :  { %v10101_v51 = vadd.f32 %v10076_v7, %v10053_v21  ;;  %v10056_v12 = vadd.f32 %v9970_v60, %v9366_v33  ;;  %v10181_v0 = vsel %vm2245_vm4, %v10171_v32, 0.0  ;;  %v11314_v9 = vpop.f32.mrb[111].mxu0  ;;  %v10174_v35 = vmul.f32 %v10532_v14, %v10102_v52 }
 0xf12   :  { %v9894_v29 = vpop.f32.mrb[108].mxu1  ;;  %10182 = vadd.xlane.f32.xlu0 %v10181_v0  ;;  %v13534_v57 = vsub.s32 %v10288_v56, %v10208_v5  ;;  %v10209_v18 = vsub.s32 0, %v10208_v5  ;;  %v10213_v20 = vsub.s32 1, %v10208_v5  ;;  %v10217_v63 = vsub.s32 2, %v10208_v5 }
 0xf13   :  { %v10055_v41 = vadd.f32 %v9894_v29, %v9293_v44  ;;  %v11309_v15 = vpop.f32.mrb[109].mxu1  ;;  %v10173_v46 = vmul.f32 %v10531_v26, %v10101_v51  ;;  %v10104_v42 = vadd.f32 %v10091_v40, %v10056_v12  ;;  %v10190_v4 = vsel %vm2245_vm4, %v10174_v35, 0.0  ;;  %v10535_v44 = vld [vmem:[#allocation2 + $0x7] ss:$0 sm:$0xff] }
 0xf14   :  { %v10225_v45 = vsub.s32 4, %v10208_v5  ;;  %v10233_v30 = vsub.s32 6, %v10208_v5  ;;  %v10221_v27 = vsub.s32 3, %v10208_v5  ;;  %v10229_v19 = vsub.s32 5, %v10208_v5 }
 0xf15   :  { %v10103_v23 = vadd.f32 %v10086_v8, %v10055_v41  ;;  %v10187_v17 = vsel %vm2245_vm4, %v10173_v46, 0.0  ;;  %v10176_v61 = vmul.f32 %v10534_v37, %v10104_v42  ;;  %v10237_v51 = vsub.s32 7, %v10208_v5 }
 0xf16   :  { %v10046_v48 = vpop.f32.mrb[110].mxu1  ;;  %10185 = vadd.xlane.f32.xlu0 %v10184_v13  ;;  %10188 = vadd.xlane.f32.xlu1 %v10187_v17 }
 0xf17   :  { %v10057_v3 = vadd.f32 %v10046_v48, %v9439_v58  ;;  %v10175_v49 = vmul.f32 %v10533_v43, %v10103_v23  ;;  %v11319_v38 = vpop.f32.mrb[111].mxu1  ;;  %v10196_v62 = vsel %vm2245_vm4, %v10176_v61, 0.0 }
 0xf19   :  { %v10105_v33 = vadd.f32 %v10096_v28, %v10057_v3  ;;  %v10193_v34 = vsel %vm2245_vm4, %v10175_v49, 0.0 }
 0xf1a   :  { %10191 = vadd.xlane.f32.xlu0 %v10190_v4  ;;  %10194 = vadd.xlane.f32.xlu1 %v10193_v34 }
 0xf1b   :  { %v10177_v53 = vmul.f32 %v10535_v44, %v10105_v33 }
 0xf1d   :  { %v10199_v50 = vsel %vm2245_vm4, %v10177_v53, 0.0 }
 0xf1e   :  { %10197 = vadd.xlane.f32.xlu0 %v10196_v62 }
 0xf22   :  { %10200 = vadd.xlane.f32.xlu0 %v10199_v50 }
 0xf2b   :  { %10205 = vperm.xlu1 %11336, %v10202_v1  }
 0xf99   :  { %v10180_v58 = vpop.xlane.xlu1 %10179 }
 0xf9f   :  { %v10183_v47 = vpop.xlane.xlu0 %10182 }
 0xfa3   :  { %v10189_v10 = vpop.xlane.xlu1 %10188  ;;  %v10186_v6 = vpop.xlane.xlu0 %10185 }
 0xfa7   :  { %v10195_v39 = vpop.xlane.xlu1 %10194  ;;  %v10192_v22 = vpop.xlane.xlu0 %10191 }
 0xfab   :  { %v10206_v11 = vpop.permute.xlu1 %10205  ;;  %v10198_v60 = vpop.xlane.xlu0 %10197 }
 0xfac   :  { %v10210_v54 = vrot.slane %v10206_v11, %v10209_v18  ;;  %v10214_v7 = vrot.slane %v10206_v11, %v10213_v20  ;;  %v10218_v36 = vrot.slane %v10206_v11, %v10217_v63  ;;  %v10226_v2 = vrot.slane %v10206_v11, %v10225_v45 }
 0xfad   :  { %v10234_v25 = vrot.slane %v10206_v11, %v10233_v30  ;;  %v10222_v32 = vrot.slane %v10206_v11, %v10221_v27  ;;  %v10230_v52 = vrot.slane %v10206_v11, %v10229_v19  ;;  %v10238_v9 = vrot.slane %v10206_v11, %v10237_v51 }
 0xfae   :  { %v10247_v31 = vadd.f32 %v10210_v54, %v10180_v58  ;;  %v10248_v55 = vadd.f32 %v10214_v7, %v10183_v47  ;;  %v10249_v21 = vadd.f32 %v10218_v36, %v10186_v6  ;;  %v10251_v59 = vadd.f32 %v10226_v2, %v10192_v22 }
 0xfaf   :  { %v10253_v24 = vadd.f32 %v10234_v25, %v10198_v60  ;;  %v10250_v26 = vadd.f32 %v10222_v32, %v10189_v10  ;;  %v10252_v12 = vadd.f32 %v10230_v52, %v10195_v39  ;;  %v10201_v0 = vpop.xlane.xlu0 %10200 }
 0xfb0   :  { %10264 = vperm.xlu0 %11335, %v10247_v31   ;;  %10267 = vperm.xlu1 %11336, %v10248_v55   ;;  %v10254_v8 = vadd.f32 %v10238_v9, %v10201_v0 }
 0xfb4   :  { %10270 = vperm.xlu1 %11336, %v10249_v21   ;;  %10276 = vperm.xlu0 %11335, %v10251_v59  }
 0xfb8   :  { %10273 = vperm.xlu1 %11336, %v10250_v26   ;;  %10282 = vperm.xlu0 %11335, %v10253_v24  }
 0xfbc   :  { %10279 = vperm.xlu1 %11336, %v10252_v12  }
 0xfc0   :  { %10285 = vperm.xlu1 %11336, %v10254_v8  }
 0xfc1   :  { %11516 = shalt.err (!%p11513_p8)
}
 0xfc2   :  { %s11517_s2 = scalar_lea.hbm %s13584_s21, 1024 }
 0xfc3   :  { %p11518_p9 = scmp.ne.s32.totalorder %s13584_s21, %s11517_s2  ;;  %p11521_p10 = scmp.lt.u32.totalorder %s11517_s2, %s13584_s21 }
 0xfc5   :  { %p11523_p11 = pnand %p11521_p10, %p11518_p9 }
 0xfc7   :  { %11526 = shalt.err (!%p11523_p11)
}
 0xfc8   :  { %10350 = dma.vmem_to_hbm [thread:$0]  %s10345_s26, 1024, %s13584_s21, [#allocation4], %s13603_s10, %s13603_s10, %s13602_s3   ;;  %vm10321_vm7 = vcmask 1041409   ;;  %vm10323_vm8 = vcmask 1042434   ;;  %vm10325_vm9 = vcmask 1043459   ;;  %vm10327_vm10 = vcmask 1044484  }
 0xfc9   :  { %vm10329_vm11 = vcmask 1045509   ;;  %vm10331_vm12 = vcmask 1046534   ;;  %vm10333_vm13 = vcmask 1047559   ;;  %s13611_s10 = sld [smem:[#allocation21_spill]] }
0x102f   :  { %v10268_v29 = vpop.permute.xlu1 %10267  ;;  %v10265_v14 = vpop.permute.xlu0 %10264 }
0x1030   :  { %v10296_v15 = vrot.slane %v10268_v29, %v13534_v57  ;;  %v10292_v46 = vrot.slane %v10265_v14, %v13534_v57 }
0x1032   :  { %v10322_v42 = vsel %vm10321_vm7, %v10296_v15, %v10292_v46 }
0x1033   :  { %v10271_v41 = vpop.permute.xlu1 %10270  ;;  %v10277_v13 = vpop.permute.xlu0 %10276 }
0x1034   :  { %v10300_v40 = vrot.slane %v10271_v41, %v13534_v57  ;;  %v10308_v48 = vrot.slane %v10277_v13, %v13534_v57 }
0x1036   :  { %v10324_v17 = vsel %vm10323_vm8, %v10300_v40, %v10322_v42 }
0x1037   :  { %v10274_v43 = vpop.permute.xlu1 %10273  ;;  %v10283_v3 = vpop.permute.xlu0 %10282 }
0x1038   :  { %v10304_v23 = vrot.slane %v10274_v43, %v13534_v57  ;;  %v10316_v33 = vrot.slane %v10283_v3, %v13534_v57 }
0x103a   :  { %v10326_v35 = vsel %vm10325_vm9, %v10304_v23, %v10324_v17 }
0x103b   :  { %v10280_v37 = vpop.permute.xlu1 %10279  ;;  %v10328_v38 = vsel %vm10327_vm10, %v10308_v48, %v10326_v35 }
0x103c   :  { %v10312_v49 = vrot.slane %v10280_v37, %v13534_v57 }
0x103e   :  { %v10330_v28 = vsel %vm10329_vm11, %v10312_v49, %v10328_v38 }
0x103f   :  { %v10286_v4 = vpop.permute.xlu1 %10285  ;;  %v10332_v61 = vsel %vm10331_vm12, %v10316_v33, %v10330_v28 }
0x1040   :  { %v10320_v34 = vrot.slane %v10286_v4, %v13534_v57 }
0x1042   :  { %v10334_v44 = vsel %vm10333_vm13, %v10320_v34, %v10332_v61 }
0x1043   :  { %10336 = vst.msk [vmem:[%s13611_s10] sm:$0xff] %vm376_vm2, %v10334_v44 }
0x1044   :  { %11533 = dma.done.wait [#allocation4], 1024  }
0x1045   :  { %11534 = vsyncadd [#allocation4], 4294966272 }
0x1046   :  { %10356 = vsyncpa [#allocation3], 1 }
0x1047   :  { %10357 = vsyncpa [#allocation6], 1 }
0x1048   :  { %10358 = vsyncpa [#allocation9], 1 }
0x1049   :  { %10359 = vsyncpa [#allocation4], 1 }

</bundles_post_ra>
